<compile_context>
chip_gen: v6e
topology: v6e:2x2x1
jax: 0.10.0
libtpu: 0.0.40
codegen_flags: <defaults>
</compile_context>

<pallas_src>
import functools

import jax
import jax.numpy as jnp
from jax import lax
from jax.experimental import pallas as pl
from jax.experimental.pallas import tpu as pltpu


KSIZE = 4
PAD = 1

# (c_out, stride, leaky-relu slope or None) for conv1..conv5
LAYER_SPECS = [
    (64, 2, 0.2),
    (128, 2, 0.2),
    (256, 2, 0.2),
    (512, 1, 0.2),
    (1, 1, None),
]


def _round_up(x, m):
    return ((x + m - 1) // m) * m


# ----------------------------------------------------------------------------
# Pallas kernel: tiled (X_col @ W) with f32 accumulator + fused bias/LeakyReLU
# ----------------------------------------------------------------------------
def _conv_mm_kernel(*refs, negative_slope, has_bias):
    if has_bias:
        x_ref, w_ref, b_ref, o_ref, acc_ref = refs
    else:
        x_ref, w_ref, o_ref, acc_ref = refs
        b_ref = None

    @pl.when(pl.program_id(2) == 0)
    def _():
        acc_ref[...] = jnp.zeros_like(acc_ref)

    acc_ref[...] += jnp.dot(x_ref[...], w_ref[...],
                            preferred_element_type=jnp.float32)

    @pl.when(pl.program_id(2) == pl.num_programs(2) - 1)
    def _():
        y = acc_ref[...]
        if has_bias:
            y = y + b_ref[...]                    # (tm,tn) + (1,tn)
        if negative_slope is not None:            # LeakyReLU epilogue in f32
            y = jnp.where(y >= 0.0, y, negative_slope * y)
        o_ref[...] = y.astype(o_ref.dtype)


def _choose_tiles(m, k_p, n_p):
    """Pick (M_padded, tm, tn, tk) so every layer has a small multi-step grid
    with the reduction axis tiled (pipelined weight DMA) and lane-dense out."""
    m_p = _round_up(m, 16)                 # bf16-friendly sublane multiple
    if m_p > 1024:
        tm = 1024
        m_p = _round_up(m_p, tm)
    else:
        tm = m_p
    # N (c_out) on lanes: split >=512 into 2x256 so v7x megacore can shard
    # while keeping >=256 lanes for the 256-wide MXUs of v6e/v7x.
    tn = 256 if (n_p >= 512 and n_p % 256 == 0) else n_p
    # K (reduction): a handful of steps so the weight stream double-buffers.
    if k_p <= 512:
        tk = k_p
    elif k_p <= 2048:
        tk = 512
    else:
        tk = 1024
    if k_p % tk != 0:
        tk = k_p
    return m_p, tm, tn, tk


def conv2d_fused(x_nhwc, w_p, b_p, c_out, *, stride, negative_slope, out_dtype):
    """x_nhwc: (B, H, W, C) bf16.
    w_p: (K_p, N_p) bf16, K = C*16 flattened c_in-major / (kh,kw)-minor.
    Returns (B, Ho, Wo, c_out) = act(conv(x, W) + b) in out_dtype."""
    B, H, W, C = x_nhwc.shape
    Ho = (H + 2 * PAD - KSIZE) // stride + 1
    Wo = (W + 2 * PAD - KSIZE) // stride + 1

    # Patch extraction as one fused XLA op, bf16 end-to-end.  Output feature
    # ordering is c_in-major then (kh, kw) row-major -> matches the PyTorch
    # weight.reshape(C_out, C_in*K*K) flattening.
    patches = lax.conv_general_dilated_patches(
        x_nhwc,
        filter_shape=(KSIZE, KSIZE),
        window_strides=(stride, stride),
        padding=((PAD, PAD), (PAD, PAD)),
        dimension_numbers=("NHWC", "HWIO", "NHWC"))      # (B, Ho, Wo, C*16)
    k = C * KSIZE * KSIZE
    m = B * Ho * Wo
    x_col = patches.reshape(m, k)                        # contiguous reshape

    k_p, n_p = w_p.shape
    m_p, tm, tn, tk = _choose_tiles(m, k_p, n_p)
    if (m_p, k_p) != (m, k):
        x_col = jnp.pad(x_col, ((0, m_p - m), (0, k_p - k)))

    grid = (m_p // tm, n_p // tn, k_p // tk)
    has_bias = b_p is not None

    in_specs = [
        pl.BlockSpec((tm, tk), lambda i, j, kk: (i, kk)),   # activation block
        pl.BlockSpec((tk, tn), lambda i, j, kk: (kk, j)),   # weight block
    ]
    args = [x_col, w_p]
    if has_bias:
        in_specs.append(pl.BlockSpec((1, tn), lambda i, j, kk: (0, j)))
        args.append(b_p)

    out = pl.pallas_call(
        functools.partial(_conv_mm_kernel,
                          negative_slope=negative_slope, has_bias=has_bias),
        out_shape=jax.ShapeDtypeStruct((m_p, n_p), out_dtype),
        grid_spec=pltpu.PrefetchScalarGridSpec(
            num_scalar_prefetch=0,
            grid=grid,
            in_specs=in_specs,
            out_specs=pl.BlockSpec((tm, tn), lambda i, j, kk: (i, j)),
            scratch_shapes=[pltpu.VMEM((tm, tn), jnp.float32)],
        ),
        compiler_params=pltpu.CompilerParams(
            dimension_semantics=("parallel", "parallel", "arbitrary"),
            vmem_limit_bytes=32 * 1024 * 1024,
        ),
    )(*args)

    out = out[:m, :c_out].reshape(B, Ho, Wo, c_out)
    return out


# ----------------------------------------------------------------------------
# Parameter construction (normal(0, 0.02) init + spectral norm, no bias)
# ----------------------------------------------------------------------------
def _spectral_normalize(w, key, n_power_iterations=1, eps=1e-12):
    """W / sigma, sigma estimated with PyTorch-style power iteration."""
    c_out = w.shape[0]
    w_mat = w.reshape(c_out, -1)
    u = jax.random.normal(key, (c_out,), jnp.float32)
    u = u / (jnp.linalg.norm(u) + eps)
    v = None
    for _ in range(n_power_iterations):
        v = w_mat.T @ u
        v = v / (jnp.linalg.norm(v) + eps)
        u = w_mat @ v
        u = u / (jnp.linalg.norm(u) + eps)
    sigma = jnp.dot(u, w_mat @ v)
    return w / sigma


def init_discriminator_params(in_channels, key, use_spectral_norm=True, gain=0.02):
    """Returns a list of (w_padded (K_p,N_p) bf16, bias (1,N_p) f32 | None,
    w_f32 (C_out,C_in,4,4)) per conv layer."""
    params = []
    c_in = in_channels
    for (c_out, _stride, _slope) in LAYER_SPECS:
        key, kw, ku = jax.random.split(key, 3)
        w = gain * jax.random.normal(kw, (c_out, c_in, KSIZE, KSIZE), jnp.float32)
        if use_spectral_norm:
            # TODO(synk): PyTorch keeps persistent u/v power-iteration buffers
            # updated every forward; here one iteration is applied at build.
            w = _spectral_normalize(w, ku)
        k = c_in * KSIZE * KSIZE
        k_p = _round_up(k, 128)            # reduction axis (W sublanes)
        n_p = _round_up(c_out, 128)        # c_out -> lane axis (lane-dense out)
        w_mat = w.reshape(c_out, k).T      # (K, C_out), c_in-major rows
        w_p = jnp.zeros((k_p, n_p), jnp.float32).at[:k, :c_out].set(w_mat)
        w_p = w_p.astype(jnp.bfloat16)     # pre-cast once: halves weight DMA
        if use_spectral_norm:
            b_p = None                     # bias = not use_spectral_norm
        else:
            b_p = jnp.zeros((1, n_p), jnp.float32)   # init_weights(): bias=0
        params.append((w_p, b_p, w))
        c_in = c_out
    return params


# ----------------------------------------------------------------------------
# Forward pass (matches Discriminator.forward)
# ----------------------------------------------------------------------------
def discriminator_forward(params, x, use_sigmoid=True):
    """x: (B, C, H, W) f32. Returns (outputs, [conv1..conv5]) in NCHW f32."""
    h = jnp.transpose(x, (0, 2, 3, 1)).astype(jnp.bfloat16)   # NHWC bf16
    feats_nhwc = []
    n_layers = len(LAYER_SPECS)
    for li, ((w_p, b_p, _w), (c_out, stride, slope)) in enumerate(
            zip(params, LAYER_SPECS)):
        out_dtype = jnp.float32 if li == n_layers - 1 else jnp.bfloat16
        h = conv2d_fused(h, w_p, b_p, c_out, stride=stride,
                         negative_slope=slope, out_dtype=out_dtype)
        feats_nhwc.append(h)
    feats = [jnp.transpose(f, (0, 3, 1, 2)).astype(jnp.float32)
             for f in feats_nhwc]
    conv5 = feats[-1]
    outputs = jax.nn.sigmoid(conv5) if use_sigmoid else conv5
    return outputs, feats


# ----------------------------------------------------------------------------
# Pure-XLA f32 reference (for a numerical sanity check only)
# ----------------------------------------------------------------------------
def _reference_forward(params, x, use_sigmoid=True):
    h = x
    feats = []
    for (_wp, b_p, w), (c_out, stride, slope) in zip(params, LAYER_SPECS):
        h = lax.conv_general_dilated(
            h, w, (stride, stride), ((PAD, PAD), (PAD, PAD)),
            dimension_numbers=("NCHW", "OIHW", "NCHW"))
        if b_p is not None:
            h = h + b_p[0, :c_out].reshape(1, c_out, 1, 1)
        if slope is not None:
            h = jnp.where(h >= 0.0, h, slope * h)
        feats.append(h)
    out = jax.nn.sigmoid(feats[-1]) if use_sigmoid else feats[-1]
    return out, feats


# ----------------------------------------------------------------------------
# main
# ----------------------------------------------------------------------------
if __name__ == "__main__":
    key = jax.random.PRNGKey(0)
    kp, kx = jax.random.split(key)

    in_channels = 3
    B, H, W = 2, 64, 64

    params = init_discriminator_params(in_channels, kp, use_spectral_norm=True)
    x = jax.random.normal(kx, (B, in_channels, H, W), jnp.float32)

    run = jax.jit(lambda xx: discriminator_forward(params, xx, use_sigmoid=True))
    outputs, feats = run(x)
    jax.block_until_ready(outputs)

    # shapes implied by the PyTorch forward (k=4, p=1, strides 2,2,2,1,1)
    assert feats[0].shape == (B, 64, 32, 32)
    assert feats[1].shape == (B, 128, 16, 16)
    assert feats[2].shape == (B, 256, 8, 8)
    assert feats[3].shape == (B, 512, 7, 7)
    assert feats[4].shape == (B, 1, 6, 6)
    assert outputs.shape == (B, 1, 6, 6)
    assert bool(jnp.all(jnp.isfinite(outputs)))
    assert bool(jnp.all((outputs >= 0.0) & (outputs <= 1.0)))

    # numerical sanity vs. f32 XLA conv (bf16 path tolerates a few % rel err)
    ref_out, ref_feats = _reference_forward(params, x, use_sigmoid=True)
    for got, ref in zip(feats + [outputs], ref_feats + [ref_out]):
        rel = jnp.linalg.norm(got - ref) / (jnp.linalg.norm(ref) + 1e-6)
        assert bool(rel < 0.05), f"relative error too large: {float(rel)}"

    print("KERNEL_OK")
</pallas_src>

<mosaic_0001>
module attributes {stable_mosaic.version = 11 : i64} {
  func.func @_conv_mm_kernel(%arg0: i32, %arg1: i32, %arg2: i32, %arg3: memref<1024x128xbf16, #tpu.memory_space<vmem>>, %arg4: memref<128x128xbf16, #tpu.memory_space<vmem>>, %arg5: memref<1024x128xbf16, #tpu.memory_space<vmem>>, %arg6: memref<1024x128xf32, #tpu.memory_space<vmem>>) attributes {dimension_semantics = [#tpu.dimension_semantics<parallel>, #tpu.dimension_semantics<parallel>, #tpu.dimension_semantics<arbitrary>], iteration_bounds = array<i64: 2, 1, 1>, scalar_prefetch = 0 : i64, scratch_operands = 1 : i64, tpu.core_type = #tpu.core_type<tc>, window_params = [{transform_indices = @transform_0, window_bounds = array<i64: 1024, 128>}, {transform_indices = @transform_1, window_bounds = array<i64: 128, 128>}, {transform_indices = @transform_2, window_bounds = array<i64: 1024, 128>}]} {
    %c0_i32 = arith.constant 0 : i32
    %0 = arith.cmpi eq, %arg2, %c0_i32 : i32
    %1 = arith.extui %0 : i1 to i32
    %c0_i32_0 = arith.constant 0 : i32
    %2 = arith.cmpi ne, %1, %c0_i32_0 : i32
    scf.if %2 {
      %cst_10 = arith.constant 0.000000e+00 : f32
      %12 = vector.broadcast %cst_10 : f32 to vector<1024x128xf32>
      %c0_11 = arith.constant 0 : index
      %c0_12 = arith.constant 0 : index
      %13 = vector.load %arg6[%c0_11, %c0_12] : memref<1024x128xf32, #tpu.memory_space<vmem>>, vector<1024x128xf32>
      tpu.vector_store %arg6[%c0_11, %c0_12], %12 {strides = array<i32>} : memref<1024x128xf32, #tpu.memory_space<vmem>>, vector<1024x128xf32>,
    } else {
    }
    %c0 = arith.constant 0 : index
    %c0_1 = arith.constant 0 : index
    %3 = vector.load %arg6[%c0, %c0_1] : memref<1024x128xf32, #tpu.memory_space<vmem>>, vector<1024x128xf32>
    %c0_2 = arith.constant 0 : index
    %c0_3 = arith.constant 0 : index
    %4 = vector.load %arg3[%c0_2, %c0_3] : memref<1024x128xbf16, #tpu.memory_space<vmem>>, vector<1024x128xbf16>
    %c0_4 = arith.constant 0 : index
    %c0_5 = arith.constant 0 : index
    %5 = vector.load %arg4[%c0_4, %c0_5] : memref<128x128xbf16, #tpu.memory_space<vmem>>, vector<128x128xbf16>
    %cst = arith.constant dense<0.000000e+00> : vector<1024x128xf32>
    %6 = tpu.matmul %4, %5, %cst {dimension_numbers = #tpu.dot_dimension_numbers<[1], [0], [0], [1], [0, 0, 1, 1], [], []>} : vector<1024x128xbf16>, vector<128x128xbf16>, vector<1024x128xf32> -> vector<1024x128xf32>
    %7 = arith.addf %3, %6 : vector<1024x128xf32>
    %c0_6 = arith.constant 0 : index
    %c0_7 = arith.constant 0 : index
    %8 = vector.load %arg6[%c0_6, %c0_7] : memref<1024x128xf32, #tpu.memory_space<vmem>>, vector<1024x128xf32>
    tpu.vector_store %arg6[%c0_6, %c0_7], %7 {strides = array<i32>} : memref<1024x128xf32, #tpu.memory_space<vmem>>, vector<1024x128xf32>,
    %c0_i32_8 = arith.constant 0 : i32
    %9 = arith.cmpi eq, %arg2, %c0_i32_8 : i32
    %10 = arith.extui %9 : i1 to i32
    %c0_i32_9 = arith.constant 0 : i32
    %11 = arith.cmpi ne, %10, %c0_i32_9 : i32
    scf.if %11 {
      %c0_10 = arith.constant 0 : index
      %c0_11 = arith.constant 0 : index
      %12 = vector.load %arg6[%c0_10, %c0_11] : memref<1024x128xf32, #tpu.memory_space<vmem>>, vector<1024x128xf32>
      %cst_12 = arith.constant 0.000000e+00 : f32
      %13 = vector.broadcast %cst_12 : f32 to vector<1024x128xf32>
      %14 = arith.cmpf oge, %12, %13 : vector<1024x128xf32>
      %cst_13 = arith.constant 2.000000e-01 : f32
      %15 = vector.broadcast %cst_13 : f32 to vector<1024x128xf32>
      %16 = arith.mulf %15, %12 : vector<1024x128xf32>
      %17 = arith.select %14, %12, %16 : vector<1024x128xi1>, vector<1024x128xf32>
      %18 = arith.truncf %17 : vector<1024x128xf32> to vector<1024x128xbf16>
      %c0_14 = arith.constant 0 : index
      %c0_15 = arith.constant 0 : index
      %19 = vector.load %arg5[%c0_14, %c0_15] : memref<1024x128xbf16, #tpu.memory_space<vmem>>, vector<1024x128xbf16>
      tpu.vector_store %arg5[%c0_14, %c0_15], %18 {strides = array<i32>} : memref<1024x128xbf16, #tpu.memory_space<vmem>>, vector<1024x128xbf16>,
    } else {
    }
    return
  }
  func.func @transform_0(%arg0: i32, %arg1: i32, %arg2: i32) -> (i32, i32) {
    %c0_i32 = arith.constant 0 : i32
    return %arg0, %arg2 : i32, i32
  }
  func.func @transform_1(%arg0: i32, %arg1: i32, %arg2: i32) -> (i32, i32) {
    %c0_i32 = arith.constant 0 : i32
    return %arg2, %arg1 : i32, i32
  }
  func.func @transform_2(%arg0: i32, %arg1: i32, %arg2: i32) -> (i32, i32) {
    %c0_i32 = arith.constant 0 : i32
    return %arg0, %arg1 : i32, i32
  }
}

module attributes {stable_mosaic.version = 11 : i64} {
  func.func @_conv_mm_kernel(%arg0: i32, %arg1: i32, %arg2: i32, %arg3: memref<512x512xbf16, #tpu.memory_space<vmem>>, %arg4: memref<512x128xbf16, #tpu.memory_space<vmem>>, %arg5: memref<512x128xbf16, #tpu.memory_space<vmem>>, %arg6: memref<512x128xf32, #tpu.memory_space<vmem>>) attributes {dimension_semantics = [#tpu.dimension_semantics<parallel>, #tpu.dimension_semantics<parallel>, #tpu.dimension_semantics<arbitrary>], iteration_bounds = array<i64: 1, 1, 2>, scalar_prefetch = 0 : i64, scratch_operands = 1 : i64, tpu.core_type = #tpu.core_type<tc>, window_params = [{transform_indices = @transform_0, window_bounds = array<i64: 512, 512>}, {transform_indices = @transform_1, window_bounds = array<i64: 512, 128>}, {transform_indices = @transform_2, window_bounds = array<i64: 512, 128>}]} {
    %c0_i32 = arith.constant 0 : i32
    %0 = arith.cmpi eq, %arg2, %c0_i32 : i32
    %1 = arith.extui %0 : i1 to i32
    %c0_i32_0 = arith.constant 0 : i32
    %2 = arith.cmpi ne, %1, %c0_i32_0 : i32
    scf.if %2 {
      %cst_9 = arith.constant 0.000000e+00 : f32
      %12 = vector.broadcast %cst_9 : f32 to vector<512x128xf32>
      %c0_10 = arith.constant 0 : index
      %c0_11 = arith.constant 0 : index
      %13 = vector.load %arg6[%c0_10, %c0_11] : memref<512x128xf32, #tpu.memory_space<vmem>>, vector<512x128xf32>
      tpu.vector_store %arg6[%c0_10, %c0_11], %12 {strides = array<i32>} : memref<512x128xf32, #tpu.memory_space<vmem>>, vector<512x128xf32>,
    } else {
    }
    %c0 = arith.constant 0 : index
    %c0_1 = arith.constant 0 : index
    %3 = vector.load %arg6[%c0, %c0_1] : memref<512x128xf32, #tpu.memory_space<vmem>>, vector<512x128xf32>
    %c0_2 = arith.constant 0 : index
    %c0_3 = arith.constant 0 : index
    %4 = vector.load %arg3[%c0_2, %c0_3] : memref<512x512xbf16, #tpu.memory_space<vmem>>, vector<512x512xbf16>
    %c0_4 = arith.constant 0 : index
    %c0_5 = arith.constant 0 : index
    %5 = vector.load %arg4[%c0_4, %c0_5] : memref<512x128xbf16, #tpu.memory_space<vmem>>, vector<512x128xbf16>
    %cst = arith.constant dense<0.000000e+00> : vector<512x128xf32>
    %6 = tpu.matmul %4, %5, %cst {dimension_numbers = #tpu.dot_dimension_numbers<[1], [0], [0], [1], [0, 0, 1, 1], [], []>} : vector<512x512xbf16>, vector<512x128xbf16>, vector<512x128xf32> -> vector<512x128xf32>
    %7 = arith.addf %3, %6 : vector<512x128xf32>
    %c0_6 = arith.constant 0 : index
    %c0_7 = arith.constant 0 : index
    %8 = vector.load %arg6[%c0_6, %c0_7] : memref<512x128xf32, #tpu.memory_space<vmem>>, vector<512x128xf32>
    tpu.vector_store %arg6[%c0_6, %c0_7], %7 {strides = array<i32>} : memref<512x128xf32, #tpu.memory_space<vmem>>, vector<512x128xf32>,
    %c1_i32 = arith.constant 1 : i32
    %9 = arith.cmpi eq, %arg2, %c1_i32 : i32
    %10 = arith.extui %9 : i1 to i32
    %c0_i32_8 = arith.constant 0 : i32
    %11 = arith.cmpi ne, %10, %c0_i32_8 : i32
    scf.if %11 {
      %c0_9 = arith.constant 0 : index
      %c0_10 = arith.constant 0 : index
      %12 = vector.load %arg6[%c0_9, %c0_10] : memref<512x128xf32, #tpu.memory_space<vmem>>, vector<512x128xf32>
      %cst_11 = arith.constant 0.000000e+00 : f32
      %13 = vector.broadcast %cst_11 : f32 to vector<512x128xf32>
      %14 = arith.cmpf oge, %12, %13 : vector<512x128xf32>
      %cst_12 = arith.constant 2.000000e-01 : f32
      %15 = vector.broadcast %cst_12 : f32 to vector<512x128xf32>
      %16 = arith.mulf %15, %12 : vector<512x128xf32>
      %17 = arith.select %14, %12, %16 : vector<512x128xi1>, vector<512x128xf32>
      %18 = arith.truncf %17 : vector<512x128xf32> to vector<512x128xbf16>
      %c0_13 = arith.constant 0 : index
      %c0_14 = arith.constant 0 : index
      %19 = vector.load %arg5[%c0_13, %c0_14] : memref<512x128xbf16, #tpu.memory_space<vmem>>, vector<512x128xbf16>
      tpu.vector_store %arg5[%c0_13, %c0_14], %18 {strides = array<i32>} : memref<512x128xbf16, #tpu.memory_space<vmem>>, vector<512x128xbf16>,
    } else {
    }
    return
  }
  func.func @transform_0(%arg0: i32, %arg1: i32, %arg2: i32) -> (i32, i32) {
    %c0_i32 = arith.constant 0 : i32
    return %arg0, %arg2 : i32, i32
  }
  func.func @transform_1(%arg0: i32, %arg1: i32, %arg2: i32) -> (i32, i32) {
    %c0_i32 = arith.constant 0 : i32
    return %arg2, %arg1 : i32, i32
  }
  func.func @transform_2(%arg0: i32, %arg1: i32, %arg2: i32) -> (i32, i32) {
    %c0_i32 = arith.constant 0 : i32
    return %arg0, %arg1 : i32, i32
  }
}

module attributes {stable_mosaic.version = 11 : i64} {
  func.func @_conv_mm_kernel(%arg0: i32, %arg1: i32, %arg2: i32, %arg3: memref<128x512xbf16, #tpu.memory_space<vmem>>, %arg4: memref<512x256xbf16, #tpu.memory_space<vmem>>, %arg5: memref<128x256xbf16, #tpu.memory_space<vmem>>, %arg6: memref<128x256xf32, #tpu.memory_space<vmem>>) attributes {dimension_semantics = [#tpu.dimension_semantics<parallel>, #tpu.dimension_semantics<parallel>, #tpu.dimension_semantics<arbitrary>], iteration_bounds = array<i64: 1, 1, 4>, scalar_prefetch = 0 : i64, scratch_operands = 1 : i64, tpu.core_type = #tpu.core_type<tc>, window_params = [{transform_indices = @transform_0, window_bounds = array<i64: 128, 512>}, {transform_indices = @transform_1, window_bounds = array<i64: 512, 256>}, {transform_indices = @transform_2, window_bounds = array<i64: 128, 256>}]} {
    %c0_i32 = arith.constant 0 : i32
    %0 = arith.cmpi eq, %arg2, %c0_i32 : i32
    %1 = arith.extui %0 : i1 to i32
    %c0_i32_0 = arith.constant 0 : i32
    %2 = arith.cmpi ne, %1, %c0_i32_0 : i32
    scf.if %2 {
      %cst_9 = arith.constant 0.000000e+00 : f32
      %12 = vector.broadcast %cst_9 : f32 to vector<128x256xf32>
      %c0_10 = arith.constant 0 : index
      %c0_11 = arith.constant 0 : index
      %13 = vector.load %arg6[%c0_10, %c0_11] : memref<128x256xf32, #tpu.memory_space<vmem>>, vector<128x256xf32>
      tpu.vector_store %arg6[%c0_10, %c0_11], %12 {strides = array<i32>} : memref<128x256xf32, #tpu.memory_space<vmem>>, vector<128x256xf32>,
    } else {
    }
    %c0 = arith.constant 0 : index
    %c0_1 = arith.constant 0 : index
    %3 = vector.load %arg6[%c0, %c0_1] : memref<128x256xf32, #tpu.memory_space<vmem>>, vector<128x256xf32>
    %c0_2 = arith.constant 0 : index
    %c0_3 = arith.constant 0 : index
    %4 = vector.load %arg3[%c0_2, %c0_3] : memref<128x512xbf16, #tpu.memory_space<vmem>>, vector<128x512xbf16>
    %c0_4 = arith.constant 0 : index
    %c0_5 = arith.constant 0 : index
    %5 = vector.load %arg4[%c0_4, %c0_5] : memref<512x256xbf16, #tpu.memory_space<vmem>>, vector<512x256xbf16>
    %cst = arith.constant dense<0.000000e+00> : vector<128x256xf32>
    %6 = tpu.matmul %4, %5, %cst {dimension_numbers = #tpu.dot_dimension_numbers<[1], [0], [0], [1], [0, 0, 1, 1], [], []>} : vector<128x512xbf16>, vector<512x256xbf16>, vector<128x256xf32> -> vector<128x256xf32>
    %7 = arith.addf %3, %6 : vector<128x256xf32>
    %c0_6 = arith.constant 0 : index
    %c0_7 = arith.constant 0 : index
    %8 = vector.load %arg6[%c0_6, %c0_7] : memref<128x256xf32, #tpu.memory_space<vmem>>, vector<128x256xf32>
    tpu.vector_store %arg6[%c0_6, %c0_7], %7 {strides = array<i32>} : memref<128x256xf32, #tpu.memory_space<vmem>>, vector<128x256xf32>,
    %c3_i32 = arith.constant 3 : i32
    %9 = arith.cmpi eq, %arg2, %c3_i32 : i32
    %10 = arith.extui %9 : i1 to i32
    %c0_i32_8 = arith.constant 0 : i32
    %11 = arith.cmpi ne, %10, %c0_i32_8 : i32
    scf.if %11 {
      %c0_9 = arith.constant 0 : index
      %c0_10 = arith.constant 0 : index
      %12 = vector.load %arg6[%c0_9, %c0_10] : memref<128x256xf32, #tpu.memory_space<vmem>>, vector<128x256xf32>
      %cst_11 = arith.constant 0.000000e+00 : f32
      %13 = vector.broadcast %cst_11 : f32 to vector<128x256xf32>
      %14 = arith.cmpf oge, %12, %13 : vector<128x256xf32>
      %cst_12 = arith.constant 2.000000e-01 : f32
      %15 = vector.broadcast %cst_12 : f32 to vector<128x256xf32>
      %16 = arith.mulf %15, %12 : vector<128x256xf32>
      %17 = arith.select %14, %12, %16 : vector<128x256xi1>, vector<128x256xf32>
      %18 = arith.truncf %17 : vector<128x256xf32> to vector<128x256xbf16>
      %c0_13 = arith.constant 0 : index
      %c0_14 = arith.constant 0 : index
      %19 = vector.load %arg5[%c0_13, %c0_14] : memref<128x256xbf16, #tpu.memory_space<vmem>>, vector<128x256xbf16>
      tpu.vector_store %arg5[%c0_13, %c0_14], %18 {strides = array<i32>} : memref<128x256xbf16, #tpu.memory_space<vmem>>, vector<128x256xbf16>,
    } else {
    }
    return
  }
  func.func @transform_0(%arg0: i32, %arg1: i32, %arg2: i32) -> (i32, i32) {
    %c0_i32 = arith.constant 0 : i32
    return %arg0, %arg2 : i32, i32
  }
  func.func @transform_1(%arg0: i32, %arg1: i32, %arg2: i32) -> (i32, i32) {
    %c0_i32 = arith.constant 0 : i32
    return %arg2, %arg1 : i32, i32
  }
  func.func @transform_2(%arg0: i32, %arg1: i32, %arg2: i32) -> (i32, i32) {
    %c0_i32 = arith.constant 0 : i32
    return %arg0, %arg1 : i32, i32
  }
}

module attributes {stable_mosaic.version = 11 : i64} {
  func.func @_conv_mm_kernel(%arg0: i32, %arg1: i32, %arg2: i32, %arg3: memref<112x1024xbf16, #tpu.memory_space<vmem>>, %arg4: memref<1024x256xbf16, #tpu.memory_space<vmem>>, %arg5: memref<112x256xbf16, #tpu.memory_space<vmem>>, %arg6: memref<112x256xf32, #tpu.memory_space<vmem>>) attributes {dimension_semantics = [#tpu.dimension_semantics<parallel>, #tpu.dimension_semantics<parallel>, #tpu.dimension_semantics<arbitrary>], iteration_bounds = array<i64: 1, 2, 4>, scalar_prefetch = 0 : i64, scratch_operands = 1 : i64, tpu.core_type = #tpu.core_type<tc>, window_params = [{transform_indices = @transform_0, window_bounds = array<i64: 112, 1024>}, {transform_indices = @transform_1, window_bounds = array<i64: 1024, 256>}, {transform_indices = @transform_2, window_bounds = array<i64: 112, 256>}]} {
    %c0_i32 = arith.constant 0 : i32
    %0 = arith.cmpi eq, %arg2, %c0_i32 : i32
    %1 = arith.extui %0 : i1 to i32
    %c0_i32_0 = arith.constant 0 : i32
    %2 = arith.cmpi ne, %1, %c0_i32_0 : i32
    scf.if %2 {
      %cst_9 = arith.constant 0.000000e+00 : f32
      %12 = vector.broadcast %cst_9 : f32 to vector<112x256xf32>
      %c0_10 = arith.constant 0 : index
      %c0_11 = arith.constant 0 : index
      %13 = vector.load %arg6[%c0_10, %c0_11] : memref<112x256xf32, #tpu.memory_space<vmem>>, vector<112x256xf32>
      tpu.vector_store %arg6[%c0_10, %c0_11], %12 {strides = array<i32>} : memref<112x256xf32, #tpu.memory_space<vmem>>, vector<112x256xf32>,
    } else {
    }
    %c0 = arith.constant 0 : index
    %c0_1 = arith.constant 0 : index
    %3 = vector.load %arg6[%c0, %c0_1] : memref<112x256xf32, #tpu.memory_space<vmem>>, vector<112x256xf32>
    %c0_2 = arith.constant 0 : index
    %c0_3 = arith.constant 0 : index
    %4 = vector.load %arg3[%c0_2, %c0_3] : memref<112x1024xbf16, #tpu.memory_space<vmem>>, vector<112x1024xbf16>
    %c0_4 = arith.constant 0 : index
    %c0_5 = arith.constant 0 : index
    %5 = vector.load %arg4[%c0_4, %c0_5] : memref<1024x256xbf16, #tpu.memory_space<vmem>>, vector<1024x256xbf16>
    %cst = arith.constant dense<0.000000e+00> : vector<112x256xf32>
    %6 = tpu.matmul %4, %5, %cst {dimension_numbers = #tpu.dot_dimension_numbers<[1], [0], [0], [1], [0, 0, 1, 1], [], []>} : vector<112x1024xbf16>, vector<1024x256xbf16>, vector<112x256xf32> -> vector<112x256xf32>
    %7 = arith.addf %3, %6 : vector<112x256xf32>
    %c0_6 = arith.constant 0 : index
    %c0_7 = arith.constant 0 : index
    %8 = vector.load %arg6[%c0_6, %c0_7] : memref<112x256xf32, #tpu.memory_space<vmem>>, vector<112x256xf32>
    tpu.vector_store %arg6[%c0_6, %c0_7], %7 {strides = array<i32>} : memref<112x256xf32, #tpu.memory_space<vmem>>, vector<112x256xf32>,
    %c3_i32 = arith.constant 3 : i32
    %9 = arith.cmpi eq, %arg2, %c3_i32 : i32
    %10 = arith.extui %9 : i1 to i32
    %c0_i32_8 = arith.constant 0 : i32
    %11 = arith.cmpi ne, %10, %c0_i32_8 : i32
    scf.if %11 {
      %c0_9 = arith.constant 0 : index
      %c0_10 = arith.constant 0 : index
      %12 = vector.load %arg6[%c0_9, %c0_10] : memref<112x256xf32, #tpu.memory_space<vmem>>, vector<112x256xf32>
      %cst_11 = arith.constant 0.000000e+00 : f32
      %13 = vector.broadcast %cst_11 : f32 to vector<112x256xf32>
      %14 = arith.cmpf oge, %12, %13 : vector<112x256xf32>
      %cst_12 = arith.constant 2.000000e-01 : f32
      %15 = vector.broadcast %cst_12 : f32 to vector<112x256xf32>
      %16 = arith.mulf %15, %12 : vector<112x256xf32>
      %17 = arith.select %14, %12, %16 : vector<112x256xi1>, vector<112x256xf32>
      %18 = arith.truncf %17 : vector<112x256xf32> to vector<112x256xbf16>
      %c0_13 = arith.constant 0 : index
      %c0_14 = arith.constant 0 : index
      %19 = vector.load %arg5[%c0_13, %c0_14] : memref<112x256xbf16, #tpu.memory_space<vmem>>, vector<112x256xbf16>
      tpu.vector_store %arg5[%c0_13, %c0_14], %18 {strides = array<i32>} : memref<112x256xbf16, #tpu.memory_space<vmem>>, vector<112x256xbf16>,
    } else {
    }
    return
  }
  func.func @transform_0(%arg0: i32, %arg1: i32, %arg2: i32) -> (i32, i32) {
    %c0_i32 = arith.constant 0 : i32
    return %arg0, %arg2 : i32, i32
  }
  func.func @transform_1(%arg0: i32, %arg1: i32, %arg2: i32) -> (i32, i32) {
    %c0_i32 = arith.constant 0 : i32
    return %arg2, %arg1 : i32, i32
  }
  func.func @transform_2(%arg0: i32, %arg1: i32, %arg2: i32) -> (i32, i32) {
    %c0_i32 = arith.constant 0 : i32
    return %arg0, %arg1 : i32, i32
  }
}

module attributes {stable_mosaic.version = 11 : i64} {
  func.func @_conv_mm_kernel(%arg0: i32, %arg1: i32, %arg2: i32, %arg3: memref<80x1024xbf16, #tpu.memory_space<vmem>>, %arg4: memref<1024x128xbf16, #tpu.memory_space<vmem>>, %arg5: memref<80x128xf32, #tpu.memory_space<vmem>>, %arg6: memref<80x128xf32, #tpu.memory_space<vmem>>) attributes {dimension_semantics = [#tpu.dimension_semantics<parallel>, #tpu.dimension_semantics<parallel>, #tpu.dimension_semantics<arbitrary>], iteration_bounds = array<i64: 1, 1, 8>, scalar_prefetch = 0 : i64, scratch_operands = 1 : i64, tpu.core_type = #tpu.core_type<tc>, window_params = [{transform_indices = @transform_0, window_bounds = array<i64: 80, 1024>}, {transform_indices = @transform_1, window_bounds = array<i64: 1024, 128>}, {transform_indices = @transform_2, window_bounds = array<i64: 80, 128>}]} {
    %c0_i32 = arith.constant 0 : i32
    %0 = arith.cmpi eq, %arg2, %c0_i32 : i32
    %1 = arith.extui %0 : i1 to i32
    %c0_i32_0 = arith.constant 0 : i32
    %2 = arith.cmpi ne, %1, %c0_i32_0 : i32
    scf.if %2 {
      %cst_9 = arith.constant 0.000000e+00 : f32
      %12 = vector.broadcast %cst_9 : f32 to vector<80x128xf32>
      %c0_10 = arith.constant 0 : index
      %c0_11 = arith.constant 0 : index
      %13 = vector.load %arg6[%c0_10, %c0_11] : memref<80x128xf32, #tpu.memory_space<vmem>>, vector<80x128xf32>
      tpu.vector_store %arg6[%c0_10, %c0_11], %12 {strides = array<i32>} : memref<80x128xf32, #tpu.memory_space<vmem>>, vector<80x128xf32>,
    } else {
    }
    %c0 = arith.constant 0 : index
    %c0_1 = arith.constant 0 : index
    %3 = vector.load %arg6[%c0, %c0_1] : memref<80x128xf32, #tpu.memory_space<vmem>>, vector<80x128xf32>
    %c0_2 = arith.constant 0 : index
    %c0_3 = arith.constant 0 : index
    %4 = vector.load %arg3[%c0_2, %c0_3] : memref<80x1024xbf16, #tpu.memory_space<vmem>>, vector<80x1024xbf16>
    %c0_4 = arith.constant 0 : index
    %c0_5 = arith.constant 0 : index
    %5 = vector.load %arg4[%c0_4, %c0_5] : memref<1024x128xbf16, #tpu.memory_space<vmem>>, vector<1024x128xbf16>
    %cst = arith.constant dense<0.000000e+00> : vector<80x128xf32>
    %6 = tpu.matmul %4, %5, %cst {dimension_numbers = #tpu.dot_dimension_numbers<[1], [0], [0], [1], [0, 0, 1, 1], [], []>} : vector<80x1024xbf16>, vector<1024x128xbf16>, vector<80x128xf32> -> vector<80x128xf32>
    %7 = arith.addf %3, %6 : vector<80x128xf32>
    %c0_6 = arith.constant 0 : index
    %c0_7 = arith.constant 0 : index
    %8 = vector.load %arg6[%c0_6, %c0_7] : memref<80x128xf32, #tpu.memory_space<vmem>>, vector<80x128xf32>
    tpu.vector_store %arg6[%c0_6, %c0_7], %7 {strides = array<i32>} : memref<80x128xf32, #tpu.memory_space<vmem>>, vector<80x128xf32>,
    %c7_i32 = arith.constant 7 : i32
    %9 = arith.cmpi eq, %arg2, %c7_i32 : i32
    %10 = arith.extui %9 : i1 to i32
    %c0_i32_8 = arith.constant 0 : i32
    %11 = arith.cmpi ne, %10, %c0_i32_8 : i32
    scf.if %11 {
      %c0_9 = arith.constant 0 : index
      %c0_10 = arith.constant 0 : index
      %12 = vector.load %arg6[%c0_9, %c0_10] : memref<80x128xf32, #tpu.memory_space<vmem>>, vector<80x128xf32>
      %c0_11 = arith.constant 0 : index
      %c0_12 = arith.constant 0 : index
      %13 = vector.load %arg5[%c0_11, %c0_12] : memref<80x128xf32, #tpu.memory_space<vmem>>, vector<80x128xf32>
      tpu.vector_store %arg5[%c0_11, %c0_12], %12 {strides = array<i32>} : memref<80x128xf32, #tpu.memory_space<vmem>>, vector<80x128xf32>,
    } else {
    }
    return
  }
  func.func @transform_0(%arg0: i32, %arg1: i32, %arg2: i32) -> (i32, i32) {
    %c0_i32 = arith.constant 0 : i32
    return %arg0, %arg2 : i32, i32
  }
  func.func @transform_1(%arg0: i32, %arg1: i32, %arg2: i32) -> (i32, i32) {
    %c0_i32 = arith.constant 0 : i32
    return %arg2, %arg1 : i32, i32
  }
  func.func @transform_2(%arg0: i32, %arg1: i32, %arg2: i32) -> (i32, i32) {
    %c0_i32 = arith.constant 0 : i32
    return %arg0, %arg1 : i32, i32
  }
}

</mosaic_0001>

<bundles_post_ra>
// kernel: _lambda_.5
= control target key start
LH: loop header
LB: loop body
LE: loop exit
PB: predicated region body
PF: predicated region fallthrough
CT: control target
= control target key end

     0   :  { %s4200_s9 = smov 0   ;;  %s4202_s10 = smov 0   ;;  %s4413_s0 = inlined_call_operand.vmem [shape: bf16[2048,128], index: 0, kind: input, shape index: {}]   ;;  %s4414_s1 = inlined_call_operand.vmem [shape: bf16[128,128], index: 1, kind: input, shape index: {}]   ;;  %s4415_s2 = inlined_call_operand.vmem [shape: bf16[2048,128], index: 2, kind: output, shape index: {}]  }
   0x1   :  { %s4204_s11 = smov 0  }
   0x2 LB: > { %s31_s12 = sadd.s32 1, %s4179_s10  ;;  %p3115_p0 = scmp.ge.s32.totalorder %s4183_s11, 1  ;;  %s4183_s11 = sphi %s4204_s11, %s12_s11   ;;  %s4179_s10 = sphi %s4202_s10, %s4417_s10   ;;  %s4175_s9 = sphi %s4200_s9, %s4416_s9  }
   0x3   : > { %p33_p1 = scmp.ge.s32.totalorder %s31_s12, 2  ;;  %p155_p2 = scmp.lt.s32.totalorder %s4183_s11, 3 }
   0x5   : > { %s4419_s12 = smov (%p33_p1, %s31_s12), 0  ;;  %p156_p3 = pnand %p3115_p0, %p155_p2 }
   0x6   : > { %s3116_s15 = sshll.u32 (!%p156_p3), %s4175_s9, 7 }
   0x7   : > { %159 = sbr.rel (%p156_p3) target bundleno = 371 (0x173), region = 28  ;;  %p192_p4 = scmp.lt.s32.totalorder (!%p156_p3), %s3116_s15, 255 }
   0xc   : > { %v4089_v0 = vld [vmem:[%s4414_s1 + $0x38] sm:$0xff]   ;;  %v4090_v1 = vld [vmem:[%s4414_s1 + $0x30] sm:$0xff]   ;;  %s4421_s15 = smov (!%p192_p4, %s3116_s15), 255  ;;  %v4091_v2 = vld [vmem:[%s4414_s1 + $0x28] sm:$0xff]  }
   0xd   : > { %3905 = vmatprep.subr.bf16.mxu0 %v4089_v0  ;;  %4049 = vmatprep.subr.bf16.mxu1 %v4089_v0  ;;  %s3117_s20 = sshll.u32 %s4421_s15, 2  ;;  %v4092_v3 = vld [vmem:[%s4414_s1 + $0x20] sm:$0xff]   ;;  %v4093_v6 = vld [vmem:[%s4414_s1 + $0x18] sm:$0xff]   ;;  %v4094_v7 = vld [vmem:[%s4414_s1 + $0x10] sm:$0xff]  }
   0xe   : > { %3906 = vmatpush3.bf16.msra.mxu0 %v4089_v0  ;;  %4057 = vmatpush3.bf16.msra.mxu1 %v4089_v0  ;;  %s4235_s23 = scalar_lea.vmem %s4413_s0, %s3117_s20  ;;  %v4095_v8 = vld [vmem:[%s4414_s1 + $0x8] sm:$0xff]   ;;  %v4096_v9 = vld [vmem:[%s4414_s1] sm:$0xff]   ;;  %s4321_s8 = scalar_lea.vmem %s4415_s2, %s3117_s20 }
   0xf   : > { %3907 = vmatprep.subr.bf16.mxu0 %v4090_v1  ;;  %4050 = vmatprep.subr.bf16.mxu1 %v4090_v1  ;;  %v4097_v4 = vld [vmem:[%s4235_s23] sm:$0xff]   ;;  %v4099_v10 = vld [vmem:[%s4235_s23 + $0x8] sm:$0xff]   ;;  %v4101_v12 = vld [vmem:[%s4235_s23 + $0x10] sm:$0xff]  }
  0x10   : > { %v4098_v5 = vld [vmem:[%s4235_s23 + $0x100] sm:$0xff]   ;;  %3921 = vmatprep.mubr.bf16.mxu0 %v4097_v4  ;;  %v4100_v11 = vld [vmem:[%s4235_s23 + $0x108] sm:$0xff]   ;;  %v4102_v13 = vld [vmem:[%s4235_s23 + $0x110] sm:$0xff]  }
  0x11   : > { %3985 = vmatprep.mubr.bf16.mxu1 %v4098_v5  ;;  %v4103_v14 = vld [vmem:[%s4235_s23 + $0x18] sm:$0xff]   ;;  %v4105_v16 = vld [vmem:[%s4235_s23 + $0x20] sm:$0xff]   ;;  %v4107_v18 = vld [vmem:[%s4235_s23 + $0x28] sm:$0xff]  }
  0x12   : > { %3908 = vmatpush3.bf16.msra.mxu0 %v4090_v1  ;;  %4058 = vmatpush3.bf16.msra.mxu1 %v4090_v1  ;;  %v4104_v15 = vld [vmem:[%s4235_s23 + $0x118] sm:$0xff]   ;;  %v4106_v17 = vld [vmem:[%s4235_s23 + $0x120] sm:$0xff]   ;;  %v4108_v19 = vld [vmem:[%s4235_s23 + $0x128] sm:$0xff]  }
  0x13   : > { %3909 = vmatprep.subr.bf16.mxu0 %v4091_v2  ;;  %4051 = vmatprep.subr.bf16.mxu1 %v4091_v2  ;;  %v4109_v20 = vld [vmem:[%s4235_s23 + $0x30] sm:$0xff]   ;;  %v4111_v22 = vld [vmem:[%s4235_s23 + $0x38] sm:$0xff]   ;;  %v4113_v24 = vld [vmem:[%s4235_s23 + $0x40] sm:$0xff]  }
  0x14   : > { %v4110_v21 = vld [vmem:[%s4235_s23 + $0x130] sm:$0xff]   ;;  %v4112_v23 = vld [vmem:[%s4235_s23 + $0x138] sm:$0xff]   ;;  %v4114_v25 = vld [vmem:[%s4235_s23 + $0x140] sm:$0xff]  }
  0x15   : > { %v4115_v26 = vld [vmem:[%s4235_s23 + $0x48] sm:$0xff]   ;;  %v4117_v28 = vld [vmem:[%s4235_s23 + $0x50] sm:$0xff]   ;;  %v4119_v30 = vld [vmem:[%s4235_s23 + $0x58] sm:$0xff]  }
  0x16   : > { %3910 = vmatpush3.bf16.msra.mxu0 %v4091_v2  ;;  %4059 = vmatpush3.bf16.msra.mxu1 %v4091_v2  ;;  %v4116_v27 = vld [vmem:[%s4235_s23 + $0x148] sm:$0xff]   ;;  %v4118_v29 = vld [vmem:[%s4235_s23 + $0x150] sm:$0xff]   ;;  %v4120_v31 = vld [vmem:[%s4235_s23 + $0x158] sm:$0xff]  }
  0x17   : > { %3911 = vmatprep.subr.bf16.mxu0 %v4092_v3  ;;  %4052 = vmatprep.subr.bf16.mxu1 %v4092_v3  ;;  %v4121_v32 = vld [vmem:[%s4235_s23 + $0x60] sm:$0xff]   ;;  %v4123_v34 = vld [vmem:[%s4235_s23 + $0x68] sm:$0xff]   ;;  %v4125_v36 = vld [vmem:[%s4235_s23 + $0x70] sm:$0xff]  }
  0x18   : > { %v4122_v33 = vld [vmem:[%s4235_s23 + $0x160] sm:$0xff]   ;;  %v4124_v35 = vld [vmem:[%s4235_s23 + $0x168] sm:$0xff]   ;;  %v4126_v37 = vld [vmem:[%s4235_s23 + $0x170] sm:$0xff]  }
  0x19   : > { %v4127_v38 = vld [vmem:[%s4235_s23 + $0x78] sm:$0xff]   ;;  %v4129_v40 = vld [vmem:[%s4235_s23 + $0x80] sm:$0xff]   ;;  %v4131_v42 = vld [vmem:[%s4235_s23 + $0x88] sm:$0xff]  }
  0x1a   : > { %3912 = vmatpush3.bf16.msra.mxu0 %v4092_v3  ;;  %4060 = vmatpush3.bf16.msra.mxu1 %v4092_v3  ;;  %v4128_v39 = vld [vmem:[%s4235_s23 + $0x178] sm:$0xff]   ;;  %v4130_v41 = vld [vmem:[%s4235_s23 + $0x180] sm:$0xff]   ;;  %v4132_v43 = vld [vmem:[%s4235_s23 + $0x188] sm:$0xff]  }
  0x1b   : > { %3913 = vmatprep.subr.bf16.mxu0 %v4093_v6  ;;  %4053 = vmatprep.subr.bf16.mxu1 %v4093_v6  ;;  %v4133_v44 = vld [vmem:[%s4235_s23 + $0x90] sm:$0xff]   ;;  %v4135_v46 = vld [vmem:[%s4235_s23 + $0x98] sm:$0xff]   ;;  %v4137_v48 = vld [vmem:[%s4235_s23 + $0xa0] sm:$0xff]  }
  0x1c   : > { %v4134_v45 = vld [vmem:[%s4235_s23 + $0x190] sm:$0xff]   ;;  %v4136_v47 = vld [vmem:[%s4235_s23 + $0x198] sm:$0xff]   ;;  %v4138_v49 = vld [vmem:[%s4235_s23 + $0x1a0] sm:$0xff]  }
  0x1d   : > { %v4139_v50 = vld [vmem:[%s4235_s23 + $0xa8] sm:$0xff]   ;;  %v4141_v52 = vld [vmem:[%s4235_s23 + $0xb0] sm:$0xff]   ;;  %v4143_v54 = vld [vmem:[%s4235_s23 + $0xb8] sm:$0xff]  }
  0x1e   : > { %3914 = vmatpush3.bf16.msra.mxu0 %v4093_v6  ;;  %4061 = vmatpush3.bf16.msra.mxu1 %v4093_v6  ;;  %v4140_v51 = vld [vmem:[%s4235_s23 + $0x1a8] sm:$0xff]   ;;  %v4142_v53 = vld [vmem:[%s4235_s23 + $0x1b0] sm:$0xff]   ;;  %v4144_v55 = vld [vmem:[%s4235_s23 + $0x1b8] sm:$0xff]  }
  0x1f   : > { %3915 = vmatprep.subr.bf16.mxu0 %v4094_v7  ;;  %4054 = vmatprep.subr.bf16.mxu1 %v4094_v7  ;;  %v4145_v56 = vld [vmem:[%s4235_s23 + $0xc0] sm:$0xff]   ;;  %v4147_v58 = vld [vmem:[%s4235_s23 + $0xc8] sm:$0xff]   ;;  %v4149_v60 = vld [vmem:[%s4235_s23 + $0xd0] sm:$0xff]  }
  0x20   : > { %v4146_v57 = vld [vmem:[%s4235_s23 + $0x1c0] sm:$0xff]   ;;  %v4148_v59 = vld [vmem:[%s4235_s23 + $0x1c8] sm:$0xff]   ;;  %v4150_v61 = vld [vmem:[%s4235_s23 + $0x1d0] sm:$0xff]  }
  0x21   : > { %v4151_v62 = vld [vmem:[%s4235_s23 + $0xd8] sm:$0xff]   ;;  %v4153_v0 = vld [vmem:[%s4235_s23 + $0xe0] sm:$0xff]   ;;  %v4155_v2 = vld [vmem:[%s4235_s23 + $0xe8] sm:$0xff]  }
  0x22   : > { %3916 = vmatpush3.bf16.msra.mxu0 %v4094_v7  ;;  %4062 = vmatpush3.bf16.msra.mxu1 %v4094_v7  ;;  %v4152_v63 = vld [vmem:[%s4235_s23 + $0x1d8] sm:$0xff]   ;;  %v4154_v1 = vld [vmem:[%s4235_s23 + $0x1e0] sm:$0xff]   ;;  %v4156_v3 = vld [vmem:[%s4235_s23 + $0x1e8] sm:$0xff]  }
  0x23   : > { %3917 = vmatprep.subr.bf16.mxu0 %v4095_v8  ;;  %4055 = vmatprep.subr.bf16.mxu1 %v4095_v8  ;;  %v4157_v4 = vld [vmem:[%s4235_s23 + $0xf0] sm:$0xff]   ;;  %v4159_v6 = vld [vmem:[%s4235_s23 + $0xf8] sm:$0xff]  }
  0x24   : > { %v4158_v5 = vld [vmem:[%s4235_s23 + $0x1f0] sm:$0xff]   ;;  %v4160_v7 = vld [vmem:[%s4235_s23 + $0x1f8] sm:$0xff]  }
  0x26   : > { %3918 = vmatpush3.bf16.msra.mxu0 %v4095_v8  ;;  %4063 = vmatpush3.bf16.msra.mxu1 %v4095_v8 }
  0x27   : > { %3919 = vmatprep.subr.bf16.mxu0 %v4096_v9  ;;  %4056 = vmatprep.subr.bf16.mxu1 %v4096_v9 }
  0x2a   : > { %3920 = vmatpush3.bf16.msra.mxu0 %v4096_v9  ;;  %4064 = vmatpush3.bf16.msra.mxu1 %v4096_v9 }
  0x2d   : > { %3922 = vmatmul.mubr.bf16.vlgmr.msra.gmra.mxu0 %v4099_v10  ;;  %3986 = vmatmul.mubr.bf16.vlgmr.msra.gmra.mxu1 %v4100_v11 }
  0x2e   : > { %3925 = vmatprep.mubr.bf16.mxu0 %v4101_v12  ;;  %3989 = vmatprep.mubr.bf16.mxu1 %v4102_v13 }
  0x35   : > { %3926 = vmatmul.mubr.bf16.gmra.mxu0 %v4103_v14  ;;  %3990 = vmatmul.mubr.bf16.gmra.mxu1 %v4104_v15 }
  0x36   : > { %3929 = vmatprep.mubr.bf16.mxu0 %v4105_v16  ;;  %3993 = vmatprep.mubr.bf16.mxu1 %v4106_v17 }
  0x3d   : > { %3930 = vmatmul.mubr.bf16.gmra.mxu0 %v4107_v18  ;;  %3994 = vmatmul.mubr.bf16.gmra.mxu1 %v4108_v19 }
  0x3e   : > { %3933 = vmatprep.mubr.bf16.mxu0 %v4109_v20  ;;  %3997 = vmatprep.mubr.bf16.mxu1 %v4110_v21 }
  0x45   : > { %3934 = vmatmul.mubr.bf16.gmra.mxu0 %v4111_v22  ;;  %3998 = vmatmul.mubr.bf16.gmra.mxu1 %v4112_v23 }
  0x46   : > { %3937 = vmatprep.mubr.bf16.mxu0 %v4113_v24  ;;  %4001 = vmatprep.mubr.bf16.mxu1 %v4114_v25 }
  0x4d   : > { %3938 = vmatmul.mubr.bf16.gmra.mxu0 %v4115_v26  ;;  %4002 = vmatmul.mubr.bf16.gmra.mxu1 %v4116_v27 }
  0x4e   : > { %3941 = vmatprep.mubr.bf16.mxu0 %v4117_v28  ;;  %4005 = vmatprep.mubr.bf16.mxu1 %v4118_v29 }
  0x55   : > { %3942 = vmatmul.mubr.bf16.gmra.mxu0 %v4119_v30  ;;  %4006 = vmatmul.mubr.bf16.gmra.mxu1 %v4120_v31 }
  0x56   : > { %3945 = vmatprep.mubr.bf16.mxu0 %v4121_v32  ;;  %4009 = vmatprep.mubr.bf16.mxu1 %v4122_v33 }
  0x5d   : > { %3946 = vmatmul.mubr.bf16.gmra.mxu0 %v4123_v34  ;;  %4010 = vmatmul.mubr.bf16.gmra.mxu1 %v4124_v35 }
  0x5e   : > { %3949 = vmatprep.mubr.bf16.mxu0 %v4125_v36  ;;  %4013 = vmatprep.mubr.bf16.mxu1 %v4126_v37 }
  0x65   : > { %3950 = vmatmul.mubr.bf16.gmra.mxu0 %v4127_v38  ;;  %4014 = vmatmul.mubr.bf16.gmra.mxu1 %v4128_v39 }
  0x66   : > { %3953 = vmatprep.mubr.bf16.mxu0 %v4129_v40  ;;  %4017 = vmatprep.mubr.bf16.mxu1 %v4130_v41 }
  0x6d   : > { %3954 = vmatmul.mubr.bf16.gmra.mxu0 %v4131_v42  ;;  %4018 = vmatmul.mubr.bf16.gmra.mxu1 %v4132_v43 }
  0x6e   : > { %3957 = vmatprep.mubr.bf16.mxu0 %v4133_v44  ;;  %4021 = vmatprep.mubr.bf16.mxu1 %v4134_v45 }
  0x75   : > { %3958 = vmatmul.mubr.bf16.gmra.mxu0 %v4135_v46  ;;  %4022 = vmatmul.mubr.bf16.gmra.mxu1 %v4136_v47 }
  0x76   : > { %3961 = vmatprep.mubr.bf16.mxu0 %v4137_v48  ;;  %4025 = vmatprep.mubr.bf16.mxu1 %v4138_v49 }
  0x7d   : > { %3962 = vmatmul.mubr.bf16.gmra.mxu0 %v4139_v50  ;;  %4026 = vmatmul.mubr.bf16.gmra.mxu1 %v4140_v51 }
  0x7e   : > { %3965 = vmatprep.mubr.bf16.mxu0 %v4141_v52  ;;  %4029 = vmatprep.mubr.bf16.mxu1 %v4142_v53 }
  0x85   : > { %3966 = vmatmul.mubr.bf16.gmra.mxu0 %v4143_v54  ;;  %4030 = vmatmul.mubr.bf16.gmra.mxu1 %v4144_v55 }
  0x86   : > { %3969 = vmatprep.mubr.bf16.mxu0 %v4145_v56  ;;  %4033 = vmatprep.mubr.bf16.mxu1 %v4146_v57 }
  0x8d   : > { %3970 = vmatmul.mubr.bf16.gmra.mxu0 %v4147_v58  ;;  %4034 = vmatmul.mubr.bf16.gmra.mxu1 %v4148_v59 }
  0x8e   : > { %3973 = vmatprep.mubr.bf16.mxu0 %v4149_v60  ;;  %4037 = vmatprep.mubr.bf16.mxu1 %v4150_v61 }
  0x95   : > { %3974 = vmatmul.mubr.bf16.gmra.mxu0 %v4151_v62  ;;  %4038 = vmatmul.mubr.bf16.gmra.mxu1 %v4152_v63 }
  0x96   : > { %3977 = vmatprep.mubr.bf16.mxu0 %v4153_v0  ;;  %4041 = vmatprep.mubr.bf16.mxu1 %v4154_v1 }
  0x9d   : > { %3978 = vmatmul.mubr.bf16.gmra.mxu0 %v4155_v2  ;;  %4042 = vmatmul.mubr.bf16.gmra.mxu1 %v4156_v3 }
  0x9e   : > { %3981 = vmatprep.mubr.bf16.mxu0 %v4157_v4  ;;  %4045 = vmatprep.mubr.bf16.mxu1 %v4158_v5 }
  0xa5   : > { %3982 = vmatmul.mubr.bf16.gmra.mxu0 %v4159_v6  ;;  %4046 = vmatmul.mubr.bf16.gmra.mxu1 %v4160_v7 }
  0xed   : > { %v3923_v8 = vpop.f32.mrf.mxu0  ;;  %v3987_v9 = vpop.f32.mrf.mxu1 }
  0xee   : > { %vm1989_vm0 = vcmp.ge.f32.partialorder %v3923_v8, 0.0  ;;  %v2117_v10 = vmul.f32 0.2, %v3923_v8  ;;  %v2181_v11 = vmul.f32 0.2, %v3987_v9  ;;  %vm2053_vm1 = vcmp.ge.f32.partialorder %v3987_v9, 0.0 }
  0xef   : > { %v1089_v12 = vpop.f32.mrf.mxu0  ;;  %v1345_v13 = vpop.f32.mrf.mxu1 }
  0xf0   : > { %v2245_v14 = vsel %vm1989_vm0, %v3923_v8, %v2117_v10  ;;  %v2115_v15 = vmul.f32 0.2, %v1089_v12  ;;  %vm1987_vm2 = vcmp.ge.f32.partialorder %v1089_v12, 0.0  ;;  %v2309_v19 = vsel %vm2053_vm1, %v3987_v9, %v2181_v11 }
  0xf1   : > { %v3924_v16 = vpop.f32.mrf.mxu0  ;;  %v3988_v17 = vpop.f32.mrf.mxu1  ;;  %vm2051_vm5 = vcmp.ge.f32.partialorder %v1345_v13, 0.0  ;;  %v2179_v20 = vmul.f32 0.2, %v1345_v13 }
  0xf2   : > { %vm1990_vm3 = vcmp.ge.f32.partialorder %v3924_v16, 0.0  ;;  %v2118_v18 = vmul.f32 0.2, %v3924_v16  ;;  %vm2054_vm4 = vcmp.ge.f32.partialorder %v3988_v17, 0.0  ;;  %v2182_v21 = vmul.f32 0.2, %v3988_v17 }
  0xf3   : > { %v1092_v22 = vpop.f32.mrf.mxu0  ;;  %v1348_v23 = vpop.f32.mrf.mxu1  ;;  %v2243_v26 = vsel %vm1987_vm2, %v1089_v12, %v2115_v15  ;;  %v2307_v35 = vsel %vm2051_vm5, %v1345_v13, %v2179_v20 }
  0xf4   : > { %v2246_v24 = vsel %vm1990_vm3, %v3924_v16, %v2118_v18  ;;  %vm1988_vm6 = vcmp.ge.f32.partialorder %v1092_v22, 0.0  ;;  %v2116_v25 = vmul.f32 0.2, %v1092_v22  ;;  %vm2052_vm7 = vcmp.ge.f32.partialorder %v1348_v23, 0.0 }
  0xf5   : > { %v3458_v27 = vpack.c.bf16 %v2246_v24, %v2245_v14  ;;  %v2310_v28 = vsel %vm2054_vm4, %v3988_v17, %v2182_v21  ;;  %v2180_v29 = vmul.f32 0.2, %v1348_v23  ;;  %v3927_v30 = vpop.f32.mrf.mxu0  ;;  %v3991_v31 = vpop.f32.mrf.mxu1 }
  0xf6   : > { %v3618_v32 = vpack.c.bf16 %v2310_v28, %v2309_v19  ;;  %v2244_v33 = vsel %vm1988_vm6, %v1092_v22, %v2116_v25  ;;  %vm1993_vm8 = vcmp.ge.f32.partialorder %v3927_v30, 0.0  ;;  %v2121_v34 = vmul.f32 0.2, %v3927_v30 }
  0xf7   : > { %3770 = vst [vmem:[%s4321_s8 + $0x8] sm:$0xff] %v3458_v27   ;;  %v3453_v36 = vpack.c.bf16 %v2244_v33, %v2243_v26  ;;  %v2308_v37 = vsel %vm2052_vm7, %v1348_v23, %v2180_v29  ;;  %v2185_v38 = vmul.f32 0.2, %v3991_v31  ;;  %v1105_v39 = vpop.f32.mrf.mxu0  ;;  %v1361_v40 = vpop.f32.mrf.mxu1  ;;  %vm2057_vm9 = vcmp.ge.f32.partialorder %v3991_v31, 0.0 }
  0xf8   : > { %3802 = vst [vmem:[%s4321_s8 + $0x108] sm:$0xff] %v3618_v32   ;;  %v3613_v41 = vpack.c.bf16 %v2308_v37, %v2307_v35  ;;  %v2249_v42 = vsel %vm1993_vm8, %v3927_v30, %v2121_v34  ;;  %v2119_v43 = vmul.f32 0.2, %v1105_v39  ;;  %vm1991_vm10 = vcmp.ge.f32.partialorder %v1105_v39, 0.0 }
  0xf9   : > { %3454 = vst [vmem:[%s4321_s8] sm:$0xff] %v3453_v36   ;;  %v3928_v44 = vpop.f32.mrf.mxu0  ;;  %v3992_v45 = vpop.f32.mrf.mxu1  ;;  %v2313_v47 = vsel %vm2057_vm9, %v3991_v31, %v2185_v38  ;;  %vm2055_vm13 = vcmp.ge.f32.partialorder %v1361_v40, 0.0  ;;  %v2183_v48 = vmul.f32 0.2, %v1361_v40 }
  0xfa   : > { %3801 = vst [vmem:[%s4321_s8 + $0x100] sm:$0xff] %v3613_v41   ;;  %vm1994_vm11 = vcmp.ge.f32.partialorder %v3928_v44, 0.0  ;;  %v2122_v46 = vmul.f32 0.2, %v3928_v44  ;;  %vm2058_vm12 = vcmp.ge.f32.partialorder %v3992_v45, 0.0  ;;  %v2247_v54 = vsel %vm1991_vm10, %v1105_v39, %v2119_v43 }
  0xfb   : > { %v2186_v49 = vmul.f32 0.2, %v3992_v45  ;;  %v1108_v50 = vpop.f32.mrf.mxu0  ;;  %v1364_v51 = vpop.f32.mrf.mxu1  ;;  %v2311_v63 = vsel %vm2055_vm13, %v1361_v40, %v2183_v48 }
  0xfc   : > { %v2250_v52 = vsel %vm1994_vm11, %v3928_v44, %v2122_v46  ;;  %vm1992_vm14 = vcmp.ge.f32.partialorder %v1108_v50, 0.0  ;;  %v2120_v53 = vmul.f32 0.2, %v1108_v50  ;;  %vm2056_vm15 = vcmp.ge.f32.partialorder %v1364_v51, 0.0 }
  0xfd   : > { %v3468_v55 = vpack.c.bf16 %v2250_v52, %v2249_v42  ;;  %v2314_v56 = vsel %vm2058_vm12, %v3992_v45, %v2186_v49  ;;  %v2184_v57 = vmul.f32 0.2, %v1364_v51  ;;  %v3931_v58 = vpop.f32.mrf.mxu0  ;;  %v3995_v59 = vpop.f32.mrf.mxu1 }
  0xfe   : > { %v3628_v60 = vpack.c.bf16 %v2314_v56, %v2313_v47  ;;  %v2248_v61 = vsel %vm1992_vm14, %v1108_v50, %v2120_v53  ;;  %vm1997_vm0 = vcmp.ge.f32.partialorder %v3931_v58, 0.0  ;;  %v2125_v62 = vmul.f32 0.2, %v3931_v58 }
  0xff   : > { %3772 = vst [vmem:[%s4321_s8 + $0x18] sm:$0xff] %v3468_v55   ;;  %v3463_v0 = vpack.c.bf16 %v2248_v61, %v2247_v54  ;;  %v2312_v1 = vsel %vm2056_vm15, %v1364_v51, %v2184_v57  ;;  %v2189_v2 = vmul.f32 0.2, %v3995_v59  ;;  %v1121_v3 = vpop.f32.mrf.mxu0  ;;  %v1377_v4 = vpop.f32.mrf.mxu1  ;;  %vm2061_vm1 = vcmp.ge.f32.partialorder %v3995_v59, 0.0 }
 0x100   : > { %3804 = vst [vmem:[%s4321_s8 + $0x118] sm:$0xff] %v3628_v60   ;;  %v3623_v5 = vpack.c.bf16 %v2312_v1, %v2311_v63  ;;  %v2253_v6 = vsel %vm1997_vm0, %v3931_v58, %v2125_v62  ;;  %v2123_v7 = vmul.f32 0.2, %v1121_v3  ;;  %vm1995_vm2 = vcmp.ge.f32.partialorder %v1121_v3, 0.0 }
 0x101   : > { %3771 = vst [vmem:[%s4321_s8 + $0x10] sm:$0xff] %v3463_v0   ;;  %v3932_v8 = vpop.f32.mrf.mxu0  ;;  %v3996_v9 = vpop.f32.mrf.mxu1  ;;  %v2317_v11 = vsel %vm2061_vm1, %v3995_v59, %v2189_v2  ;;  %vm2059_vm5 = vcmp.ge.f32.partialorder %v1377_v4, 0.0  ;;  %v2187_v12 = vmul.f32 0.2, %v1377_v4 }
 0x102   : > { %3803 = vst [vmem:[%s4321_s8 + $0x110] sm:$0xff] %v3623_v5   ;;  %vm1998_vm3 = vcmp.ge.f32.partialorder %v3932_v8, 0.0  ;;  %v2126_v10 = vmul.f32 0.2, %v3932_v8  ;;  %vm2062_vm4 = vcmp.ge.f32.partialorder %v3996_v9, 0.0  ;;  %v2251_v18 = vsel %vm1995_vm2, %v1121_v3, %v2123_v7 }
 0x103   : > { %v2190_v13 = vmul.f32 0.2, %v3996_v9  ;;  %v1124_v14 = vpop.f32.mrf.mxu0  ;;  %v1380_v15 = vpop.f32.mrf.mxu1  ;;  %v2315_v27 = vsel %vm2059_vm5, %v1377_v4, %v2187_v12 }
 0x104   : > { %v2254_v16 = vsel %vm1998_vm3, %v3932_v8, %v2126_v10  ;;  %vm1996_vm6 = vcmp.ge.f32.partialorder %v1124_v14, 0.0  ;;  %v2124_v17 = vmul.f32 0.2, %v1124_v14  ;;  %vm2060_vm7 = vcmp.ge.f32.partialorder %v1380_v15, 0.0 }
 0x105   : > { %v3478_v19 = vpack.c.bf16 %v2254_v16, %v2253_v6  ;;  %v2318_v20 = vsel %vm2062_vm4, %v3996_v9, %v2190_v13  ;;  %v2188_v21 = vmul.f32 0.2, %v1380_v15  ;;  %v3935_v22 = vpop.f32.mrf.mxu0  ;;  %v3999_v23 = vpop.f32.mrf.mxu1 }
 0x106   : > { %v3638_v24 = vpack.c.bf16 %v2318_v20, %v2317_v11  ;;  %v2252_v25 = vsel %vm1996_vm6, %v1124_v14, %v2124_v17  ;;  %vm2001_vm8 = vcmp.ge.f32.partialorder %v3935_v22, 0.0  ;;  %v2129_v26 = vmul.f32 0.2, %v3935_v22 }
 0x107   : > { %3774 = vst [vmem:[%s4321_s8 + $0x28] sm:$0xff] %v3478_v19   ;;  %v3473_v28 = vpack.c.bf16 %v2252_v25, %v2251_v18  ;;  %v2316_v29 = vsel %vm2060_vm7, %v1380_v15, %v2188_v21  ;;  %v2193_v30 = vmul.f32 0.2, %v3999_v23  ;;  %v1137_v31 = vpop.f32.mrf.mxu0  ;;  %v1393_v32 = vpop.f32.mrf.mxu1  ;;  %vm2065_vm9 = vcmp.ge.f32.partialorder %v3999_v23, 0.0 }
 0x108   : > { %3806 = vst [vmem:[%s4321_s8 + $0x128] sm:$0xff] %v3638_v24   ;;  %v3633_v33 = vpack.c.bf16 %v2316_v29, %v2315_v27  ;;  %v2257_v34 = vsel %vm2001_vm8, %v3935_v22, %v2129_v26  ;;  %v2127_v35 = vmul.f32 0.2, %v1137_v31  ;;  %vm1999_vm10 = vcmp.ge.f32.partialorder %v1137_v31, 0.0 }
 0x109   : > { %3773 = vst [vmem:[%s4321_s8 + $0x20] sm:$0xff] %v3473_v28   ;;  %v3936_v36 = vpop.f32.mrf.mxu0  ;;  %v4000_v37 = vpop.f32.mrf.mxu1  ;;  %v2321_v39 = vsel %vm2065_vm9, %v3999_v23, %v2193_v30  ;;  %vm2063_vm13 = vcmp.ge.f32.partialorder %v1393_v32, 0.0  ;;  %v2191_v40 = vmul.f32 0.2, %v1393_v32 }
 0x10a   : > { %3805 = vst [vmem:[%s4321_s8 + $0x120] sm:$0xff] %v3633_v33   ;;  %vm2002_vm11 = vcmp.ge.f32.partialorder %v3936_v36, 0.0  ;;  %v2130_v38 = vmul.f32 0.2, %v3936_v36  ;;  %vm2066_vm12 = vcmp.ge.f32.partialorder %v4000_v37, 0.0  ;;  %v2255_v46 = vsel %vm1999_vm10, %v1137_v31, %v2127_v35 }
 0x10b   : > { %v2194_v41 = vmul.f32 0.2, %v4000_v37  ;;  %v1140_v42 = vpop.f32.mrf.mxu0  ;;  %v1396_v43 = vpop.f32.mrf.mxu1  ;;  %v2319_v55 = vsel %vm2063_vm13, %v1393_v32, %v2191_v40 }
 0x10c   : > { %v2258_v44 = vsel %vm2002_vm11, %v3936_v36, %v2130_v38  ;;  %vm2000_vm14 = vcmp.ge.f32.partialorder %v1140_v42, 0.0  ;;  %v2128_v45 = vmul.f32 0.2, %v1140_v42  ;;  %vm2064_vm15 = vcmp.ge.f32.partialorder %v1396_v43, 0.0 }
 0x10d   : > { %v3488_v47 = vpack.c.bf16 %v2258_v44, %v2257_v34  ;;  %v2322_v48 = vsel %vm2066_vm12, %v4000_v37, %v2194_v41  ;;  %v2192_v49 = vmul.f32 0.2, %v1396_v43  ;;  %v3939_v50 = vpop.f32.mrf.mxu0  ;;  %v4003_v51 = vpop.f32.mrf.mxu1 }
 0x10e   : > { %v3648_v52 = vpack.c.bf16 %v2322_v48, %v2321_v39  ;;  %v2256_v53 = vsel %vm2000_vm14, %v1140_v42, %v2128_v45  ;;  %vm2005_vm0 = vcmp.ge.f32.partialorder %v3939_v50, 0.0  ;;  %v2133_v54 = vmul.f32 0.2, %v3939_v50 }
 0x10f   : > { %3776 = vst [vmem:[%s4321_s8 + $0x38] sm:$0xff] %v3488_v47   ;;  %v3483_v56 = vpack.c.bf16 %v2256_v53, %v2255_v46  ;;  %v2320_v57 = vsel %vm2064_vm15, %v1396_v43, %v2192_v49  ;;  %v2197_v58 = vmul.f32 0.2, %v4003_v51  ;;  %v1153_v59 = vpop.f32.mrf.mxu0  ;;  %v1409_v60 = vpop.f32.mrf.mxu1  ;;  %vm2069_vm1 = vcmp.ge.f32.partialorder %v4003_v51, 0.0 }
 0x110   : > { %3808 = vst [vmem:[%s4321_s8 + $0x138] sm:$0xff] %v3648_v52   ;;  %v3643_v61 = vpack.c.bf16 %v2320_v57, %v2319_v55  ;;  %v2261_v62 = vsel %vm2005_vm0, %v3939_v50, %v2133_v54  ;;  %v2131_v63 = vmul.f32 0.2, %v1153_v59  ;;  %vm2003_vm2 = vcmp.ge.f32.partialorder %v1153_v59, 0.0 }
 0x111   : > { %3775 = vst [vmem:[%s4321_s8 + $0x30] sm:$0xff] %v3483_v56   ;;  %v3940_v0 = vpop.f32.mrf.mxu0  ;;  %v4004_v1 = vpop.f32.mrf.mxu1  ;;  %v2325_v3 = vsel %vm2069_vm1, %v4003_v51, %v2197_v58  ;;  %vm2067_vm5 = vcmp.ge.f32.partialorder %v1409_v60, 0.0  ;;  %v2195_v4 = vmul.f32 0.2, %v1409_v60 }
 0x112   : > { %3807 = vst [vmem:[%s4321_s8 + $0x130] sm:$0xff] %v3643_v61   ;;  %vm2006_vm3 = vcmp.ge.f32.partialorder %v3940_v0, 0.0  ;;  %v2134_v2 = vmul.f32 0.2, %v3940_v0  ;;  %vm2070_vm4 = vcmp.ge.f32.partialorder %v4004_v1, 0.0  ;;  %v2259_v10 = vsel %vm2003_vm2, %v1153_v59, %v2131_v63 }
 0x113   : > { %v2198_v5 = vmul.f32 0.2, %v4004_v1  ;;  %v1156_v6 = vpop.f32.mrf.mxu0  ;;  %v1412_v7 = vpop.f32.mrf.mxu1  ;;  %v2323_v19 = vsel %vm2067_vm5, %v1409_v60, %v2195_v4 }
 0x114   : > { %v2262_v8 = vsel %vm2006_vm3, %v3940_v0, %v2134_v2  ;;  %vm2004_vm6 = vcmp.ge.f32.partialorder %v1156_v6, 0.0  ;;  %v2132_v9 = vmul.f32 0.2, %v1156_v6  ;;  %vm2068_vm7 = vcmp.ge.f32.partialorder %v1412_v7, 0.0 }
 0x115   : > { %v3498_v11 = vpack.c.bf16 %v2262_v8, %v2261_v62  ;;  %v2326_v12 = vsel %vm2070_vm4, %v4004_v1, %v2198_v5  ;;  %v2196_v13 = vmul.f32 0.2, %v1412_v7  ;;  %v3943_v14 = vpop.f32.mrf.mxu0  ;;  %v4007_v15 = vpop.f32.mrf.mxu1 }
 0x116   : > { %v3658_v16 = vpack.c.bf16 %v2326_v12, %v2325_v3  ;;  %v2260_v17 = vsel %vm2004_vm6, %v1156_v6, %v2132_v9  ;;  %vm2009_vm8 = vcmp.ge.f32.partialorder %v3943_v14, 0.0  ;;  %v2137_v18 = vmul.f32 0.2, %v3943_v14 }
 0x117   : > { %3778 = vst [vmem:[%s4321_s8 + $0x48] sm:$0xff] %v3498_v11   ;;  %v3493_v20 = vpack.c.bf16 %v2260_v17, %v2259_v10  ;;  %v2324_v21 = vsel %vm2068_vm7, %v1412_v7, %v2196_v13  ;;  %v2201_v22 = vmul.f32 0.2, %v4007_v15  ;;  %v1169_v23 = vpop.f32.mrf.mxu0  ;;  %v1425_v24 = vpop.f32.mrf.mxu1  ;;  %vm2073_vm9 = vcmp.ge.f32.partialorder %v4007_v15, 0.0 }
 0x118   : > { %3810 = vst [vmem:[%s4321_s8 + $0x148] sm:$0xff] %v3658_v16   ;;  %v3653_v25 = vpack.c.bf16 %v2324_v21, %v2323_v19  ;;  %v2265_v26 = vsel %vm2009_vm8, %v3943_v14, %v2137_v18  ;;  %v2135_v27 = vmul.f32 0.2, %v1169_v23  ;;  %vm2007_vm10 = vcmp.ge.f32.partialorder %v1169_v23, 0.0 }
 0x119   : > { %3777 = vst [vmem:[%s4321_s8 + $0x40] sm:$0xff] %v3493_v20   ;;  %v3944_v28 = vpop.f32.mrf.mxu0  ;;  %v4008_v29 = vpop.f32.mrf.mxu1  ;;  %v2329_v31 = vsel %vm2073_vm9, %v4007_v15, %v2201_v22  ;;  %vm2071_vm13 = vcmp.ge.f32.partialorder %v1425_v24, 0.0  ;;  %v2199_v32 = vmul.f32 0.2, %v1425_v24 }
 0x11a   : > { %3809 = vst [vmem:[%s4321_s8 + $0x140] sm:$0xff] %v3653_v25   ;;  %vm2010_vm11 = vcmp.ge.f32.partialorder %v3944_v28, 0.0  ;;  %v2138_v30 = vmul.f32 0.2, %v3944_v28  ;;  %vm2074_vm12 = vcmp.ge.f32.partialorder %v4008_v29, 0.0  ;;  %v2263_v38 = vsel %vm2007_vm10, %v1169_v23, %v2135_v27 }
 0x11b   : > { %v2202_v33 = vmul.f32 0.2, %v4008_v29  ;;  %v1172_v34 = vpop.f32.mrf.mxu0  ;;  %v1428_v35 = vpop.f32.mrf.mxu1  ;;  %v2327_v47 = vsel %vm2071_vm13, %v1425_v24, %v2199_v32 }
 0x11c   : > { %v2266_v36 = vsel %vm2010_vm11, %v3944_v28, %v2138_v30  ;;  %vm2008_vm14 = vcmp.ge.f32.partialorder %v1172_v34, 0.0  ;;  %v2136_v37 = vmul.f32 0.2, %v1172_v34  ;;  %vm2072_vm15 = vcmp.ge.f32.partialorder %v1428_v35, 0.0 }
 0x11d   : > { %v3508_v39 = vpack.c.bf16 %v2266_v36, %v2265_v26  ;;  %v2330_v40 = vsel %vm2074_vm12, %v4008_v29, %v2202_v33  ;;  %v2200_v41 = vmul.f32 0.2, %v1428_v35  ;;  %v3947_v42 = vpop.f32.mrf.mxu0  ;;  %v4011_v43 = vpop.f32.mrf.mxu1 }
 0x11e   : > { %v3668_v44 = vpack.c.bf16 %v2330_v40, %v2329_v31  ;;  %v2264_v45 = vsel %vm2008_vm14, %v1172_v34, %v2136_v37  ;;  %vm2013_vm0 = vcmp.ge.f32.partialorder %v3947_v42, 0.0  ;;  %v2141_v46 = vmul.f32 0.2, %v3947_v42 }
 0x11f   : > { %3780 = vst [vmem:[%s4321_s8 + $0x58] sm:$0xff] %v3508_v39   ;;  %v3503_v48 = vpack.c.bf16 %v2264_v45, %v2263_v38  ;;  %v2328_v49 = vsel %vm2072_vm15, %v1428_v35, %v2200_v41  ;;  %v2205_v50 = vmul.f32 0.2, %v4011_v43  ;;  %v1185_v51 = vpop.f32.mrf.mxu0  ;;  %v1441_v52 = vpop.f32.mrf.mxu1  ;;  %vm2077_vm1 = vcmp.ge.f32.partialorder %v4011_v43, 0.0 }
 0x120   : > { %3812 = vst [vmem:[%s4321_s8 + $0x158] sm:$0xff] %v3668_v44   ;;  %v3663_v53 = vpack.c.bf16 %v2328_v49, %v2327_v47  ;;  %v2269_v54 = vsel %vm2013_vm0, %v3947_v42, %v2141_v46  ;;  %v2139_v55 = vmul.f32 0.2, %v1185_v51  ;;  %vm2011_vm2 = vcmp.ge.f32.partialorder %v1185_v51, 0.0 }
 0x121   : > { %3779 = vst [vmem:[%s4321_s8 + $0x50] sm:$0xff] %v3503_v48   ;;  %v3948_v56 = vpop.f32.mrf.mxu0  ;;  %v4012_v57 = vpop.f32.mrf.mxu1  ;;  %v2333_v59 = vsel %vm2077_vm1, %v4011_v43, %v2205_v50  ;;  %vm2075_vm5 = vcmp.ge.f32.partialorder %v1441_v52, 0.0  ;;  %v2203_v60 = vmul.f32 0.2, %v1441_v52 }
 0x122   : > { %3811 = vst [vmem:[%s4321_s8 + $0x150] sm:$0xff] %v3663_v53   ;;  %vm2014_vm3 = vcmp.ge.f32.partialorder %v3948_v56, 0.0  ;;  %v2142_v58 = vmul.f32 0.2, %v3948_v56  ;;  %vm2078_vm4 = vcmp.ge.f32.partialorder %v4012_v57, 0.0  ;;  %v2267_v2 = vsel %vm2011_vm2, %v1185_v51, %v2139_v55 }
 0x123   : > { %v2206_v61 = vmul.f32 0.2, %v4012_v57  ;;  %v1188_v62 = vpop.f32.mrf.mxu0  ;;  %v1444_v63 = vpop.f32.mrf.mxu1  ;;  %v2331_v11 = vsel %vm2075_vm5, %v1441_v52, %v2203_v60 }
 0x124   : > { %v2270_v0 = vsel %vm2014_vm3, %v3948_v56, %v2142_v58  ;;  %vm2012_vm6 = vcmp.ge.f32.partialorder %v1188_v62, 0.0  ;;  %v2140_v1 = vmul.f32 0.2, %v1188_v62  ;;  %vm2076_vm7 = vcmp.ge.f32.partialorder %v1444_v63, 0.0 }
 0x125   : > { %v3518_v3 = vpack.c.bf16 %v2270_v0, %v2269_v54  ;;  %v2334_v4 = vsel %vm2078_vm4, %v4012_v57, %v2206_v61  ;;  %v2204_v5 = vmul.f32 0.2, %v1444_v63  ;;  %v3951_v6 = vpop.f32.mrf.mxu0  ;;  %v4015_v7 = vpop.f32.mrf.mxu1 }
 0x126   : > { %v3678_v8 = vpack.c.bf16 %v2334_v4, %v2333_v59  ;;  %v2268_v9 = vsel %vm2012_vm6, %v1188_v62, %v2140_v1  ;;  %vm2017_vm8 = vcmp.ge.f32.partialorder %v3951_v6, 0.0  ;;  %v2145_v10 = vmul.f32 0.2, %v3951_v6 }
 0x127   : > { %3782 = vst [vmem:[%s4321_s8 + $0x68] sm:$0xff] %v3518_v3   ;;  %v3513_v12 = vpack.c.bf16 %v2268_v9, %v2267_v2  ;;  %v2332_v13 = vsel %vm2076_vm7, %v1444_v63, %v2204_v5  ;;  %v2209_v14 = vmul.f32 0.2, %v4015_v7  ;;  %v1201_v15 = vpop.f32.mrf.mxu0  ;;  %v1457_v16 = vpop.f32.mrf.mxu1  ;;  %vm2081_vm9 = vcmp.ge.f32.partialorder %v4015_v7, 0.0 }
 0x128   : > { %3814 = vst [vmem:[%s4321_s8 + $0x168] sm:$0xff] %v3678_v8   ;;  %v3673_v17 = vpack.c.bf16 %v2332_v13, %v2331_v11  ;;  %v2273_v18 = vsel %vm2017_vm8, %v3951_v6, %v2145_v10  ;;  %v2143_v19 = vmul.f32 0.2, %v1201_v15  ;;  %vm2015_vm10 = vcmp.ge.f32.partialorder %v1201_v15, 0.0 }
 0x129   : > { %3781 = vst [vmem:[%s4321_s8 + $0x60] sm:$0xff] %v3513_v12   ;;  %v3952_v20 = vpop.f32.mrf.mxu0  ;;  %v4016_v21 = vpop.f32.mrf.mxu1  ;;  %v2337_v23 = vsel %vm2081_vm9, %v4015_v7, %v2209_v14  ;;  %vm2079_vm13 = vcmp.ge.f32.partialorder %v1457_v16, 0.0  ;;  %v2207_v24 = vmul.f32 0.2, %v1457_v16 }
 0x12a   : > { %3813 = vst [vmem:[%s4321_s8 + $0x160] sm:$0xff] %v3673_v17   ;;  %vm2018_vm11 = vcmp.ge.f32.partialorder %v3952_v20, 0.0  ;;  %v2146_v22 = vmul.f32 0.2, %v3952_v20  ;;  %vm2082_vm12 = vcmp.ge.f32.partialorder %v4016_v21, 0.0  ;;  %v2271_v30 = vsel %vm2015_vm10, %v1201_v15, %v2143_v19 }
 0x12b   : > { %v2210_v25 = vmul.f32 0.2, %v4016_v21  ;;  %v1204_v26 = vpop.f32.mrf.mxu0  ;;  %v1460_v27 = vpop.f32.mrf.mxu1  ;;  %v2335_v39 = vsel %vm2079_vm13, %v1457_v16, %v2207_v24 }
 0x12c   : > { %v2274_v28 = vsel %vm2018_vm11, %v3952_v20, %v2146_v22  ;;  %vm2016_vm14 = vcmp.ge.f32.partialorder %v1204_v26, 0.0  ;;  %v2144_v29 = vmul.f32 0.2, %v1204_v26  ;;  %vm2080_vm15 = vcmp.ge.f32.partialorder %v1460_v27, 0.0 }
 0x12d   : > { %v3528_v31 = vpack.c.bf16 %v2274_v28, %v2273_v18  ;;  %v2338_v32 = vsel %vm2082_vm12, %v4016_v21, %v2210_v25  ;;  %v2208_v33 = vmul.f32 0.2, %v1460_v27  ;;  %v3955_v34 = vpop.f32.mrf.mxu0  ;;  %v4019_v35 = vpop.f32.mrf.mxu1 }
 0x12e   : > { %v3688_v36 = vpack.c.bf16 %v2338_v32, %v2337_v23  ;;  %v2272_v37 = vsel %vm2016_vm14, %v1204_v26, %v2144_v29  ;;  %vm2021_vm0 = vcmp.ge.f32.partialorder %v3955_v34, 0.0  ;;  %v2149_v38 = vmul.f32 0.2, %v3955_v34 }
 0x12f   : > { %3784 = vst [vmem:[%s4321_s8 + $0x78] sm:$0xff] %v3528_v31   ;;  %v3523_v40 = vpack.c.bf16 %v2272_v37, %v2271_v30  ;;  %v2336_v41 = vsel %vm2080_vm15, %v1460_v27, %v2208_v33  ;;  %v2213_v42 = vmul.f32 0.2, %v4019_v35  ;;  %v1217_v43 = vpop.f32.mrf.mxu0  ;;  %v1473_v44 = vpop.f32.mrf.mxu1  ;;  %vm2085_vm1 = vcmp.ge.f32.partialorder %v4019_v35, 0.0 }
 0x130   : > { %3816 = vst [vmem:[%s4321_s8 + $0x178] sm:$0xff] %v3688_v36   ;;  %v3683_v45 = vpack.c.bf16 %v2336_v41, %v2335_v39  ;;  %v2277_v46 = vsel %vm2021_vm0, %v3955_v34, %v2149_v38  ;;  %v2147_v47 = vmul.f32 0.2, %v1217_v43  ;;  %vm2019_vm2 = vcmp.ge.f32.partialorder %v1217_v43, 0.0 }
 0x131   : > { %3783 = vst [vmem:[%s4321_s8 + $0x70] sm:$0xff] %v3523_v40   ;;  %v3956_v48 = vpop.f32.mrf.mxu0  ;;  %v4020_v49 = vpop.f32.mrf.mxu1  ;;  %v2341_v51 = vsel %vm2085_vm1, %v4019_v35, %v2213_v42  ;;  %vm2083_vm5 = vcmp.ge.f32.partialorder %v1473_v44, 0.0  ;;  %v2211_v52 = vmul.f32 0.2, %v1473_v44 }
 0x132   : > { %3815 = vst [vmem:[%s4321_s8 + $0x170] sm:$0xff] %v3683_v45   ;;  %vm2022_vm3 = vcmp.ge.f32.partialorder %v3956_v48, 0.0  ;;  %v2150_v50 = vmul.f32 0.2, %v3956_v48  ;;  %vm2086_vm4 = vcmp.ge.f32.partialorder %v4020_v49, 0.0  ;;  %v2275_v58 = vsel %vm2019_vm2, %v1217_v43, %v2147_v47 }
 0x133   : > { %v2214_v53 = vmul.f32 0.2, %v4020_v49  ;;  %v1220_v54 = vpop.f32.mrf.mxu0  ;;  %v1476_v55 = vpop.f32.mrf.mxu1  ;;  %v2339_v3 = vsel %vm2083_vm5, %v1473_v44, %v2211_v52 }
 0x134   : > { %v2278_v56 = vsel %vm2022_vm3, %v3956_v48, %v2150_v50  ;;  %vm2020_vm6 = vcmp.ge.f32.partialorder %v1220_v54, 0.0  ;;  %v2148_v57 = vmul.f32 0.2, %v1220_v54  ;;  %vm2084_vm7 = vcmp.ge.f32.partialorder %v1476_v55, 0.0 }
 0x135   : > { %v3538_v59 = vpack.c.bf16 %v2278_v56, %v2277_v46  ;;  %v2342_v60 = vsel %vm2086_vm4, %v4020_v49, %v2214_v53  ;;  %v2212_v61 = vmul.f32 0.2, %v1476_v55  ;;  %v3959_v62 = vpop.f32.mrf.mxu0  ;;  %v4023_v63 = vpop.f32.mrf.mxu1 }
 0x136   : > { %v3698_v0 = vpack.c.bf16 %v2342_v60, %v2341_v51  ;;  %v2276_v1 = vsel %vm2020_vm6, %v1220_v54, %v2148_v57  ;;  %vm2025_vm8 = vcmp.ge.f32.partialorder %v3959_v62, 0.0  ;;  %v2153_v2 = vmul.f32 0.2, %v3959_v62 }
 0x137   : > { %3786 = vst [vmem:[%s4321_s8 + $0x88] sm:$0xff] %v3538_v59   ;;  %v3533_v4 = vpack.c.bf16 %v2276_v1, %v2275_v58  ;;  %v2340_v5 = vsel %vm2084_vm7, %v1476_v55, %v2212_v61  ;;  %v2217_v6 = vmul.f32 0.2, %v4023_v63  ;;  %v1233_v7 = vpop.f32.mrf.mxu0  ;;  %v1489_v8 = vpop.f32.mrf.mxu1  ;;  %vm2089_vm9 = vcmp.ge.f32.partialorder %v4023_v63, 0.0 }
 0x138   : > { %3818 = vst [vmem:[%s4321_s8 + $0x188] sm:$0xff] %v3698_v0   ;;  %v3693_v9 = vpack.c.bf16 %v2340_v5, %v2339_v3  ;;  %v2281_v10 = vsel %vm2025_vm8, %v3959_v62, %v2153_v2  ;;  %v2151_v11 = vmul.f32 0.2, %v1233_v7  ;;  %vm2023_vm10 = vcmp.ge.f32.partialorder %v1233_v7, 0.0 }
 0x139   : > { %3785 = vst [vmem:[%s4321_s8 + $0x80] sm:$0xff] %v3533_v4   ;;  %v3960_v12 = vpop.f32.mrf.mxu0  ;;  %v4024_v13 = vpop.f32.mrf.mxu1  ;;  %v2345_v15 = vsel %vm2089_vm9, %v4023_v63, %v2217_v6  ;;  %vm2087_vm13 = vcmp.ge.f32.partialorder %v1489_v8, 0.0  ;;  %v2215_v16 = vmul.f32 0.2, %v1489_v8 }
 0x13a   : > { %3817 = vst [vmem:[%s4321_s8 + $0x180] sm:$0xff] %v3693_v9   ;;  %vm2026_vm11 = vcmp.ge.f32.partialorder %v3960_v12, 0.0  ;;  %v2154_v14 = vmul.f32 0.2, %v3960_v12  ;;  %vm2090_vm12 = vcmp.ge.f32.partialorder %v4024_v13, 0.0  ;;  %v2279_v22 = vsel %vm2023_vm10, %v1233_v7, %v2151_v11 }
 0x13b   : > { %v2218_v17 = vmul.f32 0.2, %v4024_v13  ;;  %v1236_v18 = vpop.f32.mrf.mxu0  ;;  %v1492_v19 = vpop.f32.mrf.mxu1  ;;  %v2343_v31 = vsel %vm2087_vm13, %v1489_v8, %v2215_v16 }
 0x13c   : > { %v2282_v20 = vsel %vm2026_vm11, %v3960_v12, %v2154_v14  ;;  %vm2024_vm14 = vcmp.ge.f32.partialorder %v1236_v18, 0.0  ;;  %v2152_v21 = vmul.f32 0.2, %v1236_v18  ;;  %vm2088_vm15 = vcmp.ge.f32.partialorder %v1492_v19, 0.0 }
 0x13d   : > { %v3548_v23 = vpack.c.bf16 %v2282_v20, %v2281_v10  ;;  %v2346_v24 = vsel %vm2090_vm12, %v4024_v13, %v2218_v17  ;;  %v2216_v25 = vmul.f32 0.2, %v1492_v19  ;;  %v3963_v26 = vpop.f32.mrf.mxu0  ;;  %v4027_v27 = vpop.f32.mrf.mxu1 }
 0x13e   : > { %v3708_v28 = vpack.c.bf16 %v2346_v24, %v2345_v15  ;;  %v2280_v29 = vsel %vm2024_vm14, %v1236_v18, %v2152_v21  ;;  %vm2029_vm0 = vcmp.ge.f32.partialorder %v3963_v26, 0.0  ;;  %v2157_v30 = vmul.f32 0.2, %v3963_v26 }
 0x13f   : > { %3788 = vst [vmem:[%s4321_s8 + $0x98] sm:$0xff] %v3548_v23   ;;  %v3543_v32 = vpack.c.bf16 %v2280_v29, %v2279_v22  ;;  %v2344_v33 = vsel %vm2088_vm15, %v1492_v19, %v2216_v25  ;;  %v2221_v34 = vmul.f32 0.2, %v4027_v27  ;;  %v1249_v35 = vpop.f32.mrf.mxu0  ;;  %v1505_v36 = vpop.f32.mrf.mxu1  ;;  %vm2093_vm1 = vcmp.ge.f32.partialorder %v4027_v27, 0.0 }
 0x140   : > { %3820 = vst [vmem:[%s4321_s8 + $0x198] sm:$0xff] %v3708_v28   ;;  %v3703_v37 = vpack.c.bf16 %v2344_v33, %v2343_v31  ;;  %v2285_v38 = vsel %vm2029_vm0, %v3963_v26, %v2157_v30  ;;  %v2155_v39 = vmul.f32 0.2, %v1249_v35  ;;  %vm2027_vm2 = vcmp.ge.f32.partialorder %v1249_v35, 0.0 }
 0x141   : > { %3787 = vst [vmem:[%s4321_s8 + $0x90] sm:$0xff] %v3543_v32   ;;  %v3964_v40 = vpop.f32.mrf.mxu0  ;;  %v4028_v41 = vpop.f32.mrf.mxu1  ;;  %v2349_v43 = vsel %vm2093_vm1, %v4027_v27, %v2221_v34  ;;  %vm2091_vm5 = vcmp.ge.f32.partialorder %v1505_v36, 0.0  ;;  %v2219_v44 = vmul.f32 0.2, %v1505_v36 }
 0x142   : > { %3819 = vst [vmem:[%s4321_s8 + $0x190] sm:$0xff] %v3703_v37   ;;  %vm2030_vm3 = vcmp.ge.f32.partialorder %v3964_v40, 0.0  ;;  %v2158_v42 = vmul.f32 0.2, %v3964_v40  ;;  %vm2094_vm4 = vcmp.ge.f32.partialorder %v4028_v41, 0.0  ;;  %v2283_v50 = vsel %vm2027_vm2, %v1249_v35, %v2155_v39 }
 0x143   : > { %v2222_v45 = vmul.f32 0.2, %v4028_v41  ;;  %v1252_v46 = vpop.f32.mrf.mxu0  ;;  %v1508_v47 = vpop.f32.mrf.mxu1  ;;  %v2347_v59 = vsel %vm2091_vm5, %v1505_v36, %v2219_v44 }
 0x144   : > { %v2286_v48 = vsel %vm2030_vm3, %v3964_v40, %v2158_v42  ;;  %vm2028_vm6 = vcmp.ge.f32.partialorder %v1252_v46, 0.0  ;;  %v2156_v49 = vmul.f32 0.2, %v1252_v46  ;;  %vm2092_vm7 = vcmp.ge.f32.partialorder %v1508_v47, 0.0 }
 0x145   : > { %v3558_v51 = vpack.c.bf16 %v2286_v48, %v2285_v38  ;;  %v2350_v52 = vsel %vm2094_vm4, %v4028_v41, %v2222_v45  ;;  %v2220_v53 = vmul.f32 0.2, %v1508_v47  ;;  %v3967_v54 = vpop.f32.mrf.mxu0  ;;  %v4031_v55 = vpop.f32.mrf.mxu1 }
 0x146   : > { %v3718_v56 = vpack.c.bf16 %v2350_v52, %v2349_v43  ;;  %v2284_v57 = vsel %vm2028_vm6, %v1252_v46, %v2156_v49  ;;  %vm2033_vm8 = vcmp.ge.f32.partialorder %v3967_v54, 0.0  ;;  %v2161_v58 = vmul.f32 0.2, %v3967_v54 }
 0x147   : > { %3790 = vst [vmem:[%s4321_s8 + $0xa8] sm:$0xff] %v3558_v51   ;;  %v3553_v60 = vpack.c.bf16 %v2284_v57, %v2283_v50  ;;  %v2348_v61 = vsel %vm2092_vm7, %v1508_v47, %v2220_v53  ;;  %v2225_v62 = vmul.f32 0.2, %v4031_v55  ;;  %v1265_v63 = vpop.f32.mrf.mxu0  ;;  %v1521_v0 = vpop.f32.mrf.mxu1  ;;  %vm2097_vm9 = vcmp.ge.f32.partialorder %v4031_v55, 0.0 }
 0x148   : > { %3822 = vst [vmem:[%s4321_s8 + $0x1a8] sm:$0xff] %v3718_v56   ;;  %v3713_v1 = vpack.c.bf16 %v2348_v61, %v2347_v59  ;;  %v2289_v2 = vsel %vm2033_vm8, %v3967_v54, %v2161_v58  ;;  %v2159_v3 = vmul.f32 0.2, %v1265_v63  ;;  %vm2031_vm10 = vcmp.ge.f32.partialorder %v1265_v63, 0.0 }
 0x149   : > { %3789 = vst [vmem:[%s4321_s8 + $0xa0] sm:$0xff] %v3553_v60   ;;  %v3968_v4 = vpop.f32.mrf.mxu0  ;;  %v4032_v5 = vpop.f32.mrf.mxu1  ;;  %v2353_v7 = vsel %vm2097_vm9, %v4031_v55, %v2225_v62  ;;  %vm2095_vm13 = vcmp.ge.f32.partialorder %v1521_v0, 0.0  ;;  %v2223_v8 = vmul.f32 0.2, %v1521_v0 }
 0x14a   : > { %3821 = vst [vmem:[%s4321_s8 + $0x1a0] sm:$0xff] %v3713_v1   ;;  %vm2034_vm11 = vcmp.ge.f32.partialorder %v3968_v4, 0.0  ;;  %v2162_v6 = vmul.f32 0.2, %v3968_v4  ;;  %vm2098_vm12 = vcmp.ge.f32.partialorder %v4032_v5, 0.0  ;;  %v2287_v14 = vsel %vm2031_vm10, %v1265_v63, %v2159_v3 }
 0x14b   : > { %v2226_v9 = vmul.f32 0.2, %v4032_v5  ;;  %v1268_v10 = vpop.f32.mrf.mxu0  ;;  %v1524_v11 = vpop.f32.mrf.mxu1  ;;  %v2351_v23 = vsel %vm2095_vm13, %v1521_v0, %v2223_v8 }
 0x14c   : > { %v2290_v12 = vsel %vm2034_vm11, %v3968_v4, %v2162_v6  ;;  %vm2032_vm14 = vcmp.ge.f32.partialorder %v1268_v10, 0.0  ;;  %v2160_v13 = vmul.f32 0.2, %v1268_v10  ;;  %vm2096_vm15 = vcmp.ge.f32.partialorder %v1524_v11, 0.0 }
 0x14d   : > { %v3568_v15 = vpack.c.bf16 %v2290_v12, %v2289_v2  ;;  %v2354_v16 = vsel %vm2098_vm12, %v4032_v5, %v2226_v9  ;;  %v2224_v17 = vmul.f32 0.2, %v1524_v11  ;;  %v3971_v18 = vpop.f32.mrf.mxu0  ;;  %v4035_v19 = vpop.f32.mrf.mxu1 }
 0x14e   : > { %v3728_v20 = vpack.c.bf16 %v2354_v16, %v2353_v7  ;;  %v2288_v21 = vsel %vm2032_vm14, %v1268_v10, %v2160_v13  ;;  %vm2037_vm0 = vcmp.ge.f32.partialorder %v3971_v18, 0.0  ;;  %v2165_v22 = vmul.f32 0.2, %v3971_v18 }
 0x14f   : > { %3792 = vst [vmem:[%s4321_s8 + $0xb8] sm:$0xff] %v3568_v15   ;;  %v3563_v24 = vpack.c.bf16 %v2288_v21, %v2287_v14  ;;  %v2352_v25 = vsel %vm2096_vm15, %v1524_v11, %v2224_v17  ;;  %v2229_v26 = vmul.f32 0.2, %v4035_v19  ;;  %v1281_v27 = vpop.f32.mrf.mxu0  ;;  %v1537_v28 = vpop.f32.mrf.mxu1  ;;  %vm2101_vm1 = vcmp.ge.f32.partialorder %v4035_v19, 0.0 }
 0x150   : > { %3824 = vst [vmem:[%s4321_s8 + $0x1b8] sm:$0xff] %v3728_v20   ;;  %v3723_v29 = vpack.c.bf16 %v2352_v25, %v2351_v23  ;;  %v2293_v30 = vsel %vm2037_vm0, %v3971_v18, %v2165_v22  ;;  %v2163_v31 = vmul.f32 0.2, %v1281_v27  ;;  %vm2035_vm2 = vcmp.ge.f32.partialorder %v1281_v27, 0.0 }
 0x151   : > { %3791 = vst [vmem:[%s4321_s8 + $0xb0] sm:$0xff] %v3563_v24   ;;  %v3972_v32 = vpop.f32.mrf.mxu0  ;;  %v4036_v33 = vpop.f32.mrf.mxu1  ;;  %v2357_v35 = vsel %vm2101_vm1, %v4035_v19, %v2229_v26  ;;  %vm2099_vm5 = vcmp.ge.f32.partialorder %v1537_v28, 0.0  ;;  %v2227_v36 = vmul.f32 0.2, %v1537_v28 }
 0x152   : > { %3823 = vst [vmem:[%s4321_s8 + $0x1b0] sm:$0xff] %v3723_v29   ;;  %vm2038_vm3 = vcmp.ge.f32.partialorder %v3972_v32, 0.0  ;;  %v2166_v34 = vmul.f32 0.2, %v3972_v32  ;;  %vm2102_vm4 = vcmp.ge.f32.partialorder %v4036_v33, 0.0  ;;  %v2291_v42 = vsel %vm2035_vm2, %v1281_v27, %v2163_v31 }
 0x153   : > { %v2230_v37 = vmul.f32 0.2, %v4036_v33  ;;  %v1284_v38 = vpop.f32.mrf.mxu0  ;;  %v1540_v39 = vpop.f32.mrf.mxu1  ;;  %v2355_v51 = vsel %vm2099_vm5, %v1537_v28, %v2227_v36 }
 0x154   : > { %v2294_v40 = vsel %vm2038_vm3, %v3972_v32, %v2166_v34  ;;  %vm2036_vm6 = vcmp.ge.f32.partialorder %v1284_v38, 0.0  ;;  %v2164_v41 = vmul.f32 0.2, %v1284_v38  ;;  %vm2100_vm7 = vcmp.ge.f32.partialorder %v1540_v39, 0.0 }
 0x155   : > { %v3578_v43 = vpack.c.bf16 %v2294_v40, %v2293_v30  ;;  %v2358_v44 = vsel %vm2102_vm4, %v4036_v33, %v2230_v37  ;;  %v2228_v45 = vmul.f32 0.2, %v1540_v39  ;;  %v3975_v46 = vpop.f32.mrf.mxu0  ;;  %v4039_v47 = vpop.f32.mrf.mxu1 }
 0x156   : > { %v3738_v48 = vpack.c.bf16 %v2358_v44, %v2357_v35  ;;  %v2292_v49 = vsel %vm2036_vm6, %v1284_v38, %v2164_v41  ;;  %vm2041_vm8 = vcmp.ge.f32.partialorder %v3975_v46, 0.0  ;;  %v2169_v50 = vmul.f32 0.2, %v3975_v46 }
 0x157   : > { %3794 = vst [vmem:[%s4321_s8 + $0xc8] sm:$0xff] %v3578_v43   ;;  %v3573_v52 = vpack.c.bf16 %v2292_v49, %v2291_v42  ;;  %v2356_v53 = vsel %vm2100_vm7, %v1540_v39, %v2228_v45  ;;  %v2233_v54 = vmul.f32 0.2, %v4039_v47  ;;  %v1297_v55 = vpop.f32.mrf.mxu0  ;;  %v1553_v56 = vpop.f32.mrf.mxu1  ;;  %vm2105_vm9 = vcmp.ge.f32.partialorder %v4039_v47, 0.0 }
 0x158   : > { %3826 = vst [vmem:[%s4321_s8 + $0x1c8] sm:$0xff] %v3738_v48   ;;  %v3733_v57 = vpack.c.bf16 %v2356_v53, %v2355_v51  ;;  %v2297_v58 = vsel %vm2041_vm8, %v3975_v46, %v2169_v50  ;;  %v2167_v59 = vmul.f32 0.2, %v1297_v55  ;;  %vm2039_vm10 = vcmp.ge.f32.partialorder %v1297_v55, 0.0 }
 0x159   : > { %3793 = vst [vmem:[%s4321_s8 + $0xc0] sm:$0xff] %v3573_v52   ;;  %v3976_v60 = vpop.f32.mrf.mxu0  ;;  %v4040_v61 = vpop.f32.mrf.mxu1  ;;  %v2361_v63 = vsel %vm2105_vm9, %v4039_v47, %v2233_v54  ;;  %vm2103_vm13 = vcmp.ge.f32.partialorder %v1553_v56, 0.0  ;;  %v2231_v0 = vmul.f32 0.2, %v1553_v56 }
 0x15a   : > { %3825 = vst [vmem:[%s4321_s8 + $0x1c0] sm:$0xff] %v3733_v57   ;;  %vm2042_vm11 = vcmp.ge.f32.partialorder %v3976_v60, 0.0  ;;  %v2170_v62 = vmul.f32 0.2, %v3976_v60  ;;  %vm2106_vm12 = vcmp.ge.f32.partialorder %v4040_v61, 0.0  ;;  %v2295_v6 = vsel %vm2039_vm10, %v1297_v55, %v2167_v59 }
 0x15b   : > { %v2234_v1 = vmul.f32 0.2, %v4040_v61  ;;  %v1300_v2 = vpop.f32.mrf.mxu0  ;;  %v1556_v3 = vpop.f32.mrf.mxu1  ;;  %v2359_v15 = vsel %vm2103_vm13, %v1553_v56, %v2231_v0 }
 0x15c   : > { %v2298_v4 = vsel %vm2042_vm11, %v3976_v60, %v2170_v62  ;;  %vm2040_vm14 = vcmp.ge.f32.partialorder %v1300_v2, 0.0  ;;  %v2168_v5 = vmul.f32 0.2, %v1300_v2  ;;  %vm2104_vm15 = vcmp.ge.f32.partialorder %v1556_v3, 0.0 }
 0x15d   : > { %v3588_v7 = vpack.c.bf16 %v2298_v4, %v2297_v58  ;;  %v2362_v8 = vsel %vm2106_vm12, %v4040_v61, %v2234_v1  ;;  %v2232_v9 = vmul.f32 0.2, %v1556_v3  ;;  %v3979_v10 = vpop.f32.mrf.mxu0  ;;  %v4043_v11 = vpop.f32.mrf.mxu1 }
 0x15e   : > { %v3748_v12 = vpack.c.bf16 %v2362_v8, %v2361_v63  ;;  %v2296_v13 = vsel %vm2040_vm14, %v1300_v2, %v2168_v5  ;;  %vm2045_vm0 = vcmp.ge.f32.partialorder %v3979_v10, 0.0  ;;  %v2173_v14 = vmul.f32 0.2, %v3979_v10 }
 0x15f   : > { %3796 = vst [vmem:[%s4321_s8 + $0xd8] sm:$0xff] %v3588_v7   ;;  %v3583_v16 = vpack.c.bf16 %v2296_v13, %v2295_v6  ;;  %v2360_v17 = vsel %vm2104_vm15, %v1556_v3, %v2232_v9  ;;  %v2237_v18 = vmul.f32 0.2, %v4043_v11  ;;  %v1313_v19 = vpop.f32.mrf.mxu0  ;;  %v1569_v20 = vpop.f32.mrf.mxu1  ;;  %vm2109_vm1 = vcmp.ge.f32.partialorder %v4043_v11, 0.0 }
 0x160   : > { %3828 = vst [vmem:[%s4321_s8 + $0x1d8] sm:$0xff] %v3748_v12   ;;  %v3743_v21 = vpack.c.bf16 %v2360_v17, %v2359_v15  ;;  %v2301_v22 = vsel %vm2045_vm0, %v3979_v10, %v2173_v14  ;;  %v2171_v23 = vmul.f32 0.2, %v1313_v19  ;;  %vm2043_vm2 = vcmp.ge.f32.partialorder %v1313_v19, 0.0 }
 0x161   : > { %3795 = vst [vmem:[%s4321_s8 + $0xd0] sm:$0xff] %v3583_v16   ;;  %v3980_v24 = vpop.f32.mrf.mxu0  ;;  %v4044_v25 = vpop.f32.mrf.mxu1  ;;  %v2365_v27 = vsel %vm2109_vm1, %v4043_v11, %v2237_v18  ;;  %vm2107_vm5 = vcmp.ge.f32.partialorder %v1569_v20, 0.0  ;;  %v2235_v28 = vmul.f32 0.2, %v1569_v20 }
 0x162   : > { %3827 = vst [vmem:[%s4321_s8 + $0x1d0] sm:$0xff] %v3743_v21   ;;  %vm2046_vm3 = vcmp.ge.f32.partialorder %v3980_v24, 0.0  ;;  %v2174_v26 = vmul.f32 0.2, %v3980_v24  ;;  %vm2110_vm4 = vcmp.ge.f32.partialorder %v4044_v25, 0.0  ;;  %v2299_v34 = vsel %vm2043_vm2, %v1313_v19, %v2171_v23 }
 0x163   : > { %v2238_v29 = vmul.f32 0.2, %v4044_v25  ;;  %v1316_v30 = vpop.f32.mrf.mxu0  ;;  %v1572_v31 = vpop.f32.mrf.mxu1  ;;  %v2363_v43 = vsel %vm2107_vm5, %v1569_v20, %v2235_v28 }
 0x164   : > { %v2302_v32 = vsel %vm2046_vm3, %v3980_v24, %v2174_v26  ;;  %vm2044_vm6 = vcmp.ge.f32.partialorder %v1316_v30, 0.0  ;;  %v2172_v33 = vmul.f32 0.2, %v1316_v30  ;;  %vm2108_vm7 = vcmp.ge.f32.partialorder %v1572_v31, 0.0 }
 0x165   : > { %v3598_v35 = vpack.c.bf16 %v2302_v32, %v2301_v22  ;;  %v2366_v36 = vsel %vm2110_vm4, %v4044_v25, %v2238_v29  ;;  %v2236_v37 = vmul.f32 0.2, %v1572_v31  ;;  %v3983_v38 = vpop.f32.mrf.mxu0  ;;  %v4047_v39 = vpop.f32.mrf.mxu1 }
 0x166   : > { %v3758_v40 = vpack.c.bf16 %v2366_v36, %v2365_v27  ;;  %v2300_v41 = vsel %vm2044_vm6, %v1316_v30, %v2172_v33  ;;  %vm2049_vm8 = vcmp.ge.f32.partialorder %v3983_v38, 0.0  ;;  %v2177_v42 = vmul.f32 0.2, %v3983_v38 }
 0x167   : > { %3798 = vst [vmem:[%s4321_s8 + $0xe8] sm:$0xff] %v3598_v35   ;;  %v3593_v44 = vpack.c.bf16 %v2300_v41, %v2299_v34  ;;  %v2364_v45 = vsel %vm2108_vm7, %v1572_v31, %v2236_v37  ;;  %v1329_v46 = vpop.f32.mrf.mxu0  ;;  %v1585_v47 = vpop.f32.mrf.mxu1  ;;  %vm2113_vm9 = vcmp.ge.f32.partialorder %v4047_v39, 0.0  ;;  %v2241_v50 = vmul.f32 0.2, %v4047_v39 }
 0x168   : > { %3830 = vst [vmem:[%s4321_s8 + $0x1e8] sm:$0xff] %v3758_v40   ;;  %v3753_v48 = vpack.c.bf16 %v2364_v45, %v2363_v43  ;;  %v2305_v49 = vsel %vm2049_vm8, %v3983_v38, %v2177_v42  ;;  %v2175_v53 = vmul.f32 0.2, %v1329_v46  ;;  %vm2047_vm12 = vcmp.ge.f32.partialorder %v1329_v46, 0.0 }
 0x169   : > { %3797 = vst [vmem:[%s4321_s8 + $0xe0] sm:$0xff] %v3593_v44   ;;  %v3984_v51 = vpop.f32.mrf.mxu0  ;;  %v4048_v52 = vpop.f32.mrf.mxu1  ;;  %vm2111_vm13 = vcmp.ge.f32.partialorder %v1585_v47, 0.0  ;;  %v2239_v55 = vmul.f32 0.2, %v1585_v47  ;;  %v2369_v61 = vsel %vm2113_vm9, %v4047_v39, %v2241_v50 }
 0x16a   : > { %3829 = vst [vmem:[%s4321_s8 + $0x1e0] sm:$0xff] %v3753_v48   ;;  %vm2050_vm10 = vcmp.ge.f32.partialorder %v3984_v51, 0.0  ;;  %v2178_v54 = vmul.f32 0.2, %v3984_v51  ;;  %vm2114_vm11 = vcmp.ge.f32.partialorder %v4048_v52, 0.0  ;;  %v2303_v1 = vsel %vm2047_vm12, %v1329_v46, %v2175_v53 }
 0x16b   : > { %v2242_v56 = vmul.f32 0.2, %v4048_v52  ;;  %v1332_v57 = vpop.f32.mrf.mxu0  ;;  %v1588_v58 = vpop.f32.mrf.mxu1  ;;  %v2367_v4 = vsel %vm2111_vm13, %v1585_v47, %v2239_v55 }
 0x16c   : > { %v2306_v59 = vsel %vm2050_vm10, %v3984_v51, %v2178_v54  ;;  %vm2048_vm14 = vcmp.ge.f32.partialorder %v1332_v57, 0.0  ;;  %v2176_v60 = vmul.f32 0.2, %v1332_v57  ;;  %vm2112_vm15 = vcmp.ge.f32.partialorder %v1588_v58, 0.0 }
 0x16d   : > { %v3608_v62 = vpack.c.bf16 %v2306_v59, %v2305_v49  ;;  %v2370_v63 = vsel %vm2114_vm11, %v4048_v52, %v2242_v56  ;;  %v2240_v0 = vmul.f32 0.2, %v1588_v58 }
 0x16e   : > { %v3768_v2 = vpack.c.bf16 %v2370_v63, %v2369_v61  ;;  %v2304_v3 = vsel %vm2048_vm14, %v1332_v57, %v2176_v60 }
 0x16f   : > { %3800 = vst [vmem:[%s4321_s8 + $0xf8] sm:$0xff] %v3608_v62   ;;  %v3603_v5 = vpack.c.bf16 %v2304_v3, %v2303_v1  ;;  %v2368_v6 = vsel %vm2112_vm15, %v1588_v58, %v2240_v0 }
 0x170   : > { %3832 = vst [vmem:[%s4321_s8 + $0x1f8] sm:$0xff] %v3768_v2   ;;  %v3763_v7 = vpack.c.bf16 %v2368_v6, %v2367_v4 }
 0x171   : > { %3799 = vst [vmem:[%s4321_s8 + $0xf0] sm:$0xff] %v3603_v5  }
 0x172   : > { %3831 = vst [vmem:[%s4321_s8 + $0x1f0] sm:$0xff] %v3763_v7  }
 0x173 PF: > { %s12_s11 = sadd.s32 1, %s4183_s11   ;;  %s4416_s9 = smov %s4179_s10 }
 0x174   : > { %p9_p5 = scmp.ge.s32.totalorder %s12_s11, 4   ;;  %s4417_s10 = smov %s4419_s12 }
 0x176   :  { %11 = sbr.rel (!%p9_p5) target bundleno = 2 (0x2), region = 69 }

// kernel: _lambda_.6
= control target key start
LH: loop header
LB: loop body
LE: loop exit
PB: predicated region body
PF: predicated region fallthrough
CT: control target
= control target key end

     0   :  { %s3847_s9 = smov 0   ;;  %s3849_s10 = smov 0   ;;  %s4552_s0 = inlined_call_operand.vmem [shape: bf16[512,1024], index: 0, kind: input, shape index: {}]   ;;  %s4553_s1 = inlined_call_operand.vmem [shape: bf16[1024,128], index: 1, kind: input, shape index: {}]   ;;  %s4554_s2 = inlined_call_operand.vmem [shape: bf16[512,128], index: 2, kind: output, shape index: {}]  }
   0x1   :  { %s3851_s11 = smov 0   ;;  %s3853_s12 = smov 0  }
   0x2   :  { %s3855_s13 = smov 0  }
   0x3 LB: > { %s24_s14 = sadd.s32 1, %s3824_s12  ;;  %p47_p1 = scmp.ne.s32.totalorder %s3816_s10, %s3812_s9  ;;  %s3828_s13 = sphi %s3855_s13, %s12_s13   ;;  %s3824_s12 = sphi %s3853_s12, %s4558_s12   ;;  %s3820_s11 = sphi %s3851_s11, %s4557_s11   ;;  %s3816_s10 = sphi %s3849_s10, %s4556_s10   ;;  %s3812_s9 = sphi %s3847_s9, %s4555_s9  }
   0x4   : > { %p25_p0 = scmp.ge.s32.totalorder %s24_s14, 2  ;;  %p48_p2 = scmp.eq.s32.totalorder %s3828_s13, 0 }
   0x5   : > { %s40_s16 = sadd.s32 1, %s3816_s10  ;;  %p3030_p5 = scmp.ge.s32.totalorder %s3828_s13, 2 }
   0x6   : > { %s4560_s14 = smov (%p25_p0, %s24_s14), 0  ;;  %p49_p3 = por %p48_p2, %p47_p1 }
   0x7   : > { %s36_s15 = ssub.s32 %s3824_s12, %s4560_s14  ;;  %129 = sbr.rel (%p3030_p5) target bundleno = 80 (0x50), region = 16 }
   0x8   : > { %p38_p4 = scmp.eq.s32.totalorder %s36_s15, 0 }
   0xa   : > { %s3882_s17 = scalar_select %p38_p4, %s3816_s10, %s40_s16  }
   0xc   : > { %132 = sbr.rel (!%p49_p3) target bundleno = 80 (0x50), region = 20  ;;  %s134_s18 = sand.u32 (%p49_p3), 1, %s3816_s10  }
   0xd   : > { %s3268_s19 = sshll.u32 (%p49_p3), %s3824_s12, 4  ;;  %s3031_s20 = sshll.u32 (%p49_p3), %s134_s18, 10 }
   0xe   : > { %s3890_s23 = scalar_lea.vmem (%p49_p3), %s4552_s0, %s3268_s19  ;;  %s3895_s24 = scalar_lea.vmem (%p49_p3), [#allocation3], %s3031_s20 }
   0xf   : > { %v155_v0 = vld [vmem:[%s3890_s23] sm:$0xff] (%p49_p3)  ;;  %v157_v1 = vld [vmem:[%s3890_s23 + $0x8] sm:$0xff] (%p49_p3) }
  0x10   : > { %v159_v2 = vld [vmem:[%s3890_s23 + $0x20] sm:$0xff] (%p49_p3)  ;;  %156 = vst [vmem:[%s3895_s24] sm:$0xff] (%p49_p3), %v155_v0  ;;  %158 = vst [vmem:[%s3895_s24 + $0x8] sm:$0xff] (%p49_p3), %v157_v1  ;;  %v161_v3 = vld [vmem:[%s3890_s23 + $0x28] sm:$0xff] (%p49_p3) }
  0x11   : > { %160 = vst [vmem:[%s3895_s24 + $0x10] sm:$0xff] %v159_v2  ;;  %v163_v4 = vld [vmem:[%s3890_s23 + $0x40] sm:$0xff]  ;;  %v165_v5 = vld [vmem:[%s3890_s23 + $0x48] sm:$0xff]  ;;  %162 = vst [vmem:[%s3895_s24 + $0x18] sm:$0xff] %v161_v3 }
  0x12   : > { %164 = vst [vmem:[%s3895_s24 + $0x20] sm:$0xff] %v163_v4  ;;  %166 = vst [vmem:[%s3895_s24 + $0x28] sm:$0xff] %v165_v5  ;;  %v167_v6 = vld [vmem:[%s3890_s23 + $0x60] sm:$0xff]  ;;  %v169_v7 = vld [vmem:[%s3890_s23 + $0x68] sm:$0xff] }
  0x13   : > { %v171_v8 = vld [vmem:[%s3890_s23 + $0x80] sm:$0xff]  ;;  %168 = vst [vmem:[%s3895_s24 + $0x30] sm:$0xff] %v167_v6  ;;  %170 = vst [vmem:[%s3895_s24 + $0x38] sm:$0xff] %v169_v7  ;;  %v173_v9 = vld [vmem:[%s3890_s23 + $0x88] sm:$0xff] }
  0x14   : > { %172 = vst [vmem:[%s3895_s24 + $0x40] sm:$0xff] %v171_v8  ;;  %v175_v10 = vld [vmem:[%s3890_s23 + $0xa0] sm:$0xff]  ;;  %v177_v11 = vld [vmem:[%s3890_s23 + $0xa8] sm:$0xff]  ;;  %174 = vst [vmem:[%s3895_s24 + $0x48] sm:$0xff] %v173_v9 }
  0x15   : > { %176 = vst [vmem:[%s3895_s24 + $0x50] sm:$0xff] %v175_v10  ;;  %178 = vst [vmem:[%s3895_s24 + $0x58] sm:$0xff] %v177_v11  ;;  %v179_v12 = vld [vmem:[%s3890_s23 + $0xc0] sm:$0xff]  ;;  %v181_v13 = vld [vmem:[%s3890_s23 + $0xc8] sm:$0xff] }
  0x16   : > { %v183_v14 = vld [vmem:[%s3890_s23 + $0xe0] sm:$0xff]  ;;  %180 = vst [vmem:[%s3895_s24 + $0x60] sm:$0xff] %v179_v12  ;;  %182 = vst [vmem:[%s3895_s24 + $0x68] sm:$0xff] %v181_v13  ;;  %v185_v15 = vld [vmem:[%s3890_s23 + $0xe8] sm:$0xff] }
  0x17   : > { %184 = vst [vmem:[%s3895_s24 + $0x70] sm:$0xff] %v183_v14  ;;  %v187_v16 = vld [vmem:[%s3890_s23 + $0x100] sm:$0xff]  ;;  %v189_v17 = vld [vmem:[%s3890_s23 + $0x108] sm:$0xff]  ;;  %186 = vst [vmem:[%s3895_s24 + $0x78] sm:$0xff] %v185_v15 }
  0x18   : > { %188 = vst [vmem:[%s3895_s24 + $0x80] sm:$0xff] %v187_v16  ;;  %190 = vst [vmem:[%s3895_s24 + $0x88] sm:$0xff] %v189_v17  ;;  %v191_v18 = vld [vmem:[%s3890_s23 + $0x120] sm:$0xff]  ;;  %v193_v19 = vld [vmem:[%s3890_s23 + $0x128] sm:$0xff] }
  0x19   : > { %v195_v20 = vld [vmem:[%s3890_s23 + $0x140] sm:$0xff]  ;;  %192 = vst [vmem:[%s3895_s24 + $0x90] sm:$0xff] %v191_v18  ;;  %194 = vst [vmem:[%s3895_s24 + $0x98] sm:$0xff] %v193_v19  ;;  %v197_v21 = vld [vmem:[%s3890_s23 + $0x148] sm:$0xff] }
  0x1a   : > { %196 = vst [vmem:[%s3895_s24 + $0xa0] sm:$0xff] %v195_v20  ;;  %v199_v22 = vld [vmem:[%s3890_s23 + $0x160] sm:$0xff]  ;;  %v201_v23 = vld [vmem:[%s3890_s23 + $0x168] sm:$0xff]  ;;  %198 = vst [vmem:[%s3895_s24 + $0xa8] sm:$0xff] %v197_v21 }
  0x1b   : > { %200 = vst [vmem:[%s3895_s24 + $0xb0] sm:$0xff] %v199_v22  ;;  %202 = vst [vmem:[%s3895_s24 + $0xb8] sm:$0xff] %v201_v23  ;;  %v203_v24 = vld [vmem:[%s3890_s23 + $0x180] sm:$0xff]  ;;  %v205_v25 = vld [vmem:[%s3890_s23 + $0x188] sm:$0xff] }
  0x1c   : > { %v207_v26 = vld [vmem:[%s3890_s23 + $0x1a0] sm:$0xff]  ;;  %204 = vst [vmem:[%s3895_s24 + $0xc0] sm:$0xff] %v203_v24  ;;  %206 = vst [vmem:[%s3895_s24 + $0xc8] sm:$0xff] %v205_v25  ;;  %v209_v27 = vld [vmem:[%s3890_s23 + $0x1a8] sm:$0xff] }
  0x1d   : > { %208 = vst [vmem:[%s3895_s24 + $0xd0] sm:$0xff] %v207_v26  ;;  %v211_v28 = vld [vmem:[%s3890_s23 + $0x1c0] sm:$0xff]  ;;  %v213_v29 = vld [vmem:[%s3890_s23 + $0x1c8] sm:$0xff]  ;;  %210 = vst [vmem:[%s3895_s24 + $0xd8] sm:$0xff] %v209_v27 }
  0x1e   : > { %212 = vst [vmem:[%s3895_s24 + $0xe0] sm:$0xff] %v211_v28  ;;  %214 = vst [vmem:[%s3895_s24 + $0xe8] sm:$0xff] %v213_v29  ;;  %v215_v30 = vld [vmem:[%s3890_s23 + $0x1e0] sm:$0xff]  ;;  %v217_v31 = vld [vmem:[%s3890_s23 + $0x1e8] sm:$0xff] }
  0x1f   : > { %v219_v32 = vld [vmem:[%s3890_s23 + $0x200] sm:$0xff]  ;;  %216 = vst [vmem:[%s3895_s24 + $0xf0] sm:$0xff] %v215_v30  ;;  %218 = vst [vmem:[%s3895_s24 + $0xf8] sm:$0xff] %v217_v31  ;;  %v221_v33 = vld [vmem:[%s3890_s23 + $0x208] sm:$0xff] }
  0x20   : > { %220 = vst [vmem:[%s3895_s24 + $0x100] sm:$0xff] %v219_v32  ;;  %v223_v34 = vld [vmem:[%s3890_s23 + $0x220] sm:$0xff]  ;;  %v225_v35 = vld [vmem:[%s3890_s23 + $0x228] sm:$0xff]  ;;  %222 = vst [vmem:[%s3895_s24 + $0x108] sm:$0xff] %v221_v33 }
  0x21   : > { %224 = vst [vmem:[%s3895_s24 + $0x110] sm:$0xff] %v223_v34  ;;  %226 = vst [vmem:[%s3895_s24 + $0x118] sm:$0xff] %v225_v35  ;;  %v227_v36 = vld [vmem:[%s3890_s23 + $0x240] sm:$0xff]  ;;  %v229_v37 = vld [vmem:[%s3890_s23 + $0x248] sm:$0xff] }
  0x22   : > { %v231_v38 = vld [vmem:[%s3890_s23 + $0x260] sm:$0xff]  ;;  %228 = vst [vmem:[%s3895_s24 + $0x120] sm:$0xff] %v227_v36  ;;  %230 = vst [vmem:[%s3895_s24 + $0x128] sm:$0xff] %v229_v37  ;;  %v233_v39 = vld [vmem:[%s3890_s23 + $0x268] sm:$0xff] }
  0x23   : > { %232 = vst [vmem:[%s3895_s24 + $0x130] sm:$0xff] %v231_v38  ;;  %v235_v40 = vld [vmem:[%s3890_s23 + $0x280] sm:$0xff]  ;;  %v237_v41 = vld [vmem:[%s3890_s23 + $0x288] sm:$0xff]  ;;  %234 = vst [vmem:[%s3895_s24 + $0x138] sm:$0xff] %v233_v39 }
  0x24   : > { %236 = vst [vmem:[%s3895_s24 + $0x140] sm:$0xff] %v235_v40  ;;  %238 = vst [vmem:[%s3895_s24 + $0x148] sm:$0xff] %v237_v41  ;;  %v239_v42 = vld [vmem:[%s3890_s23 + $0x2a0] sm:$0xff]  ;;  %v241_v43 = vld [vmem:[%s3890_s23 + $0x2a8] sm:$0xff] }
  0x25   : > { %v243_v44 = vld [vmem:[%s3890_s23 + $0x2c0] sm:$0xff]  ;;  %240 = vst [vmem:[%s3895_s24 + $0x150] sm:$0xff] %v239_v42  ;;  %242 = vst [vmem:[%s3895_s24 + $0x158] sm:$0xff] %v241_v43  ;;  %v245_v45 = vld [vmem:[%s3890_s23 + $0x2c8] sm:$0xff] }
  0x26   : > { %244 = vst [vmem:[%s3895_s24 + $0x160] sm:$0xff] %v243_v44  ;;  %v247_v46 = vld [vmem:[%s3890_s23 + $0x2e0] sm:$0xff]  ;;  %v249_v47 = vld [vmem:[%s3890_s23 + $0x2e8] sm:$0xff]  ;;  %246 = vst [vmem:[%s3895_s24 + $0x168] sm:$0xff] %v245_v45 }
  0x27   : > { %248 = vst [vmem:[%s3895_s24 + $0x170] sm:$0xff] %v247_v46  ;;  %250 = vst [vmem:[%s3895_s24 + $0x178] sm:$0xff] %v249_v47  ;;  %v251_v48 = vld [vmem:[%s3890_s23 + $0x300] sm:$0xff]  ;;  %v253_v49 = vld [vmem:[%s3890_s23 + $0x308] sm:$0xff] }
  0x28   : > { %v255_v50 = vld [vmem:[%s3890_s23 + $0x320] sm:$0xff]  ;;  %252 = vst [vmem:[%s3895_s24 + $0x180] sm:$0xff] %v251_v48  ;;  %254 = vst [vmem:[%s3895_s24 + $0x188] sm:$0xff] %v253_v49  ;;  %v257_v51 = vld [vmem:[%s3890_s23 + $0x328] sm:$0xff] }
  0x29   : > { %256 = vst [vmem:[%s3895_s24 + $0x190] sm:$0xff] %v255_v50  ;;  %v259_v52 = vld [vmem:[%s3890_s23 + $0x340] sm:$0xff]  ;;  %v261_v53 = vld [vmem:[%s3890_s23 + $0x348] sm:$0xff]  ;;  %258 = vst [vmem:[%s3895_s24 + $0x198] sm:$0xff] %v257_v51 }
  0x2a   : > { %260 = vst [vmem:[%s3895_s24 + $0x1a0] sm:$0xff] %v259_v52  ;;  %262 = vst [vmem:[%s3895_s24 + $0x1a8] sm:$0xff] %v261_v53  ;;  %v263_v54 = vld [vmem:[%s3890_s23 + $0x360] sm:$0xff]  ;;  %v265_v55 = vld [vmem:[%s3890_s23 + $0x368] sm:$0xff] }
  0x2b   : > { %v267_v56 = vld [vmem:[%s3890_s23 + $0x380] sm:$0xff]  ;;  %264 = vst [vmem:[%s3895_s24 + $0x1b0] sm:$0xff] %v263_v54  ;;  %266 = vst [vmem:[%s3895_s24 + $0x1b8] sm:$0xff] %v265_v55  ;;  %v269_v57 = vld [vmem:[%s3890_s23 + $0x388] sm:$0xff] }
  0x2c   : > { %268 = vst [vmem:[%s3895_s24 + $0x1c0] sm:$0xff] %v267_v56  ;;  %v271_v58 = vld [vmem:[%s3890_s23 + $0x3a0] sm:$0xff]  ;;  %v273_v59 = vld [vmem:[%s3890_s23 + $0x3a8] sm:$0xff]  ;;  %270 = vst [vmem:[%s3895_s24 + $0x1c8] sm:$0xff] %v269_v57 }
  0x2d   : > { %272 = vst [vmem:[%s3895_s24 + $0x1d0] sm:$0xff] %v271_v58  ;;  %274 = vst [vmem:[%s3895_s24 + $0x1d8] sm:$0xff] %v273_v59  ;;  %v275_v60 = vld [vmem:[%s3890_s23 + $0x3c0] sm:$0xff]  ;;  %v277_v61 = vld [vmem:[%s3890_s23 + $0x3c8] sm:$0xff] }
  0x2e   : > { %v279_v62 = vld [vmem:[%s3890_s23 + $0x3e0] sm:$0xff]  ;;  %276 = vst [vmem:[%s3895_s24 + $0x1e0] sm:$0xff] %v275_v60  ;;  %278 = vst [vmem:[%s3895_s24 + $0x1e8] sm:$0xff] %v277_v61  ;;  %v281_v63 = vld [vmem:[%s3890_s23 + $0x3e8] sm:$0xff] }
  0x2f   : > { %280 = vst [vmem:[%s3895_s24 + $0x1f0] sm:$0xff] %v279_v62  ;;  %v283_v0 = vld [vmem:[%s3890_s23 + $0x400] sm:$0xff]  ;;  %v285_v1 = vld [vmem:[%s3890_s23 + $0x408] sm:$0xff]  ;;  %282 = vst [vmem:[%s3895_s24 + $0x1f8] sm:$0xff] %v281_v63 }
  0x30   : > { %284 = vst [vmem:[%s3895_s24 + $0x200] sm:$0xff] %v283_v0  ;;  %286 = vst [vmem:[%s3895_s24 + $0x208] sm:$0xff] %v285_v1  ;;  %v287_v2 = vld [vmem:[%s3890_s23 + $0x420] sm:$0xff]  ;;  %v289_v3 = vld [vmem:[%s3890_s23 + $0x428] sm:$0xff] }
  0x31   : > { %v291_v4 = vld [vmem:[%s3890_s23 + $0x440] sm:$0xff]  ;;  %288 = vst [vmem:[%s3895_s24 + $0x210] sm:$0xff] %v287_v2  ;;  %290 = vst [vmem:[%s3895_s24 + $0x218] sm:$0xff] %v289_v3  ;;  %v293_v5 = vld [vmem:[%s3890_s23 + $0x448] sm:$0xff] }
  0x32   : > { %292 = vst [vmem:[%s3895_s24 + $0x220] sm:$0xff] %v291_v4  ;;  %v295_v6 = vld [vmem:[%s3890_s23 + $0x460] sm:$0xff]  ;;  %v297_v7 = vld [vmem:[%s3890_s23 + $0x468] sm:$0xff]  ;;  %294 = vst [vmem:[%s3895_s24 + $0x228] sm:$0xff] %v293_v5 }
  0x33   : > { %296 = vst [vmem:[%s3895_s24 + $0x230] sm:$0xff] %v295_v6  ;;  %298 = vst [vmem:[%s3895_s24 + $0x238] sm:$0xff] %v297_v7  ;;  %v299_v8 = vld [vmem:[%s3890_s23 + $0x480] sm:$0xff]  ;;  %v301_v9 = vld [vmem:[%s3890_s23 + $0x488] sm:$0xff] }
  0x34   : > { %v303_v10 = vld [vmem:[%s3890_s23 + $0x4a0] sm:$0xff]  ;;  %300 = vst [vmem:[%s3895_s24 + $0x240] sm:$0xff] %v299_v8  ;;  %302 = vst [vmem:[%s3895_s24 + $0x248] sm:$0xff] %v301_v9  ;;  %v305_v11 = vld [vmem:[%s3890_s23 + $0x4a8] sm:$0xff] }
  0x35   : > { %304 = vst [vmem:[%s3895_s24 + $0x250] sm:$0xff] %v303_v10  ;;  %v307_v12 = vld [vmem:[%s3890_s23 + $0x4c0] sm:$0xff]  ;;  %v309_v13 = vld [vmem:[%s3890_s23 + $0x4c8] sm:$0xff]  ;;  %306 = vst [vmem:[%s3895_s24 + $0x258] sm:$0xff] %v305_v11 }
  0x36   : > { %308 = vst [vmem:[%s3895_s24 + $0x260] sm:$0xff] %v307_v12  ;;  %310 = vst [vmem:[%s3895_s24 + $0x268] sm:$0xff] %v309_v13  ;;  %v311_v14 = vld [vmem:[%s3890_s23 + $0x4e0] sm:$0xff]  ;;  %v313_v15 = vld [vmem:[%s3890_s23 + $0x4e8] sm:$0xff] }
  0x37   : > { %v315_v16 = vld [vmem:[%s3890_s23 + $0x500] sm:$0xff]  ;;  %312 = vst [vmem:[%s3895_s24 + $0x270] sm:$0xff] %v311_v14  ;;  %314 = vst [vmem:[%s3895_s24 + $0x278] sm:$0xff] %v313_v15  ;;  %v317_v17 = vld [vmem:[%s3890_s23 + $0x508] sm:$0xff] }
  0x38   : > { %316 = vst [vmem:[%s3895_s24 + $0x280] sm:$0xff] %v315_v16  ;;  %v319_v18 = vld [vmem:[%s3890_s23 + $0x520] sm:$0xff]  ;;  %v321_v19 = vld [vmem:[%s3890_s23 + $0x528] sm:$0xff]  ;;  %318 = vst [vmem:[%s3895_s24 + $0x288] sm:$0xff] %v317_v17 }
  0x39   : > { %320 = vst [vmem:[%s3895_s24 + $0x290] sm:$0xff] %v319_v18  ;;  %322 = vst [vmem:[%s3895_s24 + $0x298] sm:$0xff] %v321_v19  ;;  %v323_v20 = vld [vmem:[%s3890_s23 + $0x540] sm:$0xff]  ;;  %v325_v21 = vld [vmem:[%s3890_s23 + $0x548] sm:$0xff] }
  0x3a   : > { %v327_v22 = vld [vmem:[%s3890_s23 + $0x560] sm:$0xff]  ;;  %324 = vst [vmem:[%s3895_s24 + $0x2a0] sm:$0xff] %v323_v20  ;;  %326 = vst [vmem:[%s3895_s24 + $0x2a8] sm:$0xff] %v325_v21  ;;  %v329_v23 = vld [vmem:[%s3890_s23 + $0x568] sm:$0xff] }
  0x3b   : > { %328 = vst [vmem:[%s3895_s24 + $0x2b0] sm:$0xff] %v327_v22  ;;  %v331_v24 = vld [vmem:[%s3890_s23 + $0x580] sm:$0xff]  ;;  %v333_v25 = vld [vmem:[%s3890_s23 + $0x588] sm:$0xff]  ;;  %330 = vst [vmem:[%s3895_s24 + $0x2b8] sm:$0xff] %v329_v23 }
  0x3c   : > { %332 = vst [vmem:[%s3895_s24 + $0x2c0] sm:$0xff] %v331_v24  ;;  %334 = vst [vmem:[%s3895_s24 + $0x2c8] sm:$0xff] %v333_v25  ;;  %v335_v26 = vld [vmem:[%s3890_s23 + $0x5a0] sm:$0xff]  ;;  %v337_v27 = vld [vmem:[%s3890_s23 + $0x5a8] sm:$0xff] }
  0x3d   : > { %v339_v28 = vld [vmem:[%s3890_s23 + $0x5c0] sm:$0xff]  ;;  %336 = vst [vmem:[%s3895_s24 + $0x2d0] sm:$0xff] %v335_v26  ;;  %338 = vst [vmem:[%s3895_s24 + $0x2d8] sm:$0xff] %v337_v27  ;;  %v341_v29 = vld [vmem:[%s3890_s23 + $0x5c8] sm:$0xff] }
  0x3e   : > { %340 = vst [vmem:[%s3895_s24 + $0x2e0] sm:$0xff] %v339_v28  ;;  %v343_v30 = vld [vmem:[%s3890_s23 + $0x5e0] sm:$0xff]  ;;  %v345_v31 = vld [vmem:[%s3890_s23 + $0x5e8] sm:$0xff]  ;;  %342 = vst [vmem:[%s3895_s24 + $0x2e8] sm:$0xff] %v341_v29 }
  0x3f   : > { %344 = vst [vmem:[%s3895_s24 + $0x2f0] sm:$0xff] %v343_v30  ;;  %346 = vst [vmem:[%s3895_s24 + $0x2f8] sm:$0xff] %v345_v31  ;;  %v347_v32 = vld [vmem:[%s3890_s23 + $0x600] sm:$0xff]  ;;  %v349_v33 = vld [vmem:[%s3890_s23 + $0x608] sm:$0xff] }
  0x40   : > { %v351_v34 = vld [vmem:[%s3890_s23 + $0x620] sm:$0xff]  ;;  %348 = vst [vmem:[%s3895_s24 + $0x300] sm:$0xff] %v347_v32  ;;  %350 = vst [vmem:[%s3895_s24 + $0x308] sm:$0xff] %v349_v33  ;;  %v353_v35 = vld [vmem:[%s3890_s23 + $0x628] sm:$0xff] }
  0x41   : > { %352 = vst [vmem:[%s3895_s24 + $0x310] sm:$0xff] %v351_v34  ;;  %v355_v36 = vld [vmem:[%s3890_s23 + $0x640] sm:$0xff]  ;;  %v357_v37 = vld [vmem:[%s3890_s23 + $0x648] sm:$0xff]  ;;  %354 = vst [vmem:[%s3895_s24 + $0x318] sm:$0xff] %v353_v35 }
  0x42   : > { %356 = vst [vmem:[%s3895_s24 + $0x320] sm:$0xff] %v355_v36  ;;  %358 = vst [vmem:[%s3895_s24 + $0x328] sm:$0xff] %v357_v37  ;;  %v359_v38 = vld [vmem:[%s3890_s23 + $0x660] sm:$0xff]  ;;  %v361_v39 = vld [vmem:[%s3890_s23 + $0x668] sm:$0xff] }
  0x43   : > { %v363_v40 = vld [vmem:[%s3890_s23 + $0x680] sm:$0xff]  ;;  %360 = vst [vmem:[%s3895_s24 + $0x330] sm:$0xff] %v359_v38  ;;  %362 = vst [vmem:[%s3895_s24 + $0x338] sm:$0xff] %v361_v39  ;;  %v365_v41 = vld [vmem:[%s3890_s23 + $0x688] sm:$0xff] }
  0x44   : > { %364 = vst [vmem:[%s3895_s24 + $0x340] sm:$0xff] %v363_v40  ;;  %v367_v42 = vld [vmem:[%s3890_s23 + $0x6a0] sm:$0xff]  ;;  %v369_v43 = vld [vmem:[%s3890_s23 + $0x6a8] sm:$0xff]  ;;  %366 = vst [vmem:[%s3895_s24 + $0x348] sm:$0xff] %v365_v41 }
  0x45   : > { %368 = vst [vmem:[%s3895_s24 + $0x350] sm:$0xff] %v367_v42  ;;  %370 = vst [vmem:[%s3895_s24 + $0x358] sm:$0xff] %v369_v43  ;;  %v371_v44 = vld [vmem:[%s3890_s23 + $0x6c0] sm:$0xff]  ;;  %v373_v45 = vld [vmem:[%s3890_s23 + $0x6c8] sm:$0xff] }
  0x46   : > { %v375_v46 = vld [vmem:[%s3890_s23 + $0x6e0] sm:$0xff]  ;;  %372 = vst [vmem:[%s3895_s24 + $0x360] sm:$0xff] %v371_v44  ;;  %374 = vst [vmem:[%s3895_s24 + $0x368] sm:$0xff] %v373_v45  ;;  %v377_v47 = vld [vmem:[%s3890_s23 + $0x6e8] sm:$0xff] }
  0x47   : > { %376 = vst [vmem:[%s3895_s24 + $0x370] sm:$0xff] %v375_v46  ;;  %v379_v48 = vld [vmem:[%s3890_s23 + $0x700] sm:$0xff]  ;;  %v381_v49 = vld [vmem:[%s3890_s23 + $0x708] sm:$0xff]  ;;  %378 = vst [vmem:[%s3895_s24 + $0x378] sm:$0xff] %v377_v47 }
  0x48   : > { %380 = vst [vmem:[%s3895_s24 + $0x380] sm:$0xff] %v379_v48  ;;  %382 = vst [vmem:[%s3895_s24 + $0x388] sm:$0xff] %v381_v49  ;;  %v383_v50 = vld [vmem:[%s3890_s23 + $0x720] sm:$0xff]  ;;  %v385_v51 = vld [vmem:[%s3890_s23 + $0x728] sm:$0xff] }
  0x49   : > { %v387_v52 = vld [vmem:[%s3890_s23 + $0x740] sm:$0xff]  ;;  %384 = vst [vmem:[%s3895_s24 + $0x390] sm:$0xff] %v383_v50  ;;  %386 = vst [vmem:[%s3895_s24 + $0x398] sm:$0xff] %v385_v51  ;;  %v389_v53 = vld [vmem:[%s3890_s23 + $0x748] sm:$0xff] }
  0x4a   : > { %388 = vst [vmem:[%s3895_s24 + $0x3a0] sm:$0xff] %v387_v52  ;;  %v391_v54 = vld [vmem:[%s3890_s23 + $0x760] sm:$0xff]  ;;  %v393_v55 = vld [vmem:[%s3890_s23 + $0x768] sm:$0xff]  ;;  %390 = vst [vmem:[%s3895_s24 + $0x3a8] sm:$0xff] %v389_v53 }
  0x4b   : > { %392 = vst [vmem:[%s3895_s24 + $0x3b0] sm:$0xff] %v391_v54  ;;  %394 = vst [vmem:[%s3895_s24 + $0x3b8] sm:$0xff] %v393_v55  ;;  %v395_v56 = vld [vmem:[%s3890_s23 + $0x780] sm:$0xff]  ;;  %v397_v57 = vld [vmem:[%s3890_s23 + $0x788] sm:$0xff] }
  0x4c   : > { %v399_v58 = vld [vmem:[%s3890_s23 + $0x7a0] sm:$0xff]  ;;  %396 = vst [vmem:[%s3895_s24 + $0x3c0] sm:$0xff] %v395_v56  ;;  %398 = vst [vmem:[%s3895_s24 + $0x3c8] sm:$0xff] %v397_v57  ;;  %v401_v59 = vld [vmem:[%s3890_s23 + $0x7a8] sm:$0xff] }
  0x4d   : > { %400 = vst [vmem:[%s3895_s24 + $0x3d0] sm:$0xff] %v399_v58  ;;  %v403_v60 = vld [vmem:[%s3890_s23 + $0x7c0] sm:$0xff]  ;;  %v405_v61 = vld [vmem:[%s3890_s23 + $0x7c8] sm:$0xff]  ;;  %402 = vst [vmem:[%s3895_s24 + $0x3d8] sm:$0xff] %v401_v59 }
  0x4e   : > { %404 = vst [vmem:[%s3895_s24 + $0x3e0] sm:$0xff] %v403_v60  ;;  %406 = vst [vmem:[%s3895_s24 + $0x3e8] sm:$0xff] %v405_v61  ;;  %v407_v62 = vld [vmem:[%s3890_s23 + $0x7e0] sm:$0xff]  ;;  %v409_v63 = vld [vmem:[%s3890_s23 + $0x7e8] sm:$0xff] }
  0x4f   : > { %408 = vst [vmem:[%s3895_s24 + $0x3f0] sm:$0xff] %v407_v62  ;;  %410 = vst [vmem:[%s3895_s24 + $0x3f8] sm:$0xff] %v409_v63 }
  0x50 PF: > { %p3034_p6 = scmp.ge.s32.totalorder %s3828_s13, 1  ;;  %p427_p7 = scmp.lt.s32.totalorder %s3828_s13, 3 }
  0x52   : > { %p428_p8 = pnand %p3034_p6, %p427_p7 }
  0x53   : > { %s434_s25 = sand.u32 (!%p428_p8), 1, %s3812_s9   ;;  %s3036_s26 = sshll.u32 (!%p428_p8), %s3820_s11, 6 }
  0x54   : > { %431 = sbr.rel (%p428_p8) target bundleno = 704 (0x2c0), region = 47  ;;  %s3035_s27 = sshll.u32 (!%p428_p8), %s434_s25, 10 }
  0x55   : > { %p469_p9 = scmp.lt.s32.totalorder (!%p428_p8), %s3036_s26, 127  ;;  %s4159_s4 = scalar_lea.vmem (!%p428_p8), [#allocation3], %s3035_s27 }
  0x56   : > { %p3038_p10 = scmp.ne.s32.totalorder (!%p428_p8), %s3820_s11, 0 }
  0x59   : > { %s4562_s26 = smov (!%p469_p9, %s3036_s26), 127  ;;  %490 = sbr.rel (%p3038_p10) target bundleno = 127 (0x7f), region = 55 }
  0x5a   : > { %s3037_s28 = sshll.u32 %s4562_s26, 2 }
  0x5b   : > { %s4157_s3 = scalar_lea.vmem %s4553_s1, %s3037_s28 }
  0x5e   : > { %v3830_v0 = vmov 0.0  }
  0x5f   : > { %491 = vst [vmem:[#allocation2 + $0xb0] sm:$0xff] %v3830_v0  ;;  %492 = vst [vmem:[#allocation2 + $0x1b0] sm:$0xff] %v3830_v0 }
  0x60   : > { %493 = vst [vmem:[#allocation2 + $0xd8] sm:$0xff] %v3830_v0  ;;  %494 = vst [vmem:[#allocation2 + $0x18] sm:$0xff] %v3830_v0 }
  0x61   : > { %495 = vst [vmem:[#allocation2 + $0x50] sm:$0xff] %v3830_v0  ;;  %496 = vst [vmem:[#allocation2 + $0x168] sm:$0xff] %v3830_v0 }
  0x62   : > { %497 = vst [vmem:[#allocation2 + $0x130] sm:$0xff] %v3830_v0  ;;  %498 = vst [vmem:[#allocation2 + $0x48] sm:$0xff] %v3830_v0 }
  0x63   : > { %499 = vst [vmem:[#allocation2 + $0x180] sm:$0xff] %v3830_v0  ;;  %500 = vst [vmem:[#allocation2 + $0x110] sm:$0xff] %v3830_v0 }
  0x64   : > { %501 = vst [vmem:[#allocation2 + $0x118] sm:$0xff] %v3830_v0  ;;  %502 = vst [vmem:[#allocation2 + $0x98] sm:$0xff] %v3830_v0 }
  0x65   : > { %503 = vst [vmem:[#allocation2 + $0x120] sm:$0xff] %v3830_v0  ;;  %504 = vst [vmem:[#allocation2 + $0x150] sm:$0xff] %v3830_v0 }
  0x66   : > { %505 = vst [vmem:[#allocation2 + $0x108] sm:$0xff] %v3830_v0  ;;  %506 = vst [vmem:[#allocation2 + $0x60] sm:$0xff] %v3830_v0 }
  0x67   : > { %507 = vst [vmem:[#allocation2 + $0xe0] sm:$0xff] %v3830_v0  ;;  %508 = vst [vmem:[#allocation2 + $0x188] sm:$0xff] %v3830_v0 }
  0x68   : > { %509 = vst [vmem:[#allocation2 + $0x138] sm:$0xff] %v3830_v0  ;;  %510 = vst [vmem:[#allocation2 + $0x140] sm:$0xff] %v3830_v0 }
  0x69   : > { %511 = vst [vmem:[#allocation2 + $0x80] sm:$0xff] %v3830_v0  ;;  %512 = vst [vmem:[#allocation2 + $0x1a8] sm:$0xff] %v3830_v0 }
  0x6a   : > { %513 = vst [vmem:[#allocation2 + $0x1b8] sm:$0xff] %v3830_v0  ;;  %514 = vst [vmem:[#allocation2 + $0x28] sm:$0xff] %v3830_v0 }
  0x6b   : > { %515 = vst [vmem:[#allocation2 + $0x1e8] sm:$0xff] %v3830_v0  ;;  %516 = vst [vmem:[#allocation2 + $0xf8] sm:$0xff] %v3830_v0 }
  0x6c   : > { %517 = vst [vmem:[#allocation2 + $0x160] sm:$0xff] %v3830_v0  ;;  %518 = vst [vmem:[#allocation2 + $0x30] sm:$0xff] %v3830_v0 }
  0x6d   : > { %519 = vst [vmem:[#allocation2 + $0x1e0] sm:$0xff] %v3830_v0  ;;  %520 = vst [vmem:[#allocation2] sm:$0xff] %v3830_v0 }
  0x6e   : > { %521 = vst [vmem:[#allocation2 + $0xf0] sm:$0xff] %v3830_v0  ;;  %522 = vst [vmem:[#allocation2 + $0x8] sm:$0xff] %v3830_v0 }
  0x6f   : > { %523 = vst [vmem:[#allocation2 + $0x148] sm:$0xff] %v3830_v0  ;;  %524 = vst [vmem:[#allocation2 + $0x1d0] sm:$0xff] %v3830_v0 }
  0x70   : > { %525 = vst [vmem:[#allocation2 + $0x100] sm:$0xff] %v3830_v0  ;;  %526 = vst [vmem:[#allocation2 + $0xc8] sm:$0xff] %v3830_v0 }
  0x71   : > { %527 = vst [vmem:[#allocation2 + $0x40] sm:$0xff] %v3830_v0  ;;  %528 = vst [vmem:[#allocation2 + $0x1f8] sm:$0xff] %v3830_v0 }
  0x72   : > { %529 = vst [vmem:[#allocation2 + $0x20] sm:$0xff] %v3830_v0  ;;  %530 = vst [vmem:[#allocation2 + $0x128] sm:$0xff] %v3830_v0 }
  0x73   : > { %531 = vst [vmem:[#allocation2 + $0x1a0] sm:$0xff] %v3830_v0  ;;  %532 = vst [vmem:[#allocation2 + $0x1f0] sm:$0xff] %v3830_v0 }
  0x74   : > { %533 = vst [vmem:[#allocation2 + $0xe8] sm:$0xff] %v3830_v0  ;;  %534 = vst [vmem:[#allocation2 + $0x78] sm:$0xff] %v3830_v0 }
  0x75   : > { %535 = vst [vmem:[#allocation2 + $0x70] sm:$0xff] %v3830_v0  ;;  %536 = vst [vmem:[#allocation2 + $0x90] sm:$0xff] %v3830_v0 }
  0x76   : > { %537 = vst [vmem:[#allocation2 + $0x1d8] sm:$0xff] %v3830_v0  ;;  %538 = vst [vmem:[#allocation2 + $0xd0] sm:$0xff] %v3830_v0 }
  0x77   : > { %539 = vst [vmem:[#allocation2 + $0xb8] sm:$0xff] %v3830_v0  ;;  %540 = vst [vmem:[#allocation2 + $0x88] sm:$0xff] %v3830_v0 }
  0x78   : > { %541 = vst [vmem:[#allocation2 + $0xa8] sm:$0xff] %v3830_v0  ;;  %542 = vst [vmem:[#allocation2 + $0x1c8] sm:$0xff] %v3830_v0 }
  0x79   : > { %543 = vst [vmem:[#allocation2 + $0x170] sm:$0xff] %v3830_v0  ;;  %544 = vst [vmem:[#allocation2 + $0x178] sm:$0xff] %v3830_v0 }
  0x7a   : > { %545 = vst [vmem:[#allocation2 + $0x68] sm:$0xff] %v3830_v0  ;;  %546 = vst [vmem:[#allocation2 + $0x190] sm:$0xff] %v3830_v0 }
  0x7b   : > { %547 = vst [vmem:[#allocation2 + $0x198] sm:$0xff] %v3830_v0  ;;  %548 = vst [vmem:[#allocation2 + $0x38] sm:$0xff] %v3830_v0 }
  0x7c   : > { %549 = vst [vmem:[#allocation2 + $0xc0] sm:$0xff] %v3830_v0  ;;  %550 = vst [vmem:[#allocation2 + $0x1c0] sm:$0xff] %v3830_v0 }
  0x7d   : > { %551 = vst [vmem:[#allocation2 + $0x158] sm:$0xff] %v3830_v0  ;;  %552 = vst [vmem:[#allocation2 + $0x10] sm:$0xff] %v3830_v0 }
  0x7e   : > { %553 = vst [vmem:[#allocation2 + $0x58] sm:$0xff] %v3830_v0  ;;  %554 = vst [vmem:[#allocation2 + $0xa0] sm:$0xff] %v3830_v0 }
  0x7f PF: > { %v3566_v1 = vld [vmem:[%s4157_s3 + $0x38] sm:$0xff]   ;;  %v3831_v2 = vmov 0   ;;  %v3568_v4 = vld [vmem:[%s4157_s3 + $0x30] sm:$0xff]   ;;  %v3570_v6 = vld [vmem:[%s4157_s3 + $0x28] sm:$0xff]   ;;  %p3199_p11 = scmp.ne.s32.totalorder %s3820_s11, 1 }
  0x80   : > { %1643 = vmatprep.subr.bf16.mxu0 %v3831_v2  ;;  %1932 = vmatprep.subr.bf16.mxu1 %v3831_v2  ;;  %v3567_v3 = vld [vmem:[%s4157_s3 + $0xb8] sm:$0xff]   ;;  %v3569_v5 = vld [vmem:[%s4157_s3 + $0xb0] sm:$0xff]   ;;  %v3571_v7 = vld [vmem:[%s4157_s3 + $0xa8] sm:$0xff]  }
  0x81   : > { %1644 = vmatpush1.bf16.msra.mxu0 %v3566_v1  ;;  %1933 = vmatpush1.bf16.msra.mxu1 %v3567_v3  ;;  %v3572_v8 = vld [vmem:[%s4157_s3 + $0x20] sm:$0xff]   ;;  %v3574_v10 = vld [vmem:[%s4157_s3 + $0x18] sm:$0xff]   ;;  %v3576_v12 = vld [vmem:[%s4157_s3 + $0x10] sm:$0xff]  }
  0x82   : > { %1645 = vmatprep.subr.bf16.mxu0 %v3831_v2  ;;  %1934 = vmatprep.subr.bf16.mxu1 %v3831_v2  ;;  %v3573_v9 = vld [vmem:[%s4157_s3 + $0xa0] sm:$0xff]   ;;  %v3575_v11 = vld [vmem:[%s4157_s3 + $0x98] sm:$0xff]   ;;  %v3577_v13 = vld [vmem:[%s4157_s3 + $0x90] sm:$0xff]  }
  0x83   : > { %v3578_v14 = vld [vmem:[%s4157_s3 + $0x8] sm:$0xff]   ;;  %v3580_v16 = vld [vmem:[%s4157_s3] sm:$0xff]   ;;  %v3582_v18 = vld [vmem:[%s4157_s3 + $0x78] sm:$0xff]  }
  0x84   : > { %v3579_v15 = vld [vmem:[%s4157_s3 + $0x88] sm:$0xff]   ;;  %v3581_v17 = vld [vmem:[%s4157_s3 + $0x80] sm:$0xff]   ;;  %v3583_v19 = vld [vmem:[%s4157_s3 + $0xf8] sm:$0xff]  }
  0x85   : > { %1646 = vmatpush1.bf16.msra.mxu0 %v3568_v4  ;;  %1935 = vmatpush1.bf16.msra.mxu1 %v3569_v5  ;;  %v3600_v20 = vld [vmem:[%s4159_s4 + $0x4] ss:$16 sps:$4 sm:$0xff]   ;;  %v3603_v22 = vld [vmem:[%s4159_s4 + $0xc] ss:$16 sps:$4 sm:$0xff]   ;;  %v3598_v36 = vld [vmem:[%s4159_s4] ss:$16 sps:$4 sm:$0xff]  }
  0x86   : > { %1647 = vmatprep.subr.bf16.mxu0 %v3831_v2  ;;  %1936 = vmatprep.subr.bf16.mxu1 %v3831_v2  ;;  %v3584_v21 = vld [vmem:[%s4157_s3 + $0x70] sm:$0xff]   ;;  %v3586_v24 = vld [vmem:[%s4157_s3 + $0x68] sm:$0xff]   ;;  %v3588_v26 = vld [vmem:[%s4157_s3 + $0x60] sm:$0xff]  }
  0x87   : > { %v3585_v23 = vld [vmem:[%s4157_s3 + $0xf0] sm:$0xff]   ;;  %1675 = vmatprep.mubr.bf16.mxu0 %v3600_v20  ;;  %1964 = vmatprep.mubr.bf16.mxu1 %v3603_v22  ;;  %v3587_v25 = vld [vmem:[%s4157_s3 + $0xe8] sm:$0xff]   ;;  %v3589_v27 = vld [vmem:[%s4157_s3 + $0xe0] sm:$0xff]  }
  0x88   : > { %v3590_v28 = vld [vmem:[%s4157_s3 + $0x58] sm:$0xff]   ;;  %v3592_v30 = vld [vmem:[%s4157_s3 + $0x50] sm:$0xff]   ;;  %v3594_v32 = vld [vmem:[%s4157_s3 + $0x48] sm:$0xff]  }
  0x89   : > { %1648 = vmatpush1.bf16.msra.mxu0 %v3570_v6  ;;  %1937 = vmatpush1.bf16.msra.mxu1 %v3571_v7  ;;  %v3591_v29 = vld [vmem:[%s4157_s3 + $0xd8] sm:$0xff]   ;;  %v3593_v31 = vld [vmem:[%s4157_s3 + $0xd0] sm:$0xff]   ;;  %v3595_v33 = vld [vmem:[%s4157_s3 + $0xc8] sm:$0xff]  }
  0x8a   : > { %1649 = vmatprep.subr.bf16.mxu0 %v3831_v2  ;;  %1938 = vmatprep.subr.bf16.mxu1 %v3831_v2  ;;  %v3596_v34 = vld [vmem:[%s4157_s3 + $0x40] sm:$0xff]   ;;  %v3601_v37 = vld [vmem:[%s4159_s4 + $0x8] ss:$16 sps:$4 sm:$0xff]   ;;  %v3606_v39 = vld [vmem:[%s4159_s4 + $0x2c] ss:$16 sps:$4 sm:$0xff]  }
  0x8b   : > { %v3597_v35 = vld [vmem:[%s4157_s3 + $0xc0] sm:$0xff]   ;;  %v3609_v41 = vld [vmem:[%s4159_s4 + $0x28] ss:$16 sps:$4 sm:$0xff]   ;;  %v3612_v43 = vld [vmem:[%s4159_s4 + $0x4c] ss:$16 sps:$4 sm:$0xff]  }
  0x8c   : > { %v3604_v38 = vld [vmem:[%s4159_s4 + $0x24] ss:$16 sps:$4 sm:$0xff]   ;;  %v3608_v40 = vld [vmem:[%s4159_s4 + $0x20] ss:$16 sps:$4 sm:$0xff]   ;;  %v3615_v45 = vld [vmem:[%s4159_s4 + $0x48] ss:$16 sps:$4 sm:$0xff]  }
  0x8d   : > { %1650 = vmatpush1.bf16.msra.mxu0 %v3572_v8  ;;  %1939 = vmatpush1.bf16.msra.mxu1 %v3573_v9  ;;  %v3610_v42 = vld [vmem:[%s4159_s4 + $0x44] ss:$16 sps:$4 sm:$0xff]   ;;  %v3614_v44 = vld [vmem:[%s4159_s4 + $0x40] ss:$16 sps:$4 sm:$0xff]   ;;  %v3618_v47 = vld [vmem:[%s4159_s4 + $0x6c] ss:$16 sps:$4 sm:$0xff]  }
  0x8e   : > { %1651 = vmatprep.subr.bf16.mxu0 %v3831_v2  ;;  %1940 = vmatprep.subr.bf16.mxu1 %v3831_v2  ;;  %v3616_v46 = vld [vmem:[%s4159_s4 + $0x64] ss:$16 sps:$4 sm:$0xff]   ;;  %v3620_v48 = vld [vmem:[%s4159_s4 + $0x60] ss:$16 sps:$4 sm:$0xff]   ;;  %v3621_v49 = vld [vmem:[%s4159_s4 + $0x68] ss:$16 sps:$4 sm:$0xff]  }
  0x8f   : > { %v3622_v50 = vld [vmem:[%s4159_s4 + $0x84] ss:$16 sps:$4 sm:$0xff]   ;;  %v3624_v51 = vld [vmem:[%s4159_s4 + $0x8c] ss:$16 sps:$4 sm:$0xff]   ;;  %v3626_v52 = vld [vmem:[%s4159_s4 + $0x80] ss:$16 sps:$4 sm:$0xff]  }
  0x90   : > { %v3627_v53 = vld [vmem:[%s4159_s4 + $0x88] ss:$16 sps:$4 sm:$0xff]   ;;  %v3628_v54 = vld [vmem:[%s4159_s4 + $0xa4] ss:$16 sps:$4 sm:$0xff]   ;;  %v3630_v55 = vld [vmem:[%s4159_s4 + $0xac] ss:$16 sps:$4 sm:$0xff]  }
  0x91   : > { %1652 = vmatpush1.bf16.msra.mxu0 %v3574_v10  ;;  %1941 = vmatpush1.bf16.msra.mxu1 %v3575_v11  ;;  %v3632_v56 = vld [vmem:[%s4159_s4 + $0xa0] ss:$16 sps:$4 sm:$0xff]   ;;  %v3633_v57 = vld [vmem:[%s4159_s4 + $0xa8] ss:$16 sps:$4 sm:$0xff]   ;;  %v3634_v58 = vld [vmem:[%s4159_s4 + $0xc4] ss:$16 sps:$4 sm:$0xff]  }
  0x92   : > { %1653 = vmatprep.subr.bf16.mxu0 %v3831_v2  ;;  %1942 = vmatprep.subr.bf16.mxu1 %v3831_v2  ;;  %v3636_v59 = vld [vmem:[%s4159_s4 + $0xcc] ss:$16 sps:$4 sm:$0xff]   ;;  %v3638_v60 = vld [vmem:[%s4159_s4 + $0xc0] ss:$16 sps:$4 sm:$0xff]   ;;  %v3639_v61 = vld [vmem:[%s4159_s4 + $0xc8] ss:$16 sps:$4 sm:$0xff]  }
  0x93   : > { %v3640_v62 = vld [vmem:[%s4159_s4 + $0xe4] ss:$16 sps:$4 sm:$0xff]   ;;  %v3642_v63 = vld [vmem:[%s4159_s4 + $0xec] ss:$16 sps:$4 sm:$0xff]   ;;  %v3644_v0 = vld [vmem:[%s4159_s4 + $0xe0] ss:$16 sps:$4 sm:$0xff]  }
  0x94   : > { %v3645_v1 = vld [vmem:[%s4159_s4 + $0xe8] ss:$16 sps:$4 sm:$0xff]   ;;  %v3648_v3 = vld [vmem:[%s4159_s4 + $0x10c] ss:$16 sps:$4 sm:$0xff]   ;;  %v3650_v4 = vld [vmem:[%s4159_s4 + $0x100] ss:$16 sps:$4 sm:$0xff]  }
  0x95   : > { %1654 = vmatpush1.bf16.msra.mxu0 %v3576_v12  ;;  %1943 = vmatpush1.bf16.msra.mxu1 %v3577_v13  ;;  %v3651_v5 = vld [vmem:[%s4159_s4 + $0x108] ss:$16 sps:$4 sm:$0xff]   ;;  %v3652_v6 = vld [vmem:[%s4159_s4 + $0x124] ss:$16 sps:$4 sm:$0xff]   ;;  %v3654_v7 = vld [vmem:[%s4159_s4 + $0x12c] ss:$16 sps:$4 sm:$0xff]  }
  0x96   : > { %1655 = vmatprep.subr.bf16.mxu0 %v3831_v2  ;;  %1944 = vmatprep.subr.bf16.mxu1 %v3831_v2  ;;  %v3656_v8 = vld [vmem:[%s4159_s4 + $0x120] ss:$16 sps:$4 sm:$0xff]   ;;  %v3657_v9 = vld [vmem:[%s4159_s4 + $0x128] ss:$16 sps:$4 sm:$0xff]   ;;  %v3658_v10 = vld [vmem:[%s4159_s4 + $0x144] ss:$16 sps:$4 sm:$0xff]  }
  0x97   : > { %v3660_v11 = vld [vmem:[%s4159_s4 + $0x14c] ss:$16 sps:$4 sm:$0xff]   ;;  %v3662_v12 = vld [vmem:[%s4159_s4 + $0x140] ss:$16 sps:$4 sm:$0xff]   ;;  %v3663_v13 = vld [vmem:[%s4159_s4 + $0x148] ss:$16 sps:$4 sm:$0xff]  }
  0x98   : > { %v3674_v20 = vld [vmem:[%s4159_s4 + $0x180] ss:$16 sps:$4 sm:$0xff]   ;;  %v3676_v22 = vld [vmem:[%s4159_s4 + $0x1a4] ss:$16 sps:$4 sm:$0xff]  }
  0x99   : > { %1656 = vmatpush1.bf16.msra.mxu0 %v3578_v14  ;;  %1945 = vmatpush1.bf16.msra.mxu1 %v3579_v15  ;;  %v3664_v14 = vld [vmem:[%s4159_s4 + $0x164] ss:$16 sps:$4 sm:$0xff]   ;;  %v3666_v15 = vld [vmem:[%s4159_s4 + $0x16c] ss:$16 sps:$4 sm:$0xff]  }
  0x9a   : > { %1657 = vmatprep.subr.bf16.mxu0 %v3831_v2  ;;  %1946 = vmatprep.subr.bf16.mxu1 %v3831_v2 }
  0x9d   : > { %1658 = vmatpush1.bf16.msra.mxu0 %v3580_v16  ;;  %1947 = vmatpush1.bf16.msra.mxu1 %v3581_v17  ;;  %v3668_v16 = vld [vmem:[%s4159_s4 + $0x160] ss:$16 sps:$4 sm:$0xff]   ;;  %v3669_v17 = vld [vmem:[%s4159_s4 + $0x168] ss:$16 sps:$4 sm:$0xff]  }
  0x9e   : > { %1659 = vmatprep.subr.bf16.mxu0 %v3831_v2  ;;  %1948 = vmatprep.subr.bf16.mxu1 %v3831_v2 }
  0xa1   : > { %1660 = vmatpush2.bf16.msra.mxu0 %v3582_v18  ;;  %1949 = vmatpush2.bf16.msra.mxu1 %v3583_v19  ;;  %v3670_v18 = vld [vmem:[%s4159_s4 + $0x184] ss:$16 sps:$4 sm:$0xff]   ;;  %v3672_v19 = vld [vmem:[%s4159_s4 + $0x18c] ss:$16 sps:$4 sm:$0xff]  }
  0xa2   : > { %1661 = vmatprep.subr.bf16.mxu0 %v3831_v2  ;;  %1950 = vmatprep.subr.bf16.mxu1 %v3831_v2 }
  0xa5   : > { %1662 = vmatpush2.bf16.msra.mxu0 %v3584_v21  ;;  %1951 = vmatpush2.bf16.msra.mxu1 %v3585_v23  ;;  %v3675_v21 = vld [vmem:[%s4159_s4 + $0x188] ss:$16 sps:$4 sm:$0xff]   ;;  %v3678_v23 = vld [vmem:[%s4159_s4 + $0x1ac] ss:$16 sps:$4 sm:$0xff]  }
  0xa6   : > { %1663 = vmatprep.subr.bf16.mxu0 %v3831_v2  ;;  %1952 = vmatprep.subr.bf16.mxu1 %v3831_v2 }
  0xa9   : > { %1664 = vmatpush2.bf16.msra.mxu0 %v3586_v24  ;;  %1953 = vmatpush2.bf16.msra.mxu1 %v3587_v25  ;;  %v3680_v24 = vld [vmem:[%s4159_s4 + $0x1a0] ss:$16 sps:$4 sm:$0xff]   ;;  %v3681_v25 = vld [vmem:[%s4159_s4 + $0x1a8] ss:$16 sps:$4 sm:$0xff]  }
  0xaa   : > { %1665 = vmatprep.subr.bf16.mxu0 %v3831_v2  ;;  %1954 = vmatprep.subr.bf16.mxu1 %v3831_v2 }
  0xad   : > { %1666 = vmatpush2.bf16.msra.mxu0 %v3588_v26  ;;  %1955 = vmatpush2.bf16.msra.mxu1 %v3589_v27  ;;  %v3682_v26 = vld [vmem:[%s4159_s4 + $0x1c4] ss:$16 sps:$4 sm:$0xff]   ;;  %v3684_v27 = vld [vmem:[%s4159_s4 + $0x1cc] ss:$16 sps:$4 sm:$0xff]  }
  0xae   : > { %1667 = vmatprep.subr.bf16.mxu0 %v3831_v2  ;;  %1956 = vmatprep.subr.bf16.mxu1 %v3831_v2 }
  0xb1   : > { %1668 = vmatpush2.bf16.msra.mxu0 %v3590_v28  ;;  %1957 = vmatpush2.bf16.msra.mxu1 %v3591_v29  ;;  %v3686_v28 = vld [vmem:[%s4159_s4 + $0x1c0] ss:$16 sps:$4 sm:$0xff]   ;;  %v3687_v29 = vld [vmem:[%s4159_s4 + $0x1c8] ss:$16 sps:$4 sm:$0xff]  }
  0xb2   : > { %1669 = vmatprep.subr.bf16.mxu0 %v3831_v2  ;;  %1958 = vmatprep.subr.bf16.mxu1 %v3831_v2 }
  0xb5   : > { %1670 = vmatpush2.bf16.msra.mxu0 %v3592_v30  ;;  %1959 = vmatpush2.bf16.msra.mxu1 %v3593_v31  ;;  %v3688_v30 = vld [vmem:[%s4159_s4 + $0x1e4] ss:$16 sps:$4 sm:$0xff]   ;;  %v3690_v31 = vld [vmem:[%s4159_s4 + $0x1ec] ss:$16 sps:$4 sm:$0xff]  }
  0xb6   : > { %1671 = vmatprep.subr.bf16.mxu0 %v3831_v2  ;;  %1960 = vmatprep.subr.bf16.mxu1 %v3831_v2 }
  0xb9   : > { %1672 = vmatpush2.bf16.msra.mxu0 %v3594_v32  ;;  %1961 = vmatpush2.bf16.msra.mxu1 %v3595_v33  ;;  %v3692_v32 = vld [vmem:[%s4159_s4 + $0x1e0] ss:$16 sps:$4 sm:$0xff]   ;;  %v3693_v33 = vld [vmem:[%s4159_s4 + $0x1e8] ss:$16 sps:$4 sm:$0xff]  }
  0xba   : > { %1673 = vmatprep.subr.bf16.mxu0 %v3831_v2  ;;  %1962 = vmatprep.subr.bf16.mxu1 %v3831_v2  ;;  %v3646_v2 = vld [vmem:[%s4159_s4 + $0x104] ss:$16 sps:$4 sm:$0xff]  }
  0xbd   : > { %1674 = vmatpush2.bf16.msra.mxu0 %v3596_v34  ;;  %1963 = vmatpush2.bf16.msra.mxu1 %v3597_v35  ;;  %v3694_v34 = vld [vmem:[%s4159_s4 + $0x204] ss:$16 sps:$4 sm:$0xff]   ;;  %v3696_v35 = vld [vmem:[%s4159_s4 + $0x20c] ss:$16 sps:$4 sm:$0xff]  }
  0xc0   : > { %1676 = vmatmul.mubr.bf16.vlgmr.msra.gmra.mxu0 %v3598_v36  ;;  %1965 = vmatmul.mubr.bf16.vlgmr.msra.gmra.mxu1 %v3601_v37  ;;  %v3698_v36 = vld [vmem:[%s4159_s4 + $0x200] ss:$16 sps:$4 sm:$0xff]   ;;  %v3699_v37 = vld [vmem:[%s4159_s4 + $0x208] ss:$16 sps:$4 sm:$0xff]  }
  0xc1   : > { %1683 = vmatprep.mubr.bf16.mxu0 %v3604_v38  ;;  %1972 = vmatprep.mubr.bf16.mxu1 %v3606_v39  ;;  %v3700_v38 = vld [vmem:[%s4159_s4 + $0x224] ss:$16 sps:$4 sm:$0xff]   ;;  %v3702_v39 = vld [vmem:[%s4159_s4 + $0x22c] ss:$16 sps:$4 sm:$0xff]  }
  0xc8   : > { %1684 = vmatmul.mubr.bf16.gmra.mxu0 %v3608_v40  ;;  %1973 = vmatmul.mubr.bf16.gmra.mxu1 %v3609_v41  ;;  %v3704_v40 = vld [vmem:[%s4159_s4 + $0x220] ss:$16 sps:$4 sm:$0xff]   ;;  %v3705_v41 = vld [vmem:[%s4159_s4 + $0x228] ss:$16 sps:$4 sm:$0xff]  }
  0xc9   : > { %1691 = vmatprep.mubr.bf16.mxu0 %v3610_v42  ;;  %1980 = vmatprep.mubr.bf16.mxu1 %v3612_v43  ;;  %v3706_v42 = vld [vmem:[%s4159_s4 + $0x244] ss:$16 sps:$4 sm:$0xff]   ;;  %v3708_v43 = vld [vmem:[%s4159_s4 + $0x24c] ss:$16 sps:$4 sm:$0xff]  }
  0xd0   : > { %1692 = vmatmul.mubr.bf16.gmra.mxu0 %v3614_v44  ;;  %1981 = vmatmul.mubr.bf16.gmra.mxu1 %v3615_v45  ;;  %v3710_v44 = vld [vmem:[%s4159_s4 + $0x240] ss:$16 sps:$4 sm:$0xff]   ;;  %v3711_v45 = vld [vmem:[%s4159_s4 + $0x248] ss:$16 sps:$4 sm:$0xff]  }
  0xd1   : > { %1699 = vmatprep.mubr.bf16.mxu0 %v3616_v46  ;;  %1988 = vmatprep.mubr.bf16.mxu1 %v3618_v47  ;;  %v3712_v46 = vld [vmem:[%s4159_s4 + $0x264] ss:$16 sps:$4 sm:$0xff]   ;;  %v3714_v47 = vld [vmem:[%s4159_s4 + $0x26c] ss:$16 sps:$4 sm:$0xff]  }
  0xd8   : > { %1700 = vmatmul.mubr.bf16.gmra.mxu0 %v3620_v48  ;;  %1989 = vmatmul.mubr.bf16.gmra.mxu1 %v3621_v49  ;;  %v3716_v48 = vld [vmem:[%s4159_s4 + $0x260] ss:$16 sps:$4 sm:$0xff]   ;;  %v3717_v49 = vld [vmem:[%s4159_s4 + $0x268] ss:$16 sps:$4 sm:$0xff]  }
  0xd9   : > { %1707 = vmatprep.mubr.bf16.mxu0 %v3622_v50  ;;  %1996 = vmatprep.mubr.bf16.mxu1 %v3624_v51  ;;  %v3718_v50 = vld [vmem:[%s4159_s4 + $0x284] ss:$16 sps:$4 sm:$0xff]   ;;  %v3720_v51 = vld [vmem:[%s4159_s4 + $0x28c] ss:$16 sps:$4 sm:$0xff]  }
  0xe0   : > { %1708 = vmatmul.mubr.bf16.gmra.mxu0 %v3626_v52  ;;  %1997 = vmatmul.mubr.bf16.gmra.mxu1 %v3627_v53  ;;  %v3722_v52 = vld [vmem:[%s4159_s4 + $0x280] ss:$16 sps:$4 sm:$0xff]   ;;  %v3723_v53 = vld [vmem:[%s4159_s4 + $0x288] ss:$16 sps:$4 sm:$0xff]  }
  0xe1   : > { %1715 = vmatprep.mubr.bf16.mxu0 %v3628_v54  ;;  %2004 = vmatprep.mubr.bf16.mxu1 %v3630_v55  ;;  %v3724_v54 = vld [vmem:[%s4159_s4 + $0x2a4] ss:$16 sps:$4 sm:$0xff]   ;;  %v3726_v55 = vld [vmem:[%s4159_s4 + $0x2ac] ss:$16 sps:$4 sm:$0xff]  }
  0xe8   : > { %1716 = vmatmul.mubr.bf16.gmra.mxu0 %v3632_v56  ;;  %2005 = vmatmul.mubr.bf16.gmra.mxu1 %v3633_v57  ;;  %v3728_v56 = vld [vmem:[%s4159_s4 + $0x2a0] ss:$16 sps:$4 sm:$0xff]   ;;  %v3729_v57 = vld [vmem:[%s4159_s4 + $0x2a8] ss:$16 sps:$4 sm:$0xff]  }
  0xe9   : > { %1723 = vmatprep.mubr.bf16.mxu0 %v3634_v58  ;;  %2012 = vmatprep.mubr.bf16.mxu1 %v3636_v59  ;;  %v3730_v58 = vld [vmem:[%s4159_s4 + $0x2c4] ss:$16 sps:$4 sm:$0xff]   ;;  %v3732_v59 = vld [vmem:[%s4159_s4 + $0x2cc] ss:$16 sps:$4 sm:$0xff]  }
  0xf0   : > { %1724 = vmatmul.mubr.bf16.gmra.mxu0 %v3638_v60  ;;  %2013 = vmatmul.mubr.bf16.gmra.mxu1 %v3639_v61  ;;  %v3734_v60 = vld [vmem:[%s4159_s4 + $0x2c0] ss:$16 sps:$4 sm:$0xff]   ;;  %v3735_v61 = vld [vmem:[%s4159_s4 + $0x2c8] ss:$16 sps:$4 sm:$0xff]  }
  0xf1   : > { %1731 = vmatprep.mubr.bf16.mxu0 %v3640_v62  ;;  %2020 = vmatprep.mubr.bf16.mxu1 %v3642_v63  ;;  %v3736_v62 = vld [vmem:[%s4159_s4 + $0x2e4] ss:$16 sps:$4 sm:$0xff]   ;;  %v3738_v63 = vld [vmem:[%s4159_s4 + $0x2ec] ss:$16 sps:$4 sm:$0xff]  }
  0xf8   : > { %1732 = vmatmul.mubr.bf16.gmra.mxu0 %v3644_v0  ;;  %2021 = vmatmul.mubr.bf16.gmra.mxu1 %v3645_v1  ;;  %v3740_v0 = vld [vmem:[%s4159_s4 + $0x2e0] ss:$16 sps:$4 sm:$0xff]   ;;  %v3741_v1 = vld [vmem:[%s4159_s4 + $0x2e8] ss:$16 sps:$4 sm:$0xff]  }
  0xf9   : > { %1739 = vmatprep.mubr.bf16.mxu0 %v3646_v2  ;;  %2028 = vmatprep.mubr.bf16.mxu1 %v3648_v3  ;;  %v3742_v2 = vld [vmem:[%s4159_s4 + $0x304] ss:$16 sps:$4 sm:$0xff]   ;;  %v3744_v3 = vld [vmem:[%s4159_s4 + $0x30c] ss:$16 sps:$4 sm:$0xff]  }
 0x100   : > { %1740 = vmatmul.mubr.bf16.gmra.mxu0 %v3650_v4  ;;  %2029 = vmatmul.mubr.bf16.gmra.mxu1 %v3651_v5  ;;  %v3746_v4 = vld [vmem:[%s4159_s4 + $0x300] ss:$16 sps:$4 sm:$0xff]   ;;  %v3747_v5 = vld [vmem:[%s4159_s4 + $0x308] ss:$16 sps:$4 sm:$0xff]  }
 0x101   : > { %1747 = vmatprep.mubr.bf16.mxu0 %v3652_v6  ;;  %2036 = vmatprep.mubr.bf16.mxu1 %v3654_v7  ;;  %v3748_v6 = vld [vmem:[%s4159_s4 + $0x324] ss:$16 sps:$4 sm:$0xff]   ;;  %v3750_v7 = vld [vmem:[%s4159_s4 + $0x32c] ss:$16 sps:$4 sm:$0xff]  }
 0x108   : > { %1748 = vmatmul.mubr.bf16.gmra.mxu0 %v3656_v8  ;;  %2037 = vmatmul.mubr.bf16.gmra.mxu1 %v3657_v9  ;;  %v555_v9 = vld [vmem:[#allocation2 + $0xb0] sm:$0xff] }
 0x109   : > { %1755 = vmatprep.mubr.bf16.mxu0 %v3658_v10  ;;  %2044 = vmatprep.mubr.bf16.mxu1 %v3660_v11 }
 0x110   : > { %1756 = vmatmul.mubr.bf16.gmra.mxu0 %v3662_v12  ;;  %2045 = vmatmul.mubr.bf16.gmra.mxu1 %v3663_v13 }
 0x111   : > { %1763 = vmatprep.mubr.bf16.mxu0 %v3664_v14  ;;  %2052 = vmatprep.mubr.bf16.mxu1 %v3666_v15 }
 0x118   : > { %1764 = vmatmul.mubr.bf16.gmra.mxu0 %v3668_v16  ;;  %2053 = vmatmul.mubr.bf16.gmra.mxu1 %v3669_v17  ;;  %v3752_v16 = vld [vmem:[%s4159_s4 + $0x320] ss:$16 sps:$4 sm:$0xff]  }
 0x119   : > { %1771 = vmatprep.mubr.bf16.mxu0 %v3670_v18  ;;  %2060 = vmatprep.mubr.bf16.mxu1 %v3672_v19  ;;  %v556_v17 = vld [vmem:[#allocation2 + $0x1b0] sm:$0xff]  ;;  %v3753_v19 = vld [vmem:[%s4159_s4 + $0x328] ss:$16 sps:$4 sm:$0xff]  }
 0x120   : > { %1772 = vmatmul.mubr.bf16.gmra.mxu0 %v3674_v20  ;;  %2061 = vmatmul.mubr.bf16.gmra.mxu1 %v3675_v21  ;;  %v3754_v20 = vld [vmem:[%s4159_s4 + $0x344] ss:$16 sps:$4 sm:$0xff]  }
 0x121   : > { %1779 = vmatprep.mubr.bf16.mxu0 %v3676_v22  ;;  %2068 = vmatprep.mubr.bf16.mxu1 %v3678_v23  ;;  %v3756_v23 = vld [vmem:[%s4159_s4 + $0x34c] ss:$16 sps:$4 sm:$0xff]  }
 0x128   : > { %1780 = vmatmul.mubr.bf16.gmra.mxu0 %v3680_v24  ;;  %2069 = vmatmul.mubr.bf16.gmra.mxu1 %v3681_v25 }
 0x129   : > { %1787 = vmatprep.mubr.bf16.mxu0 %v3682_v26  ;;  %2076 = vmatprep.mubr.bf16.mxu1 %v3684_v27  ;;  %v557_v27 = vld [vmem:[#allocation2 + $0xd8] sm:$0xff] }
 0x130   : > { %1788 = vmatmul.mubr.bf16.gmra.mxu0 %v3686_v28  ;;  %2077 = vmatmul.mubr.bf16.gmra.mxu1 %v3687_v29 }
 0x131   : > { %1795 = vmatprep.mubr.bf16.mxu0 %v3688_v30  ;;  %2084 = vmatprep.mubr.bf16.mxu1 %v3690_v31 }
 0x138   : > { %1796 = vmatmul.mubr.bf16.gmra.mxu0 %v3692_v32  ;;  %2085 = vmatmul.mubr.bf16.gmra.mxu1 %v3693_v33 }
 0x139   : > { %1803 = vmatprep.mubr.bf16.mxu0 %v3694_v34  ;;  %2092 = vmatprep.mubr.bf16.mxu1 %v3696_v35  ;;  %v3758_v34 = vld [vmem:[%s4159_s4 + $0x340] ss:$16 sps:$4 sm:$0xff]   ;;  %v558_v35 = vld [vmem:[#allocation2 + $0x18] sm:$0xff] }
 0x140   : > { %1804 = vmatmul.mubr.bf16.gmra.mxu0 %v3698_v36  ;;  %2093 = vmatmul.mubr.bf16.gmra.mxu1 %v3699_v37  ;;  %v3759_v37 = vld [vmem:[%s4159_s4 + $0x348] ss:$16 sps:$4 sm:$0xff]  }
 0x141   : > { %1811 = vmatprep.mubr.bf16.mxu0 %v3700_v38  ;;  %2100 = vmatprep.mubr.bf16.mxu1 %v3702_v39  ;;  %v3760_v38 = vld [vmem:[%s4159_s4 + $0x364] ss:$16 sps:$4 sm:$0xff]  }
 0x148   : > { %1812 = vmatmul.mubr.bf16.gmra.mxu0 %v3704_v40  ;;  %2101 = vmatmul.mubr.bf16.gmra.mxu1 %v3705_v41  ;;  %v3762_v41 = vld [vmem:[%s4159_s4 + $0x36c] ss:$16 sps:$4 sm:$0xff]  }
 0x149   : > { %1819 = vmatprep.mubr.bf16.mxu0 %v3706_v42  ;;  %2108 = vmatprep.mubr.bf16.mxu1 %v3708_v43 }
 0x150   : > { %1820 = vmatmul.mubr.bf16.gmra.mxu0 %v3710_v44  ;;  %2109 = vmatmul.mubr.bf16.gmra.mxu1 %v3711_v45  ;;  %v559_v45 = vld [vmem:[#allocation2 + $0x50] sm:$0xff] }
 0x151   : > { %1827 = vmatprep.mubr.bf16.mxu0 %v3712_v46  ;;  %2116 = vmatprep.mubr.bf16.mxu1 %v3714_v47 }
 0x158   : > { %1828 = vmatmul.mubr.bf16.gmra.mxu0 %v3716_v48  ;;  %2117 = vmatmul.mubr.bf16.gmra.mxu1 %v3717_v49 }
 0x159   : > { %1835 = vmatprep.mubr.bf16.mxu0 %v3718_v50  ;;  %2124 = vmatprep.mubr.bf16.mxu1 %v3720_v51 }
 0x160   : > { %1836 = vmatmul.mubr.bf16.gmra.mxu0 %v3722_v52  ;;  %2125 = vmatmul.mubr.bf16.gmra.mxu1 %v3723_v53  ;;  %v3764_v52 = vld [vmem:[%s4159_s4 + $0x360] ss:$16 sps:$4 sm:$0xff]   ;;  %v560_v53 = vld [vmem:[#allocation2 + $0x168] sm:$0xff] }
 0x161   : > { %1843 = vmatprep.mubr.bf16.mxu0 %v3724_v54  ;;  %2132 = vmatprep.mubr.bf16.mxu1 %v3726_v55  ;;  %v3765_v55 = vld [vmem:[%s4159_s4 + $0x368] ss:$16 sps:$4 sm:$0xff]  }
 0x168   : > { %1844 = vmatmul.mubr.bf16.gmra.mxu0 %v3728_v56  ;;  %2133 = vmatmul.mubr.bf16.gmra.mxu1 %v3729_v57  ;;  %v3768_v56 = vld [vmem:[%s4159_s4 + $0x384] ss:$16 sps:$4 sm:$0xff]  }
 0x169   : > { %1851 = vmatprep.mubr.bf16.mxu0 %v3730_v58  ;;  %2140 = vmatprep.mubr.bf16.mxu1 %v3732_v59  ;;  %v3771_v59 = vld [vmem:[%s4159_s4 + $0x38c] ss:$16 sps:$4 sm:$0xff]  }
 0x170   : > { %1852 = vmatmul.mubr.bf16.gmra.mxu0 %v3734_v60  ;;  %2141 = vmatmul.mubr.bf16.gmra.mxu1 %v3735_v61 }
 0x171   : > { %1859 = vmatprep.mubr.bf16.mxu0 %v3736_v62  ;;  %2148 = vmatprep.mubr.bf16.mxu1 %v3738_v63  ;;  %v561_v63 = vld [vmem:[#allocation2 + $0x130] sm:$0xff] }
 0x178   : > { %1860 = vmatmul.mubr.bf16.gmra.mxu0 %v3740_v0  ;;  %2149 = vmatmul.mubr.bf16.gmra.mxu1 %v3741_v1 }
 0x179   : > { %1867 = vmatprep.mubr.bf16.mxu0 %v3742_v2  ;;  %2156 = vmatprep.mubr.bf16.mxu1 %v3744_v3 }
 0x180   : > { %v1677_v8 = vpop.f32.mrf.mxu0  ;;  %1868 = vmatmul.mubr.bf16.gmra.mxu0 %v3746_v4  ;;  %v1966_v10 = vpop.f32.mrf.mxu1  ;;  %2157 = vmatmul.mubr.bf16.gmra.mxu1 %v3747_v5 }
 0x181   : > { %1875 = vmatprep.mubr.bf16.mxu0 %v3748_v6  ;;  %v1967_v11 = vadd.f32 %v1966_v10, %v1677_v8  ;;  %2164 = vmatprep.mubr.bf16.mxu1 %v3750_v7  ;;  %v3766_v6 = vld [vmem:[%s4159_s4 + $0x380] ss:$16 sps:$4 sm:$0xff]   ;;  %v562_v7 = vld [vmem:[#allocation2 + $0x48] sm:$0xff]  ;;  %v3774_v10 = vld [vmem:[%s4159_s4 + $0x3a4] ss:$16 sps:$4 sm:$0xff]  }
 0x182   : > { %v1679_v12 = vpop.f32.mrf.mxu0  ;;  %v1968_v13 = vpop.f32.mrf.mxu1 }
 0x183   : > { %v2221_v14 = vadd.f32 %v1967_v11, %v555_v9  ;;  %v3769_v9 = vld [vmem:[%s4159_s4 + $0x388] ss:$16 sps:$4 sm:$0xff]   ;;  %v3777_v13 = vld [vmem:[%s4159_s4 + $0x3ac] ss:$16 sps:$4 sm:$0xff]  }
 0x184   : > { %v1680_v15 = vpop.f32.mrf.mxu0  ;;  %v1969_v18 = vpop.f32.mrf.mxu1 }
 0x185   : > { %2285 = vst [vmem:[#allocation2 + $0xb0] sm:$0xff] %v2221_v14  ;;  %v1970_v21 = vadd.f32 %v1969_v18, %v1680_v15 }
 0x186   : > { %v1682_v22 = vpop.f32.mrf.mxu0  ;;  %v1971_v24 = vpop.f32.mrf.mxu1 }
 0x187   : > { %v2222_v25 = vadd.f32 %v1970_v21, %v556_v17  ;;  %v563_v17 = vld [vmem:[#allocation2 + $0x180] sm:$0xff] }
 0x188   : > { %v1685_v26 = vpop.f32.mrf.mxu0  ;;  %1876 = vmatmul.mubr.bf16.gmra.mxu0 %v3752_v16  ;;  %v1974_v28 = vpop.f32.mrf.mxu1  ;;  %2165 = vmatmul.mubr.bf16.gmra.mxu1 %v3753_v19  ;;  %v3772_v24 = vld [vmem:[%s4159_s4 + $0x3a0] ss:$16 sps:$4 sm:$0xff]  }
 0x189   : > { %1883 = vmatprep.mubr.bf16.mxu0 %v3754_v20  ;;  %2286 = vst [vmem:[#allocation2 + $0x1b0] sm:$0xff] %v2222_v25  ;;  %v1975_v29 = vadd.f32 %v1974_v28, %v1685_v26  ;;  %2172 = vmatprep.mubr.bf16.mxu1 %v3756_v23  ;;  %v564_v25 = vld [vmem:[#allocation2 + $0x110] sm:$0xff] }
 0x18a   : > { %v1687_v30 = vpop.f32.mrf.mxu0  ;;  %v1976_v31 = vpop.f32.mrf.mxu1  ;;  %v3780_v28 = vld [vmem:[%s4159_s4 + $0x3c4] ss:$16 sps:$4 sm:$0xff]  }
 0x18b   : > { %v2223_v32 = vadd.f32 %v1975_v29, %v557_v27  ;;  %v3775_v27 = vld [vmem:[%s4159_s4 + $0x3a8] ss:$16 sps:$4 sm:$0xff]   ;;  %v3783_v31 = vld [vmem:[%s4159_s4 + $0x3cc] ss:$16 sps:$4 sm:$0xff]  }
 0x18c   : > { %v1688_v33 = vpop.f32.mrf.mxu0  ;;  %v1977_v36 = vpop.f32.mrf.mxu1 }
 0x18d   : > { %2287 = vst [vmem:[#allocation2 + $0xd8] sm:$0xff] %v2223_v32  ;;  %v1978_v39 = vadd.f32 %v1977_v36, %v1688_v33 }
 0x18e   : > { %v1690_v40 = vpop.f32.mrf.mxu0  ;;  %v1979_v42 = vpop.f32.mrf.mxu1 }
 0x18f   : > { %v2224_v43 = vadd.f32 %v1978_v39, %v558_v35  ;;  %v565_v35 = vld [vmem:[#allocation2 + $0x118] sm:$0xff]  ;;  %v3778_v42 = vld [vmem:[%s4159_s4 + $0x3c0] ss:$16 sps:$4 sm:$0xff]  }
 0x190   : > { %v1693_v44 = vpop.f32.mrf.mxu0  ;;  %1884 = vmatmul.mubr.bf16.gmra.mxu0 %v3758_v34  ;;  %v1982_v46 = vpop.f32.mrf.mxu1  ;;  %2173 = vmatmul.mubr.bf16.gmra.mxu1 %v3759_v37 }
 0x191   : > { %1891 = vmatprep.mubr.bf16.mxu0 %v3760_v38  ;;  %2288 = vst [vmem:[#allocation2 + $0x18] sm:$0xff] %v2224_v43  ;;  %v1983_v47 = vadd.f32 %v1982_v46, %v1693_v44  ;;  %2180 = vmatprep.mubr.bf16.mxu1 %v3762_v41  ;;  %v566_v43 = vld [vmem:[#allocation2 + $0x98] sm:$0xff]  ;;  %v3786_v46 = vld [vmem:[%s4159_s4 + $0x3e4] ss:$16 sps:$4 sm:$0xff]  }
 0x192   : > { %v1695_v48 = vpop.f32.mrf.mxu0  ;;  %v1984_v49 = vpop.f32.mrf.mxu1 }
 0x193   : > { %v2225_v50 = vadd.f32 %v1983_v47, %v559_v45  ;;  %v3781_v45 = vld [vmem:[%s4159_s4 + $0x3c8] ss:$16 sps:$4 sm:$0xff]   ;;  %v3789_v49 = vld [vmem:[%s4159_s4 + $0x3ec] ss:$16 sps:$4 sm:$0xff]  }
 0x194   : > { %v1696_v51 = vpop.f32.mrf.mxu0  ;;  %v1985_v54 = vpop.f32.mrf.mxu1 }
 0x195   : > { %2289 = vst [vmem:[#allocation2 + $0x50] sm:$0xff] %v2225_v50  ;;  %v1986_v57 = vadd.f32 %v1985_v54, %v1696_v51 }
 0x196   : > { %v1698_v58 = vpop.f32.mrf.mxu0  ;;  %v1987_v60 = vpop.f32.mrf.mxu1 }
 0x197   : > { %v2226_v61 = vadd.f32 %v1986_v57, %v560_v53  ;;  %v567_v53 = vld [vmem:[#allocation2 + $0x120] sm:$0xff] }
 0x198   : > { %v1701_v62 = vpop.f32.mrf.mxu0  ;;  %1892 = vmatmul.mubr.bf16.gmra.mxu0 %v3764_v52  ;;  %v1990_v0 = vpop.f32.mrf.mxu1  ;;  %2181 = vmatmul.mubr.bf16.gmra.mxu1 %v3765_v55  ;;  %v3784_v60 = vld [vmem:[%s4159_s4 + $0x3e0] ss:$16 sps:$4 sm:$0xff]  }
 0x199   : > { %1899 = vmatprep.mubr.bf16.mxu0 %v3768_v56  ;;  %2290 = vst [vmem:[#allocation2 + $0x168] sm:$0xff] %v2226_v61  ;;  %v1991_v1 = vadd.f32 %v1990_v0, %v1701_v62  ;;  %2188 = vmatprep.mubr.bf16.mxu1 %v3771_v59  ;;  %v568_v61 = vld [vmem:[#allocation2 + $0x150] sm:$0xff] }
 0x19a   : > { %v1703_v2 = vpop.f32.mrf.mxu0  ;;  %v1992_v3 = vpop.f32.mrf.mxu1 }
 0x19b   : > { %v2227_v4 = vadd.f32 %v1991_v1, %v561_v63  ;;  %v3787_v63 = vld [vmem:[%s4159_s4 + $0x3e8] ss:$16 sps:$4 sm:$0xff]  }
 0x19c   : > { %v1704_v5 = vpop.f32.mrf.mxu0  ;;  %v1993_v8 = vpop.f32.mrf.mxu1 }
 0x19d   : > { %2291 = vst [vmem:[#allocation2 + $0x130] sm:$0xff] %v2227_v4  ;;  %v1994_v11 = vadd.f32 %v1993_v8, %v1704_v5  ;;  %v569_v5 = vld [vmem:[#allocation2 + $0x108] sm:$0xff] }
 0x19e   : > { %v1706_v12 = vpop.f32.mrf.mxu0  ;;  %v1995_v14 = vpop.f32.mrf.mxu1 }
 0x19f   : > { %v2228_v15 = vadd.f32 %v1994_v11, %v562_v7  ;;  %v570_v12 = vld [vmem:[#allocation2 + $0x60] sm:$0xff] }
 0x1a0   : > { %v1709_v16 = vpop.f32.mrf.mxu0  ;;  %1900 = vmatmul.mubr.bf16.gmra.mxu0 %v3766_v6  ;;  %v1998_v18 = vpop.f32.mrf.mxu1  ;;  %2189 = vmatmul.mubr.bf16.gmra.mxu1 %v3769_v9 }
 0x1a1   : > { %1907 = vmatprep.mubr.bf16.mxu0 %v3774_v10  ;;  %2292 = vst [vmem:[#allocation2 + $0x48] sm:$0xff] %v2228_v15  ;;  %v1999_v19 = vadd.f32 %v1998_v18, %v1709_v16  ;;  %2196 = vmatprep.mubr.bf16.mxu1 %v3777_v13 }
 0x1a2   : > { %v1711_v20 = vpop.f32.mrf.mxu0  ;;  %v2000_v21 = vpop.f32.mrf.mxu1 }
 0x1a3   : > { %v2229_v22 = vadd.f32 %v1999_v19, %v563_v17  ;;  %v571_v19 = vld [vmem:[#allocation2 + $0xe0] sm:$0xff] }
 0x1a4   : > { %v1712_v23 = vpop.f32.mrf.mxu0  ;;  %v2001_v26 = vpop.f32.mrf.mxu1 }
 0x1a5   : > { %2293 = vst [vmem:[#allocation2 + $0x180] sm:$0xff] %v2229_v22  ;;  %v2002_v29 = vadd.f32 %v2001_v26, %v1712_v23  ;;  %v572_v26 = vld [vmem:[#allocation2 + $0x188] sm:$0xff] }
 0x1a6   : > { %v1714_v30 = vpop.f32.mrf.mxu0  ;;  %v2003_v32 = vpop.f32.mrf.mxu1 }
 0x1a7   : > { %v2230_v33 = vadd.f32 %v2002_v29, %v564_v25 }
 0x1a8   : > { %v1717_v34 = vpop.f32.mrf.mxu0  ;;  %1908 = vmatmul.mubr.bf16.gmra.mxu0 %v3772_v24  ;;  %v2006_v36 = vpop.f32.mrf.mxu1  ;;  %2197 = vmatmul.mubr.bf16.gmra.mxu1 %v3775_v27 }
 0x1a9   : > { %1915 = vmatprep.mubr.bf16.mxu0 %v3780_v28  ;;  %2294 = vst [vmem:[#allocation2 + $0x110] sm:$0xff] %v2230_v33  ;;  %v2007_v37 = vadd.f32 %v2006_v36, %v1717_v34  ;;  %2204 = vmatprep.mubr.bf16.mxu1 %v3783_v31  ;;  %v573_v33 = vld [vmem:[#allocation2 + $0x138] sm:$0xff] }
 0x1aa   : > { %v1719_v38 = vpop.f32.mrf.mxu0  ;;  %v2008_v39 = vpop.f32.mrf.mxu1 }
 0x1ab   : > { %v2231_v40 = vadd.f32 %v2007_v37, %v565_v35 }
 0x1ac   : > { %v1720_v41 = vpop.f32.mrf.mxu0  ;;  %v2009_v44 = vpop.f32.mrf.mxu1 }
 0x1ad   : > { %2295 = vst [vmem:[#allocation2 + $0x118] sm:$0xff] %v2231_v40  ;;  %v2010_v47 = vadd.f32 %v2009_v44, %v1720_v41  ;;  %v574_v40 = vld [vmem:[#allocation2 + $0x140] sm:$0xff] }
 0x1ae   : > { %v1722_v48 = vpop.f32.mrf.mxu0  ;;  %v2011_v50 = vpop.f32.mrf.mxu1 }
 0x1af   : > { %v2232_v51 = vadd.f32 %v2010_v47, %v566_v43  ;;  %v575_v47 = vld [vmem:[#allocation2 + $0x80] sm:$0xff] }
 0x1b0   : > { %v1725_v52 = vpop.f32.mrf.mxu0  ;;  %1916 = vmatmul.mubr.bf16.gmra.mxu0 %v3778_v42  ;;  %v2014_v54 = vpop.f32.mrf.mxu1  ;;  %2205 = vmatmul.mubr.bf16.gmra.mxu1 %v3781_v45 }
 0x1b1   : > { %1923 = vmatprep.mubr.bf16.mxu0 %v3786_v46  ;;  %2296 = vst [vmem:[#allocation2 + $0x98] sm:$0xff] %v2232_v51  ;;  %v2015_v55 = vadd.f32 %v2014_v54, %v1725_v52  ;;  %2212 = vmatprep.mubr.bf16.mxu1 %v3789_v49  ;;  %v576_v54 = vld [vmem:[#allocation2 + $0x1a8] sm:$0xff] }
 0x1b2   : > { %v1727_v56 = vpop.f32.mrf.mxu0  ;;  %v2016_v57 = vpop.f32.mrf.mxu1 }
 0x1b3   : > { %v2233_v58 = vadd.f32 %v2015_v55, %v567_v53 }
 0x1b4   : > { %v1728_v59 = vpop.f32.mrf.mxu0  ;;  %v2017_v62 = vpop.f32.mrf.mxu1 }
 0x1b5   : > { %2297 = vst [vmem:[#allocation2 + $0x120] sm:$0xff] %v2233_v58  ;;  %v2018_v0 = vadd.f32 %v2017_v62, %v1728_v59 }
 0x1b6   : > { %v1730_v1 = vpop.f32.mrf.mxu0  ;;  %v2019_v2 = vpop.f32.mrf.mxu1 }
 0x1b7   : > { %v2234_v3 = vadd.f32 %v2018_v0, %v568_v61  ;;  %v577_v61 = vld [vmem:[#allocation2 + $0x1b8] sm:$0xff] }
 0x1b8   : > { %v1733_v4 = vpop.f32.mrf.mxu0  ;;  %1924 = vmatmul.mubr.bf16.gmra.mxu0 %v3784_v60  ;;  %v2022_v6 = vpop.f32.mrf.mxu1  ;;  %2213 = vmatmul.mubr.bf16.gmra.mxu1 %v3787_v63 }
 0x1b9   : > { %2298 = vst [vmem:[#allocation2 + $0x150] sm:$0xff] %v2234_v3  ;;  %v2023_v7 = vadd.f32 %v2022_v6, %v1733_v4  ;;  %v578_v4 = vld [vmem:[#allocation2 + $0x28] sm:$0xff] }
 0x1ba   : > { %v1735_v8 = vpop.f32.mrf.mxu0  ;;  %v2024_v9 = vpop.f32.mrf.mxu1 }
 0x1bb   : > { %v2235_v10 = vadd.f32 %v2023_v7, %v569_v5 }
 0x1bc   : > { %v1736_v11 = vpop.f32.mrf.mxu0  ;;  %v2025_v13 = vpop.f32.mrf.mxu1 }
 0x1bd   : > { %2299 = vst [vmem:[#allocation2 + $0x108] sm:$0xff] %v2235_v10  ;;  %v2026_v14 = vadd.f32 %v2025_v13, %v1736_v11  ;;  %v579_v11 = vld [vmem:[#allocation2 + $0x1e8] sm:$0xff] }
 0x1be   : > { %v1738_v15 = vpop.f32.mrf.mxu0  ;;  %v2027_v16 = vpop.f32.mrf.mxu1 }
 0x1bf   : > { %v2236_v17 = vadd.f32 %v2026_v14, %v570_v12 }
 0x1c0   : > { %v1741_v18 = vpop.f32.mrf.mxu0  ;;  %v2030_v20 = vpop.f32.mrf.mxu1 }
 0x1c1   : > { %2300 = vst [vmem:[#allocation2 + $0x60] sm:$0xff] %v2236_v17  ;;  %v2031_v21 = vadd.f32 %v2030_v20, %v1741_v18  ;;  %v580_v18 = vld [vmem:[#allocation2 + $0xf8] sm:$0xff] }
 0x1c2   : > { %v1743_v22 = vpop.f32.mrf.mxu0  ;;  %v2032_v23 = vpop.f32.mrf.mxu1 }
 0x1c3   : > { %v2237_v24 = vadd.f32 %v2031_v21, %v571_v19 }
 0x1c4   : > { %v1744_v25 = vpop.f32.mrf.mxu0  ;;  %v2033_v27 = vpop.f32.mrf.mxu1 }
 0x1c5   : > { %2301 = vst [vmem:[#allocation2 + $0xe0] sm:$0xff] %v2237_v24  ;;  %v2034_v28 = vadd.f32 %v2033_v27, %v1744_v25  ;;  %v581_v25 = vld [vmem:[#allocation2 + $0x160] sm:$0xff] }
 0x1c6   : > { %v1746_v29 = vpop.f32.mrf.mxu0  ;;  %v2035_v30 = vpop.f32.mrf.mxu1 }
 0x1c7   : > { %v2238_v31 = vadd.f32 %v2034_v28, %v572_v26 }
 0x1c8   : > { %v1749_v32 = vpop.f32.mrf.mxu0  ;;  %v2038_v34 = vpop.f32.mrf.mxu1 }
 0x1c9   : > { %2302 = vst [vmem:[#allocation2 + $0x188] sm:$0xff] %v2238_v31  ;;  %v2039_v35 = vadd.f32 %v2038_v34, %v1749_v32  ;;  %v582_v32 = vld [vmem:[#allocation2 + $0x30] sm:$0xff] }
 0x1ca   : > { %v1751_v36 = vpop.f32.mrf.mxu0  ;;  %v2040_v37 = vpop.f32.mrf.mxu1 }
 0x1cb   : > { %v2239_v38 = vadd.f32 %v2039_v35, %v573_v33 }
 0x1cc   : > { %v1752_v39 = vpop.f32.mrf.mxu0  ;;  %v2041_v41 = vpop.f32.mrf.mxu1 }
 0x1cd   : > { %2303 = vst [vmem:[#allocation2 + $0x138] sm:$0xff] %v2239_v38  ;;  %v2042_v42 = vadd.f32 %v2041_v41, %v1752_v39  ;;  %v583_v39 = vld [vmem:[#allocation2 + $0x1e0] sm:$0xff] }
 0x1ce   : > { %v1754_v43 = vpop.f32.mrf.mxu0  ;;  %v2043_v44 = vpop.f32.mrf.mxu1 }
 0x1cf   : > { %v2240_v45 = vadd.f32 %v2042_v42, %v574_v40 }
 0x1d0   : > { %v1757_v46 = vpop.f32.mrf.mxu0  ;;  %v2046_v48 = vpop.f32.mrf.mxu1 }
 0x1d1   : > { %2304 = vst [vmem:[#allocation2 + $0x140] sm:$0xff] %v2240_v45  ;;  %v2047_v49 = vadd.f32 %v2046_v48, %v1757_v46  ;;  %v584_v46 = vld [vmem:[#allocation2] sm:$0xff] }
 0x1d2   : > { %v1759_v50 = vpop.f32.mrf.mxu0  ;;  %v2048_v51 = vpop.f32.mrf.mxu1 }
 0x1d3   : > { %v2241_v52 = vadd.f32 %v2047_v49, %v575_v47 }
 0x1d4   : > { %v1760_v53 = vpop.f32.mrf.mxu0  ;;  %v2049_v55 = vpop.f32.mrf.mxu1 }
 0x1d5   : > { %2305 = vst [vmem:[#allocation2 + $0x80] sm:$0xff] %v2241_v52  ;;  %v2050_v56 = vadd.f32 %v2049_v55, %v1760_v53  ;;  %v585_v53 = vld [vmem:[#allocation2 + $0xf0] sm:$0xff] }
 0x1d6   : > { %v1762_v57 = vpop.f32.mrf.mxu0  ;;  %v2051_v58 = vpop.f32.mrf.mxu1 }
 0x1d7   : > { %v2242_v59 = vadd.f32 %v2050_v56, %v576_v54 }
 0x1d8   : > { %v1765_v60 = vpop.f32.mrf.mxu0  ;;  %v2054_v62 = vpop.f32.mrf.mxu1 }
 0x1d9   : > { %2306 = vst [vmem:[#allocation2 + $0x1a8] sm:$0xff] %v2242_v59  ;;  %v2055_v63 = vadd.f32 %v2054_v62, %v1765_v60  ;;  %v586_v60 = vld [vmem:[#allocation2 + $0x8] sm:$0xff] }
 0x1da   : > { %v1767_v0 = vpop.f32.mrf.mxu0  ;;  %v2056_v1 = vpop.f32.mrf.mxu1 }
 0x1db   : > { %v2243_v2 = vadd.f32 %v2055_v63, %v577_v61 }
 0x1dc   : > { %v1768_v3 = vpop.f32.mrf.mxu0  ;;  %v2057_v5 = vpop.f32.mrf.mxu1 }
 0x1dd   : > { %2307 = vst [vmem:[#allocation2 + $0x1b8] sm:$0xff] %v2243_v2  ;;  %v2058_v6 = vadd.f32 %v2057_v5, %v1768_v3  ;;  %v587_v3 = vld [vmem:[#allocation2 + $0x148] sm:$0xff] }
 0x1de   : > { %v1770_v7 = vpop.f32.mrf.mxu0  ;;  %v2059_v8 = vpop.f32.mrf.mxu1 }
 0x1df   : > { %v2244_v9 = vadd.f32 %v2058_v6, %v578_v4 }
 0x1e0   : > { %v1773_v10 = vpop.f32.mrf.mxu0  ;;  %v2062_v12 = vpop.f32.mrf.mxu1 }
 0x1e1   : > { %2308 = vst [vmem:[#allocation2 + $0x28] sm:$0xff] %v2244_v9  ;;  %v2063_v13 = vadd.f32 %v2062_v12, %v1773_v10  ;;  %v588_v10 = vld [vmem:[#allocation2 + $0x1d0] sm:$0xff] }
 0x1e2   : > { %v1775_v14 = vpop.f32.mrf.mxu0  ;;  %v2064_v15 = vpop.f32.mrf.mxu1 }
 0x1e3   : > { %v2245_v16 = vadd.f32 %v2063_v13, %v579_v11 }
 0x1e4   : > { %v1776_v17 = vpop.f32.mrf.mxu0  ;;  %v2065_v19 = vpop.f32.mrf.mxu1 }
 0x1e5   : > { %2309 = vst [vmem:[#allocation2 + $0x1e8] sm:$0xff] %v2245_v16  ;;  %v2066_v20 = vadd.f32 %v2065_v19, %v1776_v17  ;;  %v589_v17 = vld [vmem:[#allocation2 + $0x100] sm:$0xff] }
 0x1e6   : > { %v1778_v21 = vpop.f32.mrf.mxu0  ;;  %v2067_v22 = vpop.f32.mrf.mxu1 }
 0x1e7   : > { %v2246_v23 = vadd.f32 %v2066_v20, %v580_v18 }
 0x1e8   : > { %v1781_v24 = vpop.f32.mrf.mxu0  ;;  %v2070_v26 = vpop.f32.mrf.mxu1 }
 0x1e9   : > { %2310 = vst [vmem:[#allocation2 + $0xf8] sm:$0xff] %v2246_v23  ;;  %v2071_v27 = vadd.f32 %v2070_v26, %v1781_v24  ;;  %v590_v24 = vld [vmem:[#allocation2 + $0xc8] sm:$0xff] }
 0x1ea   : > { %v1783_v28 = vpop.f32.mrf.mxu0  ;;  %v2072_v29 = vpop.f32.mrf.mxu1 }
 0x1eb   : > { %v2247_v30 = vadd.f32 %v2071_v27, %v581_v25 }
 0x1ec   : > { %v1784_v31 = vpop.f32.mrf.mxu0  ;;  %v2073_v33 = vpop.f32.mrf.mxu1 }
 0x1ed   : > { %2311 = vst [vmem:[#allocation2 + $0x160] sm:$0xff] %v2247_v30  ;;  %v2074_v34 = vadd.f32 %v2073_v33, %v1784_v31  ;;  %v591_v31 = vld [vmem:[#allocation2 + $0x40] sm:$0xff] }
 0x1ee   : > { %v1786_v35 = vpop.f32.mrf.mxu0  ;;  %v2075_v36 = vpop.f32.mrf.mxu1 }
 0x1ef   : > { %v2248_v37 = vadd.f32 %v2074_v34, %v582_v32 }
 0x1f0   : > { %v1789_v38 = vpop.f32.mrf.mxu0  ;;  %v2078_v40 = vpop.f32.mrf.mxu1 }
 0x1f1   : > { %2312 = vst [vmem:[#allocation2 + $0x30] sm:$0xff] %v2248_v37  ;;  %v2079_v41 = vadd.f32 %v2078_v40, %v1789_v38  ;;  %v592_v38 = vld [vmem:[#allocation2 + $0x1f8] sm:$0xff] }
 0x1f2   : > { %v1791_v42 = vpop.f32.mrf.mxu0  ;;  %v2080_v43 = vpop.f32.mrf.mxu1 }
 0x1f3   : > { %v2249_v44 = vadd.f32 %v2079_v41, %v583_v39 }
 0x1f4   : > { %v1792_v45 = vpop.f32.mrf.mxu0  ;;  %v2081_v47 = vpop.f32.mrf.mxu1 }
 0x1f5   : > { %2313 = vst [vmem:[#allocation2 + $0x1e0] sm:$0xff] %v2249_v44  ;;  %v2082_v48 = vadd.f32 %v2081_v47, %v1792_v45  ;;  %v593_v45 = vld [vmem:[#allocation2 + $0x20] sm:$0xff] }
 0x1f6   : > { %v1794_v49 = vpop.f32.mrf.mxu0  ;;  %v2083_v50 = vpop.f32.mrf.mxu1 }
 0x1f7   : > { %v2250_v51 = vadd.f32 %v2082_v48, %v584_v46 }
 0x1f8   : > { %v1797_v52 = vpop.f32.mrf.mxu0  ;;  %v2086_v54 = vpop.f32.mrf.mxu1 }
 0x1f9   : > { %2314 = vst [vmem:[#allocation2] sm:$0xff] %v2250_v51  ;;  %v2087_v55 = vadd.f32 %v2086_v54, %v1797_v52  ;;  %v594_v52 = vld [vmem:[#allocation2 + $0x128] sm:$0xff] }
 0x1fa   : > { %v1799_v56 = vpop.f32.mrf.mxu0  ;;  %v2088_v57 = vpop.f32.mrf.mxu1 }
 0x1fb   : > { %v2251_v58 = vadd.f32 %v2087_v55, %v585_v53 }
 0x1fc   : > { %v1800_v59 = vpop.f32.mrf.mxu0  ;;  %v2089_v61 = vpop.f32.mrf.mxu1 }
 0x1fd   : > { %2315 = vst [vmem:[#allocation2 + $0xf0] sm:$0xff] %v2251_v58  ;;  %v2090_v62 = vadd.f32 %v2089_v61, %v1800_v59  ;;  %v595_v59 = vld [vmem:[#allocation2 + $0x1a0] sm:$0xff] }
 0x1fe   : > { %v1802_v63 = vpop.f32.mrf.mxu0  ;;  %v2091_v0 = vpop.f32.mrf.mxu1 }
 0x1ff   : > { %v2252_v1 = vadd.f32 %v2090_v62, %v586_v60 }
 0x200   : > { %v1805_v2 = vpop.f32.mrf.mxu0  ;;  %v2094_v4 = vpop.f32.mrf.mxu1 }
 0x201   : > { %2316 = vst [vmem:[#allocation2 + $0x8] sm:$0xff] %v2252_v1  ;;  %v2095_v5 = vadd.f32 %v2094_v4, %v1805_v2  ;;  %v596_v2 = vld [vmem:[#allocation2 + $0x1f0] sm:$0xff] }
 0x202   : > { %v1807_v6 = vpop.f32.mrf.mxu0  ;;  %v2096_v7 = vpop.f32.mrf.mxu1 }
 0x203   : > { %v2253_v8 = vadd.f32 %v2095_v5, %v587_v3 }
 0x204   : > { %v1808_v9 = vpop.f32.mrf.mxu0  ;;  %v2097_v11 = vpop.f32.mrf.mxu1 }
 0x205   : > { %2317 = vst [vmem:[#allocation2 + $0x148] sm:$0xff] %v2253_v8  ;;  %v2098_v12 = vadd.f32 %v2097_v11, %v1808_v9  ;;  %v597_v9 = vld [vmem:[#allocation2 + $0xe8] sm:$0xff] }
 0x206   : > { %v1810_v13 = vpop.f32.mrf.mxu0  ;;  %v2099_v14 = vpop.f32.mrf.mxu1 }
 0x207   : > { %v2254_v15 = vadd.f32 %v2098_v12, %v588_v10 }
 0x208   : > { %v1813_v16 = vpop.f32.mrf.mxu0  ;;  %v2102_v18 = vpop.f32.mrf.mxu1 }
 0x209   : > { %2318 = vst [vmem:[#allocation2 + $0x1d0] sm:$0xff] %v2254_v15  ;;  %v2103_v19 = vadd.f32 %v2102_v18, %v1813_v16  ;;  %v598_v16 = vld [vmem:[#allocation2 + $0x78] sm:$0xff] }
 0x20a   : > { %v1815_v20 = vpop.f32.mrf.mxu0  ;;  %v2104_v21 = vpop.f32.mrf.mxu1 }
 0x20b   : > { %v2255_v22 = vadd.f32 %v2103_v19, %v589_v17 }
 0x20c   : > { %v1816_v23 = vpop.f32.mrf.mxu0  ;;  %v2105_v25 = vpop.f32.mrf.mxu1 }
 0x20d   : > { %2319 = vst [vmem:[#allocation2 + $0x100] sm:$0xff] %v2255_v22  ;;  %v2106_v26 = vadd.f32 %v2105_v25, %v1816_v23  ;;  %v599_v23 = vld [vmem:[#allocation2 + $0x70] sm:$0xff] }
 0x20e   : > { %v1818_v27 = vpop.f32.mrf.mxu0  ;;  %v2107_v28 = vpop.f32.mrf.mxu1 }
 0x20f   : > { %v2256_v29 = vadd.f32 %v2106_v26, %v590_v24 }
 0x210   : > { %v1821_v30 = vpop.f32.mrf.mxu0  ;;  %v2110_v32 = vpop.f32.mrf.mxu1 }
 0x211   : > { %2320 = vst [vmem:[#allocation2 + $0xc8] sm:$0xff] %v2256_v29  ;;  %v2111_v33 = vadd.f32 %v2110_v32, %v1821_v30  ;;  %v600_v30 = vld [vmem:[#allocation2 + $0x90] sm:$0xff] }
 0x212   : > { %v1823_v34 = vpop.f32.mrf.mxu0  ;;  %v2112_v35 = vpop.f32.mrf.mxu1 }
 0x213   : > { %v2257_v36 = vadd.f32 %v2111_v33, %v591_v31 }
 0x214   : > { %v1824_v37 = vpop.f32.mrf.mxu0  ;;  %v2113_v39 = vpop.f32.mrf.mxu1 }
 0x215   : > { %2321 = vst [vmem:[#allocation2 + $0x40] sm:$0xff] %v2257_v36  ;;  %v2114_v40 = vadd.f32 %v2113_v39, %v1824_v37  ;;  %v601_v37 = vld [vmem:[#allocation2 + $0x1d8] sm:$0xff] }
 0x216   : > { %v1826_v41 = vpop.f32.mrf.mxu0  ;;  %v2115_v42 = vpop.f32.mrf.mxu1 }
 0x217   : > { %v2258_v43 = vadd.f32 %v2114_v40, %v592_v38 }
 0x218   : > { %v1829_v44 = vpop.f32.mrf.mxu0  ;;  %v2118_v46 = vpop.f32.mrf.mxu1 }
 0x219   : > { %2322 = vst [vmem:[#allocation2 + $0x1f8] sm:$0xff] %v2258_v43  ;;  %v2119_v47 = vadd.f32 %v2118_v46, %v1829_v44  ;;  %v602_v44 = vld [vmem:[#allocation2 + $0xd0] sm:$0xff] }
 0x21a   : > { %v1831_v48 = vpop.f32.mrf.mxu0  ;;  %v2120_v49 = vpop.f32.mrf.mxu1 }
 0x21b   : > { %v2259_v50 = vadd.f32 %v2119_v47, %v593_v45 }
 0x21c   : > { %v1832_v51 = vpop.f32.mrf.mxu0  ;;  %v2121_v53 = vpop.f32.mrf.mxu1 }
 0x21d   : > { %2323 = vst [vmem:[#allocation2 + $0x20] sm:$0xff] %v2259_v50  ;;  %v2122_v54 = vadd.f32 %v2121_v53, %v1832_v51  ;;  %v603_v51 = vld [vmem:[#allocation2 + $0xb8] sm:$0xff] }
 0x21e   : > { %v1834_v55 = vpop.f32.mrf.mxu0  ;;  %v2123_v56 = vpop.f32.mrf.mxu1 }
 0x21f   : > { %v2260_v57 = vadd.f32 %v2122_v54, %v594_v52 }
 0x220   : > { %v1837_v58 = vpop.f32.mrf.mxu0  ;;  %v2126_v60 = vpop.f32.mrf.mxu1 }
 0x221   : > { %2324 = vst [vmem:[#allocation2 + $0x128] sm:$0xff] %v2260_v57  ;;  %v2127_v61 = vadd.f32 %v2126_v60, %v1837_v58  ;;  %v604_v58 = vld [vmem:[#allocation2 + $0x88] sm:$0xff] }
 0x222   : > { %v1839_v62 = vpop.f32.mrf.mxu0  ;;  %v2128_v63 = vpop.f32.mrf.mxu1 }
 0x223   : > { %v2261_v0 = vadd.f32 %v2127_v61, %v595_v59 }
 0x224   : > { %v1840_v1 = vpop.f32.mrf.mxu0  ;;  %v2129_v3 = vpop.f32.mrf.mxu1 }
 0x225   : > { %2325 = vst [vmem:[#allocation2 + $0x1a0] sm:$0xff] %v2261_v0  ;;  %v2130_v4 = vadd.f32 %v2129_v3, %v1840_v1  ;;  %v605_v1 = vld [vmem:[#allocation2 + $0xa8] sm:$0xff] }
 0x226   : > { %v1842_v5 = vpop.f32.mrf.mxu0  ;;  %v2131_v6 = vpop.f32.mrf.mxu1 }
 0x227   : > { %v2262_v7 = vadd.f32 %v2130_v4, %v596_v2 }
 0x228   : > { %v1845_v8 = vpop.f32.mrf.mxu0  ;;  %v2134_v10 = vpop.f32.mrf.mxu1 }
 0x229   : > { %2326 = vst [vmem:[#allocation2 + $0x1f0] sm:$0xff] %v2262_v7  ;;  %v2135_v11 = vadd.f32 %v2134_v10, %v1845_v8  ;;  %v606_v8 = vld [vmem:[#allocation2 + $0x1c8] sm:$0xff] }
 0x22a   : > { %v1847_v12 = vpop.f32.mrf.mxu0  ;;  %v2136_v13 = vpop.f32.mrf.mxu1 }
 0x22b   : > { %v2263_v14 = vadd.f32 %v2135_v11, %v597_v9 }
 0x22c   : > { %v1848_v15 = vpop.f32.mrf.mxu0  ;;  %v2137_v17 = vpop.f32.mrf.mxu1 }
 0x22d   : > { %2327 = vst [vmem:[#allocation2 + $0xe8] sm:$0xff] %v2263_v14  ;;  %v2138_v18 = vadd.f32 %v2137_v17, %v1848_v15  ;;  %v607_v15 = vld [vmem:[#allocation2 + $0x170] sm:$0xff] }
 0x22e   : > { %v1850_v19 = vpop.f32.mrf.mxu0  ;;  %v2139_v20 = vpop.f32.mrf.mxu1 }
 0x22f   : > { %v2264_v21 = vadd.f32 %v2138_v18, %v598_v16 }
 0x230   : > { %v1853_v22 = vpop.f32.mrf.mxu0  ;;  %v2142_v24 = vpop.f32.mrf.mxu1 }
 0x231   : > { %2328 = vst [vmem:[#allocation2 + $0x78] sm:$0xff] %v2264_v21  ;;  %v2143_v25 = vadd.f32 %v2142_v24, %v1853_v22  ;;  %v608_v22 = vld [vmem:[#allocation2 + $0x178] sm:$0xff] }
 0x232   : > { %v1855_v26 = vpop.f32.mrf.mxu0  ;;  %v2144_v27 = vpop.f32.mrf.mxu1 }
 0x233   : > { %v2265_v28 = vadd.f32 %v2143_v25, %v599_v23 }
 0x234   : > { %v1856_v29 = vpop.f32.mrf.mxu0  ;;  %v2145_v31 = vpop.f32.mrf.mxu1 }
 0x235   : > { %2329 = vst [vmem:[#allocation2 + $0x70] sm:$0xff] %v2265_v28  ;;  %v2146_v32 = vadd.f32 %v2145_v31, %v1856_v29  ;;  %v609_v29 = vld [vmem:[#allocation2 + $0x68] sm:$0xff] }
 0x236   : > { %v1858_v33 = vpop.f32.mrf.mxu0  ;;  %v2147_v34 = vpop.f32.mrf.mxu1 }
 0x237   : > { %v2266_v35 = vadd.f32 %v2146_v32, %v600_v30 }
 0x238   : > { %v1861_v36 = vpop.f32.mrf.mxu0  ;;  %v2150_v38 = vpop.f32.mrf.mxu1 }
 0x239   : > { %2330 = vst [vmem:[#allocation2 + $0x90] sm:$0xff] %v2266_v35  ;;  %v2151_v39 = vadd.f32 %v2150_v38, %v1861_v36  ;;  %v610_v36 = vld [vmem:[#allocation2 + $0x190] sm:$0xff] }
 0x23a   : > { %v1863_v40 = vpop.f32.mrf.mxu0  ;;  %v2152_v41 = vpop.f32.mrf.mxu1 }
 0x23b   : > { %v2267_v42 = vadd.f32 %v2151_v39, %v601_v37 }
 0x23c   : > { %v1864_v43 = vpop.f32.mrf.mxu0  ;;  %v2153_v45 = vpop.f32.mrf.mxu1 }
 0x23d   : > { %2331 = vst [vmem:[#allocation2 + $0x1d8] sm:$0xff] %v2267_v42  ;;  %v2154_v46 = vadd.f32 %v2153_v45, %v1864_v43  ;;  %v611_v43 = vld [vmem:[#allocation2 + $0x198] sm:$0xff] }
 0x23e   : > { %v1866_v47 = vpop.f32.mrf.mxu0  ;;  %v2155_v48 = vpop.f32.mrf.mxu1 }
 0x23f   : > { %v2268_v49 = vadd.f32 %v2154_v46, %v602_v44 }
 0x240   : > { %v1869_v50 = vpop.f32.mrf.mxu0  ;;  %v2158_v52 = vpop.f32.mrf.mxu1 }
 0x241   : > { %2332 = vst [vmem:[#allocation2 + $0xd0] sm:$0xff] %v2268_v49  ;;  %v2159_v53 = vadd.f32 %v2158_v52, %v1869_v50  ;;  %v612_v50 = vld [vmem:[#allocation2 + $0x38] sm:$0xff] }
 0x242   : > { %v1871_v54 = vpop.f32.mrf.mxu0  ;;  %v2160_v55 = vpop.f32.mrf.mxu1 }
 0x243   : > { %v2269_v56 = vadd.f32 %v2159_v53, %v603_v51 }
 0x244   : > { %v1872_v57 = vpop.f32.mrf.mxu0  ;;  %v2161_v59 = vpop.f32.mrf.mxu1 }
 0x245   : > { %2333 = vst [vmem:[#allocation2 + $0xb8] sm:$0xff] %v2269_v56  ;;  %v2162_v60 = vadd.f32 %v2161_v59, %v1872_v57  ;;  %v613_v57 = vld [vmem:[#allocation2 + $0xc0] sm:$0xff] }
 0x246   : > { %v1874_v61 = vpop.f32.mrf.mxu0  ;;  %v2163_v62 = vpop.f32.mrf.mxu1 }
 0x247   : > { %v2270_v63 = vadd.f32 %v2162_v60, %v604_v58 }
 0x248   : > { %v1877_v0 = vpop.f32.mrf.mxu0  ;;  %v2166_v2 = vpop.f32.mrf.mxu1 }
 0x249   : > { %2334 = vst [vmem:[#allocation2 + $0x88] sm:$0xff] %v2270_v63  ;;  %v2167_v3 = vadd.f32 %v2166_v2, %v1877_v0  ;;  %v614_v0 = vld [vmem:[#allocation2 + $0x1c0] sm:$0xff] }
 0x24a   : > { %v1879_v4 = vpop.f32.mrf.mxu0  ;;  %v2168_v5 = vpop.f32.mrf.mxu1 }
 0x24b   : > { %v2271_v6 = vadd.f32 %v2167_v3, %v605_v1 }
 0x24c   : > { %v1880_v7 = vpop.f32.mrf.mxu0  ;;  %v2169_v9 = vpop.f32.mrf.mxu1 }
 0x24d   : > { %2335 = vst [vmem:[#allocation2 + $0xa8] sm:$0xff] %v2271_v6  ;;  %v2170_v10 = vadd.f32 %v2169_v9, %v1880_v7  ;;  %v615_v7 = vld [vmem:[#allocation2 + $0x158] sm:$0xff] }
 0x24e   : > { %v1882_v11 = vpop.f32.mrf.mxu0  ;;  %v2171_v12 = vpop.f32.mrf.mxu1 }
 0x24f   : > { %v2272_v13 = vadd.f32 %v2170_v10, %v606_v8 }
 0x250   : > { %v1885_v14 = vpop.f32.mrf.mxu0  ;;  %v2174_v16 = vpop.f32.mrf.mxu1 }
 0x251   : > { %2336 = vst [vmem:[#allocation2 + $0x1c8] sm:$0xff] %v2272_v13  ;;  %v2175_v17 = vadd.f32 %v2174_v16, %v1885_v14  ;;  %v616_v14 = vld [vmem:[#allocation2 + $0x10] sm:$0xff] }
 0x252   : > { %v1887_v18 = vpop.f32.mrf.mxu0  ;;  %v2176_v19 = vpop.f32.mrf.mxu1 }
 0x253   : > { %v2273_v20 = vadd.f32 %v2175_v17, %v607_v15 }
 0x254   : > { %v1888_v21 = vpop.f32.mrf.mxu0  ;;  %v2177_v23 = vpop.f32.mrf.mxu1 }
 0x255   : > { %2337 = vst [vmem:[#allocation2 + $0x170] sm:$0xff] %v2273_v20  ;;  %v2178_v24 = vadd.f32 %v2177_v23, %v1888_v21  ;;  %v617_v21 = vld [vmem:[#allocation2 + $0x58] sm:$0xff] }
 0x256   : > { %v1890_v25 = vpop.f32.mrf.mxu0  ;;  %v2179_v26 = vpop.f32.mrf.mxu1 }
 0x257   : > { %v2274_v27 = vadd.f32 %v2178_v24, %v608_v22 }
 0x258   : > { %v1893_v28 = vpop.f32.mrf.mxu0  ;;  %v2182_v30 = vpop.f32.mrf.mxu1 }
 0x259   : > { %2338 = vst [vmem:[#allocation2 + $0x178] sm:$0xff] %v2274_v27  ;;  %v2183_v31 = vadd.f32 %v2182_v30, %v1893_v28  ;;  %v618_v28 = vld [vmem:[#allocation2 + $0xa0] sm:$0xff] }
 0x25a   : > { %v1895_v32 = vpop.f32.mrf.mxu0  ;;  %v2184_v33 = vpop.f32.mrf.mxu1 }
 0x25b   : > { %v2275_v34 = vadd.f32 %v2183_v31, %v609_v29 }
 0x25c   : > { %v1896_v35 = vpop.f32.mrf.mxu0  ;;  %v2185_v37 = vpop.f32.mrf.mxu1 }
 0x25d   : > { %2339 = vst [vmem:[#allocation2 + $0x68] sm:$0xff] %v2275_v34  ;;  %v2186_v38 = vadd.f32 %v2185_v37, %v1896_v35 }
 0x25e   : > { %v1898_v39 = vpop.f32.mrf.mxu0  ;;  %v2187_v40 = vpop.f32.mrf.mxu1 }
 0x25f   : > { %v2276_v41 = vadd.f32 %v2186_v38, %v610_v36 }
 0x260   : > { %v1901_v42 = vpop.f32.mrf.mxu0  ;;  %v2190_v44 = vpop.f32.mrf.mxu1 }
 0x261   : > { %2340 = vst [vmem:[#allocation2 + $0x190] sm:$0xff] %v2276_v41  ;;  %v2191_v45 = vadd.f32 %v2190_v44, %v1901_v42 }
 0x262   : > { %v1903_v46 = vpop.f32.mrf.mxu0  ;;  %v2192_v47 = vpop.f32.mrf.mxu1 }
 0x263   : > { %v2277_v48 = vadd.f32 %v2191_v45, %v611_v43 }
 0x264   : > { %v1904_v49 = vpop.f32.mrf.mxu0  ;;  %v2193_v51 = vpop.f32.mrf.mxu1 }
 0x265   : > { %2341 = vst [vmem:[#allocation2 + $0x198] sm:$0xff] %v2277_v48  ;;  %v2194_v52 = vadd.f32 %v2193_v51, %v1904_v49 }
 0x266   : > { %v1906_v53 = vpop.f32.mrf.mxu0  ;;  %v2195_v54 = vpop.f32.mrf.mxu1 }
 0x267   : > { %v2278_v55 = vadd.f32 %v2194_v52, %v612_v50 }
 0x268   : > { %v1909_v56 = vpop.f32.mrf.mxu0  ;;  %v2198_v58 = vpop.f32.mrf.mxu1 }
 0x269   : > { %2342 = vst [vmem:[#allocation2 + $0x38] sm:$0xff] %v2278_v55  ;;  %v2199_v59 = vadd.f32 %v2198_v58, %v1909_v56 }
 0x26a   : > { %v1911_v60 = vpop.f32.mrf.mxu0  ;;  %v2200_v61 = vpop.f32.mrf.mxu1 }
 0x26b   : > { %v2279_v62 = vadd.f32 %v2199_v59, %v613_v57 }
 0x26c   : > { %v1912_v63 = vpop.f32.mrf.mxu0  ;;  %v2201_v1 = vpop.f32.mrf.mxu1 }
 0x26d   : > { %2343 = vst [vmem:[#allocation2 + $0xc0] sm:$0xff] %v2279_v62  ;;  %v2202_v2 = vadd.f32 %v2201_v1, %v1912_v63 }
 0x26e   : > { %v1914_v3 = vpop.f32.mrf.mxu0  ;;  %v2203_v4 = vpop.f32.mrf.mxu1 }
 0x26f   : > { %v2280_v5 = vadd.f32 %v2202_v2, %v614_v0 }
 0x270   : > { %v1917_v6 = vpop.f32.mrf.mxu0  ;;  %v2206_v8 = vpop.f32.mrf.mxu1 }
 0x271   : > { %2344 = vst [vmem:[#allocation2 + $0x1c0] sm:$0xff] %v2280_v5  ;;  %v2207_v9 = vadd.f32 %v2206_v8, %v1917_v6 }
 0x272   : > { %v1919_v10 = vpop.f32.mrf.mxu0  ;;  %v2208_v11 = vpop.f32.mrf.mxu1 }
 0x273   : > { %v2281_v12 = vadd.f32 %v2207_v9, %v615_v7 }
 0x274   : > { %v1920_v13 = vpop.f32.mrf.mxu0  ;;  %v2209_v15 = vpop.f32.mrf.mxu1 }
 0x275   : > { %2345 = vst [vmem:[#allocation2 + $0x158] sm:$0xff] %v2281_v12  ;;  %v2210_v16 = vadd.f32 %v2209_v15, %v1920_v13 }
 0x276   : > { %v1922_v17 = vpop.f32.mrf.mxu0  ;;  %v2211_v18 = vpop.f32.mrf.mxu1 }
 0x277   : > { %v2282_v19 = vadd.f32 %v2210_v16, %v616_v14 }
 0x278   : > { %v1925_v20 = vpop.f32.mrf.mxu0  ;;  %v2214_v22 = vpop.f32.mrf.mxu1 }
 0x279   : > { %2346 = vst [vmem:[#allocation2 + $0x10] sm:$0xff] %v2282_v19  ;;  %v2215_v23 = vadd.f32 %v2214_v22, %v1925_v20 }
 0x27a   : > { %v1927_v24 = vpop.f32.mrf.mxu0  ;;  %v2216_v25 = vpop.f32.mrf.mxu1 }
 0x27b   : > { %v2283_v26 = vadd.f32 %v2215_v23, %v617_v21 }
 0x27c   : > { %v1928_v27 = vpop.f32.mrf.mxu0  ;;  %v2217_v29 = vpop.f32.mrf.mxu1 }
 0x27d   : > { %2347 = vst [vmem:[#allocation2 + $0x58] sm:$0xff] %v2283_v26  ;;  %v2218_v30 = vadd.f32 %v2217_v29, %v1928_v27  ;;  %2352 = sbr.rel (%p3199_p11) target bundleno = 704 (0x2c0), region = 59 }
 0x27e   : > { %v1930_v31 = vpop.f32.mrf.mxu0  ;;  %v2219_v32 = vpop.f32.mrf.mxu1 }
 0x27f   : > { %v2284_v33 = vadd.f32 %v2218_v30, %v618_v28 }
 0x281   : > { %2348 = vst [vmem:[#allocation2 + $0xa0] sm:$0xff] %v2284_v33 }
 0x282   : > { %v2353_v34 = vld [vmem:[#allocation2 + $0xb0] sm:$0xff]  ;;  %v2355_v36 = vld [vmem:[#allocation2 + $0xd8] sm:$0xff]  ;;  %v2358_v42 = vld [vmem:[#allocation2 + $0x168] sm:$0xff] }
 0x283   : > { %v2354_v35 = vld [vmem:[#allocation2 + $0x1b0] sm:$0xff]  ;;  %vm2417_vm0 = vcmp.ge.f32.partialorder %v2353_v34, 0.0  ;;  %v2481_v37 = vmul.f32 0.2, %v2353_v34  ;;  %v2356_v39 = vld [vmem:[#allocation2 + $0x18] sm:$0xff]  ;;  %vm2419_vm2 = vcmp.ge.f32.partialorder %v2355_v36, 0.0 }
 0x284   : > { %vm2418_vm1 = vcmp.ge.f32.partialorder %v2354_v35, 0.0  ;;  %v2482_v38 = vmul.f32 0.2, %v2354_v35  ;;  %v2483_v40 = vmul.f32 0.2, %v2355_v36  ;;  %v2357_v41 = vld [vmem:[#allocation2 + $0x50] sm:$0xff] }
 0x285   : > { %v2545_v43 = vsel %vm2417_vm0, %v2353_v34, %v2481_v37  ;;  %vm2420_vm3 = vcmp.ge.f32.partialorder %v2356_v39, 0.0  ;;  %v2484_v45 = vmul.f32 0.2, %v2356_v39  ;;  %v2359_v46 = vld [vmem:[#allocation2 + $0x130] sm:$0xff]  ;;  %v2360_v47 = vld [vmem:[#allocation2 + $0x48] sm:$0xff]  ;;  %vm2421_vm4 = vcmp.ge.f32.partialorder %v2357_v41, 0.0 }
 0x286   : > { %v2546_v44 = vsel %vm2418_vm1, %v2354_v35, %v2482_v38  ;;  %v2547_v49 = vsel %vm2419_vm2, %v2355_v36, %v2483_v40  ;;  %vm2422_vm5 = vcmp.ge.f32.partialorder %v2358_v42, 0.0  ;;  %v2361_v50 = vld [vmem:[#allocation2 + $0x180] sm:$0xff]  ;;  %v2362_v51 = vld [vmem:[#allocation2 + $0x110] sm:$0xff]  ;;  %v2485_v53 = vmul.f32 0.2, %v2357_v41  ;;  %v2363_v55 = vld [vmem:[#allocation2 + $0x118] sm:$0xff] }
 0x287   : > { %v3336_v48 = vpack.c.bf16 %v2546_v44, %v2545_v43  ;;  %v2548_v52 = vsel %vm2420_vm3, %v2356_v39, %v2484_v45  ;;  %v2486_v54 = vmul.f32 0.2, %v2358_v42  ;;  %vm2423_vm6 = vcmp.ge.f32.partialorder %v2359_v46, 0.0  ;;  %v2364_v59 = vld [vmem:[#allocation2 + $0x98] sm:$0xff]  ;;  %v2365_v62 = vld [vmem:[#allocation2 + $0x120] sm:$0xff]  ;;  %v2366_v3 = vld [vmem:[#allocation2 + $0x150] sm:$0xff] }
 0x288   : > { %v3341_v56 = vpack.c.bf16 %v2548_v52, %v2547_v49  ;;  %vm2424_vm7 = vcmp.ge.f32.partialorder %v2360_v47, 0.0  ;;  %v2487_v57 = vmul.f32 0.2, %v2359_v46  ;;  %v2488_v58 = vmul.f32 0.2, %v2360_v47  ;;  %v2367_v6 = vld [vmem:[#allocation2 + $0x108] sm:$0xff] }
 0x289   : > { %3337 = vst [vmem:[%s4554_s2] sm:$0xff] %v3336_v48   ;;  %v2549_v60 = vsel %vm2421_vm4, %v2357_v41, %v2485_v53  ;;  %v2550_v61 = vsel %vm2422_vm5, %v2358_v42, %v2486_v54  ;;  %vm2425_vm8 = vcmp.ge.f32.partialorder %v2361_v50, 0.0  ;;  %vm2426_vm9 = vcmp.ge.f32.partialorder %v2362_v51, 0.0  ;;  %v2368_v10 = vld [vmem:[#allocation2 + $0x60] sm:$0xff]  ;;  %v2370_v18 = vld [vmem:[#allocation2 + $0x188] sm:$0xff]  ;;  %v2371_v19 = vld [vmem:[#allocation2 + $0x138] sm:$0xff] }
 0x28a   : > { %3493 = vst [vmem:[%s4554_s2 + $0x8] sm:$0xff] %v3341_v56   ;;  %v3346_v63 = vpack.c.bf16 %v2550_v61, %v2549_v60  ;;  %v2551_v0 = vsel %vm2423_vm6, %v2359_v46, %v2487_v57  ;;  %v2552_v1 = vsel %vm2424_vm7, %v2360_v47, %v2488_v58  ;;  %v2489_v2 = vmul.f32 0.2, %v2361_v50  ;;  %v2369_v14 = vld [vmem:[#allocation2 + $0xe0] sm:$0xff]  ;;  %v2374_v28 = vld [vmem:[#allocation2 + $0x1a8] sm:$0xff]  ;;  %v2375_v34 = vld [vmem:[#allocation2 + $0x1b8] sm:$0xff] }
 0x28b   : > { %v3351_v4 = vpack.c.bf16 %v2552_v1, %v2551_v0  ;;  %v2490_v5 = vmul.f32 0.2, %v2362_v51  ;;  %vm2427_vm10 = vcmp.ge.f32.partialorder %v2363_v55, 0.0  ;;  %vm2428_vm11 = vcmp.ge.f32.partialorder %v2364_v59, 0.0  ;;  %v2372_v23 = vld [vmem:[#allocation2 + $0x140] sm:$0xff]  ;;  %v2376_v39 = vld [vmem:[#allocation2 + $0x28] sm:$0xff] }
 0x28c   : > { %3494 = vst [vmem:[%s4554_s2 + $0x10] sm:$0xff] %v3346_v63   ;;  %v2553_v7 = vsel %vm2425_vm8, %v2361_v50, %v2489_v2  ;;  %v2491_v8 = vmul.f32 0.2, %v2363_v55  ;;  %v2492_v9 = vmul.f32 0.2, %v2364_v59  ;;  %vm2429_vm12 = vcmp.ge.f32.partialorder %v2365_v62, 0.0 }
 0x28d   : > { %3495 = vst [vmem:[%s4554_s2 + $0x18] sm:$0xff] %v3351_v4   ;;  %v2554_v11 = vsel %vm2426_vm9, %v2362_v51, %v2490_v5  ;;  %vm2430_vm13 = vcmp.ge.f32.partialorder %v2366_v3, 0.0  ;;  %v2493_v12 = vmul.f32 0.2, %v2365_v62  ;;  %v2494_v13 = vmul.f32 0.2, %v2366_v3 }
 0x28e   : > { %v3356_v15 = vpack.c.bf16 %v2554_v11, %v2553_v7  ;;  %v2555_v16 = vsel %vm2427_vm10, %v2363_v55, %v2491_v8  ;;  %v2556_v17 = vsel %vm2428_vm11, %v2364_v59, %v2492_v9  ;;  %vm2431_vm14 = vcmp.ge.f32.partialorder %v2367_v6, 0.0  ;;  %v2373_v24 = vld [vmem:[#allocation2 + $0x80] sm:$0xff]  ;;  %v2377_v42 = vld [vmem:[#allocation2 + $0x1e8] sm:$0xff]  ;;  %v2378_v43 = vld [vmem:[#allocation2 + $0xf8] sm:$0xff] }
 0x28f   : > { %v3361_v20 = vpack.c.bf16 %v2556_v17, %v2555_v16  ;;  %v2557_v21 = vsel %vm2429_vm12, %v2365_v62, %v2493_v12  ;;  %v2558_v22 = vsel %vm2430_vm13, %v2366_v3, %v2494_v13  ;;  %vm2432_vm15 = vcmp.ge.f32.partialorder %v2368_v10, 0.0  ;;  %v2379_v47 = vld [vmem:[#allocation2 + $0x160] sm:$0xff]  ;;  %v2380_v51 = vld [vmem:[#allocation2 + $0x30] sm:$0xff]  ;;  %v2384_v2 = vld [vmem:[#allocation2 + $0x8] sm:$0xff] }
 0x290   : > { %3496 = vst [vmem:[%s4554_s2 + $0x20] sm:$0xff] %v3356_v15   ;;  %v3366_v25 = vpack.c.bf16 %v2558_v22, %v2557_v21  ;;  %v2495_v26 = vmul.f32 0.2, %v2367_v6  ;;  %v2496_v27 = vmul.f32 0.2, %v2368_v10  ;;  %vm2433_vm0 = vcmp.ge.f32.partialorder %v2369_v14, 0.0 }
 0x291   : > { %3497 = vst [vmem:[%s4554_s2 + $0x28] sm:$0xff] %v3361_v20   ;;  %vm2434_vm1 = vcmp.ge.f32.partialorder %v2370_v18, 0.0  ;;  %v2497_v29 = vmul.f32 0.2, %v2369_v14  ;;  %v2498_v30 = vmul.f32 0.2, %v2370_v18 }
 0x292   : > { %vm2435_vm2 = vcmp.ge.f32.partialorder %v2371_v19, 0.0  ;;  %3498 = vst [vmem:[%s4554_s2 + $0x30] sm:$0xff] %v3366_v25   ;;  %v2559_v31 = vsel %vm2431_vm14, %v2367_v6, %v2495_v26  ;;  %v2560_v32 = vsel %vm2432_vm15, %v2368_v10, %v2496_v27  ;;  %vm2436_vm3 = vcmp.ge.f32.partialorder %v2372_v23, 0.0  ;;  %v2381_v54 = vld [vmem:[#allocation2 + $0x1e0] sm:$0xff]  ;;  %v2383_v62 = vld [vmem:[#allocation2 + $0xf0] sm:$0xff]  ;;  %v2385_v6 = vld [vmem:[#allocation2 + $0x148] sm:$0xff] }
 0x293   : > { %v2499_v33 = vmul.f32 0.2, %v2371_v19  ;;  %v3371_v35 = vpack.c.bf16 %v2560_v32, %v2559_v31  ;;  %v2561_v36 = vsel %vm2433_vm0, %v2369_v14, %v2497_v29  ;;  %v2562_v37 = vsel %vm2434_vm1, %v2370_v18, %v2498_v30  ;;  %v2382_v59 = vld [vmem:[#allocation2] sm:$0xff]  ;;  %v2386_v10 = vld [vmem:[#allocation2 + $0x1d0] sm:$0xff]  ;;  %v2388_v15 = vld [vmem:[#allocation2 + $0xc8] sm:$0xff] }
 0x294   : > { %v2500_v38 = vmul.f32 0.2, %v2372_v23  ;;  %v3376_v40 = vpack.c.bf16 %v2562_v37, %v2561_v36  ;;  %vm2437_vm4 = vcmp.ge.f32.partialorder %v2373_v24, 0.0  ;;  %vm2438_vm5 = vcmp.ge.f32.partialorder %v2374_v28, 0.0  ;;  %v2387_v11 = vld [vmem:[#allocation2 + $0x100] sm:$0xff]  ;;  %v2390_v20 = vld [vmem:[#allocation2 + $0x1f8] sm:$0xff] }
 0x295   : > { %v2563_v41 = vsel %vm2435_vm2, %v2371_v19, %v2499_v33  ;;  %3499 = vst [vmem:[%s4554_s2 + $0x38] sm:$0xff] %v3371_v35   ;;  %v2501_v45 = vmul.f32 0.2, %v2373_v24  ;;  %v2502_v46 = vmul.f32 0.2, %v2374_v28  ;;  %vm2439_vm6 = vcmp.ge.f32.partialorder %v2375_v34, 0.0 }
 0x296   : > { %v2564_v44 = vsel %vm2436_vm3, %v2372_v23, %v2500_v38  ;;  %3500 = vst [vmem:[%s4554_s2 + $0x40] sm:$0xff] %v3376_v40   ;;  %vm2440_vm7 = vcmp.ge.f32.partialorder %v2376_v39, 0.0  ;;  %v2503_v49 = vmul.f32 0.2, %v2375_v34  ;;  %v2504_v50 = vmul.f32 0.2, %v2376_v39 }
 0x297   : > { %v3381_v48 = vpack.c.bf16 %v2564_v44, %v2563_v41  ;;  %v2565_v52 = vsel %vm2437_vm4, %v2373_v24, %v2501_v45  ;;  %v2566_v53 = vsel %vm2438_vm5, %v2374_v28, %v2502_v46  ;;  %vm2441_vm8 = vcmp.ge.f32.partialorder %v2377_v42, 0.0  ;;  %v2389_v16 = vld [vmem:[#allocation2 + $0x40] sm:$0xff]  ;;  %v2392_v31 = vld [vmem:[#allocation2 + $0x128] sm:$0xff]  ;;  %v2394_v35 = vld [vmem:[#allocation2 + $0x1f0] sm:$0xff] }
 0x298   : > { %vm2442_vm9 = vcmp.ge.f32.partialorder %v2378_v43, 0.0  ;;  %v3386_v55 = vpack.c.bf16 %v2566_v53, %v2565_v52  ;;  %v2567_v56 = vsel %vm2439_vm6, %v2375_v34, %v2503_v49  ;;  %v2568_v57 = vsel %vm2440_vm7, %v2376_v39, %v2504_v50  ;;  %v2391_v26 = vld [vmem:[#allocation2 + $0x20] sm:$0xff]  ;;  %v2395_v39 = vld [vmem:[#allocation2 + $0xe8] sm:$0xff]  ;;  %v2397_v46 = vld [vmem:[#allocation2 + $0x70] sm:$0xff] }
 0x299   : > { %3501 = vst [vmem:[%s4554_s2 + $0x48] sm:$0xff] %v3381_v48   ;;  %v2505_v58 = vmul.f32 0.2, %v2377_v42  ;;  %v3391_v60 = vpack.c.bf16 %v2568_v57, %v2567_v56  ;;  %v2506_v61 = vmul.f32 0.2, %v2378_v43  ;;  %vm2443_vm10 = vcmp.ge.f32.partialorder %v2379_v47, 0.0 }
 0x29a   : > { %vm2444_vm11 = vcmp.ge.f32.partialorder %v2380_v51, 0.0  ;;  %3502 = vst [vmem:[%s4554_s2 + $0x50] sm:$0xff] %v3386_v55   ;;  %v2507_v0 = vmul.f32 0.2, %v2379_v47  ;;  %v2508_v1 = vmul.f32 0.2, %v2380_v51 }
 0x29b   : > { %v2569_v63 = vsel %vm2441_vm8, %v2377_v42, %v2505_v58  ;;  %vm2445_vm12 = vcmp.ge.f32.partialorder %v2381_v54, 0.0  ;;  %3503 = vst [vmem:[%s4554_s2 + $0x58] sm:$0xff] %v3391_v60   ;;  %v2570_v3 = vsel %vm2442_vm9, %v2378_v43, %v2506_v61  ;;  %vm2446_vm13 = vcmp.ge.f32.partialorder %v2382_v59, 0.0  ;;  %v2393_v34 = vld [vmem:[#allocation2 + $0x1a0] sm:$0xff]  ;;  %v2396_v43 = vld [vmem:[#allocation2 + $0x78] sm:$0xff]  ;;  %v2400_v58 = vld [vmem:[#allocation2 + $0xd0] sm:$0xff] }
 0x29c   : > { %v2509_v4 = vmul.f32 0.2, %v2381_v54  ;;  %v2510_v5 = vmul.f32 0.2, %v2382_v59  ;;  %v3396_v7 = vpack.c.bf16 %v2570_v3, %v2569_v63  ;;  %v2571_v8 = vsel %vm2443_vm10, %v2379_v47, %v2507_v0  ;;  %v2403_v3 = vld [vmem:[#allocation2 + $0xa8] sm:$0xff] }
 0x29d   : > { %v2572_v9 = vsel %vm2444_vm11, %v2380_v51, %v2508_v1  ;;  %vm2447_vm14 = vcmp.ge.f32.partialorder %v2383_v62, 0.0  ;;  %vm2448_vm15 = vcmp.ge.f32.partialorder %v2384_v2, 0.0  ;;  %v2511_v18 = vmul.f32 0.2, %v2383_v62  ;;  %v2398_v51 = vld [vmem:[#allocation2 + $0x90] sm:$0xff] }
 0x29e   : > { %v3401_v12 = vpack.c.bf16 %v2572_v9, %v2571_v8  ;;  %v2573_v13 = vsel %vm2445_vm12, %v2381_v54, %v2509_v4  ;;  %v2574_v14 = vsel %vm2446_vm13, %v2382_v59, %v2510_v5  ;;  %3504 = vst [vmem:[%s4554_s2 + $0x60] sm:$0xff] %v3396_v7   ;;  %v2512_v19 = vmul.f32 0.2, %v2384_v2  ;;  %v2399_v54 = vld [vmem:[#allocation2 + $0x1d8] sm:$0xff]  ;;  %v2404_v7 = vld [vmem:[#allocation2 + $0x1c8] sm:$0xff]  ;;  %v2405_v8 = vld [vmem:[#allocation2 + $0x170] sm:$0xff] }
 0x29f   : > { %v3406_v17 = vpack.c.bf16 %v2574_v14, %v2573_v13  ;;  %vm2449_vm0 = vcmp.ge.f32.partialorder %v2385_v6, 0.0  ;;  %vm2450_vm1 = vcmp.ge.f32.partialorder %v2386_v10, 0.0  ;;  %v2513_v21 = vmul.f32 0.2, %v2385_v6 }
 0x2a0   : > { %3505 = vst [vmem:[%s4554_s2 + $0x68] sm:$0xff] %v3401_v12   ;;  %v2514_v22 = vmul.f32 0.2, %v2386_v10  ;;  %vm2451_vm2 = vcmp.ge.f32.partialorder %v2387_v11, 0.0  ;;  %v2575_v23 = vsel %vm2447_vm14, %v2383_v62, %v2511_v18  ;;  %v2576_v24 = vsel %vm2448_vm15, %v2384_v2, %v2512_v19  ;;  %v2401_v62 = vld [vmem:[#allocation2 + $0xb8] sm:$0xff]  ;;  %v2402_v2 = vld [vmem:[#allocation2 + $0x88] sm:$0xff] }
 0x2a1   : > { %3506 = vst [vmem:[%s4554_s2 + $0x70] sm:$0xff] %v3406_v17   ;;  %vm2452_vm3 = vcmp.ge.f32.partialorder %v2388_v15, 0.0  ;;  %v2515_v25 = vmul.f32 0.2, %v2387_v11  ;;  %v3411_v27 = vpack.c.bf16 %v2576_v24, %v2575_v23  ;;  %v2577_v28 = vsel %vm2449_vm0, %v2385_v6, %v2513_v21  ;;  %v2406_v12 = vld [vmem:[#allocation2 + $0x178] sm:$0xff]  ;;  %v2407_v18 = vld [vmem:[#allocation2 + $0x68] sm:$0xff] }
 0x2a2   : > { %v2578_v29 = vsel %vm2450_vm1, %v2386_v10, %v2514_v22  ;;  %v2516_v30 = vmul.f32 0.2, %v2388_v15  ;;  %vm2453_vm4 = vcmp.ge.f32.partialorder %v2389_v16, 0.0  ;;  %vm2454_vm5 = vcmp.ge.f32.partialorder %v2390_v20, 0.0  ;;  %v2408_v23 = vld [vmem:[#allocation2 + $0x190] sm:$0xff] }
 0x2a3   : > { %v3416_v32 = vpack.c.bf16 %v2578_v29, %v2577_v28  ;;  %v2579_v33 = vsel %vm2451_vm2, %v2387_v11, %v2515_v25  ;;  %3507 = vst [vmem:[%s4554_s2 + $0x78] sm:$0xff] %v3411_v27   ;;  %v2517_v37 = vmul.f32 0.2, %v2389_v16  ;;  %v2518_v38 = vmul.f32 0.2, %v2390_v20  ;;  %v2410_v27 = vld [vmem:[#allocation2 + $0x38] sm:$0xff] }
 0x2a4   : > { %v2580_v36 = vsel %vm2452_vm3, %v2388_v15, %v2516_v30  ;;  %vm2455_vm6 = vcmp.ge.f32.partialorder %v2391_v26, 0.0  ;;  %vm2456_vm7 = vcmp.ge.f32.partialorder %v2392_v31, 0.0  ;;  %v2519_v41 = vmul.f32 0.2, %v2391_v26 }
 0x2a5   : > { %3508 = vst [vmem:[%s4554_s2 + $0x80] sm:$0xff] %v3416_v32   ;;  %v3421_v40 = vpack.c.bf16 %v2580_v36, %v2579_v33  ;;  %v2520_v42 = vmul.f32 0.2, %v2392_v31  ;;  %v2581_v44 = vsel %vm2453_vm4, %v2389_v16, %v2517_v37  ;;  %v2582_v45 = vsel %vm2454_vm5, %v2390_v20, %v2518_v38  ;;  %v2413_v38 = vld [vmem:[#allocation2 + $0x158] sm:$0xff] }
 0x2a6   : > { %vm2457_vm8 = vcmp.ge.f32.partialorder %v2393_v34, 0.0  ;;  %vm2458_vm9 = vcmp.ge.f32.partialorder %v2394_v35, 0.0  ;;  %v3426_v47 = vpack.c.bf16 %v2582_v45, %v2581_v44  ;;  %v2583_v48 = vsel %vm2455_vm6, %v2391_v26, %v2519_v41  ;;  %v2409_v26 = vld [vmem:[#allocation2 + $0x198] sm:$0xff] }
 0x2a7   : > { %3509 = vst [vmem:[%s4554_s2 + $0x88] sm:$0xff] %v3421_v40   ;;  %v2584_v49 = vsel %vm2456_vm7, %v2392_v31, %v2520_v42  ;;  %v2521_v50 = vmul.f32 0.2, %v2393_v34  ;;  %v2522_v53 = vmul.f32 0.2, %v2394_v35  ;;  %vm2459_vm10 = vcmp.ge.f32.partialorder %v2395_v39, 0.0 }
 0x2a8   : > { %v3431_v52 = vpack.c.bf16 %v2584_v49, %v2583_v48  ;;  %vm2460_vm11 = vcmp.ge.f32.partialorder %v2396_v43, 0.0  ;;  %3510 = vst [vmem:[%s4554_s2 + $0x90] sm:$0xff] %v3426_v47   ;;  %v2523_v56 = vmul.f32 0.2, %v2395_v39  ;;  %v2524_v57 = vmul.f32 0.2, %v2396_v43 }
 0x2a9   : > { %v2585_v55 = vsel %vm2457_vm8, %v2393_v34, %v2521_v50  ;;  %vm2461_vm12 = vcmp.ge.f32.partialorder %v2397_v46, 0.0  ;;  %v2586_v59 = vsel %vm2458_vm9, %v2394_v35, %v2522_v53  ;;  %vm2462_vm13 = vcmp.ge.f32.partialorder %v2398_v51, 0.0  ;;  %v2411_v31 = vld [vmem:[#allocation2 + $0xc0] sm:$0xff] }
 0x2aa   : > { %3511 = vst [vmem:[%s4554_s2 + $0x98] sm:$0xff] %v3431_v52   ;;  %v2525_v60 = vmul.f32 0.2, %v2397_v46  ;;  %v2526_v61 = vmul.f32 0.2, %v2398_v51  ;;  %v3436_v63 = vpack.c.bf16 %v2586_v59, %v2585_v55  ;;  %v2587_v0 = vsel %vm2459_vm10, %v2395_v39, %v2523_v56  ;;  %v2412_v35 = vld [vmem:[#allocation2 + $0x1c0] sm:$0xff] }
 0x2ab   : > { %v2588_v1 = vsel %vm2460_vm11, %v2396_v43, %v2524_v57  ;;  %vm2463_vm14 = vcmp.ge.f32.partialorder %v2399_v54, 0.0  ;;  %vm2464_vm15 = vcmp.ge.f32.partialorder %v2400_v58, 0.0  ;;  %v2527_v10 = vmul.f32 0.2, %v2399_v54  ;;  %v2414_v43 = vld [vmem:[#allocation2 + $0x10] sm:$0xff]  ;;  %v2416_v50 = vld [vmem:[#allocation2 + $0xa0] sm:$0xff] }
 0x2ac   : > { %v3441_v4 = vpack.c.bf16 %v2588_v1, %v2587_v0  ;;  %v2589_v5 = vsel %vm2461_vm12, %v2397_v46, %v2525_v60  ;;  %v2590_v6 = vsel %vm2462_vm13, %v2398_v51, %v2526_v61  ;;  %3512 = vst [vmem:[%s4554_s2 + $0xa0] sm:$0xff] %v3436_v63   ;;  %v2528_v11 = vmul.f32 0.2, %v2400_v58  ;;  %v2415_v46 = vld [vmem:[#allocation2 + $0x58] sm:$0xff] }
 0x2ad   : > { %v3446_v9 = vpack.c.bf16 %v2590_v6, %v2589_v5  ;;  %vm2465_vm0 = vcmp.ge.f32.partialorder %v2401_v62, 0.0  ;;  %vm2466_vm1 = vcmp.ge.f32.partialorder %v2402_v2, 0.0  ;;  %v2529_v13 = vmul.f32 0.2, %v2401_v62 }
 0x2ae   : > { %3513 = vst [vmem:[%s4554_s2 + $0xa8] sm:$0xff] %v3441_v4   ;;  %v2530_v14 = vmul.f32 0.2, %v2402_v2  ;;  %vm2467_vm2 = vcmp.ge.f32.partialorder %v2403_v3, 0.0  ;;  %v2591_v15 = vsel %vm2463_vm14, %v2399_v54, %v2527_v10  ;;  %v2592_v16 = vsel %vm2464_vm15, %v2400_v58, %v2528_v11 }
 0x2af   : > { %3514 = vst [vmem:[%s4554_s2 + $0xb0] sm:$0xff] %v3446_v9   ;;  %vm2468_vm3 = vcmp.ge.f32.partialorder %v2404_v7, 0.0  ;;  %v2531_v17 = vmul.f32 0.2, %v2403_v3  ;;  %v3451_v19 = vpack.c.bf16 %v2592_v16, %v2591_v15  ;;  %v2593_v20 = vsel %vm2465_vm0, %v2401_v62, %v2529_v13 }
 0x2b0   : > { %v2594_v21 = vsel %vm2466_vm1, %v2402_v2, %v2530_v14  ;;  %v2532_v22 = vmul.f32 0.2, %v2404_v7  ;;  %vm2469_vm4 = vcmp.ge.f32.partialorder %v2405_v8, 0.0  ;;  %vm2470_vm5 = vcmp.ge.f32.partialorder %v2406_v12, 0.0 }
 0x2b1   : > { %v3456_v24 = vpack.c.bf16 %v2594_v21, %v2593_v20  ;;  %v2595_v25 = vsel %vm2467_vm2, %v2403_v3, %v2531_v17  ;;  %3515 = vst [vmem:[%s4554_s2 + $0xb8] sm:$0xff] %v3451_v19   ;;  %v2533_v29 = vmul.f32 0.2, %v2405_v8  ;;  %v2534_v30 = vmul.f32 0.2, %v2406_v12 }
 0x2b2   : > { %v2596_v28 = vsel %vm2468_vm3, %v2404_v7, %v2532_v22  ;;  %vm2471_vm6 = vcmp.ge.f32.partialorder %v2407_v18, 0.0  ;;  %vm2472_vm7 = vcmp.ge.f32.partialorder %v2408_v23, 0.0  ;;  %v2535_v33 = vmul.f32 0.2, %v2407_v18 }
 0x2b3   : > { %3516 = vst [vmem:[%s4554_s2 + $0xc0] sm:$0xff] %v3456_v24   ;;  %v3461_v32 = vpack.c.bf16 %v2596_v28, %v2595_v25  ;;  %v2536_v34 = vmul.f32 0.2, %v2408_v23  ;;  %v2597_v36 = vsel %vm2469_vm4, %v2405_v8, %v2533_v29  ;;  %v2598_v37 = vsel %vm2470_vm5, %v2406_v12, %v2534_v30 }
 0x2b4   : > { %vm2473_vm8 = vcmp.ge.f32.partialorder %v2409_v26, 0.0  ;;  %vm2474_vm9 = vcmp.ge.f32.partialorder %v2410_v27, 0.0  ;;  %v3466_v39 = vpack.c.bf16 %v2598_v37, %v2597_v36  ;;  %v2599_v40 = vsel %vm2471_vm6, %v2407_v18, %v2535_v33 }
 0x2b5   : > { %3517 = vst [vmem:[%s4554_s2 + $0xc8] sm:$0xff] %v3461_v32   ;;  %v2600_v41 = vsel %vm2472_vm7, %v2408_v23, %v2536_v34  ;;  %v2537_v42 = vmul.f32 0.2, %v2409_v26  ;;  %v2538_v45 = vmul.f32 0.2, %v2410_v27  ;;  %vm2475_vm10 = vcmp.ge.f32.partialorder %v2411_v31, 0.0 }
 0x2b6   : > { %v3471_v44 = vpack.c.bf16 %v2600_v41, %v2599_v40  ;;  %vm2476_vm11 = vcmp.ge.f32.partialorder %v2412_v35, 0.0  ;;  %3518 = vst [vmem:[%s4554_s2 + $0xd0] sm:$0xff] %v3466_v39   ;;  %v2539_v48 = vmul.f32 0.2, %v2411_v31  ;;  %v2540_v49 = vmul.f32 0.2, %v2412_v35 }
 0x2b7   : > { %v2601_v47 = vsel %vm2473_vm8, %v2409_v26, %v2537_v42  ;;  %vm2477_vm12 = vcmp.ge.f32.partialorder %v2413_v38, 0.0  ;;  %v2602_v51 = vsel %vm2474_vm9, %v2410_v27, %v2538_v45  ;;  %vm2478_vm13 = vcmp.ge.f32.partialorder %v2414_v43, 0.0 }
 0x2b8   : > { %3519 = vst [vmem:[%s4554_s2 + $0xd8] sm:$0xff] %v3471_v44   ;;  %v2541_v52 = vmul.f32 0.2, %v2413_v38  ;;  %v2542_v53 = vmul.f32 0.2, %v2414_v43  ;;  %v3476_v54 = vpack.c.bf16 %v2602_v51, %v2601_v47  ;;  %v2603_v55 = vsel %vm2475_vm10, %v2411_v31, %v2539_v48 }
 0x2b9   : > { %v2604_v56 = vsel %vm2476_vm11, %v2412_v35, %v2540_v49  ;;  %vm2479_vm14 = vcmp.ge.f32.partialorder %v2415_v46, 0.0  ;;  %vm2480_vm15 = vcmp.ge.f32.partialorder %v2416_v50, 0.0  ;;  %v2543_v61 = vmul.f32 0.2, %v2415_v46 }
 0x2ba   : > { %v3481_v57 = vpack.c.bf16 %v2604_v56, %v2603_v55  ;;  %v2605_v58 = vsel %vm2477_vm12, %v2413_v38, %v2541_v52  ;;  %v2606_v59 = vsel %vm2478_vm13, %v2414_v43, %v2542_v53  ;;  %3520 = vst [vmem:[%s4554_s2 + $0xe0] sm:$0xff] %v3476_v54   ;;  %v2544_v62 = vmul.f32 0.2, %v2416_v50 }
 0x2bb   : > { %v3486_v60 = vpack.c.bf16 %v2606_v59, %v2605_v58  ;;  %v2607_v63 = vsel %vm2479_vm14, %v2415_v46, %v2543_v61 }
 0x2bc   : > { %3521 = vst [vmem:[%s4554_s2 + $0xe8] sm:$0xff] %v3481_v57   ;;  %v2608_v0 = vsel %vm2480_vm15, %v2416_v50, %v2544_v62 }
 0x2bd   : > { %3522 = vst [vmem:[%s4554_s2 + $0xf0] sm:$0xff] %v3486_v60   ;;  %v3491_v1 = vpack.c.bf16 %v2608_v0, %v2607_v63 }
 0x2bf   : > { %3523 = vst [vmem:[%s4554_s2 + $0xf8] sm:$0xff] %v3491_v1  }
 0x2c0 PF: > { %s12_s13 = sadd.s32 1, %s3828_s13   ;;  %s4555_s9 = smov %s3816_s10 }
 0x2c1   : > { %p9_p12 = scmp.ge.s32.totalorder %s12_s13, 4   ;;  %s4556_s10 = smov %s3882_s17 }
 0x2c2   : > { %s4557_s11 = smov %s3824_s12  ;;  %s4558_s12 = smov %s4560_s14 }
 0x2c3   :  { %11 = sbr.rel (!%p9_p12) target bundleno = 3 (0x3), region = 97 }

// kernel: _lambda_.7
= control target key start
LH: loop header
LB: loop body
LE: loop exit
PB: predicated region body
PF: predicated region fallthrough
CT: control target
= control target key end

     0   :  { %s1984_s9 = smov 0   ;;  %s1986_s10 = smov 0   ;;  %s2275_s0 = inlined_call_operand.vmem [shape: bf16[128,2048], index: 0, kind: input, shape index: {}]   ;;  %s2276_s1 = inlined_call_operand.vmem [shape: bf16[2048,256], index: 1, kind: input, shape index: {}]   ;;  %s2277_s2 = inlined_call_operand.vmem [shape: bf16[128,256], index: 2, kind: output, shape index: {}]  }
   0x1   :  { %s1988_s11 = smov 0   ;;  %s1990_s12 = smov 0  }
   0x2   :  { %s1992_s13 = smov 0  }
   0x3 LB: > { %s24_s14 = sadd.s32 1, %s1962_s12  ;;  %p47_p1 = scmp.ne.s32.totalorder %s1954_s10, %s1950_s9  ;;  %s1966_s13 = sphi %s1992_s13, %s12_s13   ;;  %s1962_s12 = sphi %s1990_s12, %s2281_s12   ;;  %s1958_s11 = sphi %s1988_s11, %s2280_s11   ;;  %s1954_s10 = sphi %s1986_s10, %s2279_s10   ;;  %s1950_s9 = sphi %s1984_s9, %s2278_s9  }
   0x4   : > { %p25_p0 = scmp.ge.s32.totalorder %s24_s14, 4  ;;  %p48_p2 = scmp.eq.s32.totalorder %s1966_s13, 0 }
   0x5   : > { %s40_s16 = sadd.s32 1, %s1954_s10  ;;  %p1598_p5 = scmp.ge.s32.totalorder %s1966_s13, 4 }
   0x6   : > { %s2283_s14 = smov (%p25_p0, %s24_s14), 0  ;;  %p49_p3 = por %p48_p2, %p47_p1 }
   0x7   : > { %s36_s15 = ssub.s32 %s1962_s12, %s2283_s14  ;;  %129 = sbr.rel (%p1598_p5) target bundleno = 32 (0x20), region = 16 }
   0x8   : > { %p38_p4 = scmp.eq.s32.totalorder %s36_s15, 0 }
   0xa   : > { %s2019_s17 = scalar_select %p38_p4, %s1954_s10, %s40_s16  }
   0xc   : > { %132 = sbr.rel (!%p49_p3) target bundleno = 32 (0x20), region = 20  ;;  %s134_s18 = sand.u32 (%p49_p3), 1, %s1954_s10  }
   0xd   : > { %s1725_s19 = sshll.u32 (%p49_p3), %s1962_s12, 4  ;;  %s1599_s20 = sshll.u32 (%p49_p3), %s134_s18, 8 }
   0xe   : > { %s2027_s23 = scalar_lea.vmem (%p49_p3), %s2275_s0, %s1725_s19  ;;  %s2032_s24 = scalar_lea.vmem (%p49_p3), [#allocation3], %s1599_s20 }
   0xf   : > { %v155_v0 = vld [vmem:[%s2027_s23] sm:$0xff] (%p49_p3)  ;;  %v157_v1 = vld [vmem:[%s2027_s23 + $0x8] sm:$0xff] (%p49_p3) }
  0x10   : > { %v159_v2 = vld [vmem:[%s2027_s23 + $0x40] sm:$0xff] (%p49_p3)  ;;  %156 = vst [vmem:[%s2032_s24] sm:$0xff] (%p49_p3), %v155_v0  ;;  %158 = vst [vmem:[%s2032_s24 + $0x8] sm:$0xff] (%p49_p3), %v157_v1  ;;  %v161_v3 = vld [vmem:[%s2027_s23 + $0x48] sm:$0xff] (%p49_p3) }
  0x11   : > { %160 = vst [vmem:[%s2032_s24 + $0x10] sm:$0xff] %v159_v2  ;;  %v163_v4 = vld [vmem:[%s2027_s23 + $0x80] sm:$0xff]  ;;  %v165_v5 = vld [vmem:[%s2027_s23 + $0x88] sm:$0xff]  ;;  %162 = vst [vmem:[%s2032_s24 + $0x18] sm:$0xff] %v161_v3 }
  0x12   : > { %164 = vst [vmem:[%s2032_s24 + $0x20] sm:$0xff] %v163_v4  ;;  %166 = vst [vmem:[%s2032_s24 + $0x28] sm:$0xff] %v165_v5  ;;  %v167_v6 = vld [vmem:[%s2027_s23 + $0xc0] sm:$0xff]  ;;  %v169_v7 = vld [vmem:[%s2027_s23 + $0xc8] sm:$0xff] }
  0x13   : > { %v171_v8 = vld [vmem:[%s2027_s23 + $0x100] sm:$0xff]  ;;  %168 = vst [vmem:[%s2032_s24 + $0x30] sm:$0xff] %v167_v6  ;;  %170 = vst [vmem:[%s2032_s24 + $0x38] sm:$0xff] %v169_v7  ;;  %v173_v9 = vld [vmem:[%s2027_s23 + $0x108] sm:$0xff] }
  0x14   : > { %172 = vst [vmem:[%s2032_s24 + $0x40] sm:$0xff] %v171_v8  ;;  %v175_v10 = vld [vmem:[%s2027_s23 + $0x140] sm:$0xff]  ;;  %v177_v11 = vld [vmem:[%s2027_s23 + $0x148] sm:$0xff]  ;;  %174 = vst [vmem:[%s2032_s24 + $0x48] sm:$0xff] %v173_v9 }
  0x15   : > { %176 = vst [vmem:[%s2032_s24 + $0x50] sm:$0xff] %v175_v10  ;;  %178 = vst [vmem:[%s2032_s24 + $0x58] sm:$0xff] %v177_v11  ;;  %v179_v12 = vld [vmem:[%s2027_s23 + $0x180] sm:$0xff]  ;;  %v181_v13 = vld [vmem:[%s2027_s23 + $0x188] sm:$0xff] }
  0x16   : > { %v183_v14 = vld [vmem:[%s2027_s23 + $0x1c0] sm:$0xff]  ;;  %180 = vst [vmem:[%s2032_s24 + $0x60] sm:$0xff] %v179_v12  ;;  %182 = vst [vmem:[%s2032_s24 + $0x68] sm:$0xff] %v181_v13  ;;  %v185_v15 = vld [vmem:[%s2027_s23 + $0x1c8] sm:$0xff] }
  0x17   : > { %184 = vst [vmem:[%s2032_s24 + $0x70] sm:$0xff] %v183_v14  ;;  %v187_v16 = vld [vmem:[%s2027_s23 + $0x200] sm:$0xff]  ;;  %v189_v17 = vld [vmem:[%s2027_s23 + $0x208] sm:$0xff]  ;;  %186 = vst [vmem:[%s2032_s24 + $0x78] sm:$0xff] %v185_v15 }
  0x18   : > { %188 = vst [vmem:[%s2032_s24 + $0x80] sm:$0xff] %v187_v16  ;;  %190 = vst [vmem:[%s2032_s24 + $0x88] sm:$0xff] %v189_v17  ;;  %v191_v18 = vld [vmem:[%s2027_s23 + $0x240] sm:$0xff]  ;;  %v193_v19 = vld [vmem:[%s2027_s23 + $0x248] sm:$0xff] }
  0x19   : > { %v195_v20 = vld [vmem:[%s2027_s23 + $0x280] sm:$0xff]  ;;  %192 = vst [vmem:[%s2032_s24 + $0x90] sm:$0xff] %v191_v18  ;;  %194 = vst [vmem:[%s2032_s24 + $0x98] sm:$0xff] %v193_v19  ;;  %v197_v21 = vld [vmem:[%s2027_s23 + $0x288] sm:$0xff] }
  0x1a   : > { %196 = vst [vmem:[%s2032_s24 + $0xa0] sm:$0xff] %v195_v20  ;;  %v199_v22 = vld [vmem:[%s2027_s23 + $0x2c0] sm:$0xff]  ;;  %v201_v23 = vld [vmem:[%s2027_s23 + $0x2c8] sm:$0xff]  ;;  %198 = vst [vmem:[%s2032_s24 + $0xa8] sm:$0xff] %v197_v21 }
  0x1b   : > { %200 = vst [vmem:[%s2032_s24 + $0xb0] sm:$0xff] %v199_v22  ;;  %202 = vst [vmem:[%s2032_s24 + $0xb8] sm:$0xff] %v201_v23  ;;  %v203_v24 = vld [vmem:[%s2027_s23 + $0x300] sm:$0xff]  ;;  %v205_v25 = vld [vmem:[%s2027_s23 + $0x308] sm:$0xff] }
  0x1c   : > { %v207_v26 = vld [vmem:[%s2027_s23 + $0x340] sm:$0xff]  ;;  %204 = vst [vmem:[%s2032_s24 + $0xc0] sm:$0xff] %v203_v24  ;;  %206 = vst [vmem:[%s2032_s24 + $0xc8] sm:$0xff] %v205_v25  ;;  %v209_v27 = vld [vmem:[%s2027_s23 + $0x348] sm:$0xff] }
  0x1d   : > { %208 = vst [vmem:[%s2032_s24 + $0xd0] sm:$0xff] %v207_v26  ;;  %v211_v28 = vld [vmem:[%s2027_s23 + $0x380] sm:$0xff]  ;;  %v213_v29 = vld [vmem:[%s2027_s23 + $0x388] sm:$0xff]  ;;  %210 = vst [vmem:[%s2032_s24 + $0xd8] sm:$0xff] %v209_v27 }
  0x1e   : > { %212 = vst [vmem:[%s2032_s24 + $0xe0] sm:$0xff] %v211_v28  ;;  %214 = vst [vmem:[%s2032_s24 + $0xe8] sm:$0xff] %v213_v29  ;;  %v215_v30 = vld [vmem:[%s2027_s23 + $0x3c0] sm:$0xff]  ;;  %v217_v31 = vld [vmem:[%s2027_s23 + $0x3c8] sm:$0xff] }
  0x1f   : > { %216 = vst [vmem:[%s2032_s24 + $0xf0] sm:$0xff] %v215_v30  ;;  %218 = vst [vmem:[%s2032_s24 + $0xf8] sm:$0xff] %v217_v31 }
  0x20 PF: > { %p1602_p6 = scmp.ge.s32.totalorder %s1966_s13, 1  ;;  %p238_p7 = scmp.lt.s32.totalorder %s1966_s13, 5 }
  0x22   : > { %p239_p8 = pnand %p1602_p6, %p238_p7 }
  0x23   : > { %s245_s25 = sand.u32 (!%p239_p8), 1, %s1950_s9   ;;  %s1604_s26 = sshll.u32 (!%p239_p8), %s1958_s11, 6 }
  0x24   : > { %242 = sbr.rel (%p239_p8) target bundleno = 423 (0x1a7), region = 47  ;;  %s1603_s27 = sshll.u32 (!%p239_p8), %s245_s25, 8 }
  0x25   : > { %p285_p9 = scmp.lt.s32.totalorder (!%p239_p8), %s1604_s26, 255  ;;  %s2104_s4 = scalar_lea.vmem (!%p239_p8), [#allocation3], %s1603_s27 }
  0x26   : > { %p1607_p10 = scmp.ne.s32.totalorder (!%p239_p8), %s1958_s11, 0 }
  0x29   : > { %s2285_s26 = smov (!%p285_p9, %s1604_s26), 255  ;;  %310 = sbr.rel (%p1607_p10) target bundleno = 63 (0x3f), region = 55 }
  0x2a   : > { %s1726_s28 = sshll.u32 %s2285_s26, 3 }
  0x2b   : > { %s2102_s3 = scalar_lea.vmem %s2276_s1, %s1726_s28 }
  0x2e   : > { %v1968_v32 = vmov 0.0  }
  0x2f   : > { %311 = vst [vmem:[#allocation2 + $0xb0] sm:$0xff] %v1968_v32  ;;  %312 = vst [vmem:[#allocation2] sm:$0xff] %v1968_v32 }
  0x30   : > { %313 = vst [vmem:[#allocation2 + $0xd8] sm:$0xff] %v1968_v32  ;;  %314 = vst [vmem:[#allocation2 + $0x18] sm:$0xff] %v1968_v32 }
  0x31   : > { %315 = vst [vmem:[#allocation2 + $0x50] sm:$0xff] %v1968_v32  ;;  %316 = vst [vmem:[#allocation2 + $0x68] sm:$0xff] %v1968_v32 }
  0x32   : > { %317 = vst [vmem:[#allocation2 + $0x30] sm:$0xff] %v1968_v32  ;;  %318 = vst [vmem:[#allocation2 + $0x48] sm:$0xff] %v1968_v32 }
  0x33   : > { %319 = vst [vmem:[#allocation2 + $0x80] sm:$0xff] %v1968_v32  ;;  %320 = vst [vmem:[#allocation2 + $0x88] sm:$0xff] %v1968_v32 }
  0x34   : > { %321 = vst [vmem:[#allocation2 + $0xe8] sm:$0xff] %v1968_v32  ;;  %322 = vst [vmem:[#allocation2 + $0xb8] sm:$0xff] %v1968_v32 }
  0x35   : > { %323 = vst [vmem:[#allocation2 + $0x60] sm:$0xff] %v1968_v32  ;;  %324 = vst [vmem:[#allocation2 + $0xf0] sm:$0xff] %v1968_v32 }
  0x36   : > { %325 = vst [vmem:[#allocation2 + $0x8] sm:$0xff] %v1968_v32  ;;  %326 = vst [vmem:[#allocation2 + $0x78] sm:$0xff] %v1968_v32 }
  0x37   : > { %327 = vst [vmem:[#allocation2 + $0x38] sm:$0xff] %v1968_v32  ;;  %328 = vst [vmem:[#allocation2 + $0x58] sm:$0xff] %v1968_v32 }
  0x38   : > { %329 = vst [vmem:[#allocation2 + $0x40] sm:$0xff] %v1968_v32  ;;  %330 = vst [vmem:[#allocation2 + $0xc8] sm:$0xff] %v1968_v32 }
  0x39   : > { %331 = vst [vmem:[#allocation2 + $0xe0] sm:$0xff] %v1968_v32  ;;  %332 = vst [vmem:[#allocation2 + $0x90] sm:$0xff] %v1968_v32 }
  0x3a   : > { %333 = vst [vmem:[#allocation2 + $0x70] sm:$0xff] %v1968_v32  ;;  %334 = vst [vmem:[#allocation2 + $0xc0] sm:$0xff] %v1968_v32 }
  0x3b   : > { %335 = vst [vmem:[#allocation2 + $0xa8] sm:$0xff] %v1968_v32  ;;  %336 = vst [vmem:[#allocation2 + $0xd0] sm:$0xff] %v1968_v32 }
  0x3c   : > { %337 = vst [vmem:[#allocation2 + $0x10] sm:$0xff] %v1968_v32  ;;  %338 = vst [vmem:[#allocation2 + $0x28] sm:$0xff] %v1968_v32 }
  0x3d   : > { %339 = vst [vmem:[#allocation2 + $0xa0] sm:$0xff] %v1968_v32  ;;  %340 = vst [vmem:[#allocation2 + $0xf8] sm:$0xff] %v1968_v32 }
  0x3e   : > { %341 = vst [vmem:[#allocation2 + $0x20] sm:$0xff] %v1968_v32  ;;  %342 = vst [vmem:[#allocation2 + $0x98] sm:$0xff] %v1968_v32 }
  0x3f PF: > { %v1784_v33 = vld [vmem:[%s2102_s3 + $0x74] ss:$8 sps:$4 sm:$0xff]   ;;  %v1788_v35 = vld [vmem:[%s2102_s3 + $0x70] ss:$8 sps:$4 sm:$0xff]   ;;  %v1790_v37 = vld [vmem:[%s2102_s3 + $0x64] ss:$8 sps:$4 sm:$0xff]  }
  0x40   : > { %v1786_v34 = vld [vmem:[%s2102_s3 + $0x174] ss:$8 sps:$4 sm:$0xff]   ;;  %951 = vmatprep.subr.bf16.mxu0 %v1784_v33  ;;  %v1789_v36 = vld [vmem:[%s2102_s3 + $0x170] ss:$8 sps:$4 sm:$0xff]   ;;  %v1792_v38 = vld [vmem:[%s2102_s3 + $0x164] ss:$8 sps:$4 sm:$0xff]  }
  0x41   : > { %1064 = vmatprep.subr.bf16.mxu1 %v1786_v34  ;;  %952 = vmatpush1.bf16.msra.mxu0 %v1788_v35  ;;  %v1794_v39 = vld [vmem:[%s2102_s3 + $0x60] ss:$8 sps:$4 sm:$0xff]   ;;  %v1796_v41 = vld [vmem:[%s2102_s3 + $0x54] ss:$8 sps:$4 sm:$0xff]   ;;  %v1800_v43 = vld [vmem:[%s2102_s3 + $0x50] ss:$8 sps:$4 sm:$0xff]  }
  0x42   : > { %1065 = vmatpush1.bf16.msra.mxu1 %v1789_v36  ;;  %953 = vmatprep.subr.bf16.mxu0 %v1790_v37  ;;  %v1795_v40 = vld [vmem:[%s2102_s3 + $0x160] ss:$8 sps:$4 sm:$0xff]   ;;  %v1798_v42 = vld [vmem:[%s2102_s3 + $0x154] ss:$8 sps:$4 sm:$0xff]   ;;  %v1801_v44 = vld [vmem:[%s2102_s3 + $0x150] ss:$8 sps:$4 sm:$0xff]  }
  0x43   : > { %1066 = vmatprep.subr.bf16.mxu1 %v1792_v38  ;;  %v1802_v45 = vld [vmem:[%s2102_s3 + $0x44] ss:$8 sps:$4 sm:$0xff]   ;;  %v1806_v47 = vld [vmem:[%s2102_s3 + $0x40] ss:$8 sps:$4 sm:$0xff]   ;;  %v1808_v49 = vld [vmem:[%s2102_s3 + $0x34] ss:$8 sps:$4 sm:$0xff]  }
  0x44   : > { %v1804_v46 = vld [vmem:[%s2102_s3 + $0x144] ss:$8 sps:$4 sm:$0xff]   ;;  %v1807_v48 = vld [vmem:[%s2102_s3 + $0x140] ss:$8 sps:$4 sm:$0xff]   ;;  %v1810_v50 = vld [vmem:[%s2102_s3 + $0x134] ss:$8 sps:$4 sm:$0xff]  }
  0x45   : > { %954 = vmatpush1.bf16.msra.mxu0 %v1794_v39  ;;  %v1812_v51 = vld [vmem:[%s2102_s3 + $0x30] ss:$8 sps:$4 sm:$0xff]   ;;  %v1814_v53 = vld [vmem:[%s2102_s3 + $0x24] ss:$8 sps:$4 sm:$0xff]   ;;  %v1818_v55 = vld [vmem:[%s2102_s3 + $0x20] ss:$8 sps:$4 sm:$0xff]  }
  0x46   : > { %1067 = vmatpush1.bf16.msra.mxu1 %v1795_v40  ;;  %955 = vmatprep.subr.bf16.mxu0 %v1796_v41  ;;  %v1813_v52 = vld [vmem:[%s2102_s3 + $0x130] ss:$8 sps:$4 sm:$0xff]   ;;  %v1816_v54 = vld [vmem:[%s2102_s3 + $0x124] ss:$8 sps:$4 sm:$0xff]   ;;  %v1819_v56 = vld [vmem:[%s2102_s3 + $0x120] ss:$8 sps:$4 sm:$0xff]  }
  0x47   : > { %1068 = vmatprep.subr.bf16.mxu1 %v1798_v42  ;;  %v1820_v57 = vld [vmem:[%s2102_s3 + $0x14] ss:$8 sps:$4 sm:$0xff]   ;;  %v1824_v59 = vld [vmem:[%s2102_s3 + $0x10] ss:$8 sps:$4 sm:$0xff]   ;;  %v1826_v61 = vld [vmem:[%s2102_s3 + $0x4] ss:$8 sps:$4 sm:$0xff]  }
  0x48   : > { %v1822_v58 = vld [vmem:[%s2102_s3 + $0x114] ss:$8 sps:$4 sm:$0xff]   ;;  %v1825_v60 = vld [vmem:[%s2102_s3 + $0x110] ss:$8 sps:$4 sm:$0xff]   ;;  %v1828_v62 = vld [vmem:[%s2102_s3 + $0x104] ss:$8 sps:$4 sm:$0xff]  }
  0x49   : > { %956 = vmatpush1.bf16.msra.mxu0 %v1800_v43  ;;  %v1830_v63 = vld [vmem:[%s2102_s3] ss:$8 sps:$4 sm:$0xff]   ;;  %v1832_v1 = vld [vmem:[%s2102_s3 + $0xf4] ss:$8 sps:$4 sm:$0xff]   ;;  %v1836_v3 = vld [vmem:[%s2102_s3 + $0xf0] ss:$8 sps:$4 sm:$0xff]  }
  0x4a   : > { %1069 = vmatpush1.bf16.msra.mxu1 %v1801_v44  ;;  %957 = vmatprep.subr.bf16.mxu0 %v1802_v45  ;;  %v1831_v0 = vld [vmem:[%s2102_s3 + $0x100] ss:$8 sps:$4 sm:$0xff]   ;;  %v1834_v2 = vld [vmem:[%s2102_s3 + $0x1f4] ss:$8 sps:$4 sm:$0xff]   ;;  %v1837_v4 = vld [vmem:[%s2102_s3 + $0x1f0] ss:$8 sps:$4 sm:$0xff]  }
  0x4b   : > { %1070 = vmatprep.subr.bf16.mxu1 %v1804_v46  ;;  %v1838_v5 = vld [vmem:[%s2102_s3 + $0xe4] ss:$8 sps:$4 sm:$0xff]   ;;  %v1842_v7 = vld [vmem:[%s2102_s3 + $0xe0] ss:$8 sps:$4 sm:$0xff]   ;;  %v1844_v9 = vld [vmem:[%s2102_s3 + $0xd4] ss:$8 sps:$4 sm:$0xff]  }
  0x4c   : > { %v1840_v6 = vld [vmem:[%s2102_s3 + $0x1e4] ss:$8 sps:$4 sm:$0xff]   ;;  %v1843_v8 = vld [vmem:[%s2102_s3 + $0x1e0] ss:$8 sps:$4 sm:$0xff]   ;;  %v1846_v10 = vld [vmem:[%s2102_s3 + $0x1d4] ss:$8 sps:$4 sm:$0xff]  }
  0x4d   : > { %958 = vmatpush1.bf16.msra.mxu0 %v1806_v47  ;;  %v1848_v11 = vld [vmem:[%s2102_s3 + $0xd0] ss:$8 sps:$4 sm:$0xff]   ;;  %v1850_v13 = vld [vmem:[%s2102_s3 + $0xc4] ss:$8 sps:$4 sm:$0xff]   ;;  %v1854_v15 = vld [vmem:[%s2102_s3 + $0xc0] ss:$8 sps:$4 sm:$0xff]  }
  0x4e   : > { %1071 = vmatpush1.bf16.msra.mxu1 %v1807_v48  ;;  %959 = vmatprep.subr.bf16.mxu0 %v1808_v49  ;;  %v1849_v12 = vld [vmem:[%s2102_s3 + $0x1d0] ss:$8 sps:$4 sm:$0xff]   ;;  %v1852_v14 = vld [vmem:[%s2102_s3 + $0x1c4] ss:$8 sps:$4 sm:$0xff]   ;;  %v1855_v16 = vld [vmem:[%s2102_s3 + $0x1c0] ss:$8 sps:$4 sm:$0xff]  }
  0x4f   : > { %1072 = vmatprep.subr.bf16.mxu1 %v1810_v50  ;;  %v1856_v17 = vld [vmem:[%s2102_s3 + $0xb4] ss:$8 sps:$4 sm:$0xff]   ;;  %v1860_v21 = vld [vmem:[%s2102_s3 + $0xb0] ss:$8 sps:$4 sm:$0xff]   ;;  %v1862_v23 = vld [vmem:[%s2102_s3 + $0xa4] ss:$8 sps:$4 sm:$0xff]  }
  0x50   : > { %v1882_v18 = vld [vmem:[%s2104_s4 + $0x4] ss:$16 sps:$4 sm:$0xff]   ;;  %v1885_v20 = vld [vmem:[%s2104_s4 + $0xc] ss:$16 sps:$4 sm:$0xff]   ;;  %v1861_v22 = vld [vmem:[%s2102_s3 + $0x1b0] ss:$8 sps:$4 sm:$0xff]  }
  0x51   : > { %960 = vmatpush1.bf16.msra.mxu0 %v1812_v51  ;;  %v1858_v19 = vld [vmem:[%s2102_s3 + $0x1b4] ss:$8 sps:$4 sm:$0xff]   ;;  %983 = vmatprep.mubr.bf16.mxu0 %v1882_v18  ;;  %v1864_v24 = vld [vmem:[%s2102_s3 + $0x1a4] ss:$8 sps:$4 sm:$0xff]   ;;  %v1866_v25 = vld [vmem:[%s2102_s3 + $0xa0] ss:$8 sps:$4 sm:$0xff]  }
  0x52   : > { %1073 = vmatpush1.bf16.msra.mxu1 %v1813_v52  ;;  %961 = vmatprep.subr.bf16.mxu0 %v1814_v53  ;;  %v1867_v26 = vld [vmem:[%s2102_s3 + $0x1a0] ss:$8 sps:$4 sm:$0xff]   ;;  %v1868_v27 = vld [vmem:[%s2102_s3 + $0x94] ss:$8 sps:$4 sm:$0xff]   ;;  %v1872_v29 = vld [vmem:[%s2102_s3 + $0x90] ss:$8 sps:$4 sm:$0xff]  }
  0x53   : > { %1074 = vmatprep.subr.bf16.mxu1 %v1816_v54  ;;  %1096 = vmatprep.mubr.bf16.mxu1 %v1885_v20  ;;  %v1870_v28 = vld [vmem:[%s2102_s3 + $0x194] ss:$8 sps:$4 sm:$0xff]   ;;  %v1873_v30 = vld [vmem:[%s2102_s3 + $0x190] ss:$8 sps:$4 sm:$0xff]   ;;  %v1874_v31 = vld [vmem:[%s2102_s3 + $0x84] ss:$8 sps:$4 sm:$0xff]  }
  0x54   : > { %v1876_v32 = vld [vmem:[%s2102_s3 + $0x184] ss:$8 sps:$4 sm:$0xff]   ;;  %v1878_v33 = vld [vmem:[%s2102_s3 + $0x80] ss:$8 sps:$4 sm:$0xff]   ;;  %p1704_p11 = scmp.ne.s32.totalorder %s1958_s11, 3 }
  0x55   : > { %962 = vmatpush1.bf16.msra.mxu0 %v1818_v55  ;;  %v1879_v34 = vld [vmem:[%s2102_s3 + $0x180] ss:$8 sps:$4 sm:$0xff]   ;;  %v1886_v37 = vld [vmem:[%s2104_s4 + $0x24] ss:$16 sps:$4 sm:$0xff]   ;;  %v1888_v38 = vld [vmem:[%s2104_s4 + $0x2c] ss:$16 sps:$4 sm:$0xff]  }
  0x56   : > { %1075 = vmatpush1.bf16.msra.mxu1 %v1819_v56  ;;  %963 = vmatprep.subr.bf16.mxu0 %v1820_v57  ;;  %v1880_v35 = vld [vmem:[%s2104_s4] ss:$16 sps:$4 sm:$0xff]   ;;  %v1883_v36 = vld [vmem:[%s2104_s4 + $0x8] ss:$16 sps:$4 sm:$0xff]   ;;  %v1892_v41 = vld [vmem:[%s2104_s4 + $0x44] ss:$16 sps:$4 sm:$0xff]  }
  0x57   : > { %1076 = vmatprep.subr.bf16.mxu1 %v1822_v58  ;;  %v1890_v39 = vld [vmem:[%s2104_s4 + $0x20] ss:$16 sps:$4 sm:$0xff]   ;;  %v1891_v40 = vld [vmem:[%s2104_s4 + $0x28] ss:$16 sps:$4 sm:$0xff]   ;;  %v1894_v42 = vld [vmem:[%s2104_s4 + $0x4c] ss:$16 sps:$4 sm:$0xff]  }
  0x58   : > { %v1896_v43 = vld [vmem:[%s2104_s4 + $0x40] ss:$16 sps:$4 sm:$0xff]   ;;  %v1897_v44 = vld [vmem:[%s2104_s4 + $0x48] ss:$16 sps:$4 sm:$0xff]   ;;  %v1898_v45 = vld [vmem:[%s2104_s4 + $0x64] ss:$16 sps:$4 sm:$0xff]  }
  0x59   : > { %964 = vmatpush1.bf16.msra.mxu0 %v1824_v59  ;;  %v1900_v46 = vld [vmem:[%s2104_s4 + $0x6c] ss:$16 sps:$4 sm:$0xff]   ;;  %v1902_v47 = vld [vmem:[%s2104_s4 + $0x60] ss:$16 sps:$4 sm:$0xff]   ;;  %v1903_v48 = vld [vmem:[%s2104_s4 + $0x68] ss:$16 sps:$4 sm:$0xff]  }
  0x5a   : > { %1077 = vmatpush1.bf16.msra.mxu1 %v1825_v60  ;;  %965 = vmatprep.subr.bf16.mxu0 %v1826_v61  ;;  %v1904_v49 = vld [vmem:[%s2104_s4 + $0x84] ss:$16 sps:$4 sm:$0xff]   ;;  %v1906_v50 = vld [vmem:[%s2104_s4 + $0x8c] ss:$16 sps:$4 sm:$0xff]   ;;  %v1908_v51 = vld [vmem:[%s2104_s4 + $0x80] ss:$16 sps:$4 sm:$0xff]  }
  0x5b   : > { %1078 = vmatprep.subr.bf16.mxu1 %v1828_v62  ;;  %v1909_v52 = vld [vmem:[%s2104_s4 + $0x88] ss:$16 sps:$4 sm:$0xff]   ;;  %v1910_v53 = vld [vmem:[%s2104_s4 + $0xa4] ss:$16 sps:$4 sm:$0xff]   ;;  %v1912_v54 = vld [vmem:[%s2104_s4 + $0xac] ss:$16 sps:$4 sm:$0xff]  }
  0x5c   : > { %v1914_v55 = vld [vmem:[%s2104_s4 + $0xa0] ss:$16 sps:$4 sm:$0xff]   ;;  %v1915_v56 = vld [vmem:[%s2104_s4 + $0xa8] ss:$16 sps:$4 sm:$0xff]   ;;  %v1916_v57 = vld [vmem:[%s2104_s4 + $0xc4] ss:$16 sps:$4 sm:$0xff]  }
  0x5d   : > { %966 = vmatpush1.bf16.msra.mxu0 %v1830_v63  ;;  %v1918_v58 = vld [vmem:[%s2104_s4 + $0xcc] ss:$16 sps:$4 sm:$0xff]   ;;  %v1920_v59 = vld [vmem:[%s2104_s4 + $0xc0] ss:$16 sps:$4 sm:$0xff]   ;;  %v1921_v60 = vld [vmem:[%s2104_s4 + $0xc8] ss:$16 sps:$4 sm:$0xff]  }
  0x5e   : > { %1079 = vmatpush1.bf16.msra.mxu1 %v1831_v0  ;;  %967 = vmatprep.subr.bf16.mxu0 %v1832_v1  ;;  %v1922_v61 = vld [vmem:[%s2104_s4 + $0xe4] ss:$16 sps:$4 sm:$0xff]   ;;  %v1924_v62 = vld [vmem:[%s2104_s4 + $0xec] ss:$16 sps:$4 sm:$0xff]   ;;  %v1926_v63 = vld [vmem:[%s2104_s4 + $0xe0] ss:$16 sps:$4 sm:$0xff]  }
  0x5f   : > { %1080 = vmatprep.subr.bf16.mxu1 %v1834_v2  ;;  %v1927_v0 = vld [vmem:[%s2104_s4 + $0xe8] ss:$16 sps:$4 sm:$0xff]   ;;  %v343_v2 = vld [vmem:[#allocation2 + $0xb0] sm:$0xff] }
  0x61   : > { %968 = vmatpush2.bf16.msra.mxu0 %v1836_v3 }
  0x62   : > { %1081 = vmatpush2.bf16.msra.mxu1 %v1837_v4  ;;  %969 = vmatprep.subr.bf16.mxu0 %v1838_v5 }
  0x63   : > { %1082 = vmatprep.subr.bf16.mxu1 %v1840_v6  ;;  %v344_v6 = vld [vmem:[#allocation2] sm:$0xff] }
  0x65   : > { %970 = vmatpush2.bf16.msra.mxu0 %v1842_v7 }
  0x66   : > { %1083 = vmatpush2.bf16.msra.mxu1 %v1843_v8  ;;  %971 = vmatprep.subr.bf16.mxu0 %v1844_v9 }
  0x67   : > { %1084 = vmatprep.subr.bf16.mxu1 %v1846_v10 }
  0x69   : > { %972 = vmatpush2.bf16.msra.mxu0 %v1848_v11  ;;  %v345_v11 = vld [vmem:[#allocation2 + $0xd8] sm:$0xff] }
  0x6a   : > { %1085 = vmatpush2.bf16.msra.mxu1 %v1849_v12  ;;  %973 = vmatprep.subr.bf16.mxu0 %v1850_v13 }
  0x6b   : > { %1086 = vmatprep.subr.bf16.mxu1 %v1852_v14 }
  0x6d   : > { %974 = vmatpush2.bf16.msra.mxu0 %v1854_v15 }
  0x6e   : > { %1087 = vmatpush2.bf16.msra.mxu1 %v1855_v16  ;;  %975 = vmatprep.subr.bf16.mxu0 %v1856_v17  ;;  %v346_v16 = vld [vmem:[#allocation2 + $0x18] sm:$0xff] }
  0x6f   : > { %1088 = vmatprep.subr.bf16.mxu1 %v1858_v19 }
  0x71   : > { %976 = vmatpush2.bf16.msra.mxu0 %v1860_v21  ;;  %v347_v21 = vld [vmem:[#allocation2 + $0x50] sm:$0xff] }
  0x72   : > { %1089 = vmatpush2.bf16.msra.mxu1 %v1861_v22  ;;  %977 = vmatprep.subr.bf16.mxu0 %v1862_v23 }
  0x73   : > { %1090 = vmatprep.subr.bf16.mxu1 %v1864_v24 }
  0x75   : > { %978 = vmatpush2.bf16.msra.mxu0 %v1866_v25 }
  0x76   : > { %1091 = vmatpush2.bf16.msra.mxu1 %v1867_v26  ;;  %979 = vmatprep.subr.bf16.mxu0 %v1868_v27  ;;  %v348_v26 = vld [vmem:[#allocation2 + $0x68] sm:$0xff] }
  0x77   : > { %1092 = vmatprep.subr.bf16.mxu1 %v1870_v28 }
  0x79   : > { %980 = vmatpush2.bf16.msra.mxu0 %v1872_v29 }
  0x7a   : > { %1093 = vmatpush2.bf16.msra.mxu1 %v1873_v30  ;;  %981 = vmatprep.subr.bf16.mxu0 %v1874_v31  ;;  %v349_v31 = vld [vmem:[#allocation2 + $0x30] sm:$0xff] }
  0x7b   : > { %1094 = vmatprep.subr.bf16.mxu1 %v1876_v32 }
  0x7d   : > { %982 = vmatpush2.bf16.msra.mxu0 %v1878_v33 }
  0x7e   : > { %1095 = vmatpush2.bf16.msra.mxu1 %v1879_v34 }
  0x80   : > { %984 = vmatmul.mubr.bf16.vlgmr.msra.gmra.mxu0 %v1880_v35 }
  0x81   : > { %1097 = vmatmul.mubr.bf16.vlgmr.msra.gmra.mxu1 %v1883_v36  ;;  %993 = vmatprep.mubr.bf16.mxu0 %v1886_v37  ;;  %v350_v36 = vld [vmem:[#allocation2 + $0x48] sm:$0xff] }
  0x82   : > { %1106 = vmatprep.mubr.bf16.mxu1 %v1888_v38 }
  0x88   : > { %994 = vmatmul.mubr.bf16.gmra.mxu0 %v1890_v39 }
  0x89   : > { %1107 = vmatmul.mubr.bf16.gmra.mxu1 %v1891_v40  ;;  %1003 = vmatprep.mubr.bf16.mxu0 %v1892_v41  ;;  %v351_v41 = vld [vmem:[#allocation2 + $0x80] sm:$0xff] }
  0x8a   : > { %1116 = vmatprep.mubr.bf16.mxu1 %v1894_v42 }
  0x90   : > { %1004 = vmatmul.mubr.bf16.gmra.mxu0 %v1896_v43 }
  0x91   : > { %1117 = vmatmul.mubr.bf16.gmra.mxu1 %v1897_v44  ;;  %1013 = vmatprep.mubr.bf16.mxu0 %v1898_v45 }
  0x92   : > { %1126 = vmatprep.mubr.bf16.mxu1 %v1900_v46  ;;  %v352_v46 = vld [vmem:[#allocation2 + $0x88] sm:$0xff] }
  0x98   : > { %1014 = vmatmul.mubr.bf16.gmra.mxu0 %v1902_v47 }
  0x99   : > { %1127 = vmatmul.mubr.bf16.gmra.mxu1 %v1903_v48  ;;  %1023 = vmatprep.mubr.bf16.mxu0 %v1904_v49 }
  0x9a   : > { %1136 = vmatprep.mubr.bf16.mxu1 %v1906_v50 }
  0xa0   : > { %1024 = vmatmul.mubr.bf16.gmra.mxu0 %v1908_v51  ;;  %v353_v51 = vld [vmem:[#allocation2 + $0xe8] sm:$0xff] }
  0xa1   : > { %1137 = vmatmul.mubr.bf16.gmra.mxu1 %v1909_v52  ;;  %1033 = vmatprep.mubr.bf16.mxu0 %v1910_v53 }
  0xa2   : > { %1146 = vmatprep.mubr.bf16.mxu1 %v1912_v54 }
  0xa8   : > { %1034 = vmatmul.mubr.bf16.gmra.mxu0 %v1914_v55 }
  0xa9   : > { %1147 = vmatmul.mubr.bf16.gmra.mxu1 %v1915_v56  ;;  %1043 = vmatprep.mubr.bf16.mxu0 %v1916_v57  ;;  %v354_v56 = vld [vmem:[#allocation2 + $0xb8] sm:$0xff] }
  0xaa   : > { %1156 = vmatprep.mubr.bf16.mxu1 %v1918_v58 }
  0xb0   : > { %1044 = vmatmul.mubr.bf16.gmra.mxu0 %v1920_v59 }
  0xb1   : > { %1157 = vmatmul.mubr.bf16.gmra.mxu1 %v1921_v60  ;;  %1053 = vmatprep.mubr.bf16.mxu0 %v1922_v61  ;;  %v355_v61 = vld [vmem:[#allocation2 + $0x60] sm:$0xff] }
  0xb2   : > { %1166 = vmatprep.mubr.bf16.mxu1 %v1924_v62 }
  0xb8   : > { %1054 = vmatmul.mubr.bf16.gmra.mxu0 %v1926_v63 }
  0xb9   : > { %1167 = vmatmul.mubr.bf16.gmra.mxu1 %v1927_v0 }
 0x140   : > { %v985_v1 = vpop.f32.mrf.mxu0 }
 0x141   : > { %v1098_v3 = vpop.f32.mrf.mxu1 }
 0x142   : > { %v1099_v4 = vadd.f32 %v1098_v3, %v985_v1  ;;  %v987_v5 = vpop.f32.mrf.mxu0 }
 0x143   : > { %v1100_v7 = vpop.f32.mrf.mxu1 }
 0x144   : > { %v1177_v8 = vadd.f32 %v1099_v4, %v343_v2  ;;  %v1101_v9 = vadd.f32 %v1100_v7, %v987_v5  ;;  %v989_v10 = vpop.f32.mrf.mxu0  ;;  %v356_v2 = vld [vmem:[#allocation2 + $0xf0] sm:$0xff]  ;;  %v357_v7 = vld [vmem:[#allocation2 + $0x8] sm:$0xff] }
 0x145   : > { %v1102_v12 = vpop.f32.mrf.mxu1 }
 0x146   : > { %1209 = vst [vmem:[#allocation2 + $0xb0] sm:$0xff] %v1177_v8  ;;  %v1178_v13 = vadd.f32 %v1101_v9, %v344_v6  ;;  %v1103_v14 = vadd.f32 %v1102_v12, %v989_v10  ;;  %v991_v15 = vpop.f32.mrf.mxu0  ;;  %v358_v12 = vld [vmem:[#allocation2 + $0x78] sm:$0xff] }
 0x147   : > { %v1104_v17 = vpop.f32.mrf.mxu1 }
 0x148   : > { %1210 = vst [vmem:[#allocation2] sm:$0xff] %v1178_v13  ;;  %v1179_v18 = vadd.f32 %v1103_v14, %v345_v11  ;;  %v1105_v19 = vadd.f32 %v1104_v17, %v991_v15  ;;  %v995_v20 = vpop.f32.mrf.mxu0  ;;  %v359_v17 = vld [vmem:[#allocation2 + $0x38] sm:$0xff] }
 0x149   : > { %v1108_v22 = vpop.f32.mrf.mxu1 }
 0x14a   : > { %1211 = vst [vmem:[#allocation2 + $0xd8] sm:$0xff] %v1179_v18  ;;  %v1180_v23 = vadd.f32 %v1105_v19, %v346_v16  ;;  %v1109_v24 = vadd.f32 %v1108_v22, %v995_v20  ;;  %v997_v25 = vpop.f32.mrf.mxu0  ;;  %v360_v22 = vld [vmem:[#allocation2 + $0x58] sm:$0xff] }
 0x14b   : > { %v1110_v27 = vpop.f32.mrf.mxu1 }
 0x14c   : > { %1212 = vst [vmem:[#allocation2 + $0x18] sm:$0xff] %v1180_v23  ;;  %v1181_v28 = vadd.f32 %v1109_v24, %v347_v21  ;;  %v1111_v29 = vadd.f32 %v1110_v27, %v997_v25  ;;  %v999_v30 = vpop.f32.mrf.mxu0  ;;  %v361_v27 = vld [vmem:[#allocation2 + $0x40] sm:$0xff] }
 0x14d   : > { %v1112_v32 = vpop.f32.mrf.mxu1 }
 0x14e   : > { %1213 = vst [vmem:[#allocation2 + $0x50] sm:$0xff] %v1181_v28  ;;  %v1182_v33 = vadd.f32 %v1111_v29, %v348_v26  ;;  %v1113_v34 = vadd.f32 %v1112_v32, %v999_v30  ;;  %v1001_v35 = vpop.f32.mrf.mxu0  ;;  %v362_v32 = vld [vmem:[#allocation2 + $0xc8] sm:$0xff] }
 0x14f   : > { %v1114_v37 = vpop.f32.mrf.mxu1 }
 0x150   : > { %1214 = vst [vmem:[#allocation2 + $0x68] sm:$0xff] %v1182_v33  ;;  %v1183_v38 = vadd.f32 %v1113_v34, %v349_v31  ;;  %v1115_v39 = vadd.f32 %v1114_v37, %v1001_v35  ;;  %v1005_v40 = vpop.f32.mrf.mxu0  ;;  %v363_v37 = vld [vmem:[#allocation2 + $0xe0] sm:$0xff] }
 0x151   : > { %v1118_v42 = vpop.f32.mrf.mxu1 }
 0x152   : > { %1215 = vst [vmem:[#allocation2 + $0x30] sm:$0xff] %v1183_v38  ;;  %v1184_v43 = vadd.f32 %v1115_v39, %v350_v36  ;;  %v1119_v44 = vadd.f32 %v1118_v42, %v1005_v40  ;;  %v1007_v45 = vpop.f32.mrf.mxu0  ;;  %v364_v42 = vld [vmem:[#allocation2 + $0x90] sm:$0xff] }
 0x153   : > { %v1120_v47 = vpop.f32.mrf.mxu1 }
 0x154   : > { %1216 = vst [vmem:[#allocation2 + $0x48] sm:$0xff] %v1184_v43  ;;  %v1185_v48 = vadd.f32 %v1119_v44, %v351_v41  ;;  %v1121_v49 = vadd.f32 %v1120_v47, %v1007_v45  ;;  %v1009_v50 = vpop.f32.mrf.mxu0  ;;  %v365_v47 = vld [vmem:[#allocation2 + $0x70] sm:$0xff] }
 0x155   : > { %v1122_v52 = vpop.f32.mrf.mxu1 }
 0x156   : > { %1217 = vst [vmem:[#allocation2 + $0x80] sm:$0xff] %v1185_v48  ;;  %v1186_v53 = vadd.f32 %v1121_v49, %v352_v46  ;;  %v1123_v54 = vadd.f32 %v1122_v52, %v1009_v50  ;;  %v1011_v55 = vpop.f32.mrf.mxu0  ;;  %v366_v52 = vld [vmem:[#allocation2 + $0xc0] sm:$0xff] }
 0x157   : > { %v1124_v57 = vpop.f32.mrf.mxu1 }
 0x158   : > { %1218 = vst [vmem:[#allocation2 + $0x88] sm:$0xff] %v1186_v53  ;;  %v1187_v58 = vadd.f32 %v1123_v54, %v353_v51  ;;  %v1125_v59 = vadd.f32 %v1124_v57, %v1011_v55  ;;  %v1015_v60 = vpop.f32.mrf.mxu0  ;;  %v367_v57 = vld [vmem:[#allocation2 + $0xa8] sm:$0xff] }
 0x159   : > { %v1128_v62 = vpop.f32.mrf.mxu1 }
 0x15a   : > { %1219 = vst [vmem:[#allocation2 + $0xe8] sm:$0xff] %v1187_v58  ;;  %v1188_v63 = vadd.f32 %v1125_v59, %v354_v56  ;;  %v1129_v0 = vadd.f32 %v1128_v62, %v1015_v60  ;;  %v1017_v1 = vpop.f32.mrf.mxu0  ;;  %v368_v62 = vld [vmem:[#allocation2 + $0xd0] sm:$0xff] }
 0x15b   : > { %v1130_v3 = vpop.f32.mrf.mxu1 }
 0x15c   : > { %1220 = vst [vmem:[#allocation2 + $0xb8] sm:$0xff] %v1188_v63  ;;  %v1189_v4 = vadd.f32 %v1129_v0, %v355_v61  ;;  %v1131_v5 = vadd.f32 %v1130_v3, %v1017_v1  ;;  %v1019_v6 = vpop.f32.mrf.mxu0  ;;  %v369_v3 = vld [vmem:[#allocation2 + $0x10] sm:$0xff] }
 0x15d   : > { %v1132_v8 = vpop.f32.mrf.mxu1 }
 0x15e   : > { %1221 = vst [vmem:[#allocation2 + $0x60] sm:$0xff] %v1189_v4  ;;  %v1190_v9 = vadd.f32 %v1131_v5, %v356_v2  ;;  %v1133_v10 = vadd.f32 %v1132_v8, %v1019_v6  ;;  %v1021_v11 = vpop.f32.mrf.mxu0  ;;  %v370_v8 = vld [vmem:[#allocation2 + $0x28] sm:$0xff] }
 0x15f   : > { %v1134_v13 = vpop.f32.mrf.mxu1 }
 0x160   : > { %1222 = vst [vmem:[#allocation2 + $0xf0] sm:$0xff] %v1190_v9  ;;  %v1191_v14 = vadd.f32 %v1133_v10, %v357_v7  ;;  %v1135_v15 = vadd.f32 %v1134_v13, %v1021_v11  ;;  %v1025_v16 = vpop.f32.mrf.mxu0  ;;  %v371_v13 = vld [vmem:[#allocation2 + $0xa0] sm:$0xff] }
 0x161   : > { %v1138_v18 = vpop.f32.mrf.mxu1 }
 0x162   : > { %1223 = vst [vmem:[#allocation2 + $0x8] sm:$0xff] %v1191_v14  ;;  %v1192_v19 = vadd.f32 %v1135_v15, %v358_v12  ;;  %v1139_v20 = vadd.f32 %v1138_v18, %v1025_v16  ;;  %v1027_v21 = vpop.f32.mrf.mxu0  ;;  %v372_v18 = vld [vmem:[#allocation2 + $0xf8] sm:$0xff] }
 0x163   : > { %v1140_v23 = vpop.f32.mrf.mxu1 }
 0x164   : > { %1224 = vst [vmem:[#allocation2 + $0x78] sm:$0xff] %v1192_v19  ;;  %v1193_v24 = vadd.f32 %v1139_v20, %v359_v17  ;;  %v1141_v25 = vadd.f32 %v1140_v23, %v1027_v21  ;;  %v1029_v26 = vpop.f32.mrf.mxu0  ;;  %v373_v23 = vld [vmem:[#allocation2 + $0x20] sm:$0xff] }
 0x165   : > { %v1142_v28 = vpop.f32.mrf.mxu1 }
 0x166   : > { %1225 = vst [vmem:[#allocation2 + $0x38] sm:$0xff] %v1193_v24  ;;  %v1194_v29 = vadd.f32 %v1141_v25, %v360_v22  ;;  %v1143_v30 = vadd.f32 %v1142_v28, %v1029_v26  ;;  %v1031_v31 = vpop.f32.mrf.mxu0  ;;  %v374_v28 = vld [vmem:[#allocation2 + $0x98] sm:$0xff] }
 0x167   : > { %v1144_v33 = vpop.f32.mrf.mxu1 }
 0x168   : > { %1226 = vst [vmem:[#allocation2 + $0x58] sm:$0xff] %v1194_v29  ;;  %v1195_v34 = vadd.f32 %v1143_v30, %v361_v27  ;;  %v1145_v35 = vadd.f32 %v1144_v33, %v1031_v31  ;;  %v1035_v36 = vpop.f32.mrf.mxu0 }
 0x169   : > { %v1148_v38 = vpop.f32.mrf.mxu1 }
 0x16a   : > { %1227 = vst [vmem:[#allocation2 + $0x40] sm:$0xff] %v1195_v34  ;;  %v1196_v39 = vadd.f32 %v1145_v35, %v362_v32  ;;  %v1149_v40 = vadd.f32 %v1148_v38, %v1035_v36  ;;  %v1037_v41 = vpop.f32.mrf.mxu0 }
 0x16b   : > { %v1150_v43 = vpop.f32.mrf.mxu1 }
 0x16c   : > { %1228 = vst [vmem:[#allocation2 + $0xc8] sm:$0xff] %v1196_v39  ;;  %v1197_v44 = vadd.f32 %v1149_v40, %v363_v37  ;;  %v1151_v45 = vadd.f32 %v1150_v43, %v1037_v41  ;;  %v1039_v46 = vpop.f32.mrf.mxu0 }
 0x16d   : > { %v1152_v48 = vpop.f32.mrf.mxu1 }
 0x16e   : > { %1229 = vst [vmem:[#allocation2 + $0xe0] sm:$0xff] %v1197_v44  ;;  %v1198_v49 = vadd.f32 %v1151_v45, %v364_v42  ;;  %v1153_v50 = vadd.f32 %v1152_v48, %v1039_v46  ;;  %v1041_v51 = vpop.f32.mrf.mxu0 }
 0x16f   : > { %v1154_v53 = vpop.f32.mrf.mxu1 }
 0x170   : > { %1230 = vst [vmem:[#allocation2 + $0x90] sm:$0xff] %v1198_v49  ;;  %v1199_v54 = vadd.f32 %v1153_v50, %v365_v47  ;;  %v1155_v55 = vadd.f32 %v1154_v53, %v1041_v51  ;;  %v1045_v56 = vpop.f32.mrf.mxu0 }
 0x171   : > { %v1158_v58 = vpop.f32.mrf.mxu1 }
 0x172   : > { %1231 = vst [vmem:[#allocation2 + $0x70] sm:$0xff] %v1199_v54  ;;  %v1200_v59 = vadd.f32 %v1155_v55, %v366_v52  ;;  %v1159_v60 = vadd.f32 %v1158_v58, %v1045_v56  ;;  %v1047_v61 = vpop.f32.mrf.mxu0 }
 0x173   : > { %v1160_v63 = vpop.f32.mrf.mxu1 }
 0x174   : > { %1232 = vst [vmem:[#allocation2 + $0xc0] sm:$0xff] %v1200_v59  ;;  %v1201_v0 = vadd.f32 %v1159_v60, %v367_v57  ;;  %v1161_v1 = vadd.f32 %v1160_v63, %v1047_v61  ;;  %v1049_v2 = vpop.f32.mrf.mxu0 }
 0x175   : > { %v1162_v4 = vpop.f32.mrf.mxu1 }
 0x176   : > { %1233 = vst [vmem:[#allocation2 + $0xa8] sm:$0xff] %v1201_v0  ;;  %v1202_v5 = vadd.f32 %v1161_v1, %v368_v62  ;;  %v1163_v6 = vadd.f32 %v1162_v4, %v1049_v2  ;;  %v1051_v7 = vpop.f32.mrf.mxu0 }
 0x177   : > { %v1164_v9 = vpop.f32.mrf.mxu1 }
 0x178   : > { %1234 = vst [vmem:[#allocation2 + $0xd0] sm:$0xff] %v1202_v5  ;;  %v1203_v10 = vadd.f32 %v1163_v6, %v369_v3  ;;  %v1165_v11 = vadd.f32 %v1164_v9, %v1051_v7  ;;  %v1055_v12 = vpop.f32.mrf.mxu0 }
 0x179   : > { %v1168_v14 = vpop.f32.mrf.mxu1 }
 0x17a   : > { %1235 = vst [vmem:[#allocation2 + $0x10] sm:$0xff] %v1203_v10  ;;  %v1204_v15 = vadd.f32 %v1165_v11, %v370_v8  ;;  %v1169_v16 = vadd.f32 %v1168_v14, %v1055_v12  ;;  %v1057_v17 = vpop.f32.mrf.mxu0 }
 0x17b   : > { %v1170_v19 = vpop.f32.mrf.mxu1 }
 0x17c   : > { %1236 = vst [vmem:[#allocation2 + $0x28] sm:$0xff] %v1204_v15  ;;  %v1205_v20 = vadd.f32 %v1169_v16, %v371_v13  ;;  %v1171_v21 = vadd.f32 %v1170_v19, %v1057_v17  ;;  %v1059_v22 = vpop.f32.mrf.mxu0 }
 0x17d   : > { %v1172_v24 = vpop.f32.mrf.mxu1 }
 0x17e   : > { %1237 = vst [vmem:[#allocation2 + $0xa0] sm:$0xff] %v1205_v20  ;;  %v1206_v25 = vadd.f32 %v1171_v21, %v372_v18  ;;  %v1173_v26 = vadd.f32 %v1172_v24, %v1059_v22  ;;  %v1061_v27 = vpop.f32.mrf.mxu0 }
 0x17f   : > { %v1174_v29 = vpop.f32.mrf.mxu1 }
 0x180   : > { %1238 = vst [vmem:[#allocation2 + $0xf8] sm:$0xff] %v1206_v25  ;;  %v1207_v30 = vadd.f32 %v1173_v26, %v373_v23  ;;  %v1175_v31 = vadd.f32 %v1174_v29, %v1061_v27  ;;  %1244 = sbr.rel (%p1704_p11) target bundleno = 423 (0x1a7), region = 59 }
 0x182   : > { %1239 = vst [vmem:[#allocation2 + $0x20] sm:$0xff] %v1207_v30  ;;  %v1208_v32 = vadd.f32 %v1175_v31, %v374_v28 }
 0x184   : > { %1240 = vst [vmem:[#allocation2 + $0x98] sm:$0xff] %v1208_v32 }
 0x185   : > { %v1245_v33 = vld [vmem:[#allocation2 + $0xb0] sm:$0xff]  ;;  %v1246_v34 = vld [vmem:[#allocation2] sm:$0xff]  ;;  %v1247_v35 = vld [vmem:[#allocation2 + $0xd8] sm:$0xff] }
 0x186   : > { %vm1277_vm0 = vcmp.ge.f32.partialorder %v1245_v33, 0.0  ;;  %vm1278_vm1 = vcmp.ge.f32.partialorder %v1246_v34, 0.0  ;;  %v1309_v36 = vmul.f32 0.2, %v1245_v33  ;;  %v1310_v37 = vmul.f32 0.2, %v1246_v34 }
 0x187   : > { %v1248_v38 = vld [vmem:[#allocation2 + $0x18] sm:$0xff]  ;;  %vm1279_vm2 = vcmp.ge.f32.partialorder %v1247_v35, 0.0  ;;  %v1311_v39 = vmul.f32 0.2, %v1247_v35  ;;  %v1249_v40 = vld [vmem:[#allocation2 + $0x50] sm:$0xff]  ;;  %v1250_v41 = vld [vmem:[#allocation2 + $0x68] sm:$0xff] }
 0x188   : > { %v1341_v42 = vsel %vm1277_vm0, %v1245_v33, %v1309_v36  ;;  %v1342_v43 = vsel %vm1278_vm1, %v1246_v34, %v1310_v37  ;;  %vm1280_vm3 = vcmp.ge.f32.partialorder %v1248_v38, 0.0  ;;  %v1312_v44 = vmul.f32 0.2, %v1248_v38  ;;  %v1251_v45 = vld [vmem:[#allocation2 + $0x30] sm:$0xff]  ;;  %v1252_v46 = vld [vmem:[#allocation2 + $0x48] sm:$0xff]  ;;  %v1253_v49 = vld [vmem:[#allocation2 + $0x80] sm:$0xff] }
 0x189   : > { %v1727_v47 = vpack.c.bf16 %v1342_v43, %v1341_v42  ;;  %v1343_v48 = vsel %vm1279_vm2, %v1247_v35, %v1311_v39  ;;  %vm1281_vm4 = vcmp.ge.f32.partialorder %v1249_v40, 0.0  ;;  %vm1282_vm5 = vcmp.ge.f32.partialorder %v1250_v41, 0.0  ;;  %v1254_v50 = vld [vmem:[#allocation2 + $0x88] sm:$0xff]  ;;  %v1256_v58 = vld [vmem:[#allocation2 + $0xb8] sm:$0xff]  ;;  %v1257_v61 = vld [vmem:[#allocation2 + $0x60] sm:$0xff] }
 0x18a   : > { %v1344_v51 = vsel %vm1280_vm3, %v1248_v38, %v1312_v44  ;;  %v1313_v52 = vmul.f32 0.2, %v1249_v40  ;;  %v1314_v53 = vmul.f32 0.2, %v1250_v41  ;;  %vm1283_vm6 = vcmp.ge.f32.partialorder %v1251_v45, 0.0  ;;  %v1255_v54 = vld [vmem:[#allocation2 + $0xe8] sm:$0xff] }
 0x18b   : > { %1469 = vst [vmem:[%s2277_s2] sm:$0xff] %v1727_v47  ;;  %v1728_v55 = vpack.c.bf16 %v1344_v51, %v1343_v48  ;;  %vm1284_vm7 = vcmp.ge.f32.partialorder %v1252_v46, 0.0  ;;  %v1315_v56 = vmul.f32 0.2, %v1251_v45  ;;  %v1316_v57 = vmul.f32 0.2, %v1252_v46  ;;  %v1258_v2 = vld [vmem:[#allocation2 + $0xf0] sm:$0xff] }
 0x18c   : > { %v1345_v59 = vsel %vm1281_vm4, %v1249_v40, %v1313_v52  ;;  %v1346_v60 = vsel %vm1282_vm5, %v1250_v41, %v1314_v53  ;;  %vm1285_vm8 = vcmp.ge.f32.partialorder %v1253_v49, 0.0  ;;  %vm1286_vm9 = vcmp.ge.f32.partialorder %v1254_v50, 0.0  ;;  %v1259_v5 = vld [vmem:[#allocation2 + $0x8] sm:$0xff]  ;;  %v1260_v9 = vld [vmem:[#allocation2 + $0x78] sm:$0xff]  ;;  %v1263_v18 = vld [vmem:[#allocation2 + $0x40] sm:$0xff] }
 0x18d   : > { %1470 = vst [vmem:[%s2277_s2 + $0x8] sm:$0xff] %v1728_v55  ;;  %v1729_v62 = vpack.c.bf16 %v1346_v60, %v1345_v59  ;;  %v1347_v63 = vsel %vm1283_vm6, %v1251_v45, %v1315_v56  ;;  %v1348_v0 = vsel %vm1284_vm7, %v1252_v46, %v1316_v57  ;;  %v1317_v1 = vmul.f32 0.2, %v1253_v49  ;;  %v1261_v13 = vld [vmem:[#allocation2 + $0x38] sm:$0xff]  ;;  %v1264_v22 = vld [vmem:[#allocation2 + $0xc8] sm:$0xff]  ;;  %v1265_v23 = vld [vmem:[#allocation2 + $0xe0] sm:$0xff] }
 0x18e   : > { %v1730_v3 = vpack.c.bf16 %v1348_v0, %v1347_v63  ;;  %v1318_v4 = vmul.f32 0.2, %v1254_v50  ;;  %vm1287_vm10 = vcmp.ge.f32.partialorder %v1255_v54, 0.0  ;;  %vm1288_vm11 = vcmp.ge.f32.partialorder %v1256_v58, 0.0  ;;  %v1262_v17 = vld [vmem:[#allocation2 + $0x58] sm:$0xff]  ;;  %v1266_v27 = vld [vmem:[#allocation2 + $0x90] sm:$0xff] }
 0x18f   : > { %1471 = vst [vmem:[%s2277_s2 + $0x10] sm:$0xff] %v1729_v62  ;;  %v1349_v6 = vsel %vm1285_vm8, %v1253_v49, %v1317_v1  ;;  %v1319_v7 = vmul.f32 0.2, %v1255_v54  ;;  %v1320_v8 = vmul.f32 0.2, %v1256_v58  ;;  %vm1289_vm12 = vcmp.ge.f32.partialorder %v1257_v61, 0.0 }
 0x190   : > { %1472 = vst [vmem:[%s2277_s2 + $0x18] sm:$0xff] %v1730_v3  ;;  %v1350_v10 = vsel %vm1286_vm9, %v1254_v50, %v1318_v4  ;;  %vm1290_vm13 = vcmp.ge.f32.partialorder %v1258_v2, 0.0  ;;  %v1321_v11 = vmul.f32 0.2, %v1257_v61  ;;  %v1322_v12 = vmul.f32 0.2, %v1258_v2 }
 0x191   : > { %v1731_v14 = vpack.c.bf16 %v1350_v10, %v1349_v6  ;;  %v1351_v15 = vsel %vm1287_vm10, %v1255_v54, %v1319_v7  ;;  %v1352_v16 = vsel %vm1288_vm11, %v1256_v58, %v1320_v8  ;;  %vm1291_vm14 = vcmp.ge.f32.partialorder %v1259_v5, 0.0  ;;  %v1267_v33 = vld [vmem:[#allocation2 + $0x70] sm:$0xff]  ;;  %v1268_v38 = vld [vmem:[#allocation2 + $0xc0] sm:$0xff]  ;;  %v1269_v41 = vld [vmem:[#allocation2 + $0xa8] sm:$0xff] }
 0x192   : > { %v1732_v19 = vpack.c.bf16 %v1352_v16, %v1351_v15  ;;  %v1353_v20 = vsel %vm1289_vm12, %v1257_v61, %v1321_v11  ;;  %v1354_v21 = vsel %vm1290_vm13, %v1258_v2, %v1322_v12  ;;  %vm1292_vm15 = vcmp.ge.f32.partialorder %v1260_v9, 0.0  ;;  %v1270_v42 = vld [vmem:[#allocation2 + $0xd0] sm:$0xff]  ;;  %v1272_v50 = vld [vmem:[#allocation2 + $0x28] sm:$0xff]  ;;  %v1273_v53 = vld [vmem:[#allocation2 + $0xa0] sm:$0xff] }
 0x193   : > { %1473 = vst [vmem:[%s2277_s2 + $0x20] sm:$0xff] %v1731_v14  ;;  %v1733_v24 = vpack.c.bf16 %v1354_v21, %v1353_v20  ;;  %v1323_v25 = vmul.f32 0.2, %v1259_v5  ;;  %v1324_v26 = vmul.f32 0.2, %v1260_v9  ;;  %vm1293_vm0 = vcmp.ge.f32.partialorder %v1261_v13, 0.0 }
 0x194   : > { %1474 = vst [vmem:[%s2277_s2 + $0x28] sm:$0xff] %v1732_v19  ;;  %vm1294_vm1 = vcmp.ge.f32.partialorder %v1262_v17, 0.0  ;;  %v1325_v28 = vmul.f32 0.2, %v1261_v13  ;;  %v1326_v29 = vmul.f32 0.2, %v1262_v17 }
 0x195   : > { %vm1295_vm2 = vcmp.ge.f32.partialorder %v1263_v18, 0.0  ;;  %1475 = vst [vmem:[%s2277_s2 + $0x30] sm:$0xff] %v1733_v24  ;;  %v1355_v30 = vsel %vm1291_vm14, %v1259_v5, %v1323_v25  ;;  %v1356_v31 = vsel %vm1292_vm15, %v1260_v9, %v1324_v26  ;;  %vm1296_vm3 = vcmp.ge.f32.partialorder %v1264_v22, 0.0  ;;  %v1271_v46 = vld [vmem:[#allocation2 + $0x10] sm:$0xff]  ;;  %v1274_v58 = vld [vmem:[#allocation2 + $0xf8] sm:$0xff]  ;;  %v1275_v61 = vld [vmem:[#allocation2 + $0x20] sm:$0xff] }
 0x196   : > { %v1327_v32 = vmul.f32 0.2, %v1263_v18  ;;  %v1734_v34 = vpack.c.bf16 %v1356_v31, %v1355_v30  ;;  %v1357_v35 = vsel %vm1293_vm0, %v1261_v13, %v1325_v28  ;;  %v1358_v36 = vsel %vm1294_vm1, %v1262_v17, %v1326_v29  ;;  %v1276_v1 = vld [vmem:[#allocation2 + $0x98] sm:$0xff] }
 0x197   : > { %v1328_v37 = vmul.f32 0.2, %v1264_v22  ;;  %v1735_v39 = vpack.c.bf16 %v1358_v36, %v1357_v35  ;;  %vm1297_vm4 = vcmp.ge.f32.partialorder %v1265_v23, 0.0  ;;  %vm1298_vm5 = vcmp.ge.f32.partialorder %v1266_v27, 0.0 }
 0x198   : > { %v1359_v40 = vsel %vm1295_vm2, %v1263_v18, %v1327_v32  ;;  %1476 = vst [vmem:[%s2277_s2 + $0x38] sm:$0xff] %v1734_v34  ;;  %v1329_v44 = vmul.f32 0.2, %v1265_v23  ;;  %v1330_v45 = vmul.f32 0.2, %v1266_v27  ;;  %vm1299_vm6 = vcmp.ge.f32.partialorder %v1267_v33, 0.0 }
 0x199   : > { %v1360_v43 = vsel %vm1296_vm3, %v1264_v22, %v1328_v37  ;;  %1477 = vst [vmem:[%s2277_s2 + $0x40] sm:$0xff] %v1735_v39  ;;  %vm1300_vm7 = vcmp.ge.f32.partialorder %v1268_v38, 0.0  ;;  %v1331_v48 = vmul.f32 0.2, %v1267_v33  ;;  %v1332_v49 = vmul.f32 0.2, %v1268_v38 }
 0x19a   : > { %v1736_v47 = vpack.c.bf16 %v1360_v43, %v1359_v40  ;;  %v1361_v51 = vsel %vm1297_vm4, %v1265_v23, %v1329_v44  ;;  %v1362_v52 = vsel %vm1298_vm5, %v1266_v27, %v1330_v45  ;;  %vm1301_vm8 = vcmp.ge.f32.partialorder %v1269_v41, 0.0 }
 0x19b   : > { %vm1302_vm9 = vcmp.ge.f32.partialorder %v1270_v42, 0.0  ;;  %v1737_v54 = vpack.c.bf16 %v1362_v52, %v1361_v51  ;;  %v1363_v55 = vsel %vm1299_vm6, %v1267_v33, %v1331_v48  ;;  %v1364_v56 = vsel %vm1300_vm7, %v1268_v38, %v1332_v49 }
 0x19c   : > { %1478 = vst [vmem:[%s2277_s2 + $0x48] sm:$0xff] %v1736_v47  ;;  %v1333_v57 = vmul.f32 0.2, %v1269_v41  ;;  %v1738_v59 = vpack.c.bf16 %v1364_v56, %v1363_v55  ;;  %v1334_v60 = vmul.f32 0.2, %v1270_v42  ;;  %vm1303_vm10 = vcmp.ge.f32.partialorder %v1271_v46, 0.0 }
 0x19d   : > { %vm1304_vm11 = vcmp.ge.f32.partialorder %v1272_v50, 0.0  ;;  %1479 = vst [vmem:[%s2277_s2 + $0x50] sm:$0xff] %v1737_v54  ;;  %v1335_v63 = vmul.f32 0.2, %v1271_v46  ;;  %v1336_v0 = vmul.f32 0.2, %v1272_v50 }
 0x19e   : > { %v1365_v62 = vsel %vm1301_vm8, %v1269_v41, %v1333_v57  ;;  %vm1305_vm12 = vcmp.ge.f32.partialorder %v1273_v53, 0.0  ;;  %1480 = vst [vmem:[%s2277_s2 + $0x58] sm:$0xff] %v1738_v59  ;;  %v1366_v2 = vsel %vm1302_vm9, %v1270_v42, %v1334_v60  ;;  %vm1306_vm13 = vcmp.ge.f32.partialorder %v1274_v58, 0.0 }
 0x19f   : > { %v1337_v3 = vmul.f32 0.2, %v1273_v53  ;;  %v1338_v4 = vmul.f32 0.2, %v1274_v58  ;;  %v1739_v5 = vpack.c.bf16 %v1366_v2, %v1365_v62  ;;  %v1367_v6 = vsel %vm1303_vm10, %v1271_v46, %v1335_v63 }
 0x1a0   : > { %v1368_v7 = vsel %vm1304_vm11, %v1272_v50, %v1336_v0  ;;  %vm1307_vm14 = vcmp.ge.f32.partialorder %v1275_v61, 0.0  ;;  %vm1308_vm15 = vcmp.ge.f32.partialorder %v1276_v1, 0.0  ;;  %v1339_v12 = vmul.f32 0.2, %v1275_v61 }
 0x1a1   : > { %v1740_v8 = vpack.c.bf16 %v1368_v7, %v1367_v6  ;;  %v1369_v9 = vsel %vm1305_vm12, %v1273_v53, %v1337_v3  ;;  %v1370_v10 = vsel %vm1306_vm13, %v1274_v58, %v1338_v4  ;;  %1481 = vst [vmem:[%s2277_s2 + $0x60] sm:$0xff] %v1739_v5  ;;  %v1340_v13 = vmul.f32 0.2, %v1276_v1 }
 0x1a2   : > { %v1741_v11 = vpack.c.bf16 %v1370_v10, %v1369_v9  ;;  %v1371_v14 = vsel %vm1307_vm14, %v1275_v61, %v1339_v12 }
 0x1a3   : > { %1482 = vst [vmem:[%s2277_s2 + $0x68] sm:$0xff] %v1740_v8  ;;  %v1372_v15 = vsel %vm1308_vm15, %v1276_v1, %v1340_v13 }
 0x1a4   : > { %1483 = vst [vmem:[%s2277_s2 + $0x70] sm:$0xff] %v1741_v11  ;;  %v1742_v16 = vpack.c.bf16 %v1372_v15, %v1371_v14 }
 0x1a6   : > { %1484 = vst [vmem:[%s2277_s2 + $0x78] sm:$0xff] %v1742_v16 }
 0x1a7 PF: > { %s12_s13 = sadd.s32 1, %s1966_s13   ;;  %s2278_s9 = smov %s1954_s10 }
 0x1a8   : > { %p9_p12 = scmp.ge.s32.totalorder %s12_s13, 6   ;;  %s2279_s10 = smov %s2019_s17 }
 0x1a9   : > { %s2280_s11 = smov %s1962_s12  ;;  %s2281_s12 = smov %s2283_s14 }
 0x1aa   :  { %11 = sbr.rel (!%p9_p12) target bundleno = 3 (0x3), region = 97 }

// kernel: _lambda_.8
= control target key start
LH: loop header
LB: loop body
LE: loop exit
PB: predicated region body
PF: predicated region fallthrough
CT: control target
= control target key end

     0   :  { %s4444_s0 = inlined_call_operand.vmem [shape: bf16[112,4096], index: 0, kind: input, shape index: {}]   ;;  %s4445_s1 = inlined_call_operand.vmem [shape: bf16[4096,512], index: 1, kind: input, shape index: {}]   ;;  %s4446_s2 = inlined_call_operand.vmem [shape: bf16[112,512], index: 2, kind: output, shape index: {}]  }
   0x1   :  { %4447 = sst [smem:[#allocation17_spill]] %s4444_s0 }
   0x2   :  { %s3533_s9 = smov 0   ;;  %s3535_s10 = smov 0  }
   0x3   :  { %s3537_s11 = smov 0   ;;  %s3539_s12 = smov 0  }
   0x4   :  { %s3541_s13 = smov 0   ;;  %s3543_s14 = smov 0  }
   0x5   :  { %s3545_s15 = smov 0   ;;  %s3547_s16 = smov 0  }
   0x6   :  { %s3549_s17 = smov 0   ;;  %s3551_s18 = smov 0  }
   0x7   :  { %s3553_s19 = smov 0  }
   0x8 LB: > { %s2911_s20 = sadd.s32 4294967295, %s3515_s19   ;;  %s24_s21 = sadd.s32 1, %s3507_s17  ;;  %s3515_s19 = sphi %s3553_s19, %s12_s19   ;;  %s3511_s18 = sphi %s3551_s18, %s4483_s18   ;;  %s3507_s17 = sphi %s3549_s17, %s4482_s17   ;;  %s3503_s16 = sphi %s3547_s16, %s4481_s16   ;;  %s3499_s15 = sphi %s3545_s15, %s4480_s15   ;;  %s3495_s14 = sphi %s3543_s14, %s4479_s14   ;;  %s3491_s13 = sphi %s3541_s13, %s4478_s13   ;;  %s3487_s12 = sphi %s3539_s12, %s4477_s12   ;;  %s3483_s11 = sphi %s3537_s11, %s4476_s11   ;;  %s3479_s10 = sphi %s3535_s10, %s4475_s10   ;;  %s3475_s9 = sphi %s3533_s9, %s4474_s9  }
   0x9   : > { %p25_p0 = scmp.ge.s32.totalorder %s24_s21, 4  ;;  %s27_s22 = sadd.s32 1, %s3511_s18 }
   0xa   : > { %s40_s23 = sadd.s32 1, %s3495_s14  ;;  %p47_p1 = scmp.ne.s32.totalorder %s3495_s14, %s3491_s13 }
   0xb   : > { %s4485_s21 = smov (%p25_p0, %s24_s21), 0  ;;  %s4487_s22 = smov (!%p25_p0, %s27_s22), %s3511_s18 }
   0xc   : > { %s36_s24 = ssub.s32 %s3507_s17, %s4485_s21  ;;  %p48_p2 = scmp.eq.s32.totalorder %s3515_s19, 0 }
   0xd   : > { %p29_p3 = scmp.ge.s32.totalorder %s4487_s22, 2  ;;  %p38_p4 = scmp.eq.s32.totalorder %s36_s24, 0 }
   0xe   : > { %p3600_p5 = por %p48_p2, %p47_p1  ;;  %s68_s26 = sadd.s32 1, %s3487_s12 }
   0xf   : > { %s4489_s22 = smov (%p29_p3, %s4487_s22), 0  ;;  %p75_p6 = scmp.ne.s32.totalorder %s3487_s12, %s3483_s11 }
  0x10   : > { %s3608_s27 = scalar_select %p38_p4, %s3495_s14, %s40_s23  }
  0x11   : > { %s64_s28 = ssub.s32 %s3511_s18, %s4489_s22  ;;  %p3614_p9 = por %p75_p6, %p48_p2 }
  0x12   : > { %s65_s29 = sor.u32 %s64_s28, %s36_s24  ;;  %p94_p7 = scmp.eq.s32.totalorder %s64_s28, 0 }
  0x13   : > { %p66_p8 = scmp.eq.s32.totalorder %s65_s29, 0  ;;  %s96_s3 = sadd.s32 1, %s3479_s10 }
  0x14   : > { %p106_p10 = scmp.ne.s32.totalorder %s3479_s10, %s3475_s9  ;;  %p107_p11 = scmp.eq.s32.totalorder %s2911_s20, 7 }
  0x15   : > { %s3622_s4 = scalar_select %p66_p8, %s3487_s12, %s68_s26  }
  0x16   : > { %s3625_s5 = scalar_select %p94_p7, %s3479_s10, %s96_s3  }
  0x17   : > { %p3627_p12 = por %p107_p11, %p106_p10  ;;  %p2914_p13 = scmp.ge.s32.totalorder %s3515_s19, 8 }
  0x19   : > { %129 = sbr.rel (%p2914_p13) target bundleno = 140 (0x8c), region = 16 }
  0x1e   : > { %132 = sbr.rel (!%p3600_p5) target bundleno = 69 (0x45), region = 20  ;;  %s134_s7 = sand.u32 (%p3600_p5), 1, %s3495_s14  }
  0x1f   : > { %s3128_s8 = sshll.u32 (%p3600_p5), %s3507_s17, 5  ;;  %s3145_s23 = smul.u32 (%p3600_p5), 448, %s134_s7 }
  0x20   : > { %s4451_s0 = sld [smem:[#allocation17_spill]] (%p3600_p5) }
  0x21   : > { %s3647_s20 = scalar_lea.vmem (%p3600_p5), [#allocation3], %s3145_s23 }
  0x26   : > { %s3639_s28 = scalar_lea.vmem %s4451_s0, %s3128_s8 }
  0x27   : > { %v155_v0 = vld [vmem:[%s3639_s28] sm:$0xff]  ;;  %v157_v1 = vld [vmem:[%s3639_s28 + $0x8] sm:$0xff]  ;;  %v159_v2 = vld [vmem:[%s3639_s28 + $0x10] sm:$0xff] }
  0x28   : > { %v161_v3 = vld [vmem:[%s3639_s28 + $0x18] sm:$0xff]  ;;  %v163_v4 = vld [vmem:[%s3639_s28 + $0x80] sm:$0xff]  ;;  %v165_v5 = vld [vmem:[%s3639_s28 + $0x88] sm:$0xff]  ;;  %156 = vst [vmem:[%s3647_s20] sm:$0xff] %v155_v0 }
  0x29   : > { %158 = vst [vmem:[%s3647_s20 + $0x8] sm:$0xff] %v157_v1  ;;  %160 = vst [vmem:[%s3647_s20 + $0x10] sm:$0xff] %v159_v2  ;;  %v167_v6 = vld [vmem:[%s3639_s28 + $0x90] sm:$0xff]  ;;  %v169_v7 = vld [vmem:[%s3639_s28 + $0x98] sm:$0xff] }
  0x2a   : > { %162 = vst [vmem:[%s3647_s20 + $0x18] sm:$0xff] %v161_v3  ;;  %164 = vst [vmem:[%s3647_s20 + $0x20] sm:$0xff] %v163_v4  ;;  %v171_v8 = vld [vmem:[%s3639_s28 + $0x100] sm:$0xff]  ;;  %v173_v9 = vld [vmem:[%s3639_s28 + $0x108] sm:$0xff] }
  0x2b   : > { %166 = vst [vmem:[%s3647_s20 + $0x28] sm:$0xff] %v165_v5  ;;  %168 = vst [vmem:[%s3647_s20 + $0x30] sm:$0xff] %v167_v6  ;;  %v175_v10 = vld [vmem:[%s3639_s28 + $0x110] sm:$0xff]  ;;  %v177_v11 = vld [vmem:[%s3639_s28 + $0x118] sm:$0xff] }
  0x2c   : > { %170 = vst [vmem:[%s3647_s20 + $0x38] sm:$0xff] %v169_v7  ;;  %172 = vst [vmem:[%s3647_s20 + $0x40] sm:$0xff] %v171_v8  ;;  %v179_v12 = vld [vmem:[%s3639_s28 + $0x180] sm:$0xff]  ;;  %v181_v13 = vld [vmem:[%s3639_s28 + $0x188] sm:$0xff] }
  0x2d   : > { %174 = vst [vmem:[%s3647_s20 + $0x48] sm:$0xff] %v173_v9  ;;  %176 = vst [vmem:[%s3647_s20 + $0x50] sm:$0xff] %v175_v10  ;;  %v183_v14 = vld [vmem:[%s3639_s28 + $0x190] sm:$0xff]  ;;  %v185_v15 = vld [vmem:[%s3639_s28 + $0x198] sm:$0xff] }
  0x2e   : > { %178 = vst [vmem:[%s3647_s20 + $0x58] sm:$0xff] %v177_v11  ;;  %180 = vst [vmem:[%s3647_s20 + $0x60] sm:$0xff] %v179_v12  ;;  %v187_v16 = vld [vmem:[%s3639_s28 + $0x200] sm:$0xff]  ;;  %v189_v17 = vld [vmem:[%s3639_s28 + $0x208] sm:$0xff] }
  0x2f   : > { %182 = vst [vmem:[%s3647_s20 + $0x68] sm:$0xff] %v181_v13  ;;  %184 = vst [vmem:[%s3647_s20 + $0x70] sm:$0xff] %v183_v14  ;;  %v191_v18 = vld [vmem:[%s3639_s28 + $0x210] sm:$0xff]  ;;  %v193_v19 = vld [vmem:[%s3639_s28 + $0x218] sm:$0xff] }
  0x30   : > { %186 = vst [vmem:[%s3647_s20 + $0x78] sm:$0xff] %v185_v15  ;;  %188 = vst [vmem:[%s3647_s20 + $0x80] sm:$0xff] %v187_v16  ;;  %v195_v20 = vld [vmem:[%s3639_s28 + $0x280] sm:$0xff]  ;;  %v197_v21 = vld [vmem:[%s3639_s28 + $0x288] sm:$0xff] }
  0x31   : > { %190 = vst [vmem:[%s3647_s20 + $0x88] sm:$0xff] %v189_v17  ;;  %192 = vst [vmem:[%s3647_s20 + $0x90] sm:$0xff] %v191_v18  ;;  %v199_v22 = vld [vmem:[%s3639_s28 + $0x290] sm:$0xff]  ;;  %v201_v23 = vld [vmem:[%s3639_s28 + $0x298] sm:$0xff] }
  0x32   : > { %194 = vst [vmem:[%s3647_s20 + $0x98] sm:$0xff] %v193_v19  ;;  %196 = vst [vmem:[%s3647_s20 + $0xa0] sm:$0xff] %v195_v20  ;;  %v203_v24 = vld [vmem:[%s3639_s28 + $0x300] sm:$0xff]  ;;  %v205_v25 = vld [vmem:[%s3639_s28 + $0x308] sm:$0xff] }
  0x33   : > { %198 = vst [vmem:[%s3647_s20 + $0xa8] sm:$0xff] %v197_v21  ;;  %200 = vst [vmem:[%s3647_s20 + $0xb0] sm:$0xff] %v199_v22  ;;  %v207_v26 = vld [vmem:[%s3639_s28 + $0x310] sm:$0xff]  ;;  %v209_v27 = vld [vmem:[%s3639_s28 + $0x318] sm:$0xff] }
  0x34   : > { %202 = vst [vmem:[%s3647_s20 + $0xb8] sm:$0xff] %v201_v23  ;;  %204 = vst [vmem:[%s3647_s20 + $0xc0] sm:$0xff] %v203_v24  ;;  %v211_v28 = vld [vmem:[%s3639_s28 + $0x380] sm:$0xff]  ;;  %v213_v29 = vld [vmem:[%s3639_s28 + $0x388] sm:$0xff] }
  0x35   : > { %206 = vst [vmem:[%s3647_s20 + $0xc8] sm:$0xff] %v205_v25  ;;  %208 = vst [vmem:[%s3647_s20 + $0xd0] sm:$0xff] %v207_v26  ;;  %v215_v30 = vld [vmem:[%s3639_s28 + $0x390] sm:$0xff]  ;;  %v217_v31 = vld [vmem:[%s3639_s28 + $0x398] sm:$0xff] }
  0x36   : > { %210 = vst [vmem:[%s3647_s20 + $0xd8] sm:$0xff] %v209_v27  ;;  %212 = vst [vmem:[%s3647_s20 + $0xe0] sm:$0xff] %v211_v28  ;;  %v219_v32 = vld [vmem:[%s3639_s28 + $0x400] sm:$0xff]  ;;  %v221_v33 = vld [vmem:[%s3639_s28 + $0x408] sm:$0xff] }
  0x37   : > { %214 = vst [vmem:[%s3647_s20 + $0xe8] sm:$0xff] %v213_v29  ;;  %216 = vst [vmem:[%s3647_s20 + $0xf0] sm:$0xff] %v215_v30  ;;  %v223_v34 = vld [vmem:[%s3639_s28 + $0x410] sm:$0xff]  ;;  %v225_v35 = vld [vmem:[%s3639_s28 + $0x418] sm:$0xff] }
  0x38   : > { %218 = vst [vmem:[%s3647_s20 + $0xf8] sm:$0xff] %v217_v31  ;;  %220 = vst [vmem:[%s3647_s20 + $0x100] sm:$0xff] %v219_v32  ;;  %v227_v36 = vld [vmem:[%s3639_s28 + $0x480] sm:$0xff]  ;;  %v229_v37 = vld [vmem:[%s3639_s28 + $0x488] sm:$0xff] }
  0x39   : > { %222 = vst [vmem:[%s3647_s20 + $0x108] sm:$0xff] %v221_v33  ;;  %224 = vst [vmem:[%s3647_s20 + $0x110] sm:$0xff] %v223_v34  ;;  %v231_v38 = vld [vmem:[%s3639_s28 + $0x490] sm:$0xff]  ;;  %v233_v39 = vld [vmem:[%s3639_s28 + $0x498] sm:$0xff] }
  0x3a   : > { %226 = vst [vmem:[%s3647_s20 + $0x118] sm:$0xff] %v225_v35  ;;  %228 = vst [vmem:[%s3647_s20 + $0x120] sm:$0xff] %v227_v36  ;;  %v235_v40 = vld [vmem:[%s3639_s28 + $0x500] sm:$0xff]  ;;  %v237_v41 = vld [vmem:[%s3639_s28 + $0x508] sm:$0xff] }
  0x3b   : > { %230 = vst [vmem:[%s3647_s20 + $0x128] sm:$0xff] %v229_v37  ;;  %232 = vst [vmem:[%s3647_s20 + $0x130] sm:$0xff] %v231_v38  ;;  %v239_v42 = vld [vmem:[%s3639_s28 + $0x510] sm:$0xff]  ;;  %v241_v43 = vld [vmem:[%s3639_s28 + $0x518] sm:$0xff] }
  0x3c   : > { %234 = vst [vmem:[%s3647_s20 + $0x138] sm:$0xff] %v233_v39  ;;  %236 = vst [vmem:[%s3647_s20 + $0x140] sm:$0xff] %v235_v40  ;;  %v243_v44 = vld [vmem:[%s3639_s28 + $0x580] sm:$0xff]  ;;  %v245_v45 = vld [vmem:[%s3639_s28 + $0x588] sm:$0xff] }
  0x3d   : > { %238 = vst [vmem:[%s3647_s20 + $0x148] sm:$0xff] %v237_v41  ;;  %240 = vst [vmem:[%s3647_s20 + $0x150] sm:$0xff] %v239_v42  ;;  %v247_v46 = vld [vmem:[%s3639_s28 + $0x590] sm:$0xff]  ;;  %v249_v47 = vld [vmem:[%s3639_s28 + $0x598] sm:$0xff] }
  0x3e   : > { %242 = vst [vmem:[%s3647_s20 + $0x158] sm:$0xff] %v241_v43  ;;  %244 = vst [vmem:[%s3647_s20 + $0x160] sm:$0xff] %v243_v44  ;;  %v251_v48 = vld [vmem:[%s3639_s28 + $0x600] sm:$0xff]  ;;  %v253_v49 = vld [vmem:[%s3639_s28 + $0x608] sm:$0xff] }
  0x3f   : > { %246 = vst [vmem:[%s3647_s20 + $0x168] sm:$0xff] %v245_v45  ;;  %248 = vst [vmem:[%s3647_s20 + $0x170] sm:$0xff] %v247_v46  ;;  %v255_v50 = vld [vmem:[%s3639_s28 + $0x610] sm:$0xff]  ;;  %v257_v51 = vld [vmem:[%s3639_s28 + $0x618] sm:$0xff] }
  0x40   : > { %250 = vst [vmem:[%s3647_s20 + $0x178] sm:$0xff] %v249_v47  ;;  %252 = vst [vmem:[%s3647_s20 + $0x180] sm:$0xff] %v251_v48  ;;  %v259_v52 = vld [vmem:[%s3639_s28 + $0x680] sm:$0xff]  ;;  %v261_v53 = vld [vmem:[%s3639_s28 + $0x688] sm:$0xff] }
  0x41   : > { %254 = vst [vmem:[%s3647_s20 + $0x188] sm:$0xff] %v253_v49  ;;  %256 = vst [vmem:[%s3647_s20 + $0x190] sm:$0xff] %v255_v50  ;;  %v263_v54 = vld [vmem:[%s3639_s28 + $0x690] sm:$0xff]  ;;  %v265_v55 = vld [vmem:[%s3639_s28 + $0x698] sm:$0xff] }
  0x42   : > { %258 = vst [vmem:[%s3647_s20 + $0x198] sm:$0xff] %v257_v51  ;;  %260 = vst [vmem:[%s3647_s20 + $0x1a0] sm:$0xff] %v259_v52 }
  0x43   : > { %262 = vst [vmem:[%s3647_s20 + $0x1a8] sm:$0xff] %v261_v53  ;;  %264 = vst [vmem:[%s3647_s20 + $0x1b0] sm:$0xff] %v263_v54 }
  0x44   : > { %266 = vst [vmem:[%s3647_s20 + $0x1b8] sm:$0xff] %v265_v55 }
  0x45 PF: > { %272 = sbr.rel (!%p3614_p9) target bundleno = 140 (0x8c), region = 43  ;;  %s274_s25 = sand.u32 (%p3614_p9), 1, %s3487_s12  }
  0x46   : > { %s2919_s29 = sshll.u32 (%p3614_p9), %s3511_s18, 1  ;;  %s2917_s3 = sshll.u32 (%p3614_p9), %s274_s25, 10 }
  0x47   : > { %s3129_s7 = sshll.u32 (%p3614_p9), %s3507_s17, 9  ;;  %s3768_s30 = scalar_lea.vmem (%p3614_p9), [#allocation4], %s2917_s3 }
  0x48   : > { %s280_s8 = sadd.s32 (%p3614_p9), %s3129_s7, %s2919_s29 }
  0x49   : > { %s2921_s23 = sshll.u32 (%p3614_p9), %s280_s8, 2 }
  0x4a   : > { %s3763_s0 = scalar_lea.vmem %s4445_s1, %s2921_s23 }
  0x4b   : > { %v565_v56 = vld [vmem:[%s3763_s0] sm:$0xff]  ;;  %v567_v57 = vld [vmem:[%s3763_s0 + $0x10] sm:$0xff] }
  0x4c   : > { %v569_v58 = vld [vmem:[%s3763_s0 + $0x20] sm:$0xff]  ;;  %566 = vst [vmem:[%s3768_s30] sm:$0xff] %v565_v56  ;;  %568 = vst [vmem:[%s3768_s30 + $0x8] sm:$0xff] %v567_v57  ;;  %v571_v59 = vld [vmem:[%s3763_s0 + $0x30] sm:$0xff] }
  0x4d   : > { %570 = vst [vmem:[%s3768_s30 + $0x10] sm:$0xff] %v569_v58  ;;  %v573_v60 = vld [vmem:[%s3763_s0 + $0x40] sm:$0xff]  ;;  %v575_v61 = vld [vmem:[%s3763_s0 + $0x50] sm:$0xff]  ;;  %572 = vst [vmem:[%s3768_s30 + $0x18] sm:$0xff] %v571_v59 }
  0x4e   : > { %574 = vst [vmem:[%s3768_s30 + $0x20] sm:$0xff] %v573_v60  ;;  %576 = vst [vmem:[%s3768_s30 + $0x28] sm:$0xff] %v575_v61  ;;  %v577_v62 = vld [vmem:[%s3763_s0 + $0x60] sm:$0xff]  ;;  %v579_v63 = vld [vmem:[%s3763_s0 + $0x70] sm:$0xff] }
  0x4f   : > { %v581_v0 = vld [vmem:[%s3763_s0 + $0x80] sm:$0xff]  ;;  %578 = vst [vmem:[%s3768_s30 + $0x30] sm:$0xff] %v577_v62  ;;  %580 = vst [vmem:[%s3768_s30 + $0x38] sm:$0xff] %v579_v63  ;;  %v583_v1 = vld [vmem:[%s3763_s0 + $0x90] sm:$0xff] }
  0x50   : > { %582 = vst [vmem:[%s3768_s30 + $0x40] sm:$0xff] %v581_v0  ;;  %v585_v2 = vld [vmem:[%s3763_s0 + $0xa0] sm:$0xff]  ;;  %v587_v3 = vld [vmem:[%s3763_s0 + $0xb0] sm:$0xff]  ;;  %584 = vst [vmem:[%s3768_s30 + $0x48] sm:$0xff] %v583_v1 }
  0x51   : > { %586 = vst [vmem:[%s3768_s30 + $0x50] sm:$0xff] %v585_v2  ;;  %588 = vst [vmem:[%s3768_s30 + $0x58] sm:$0xff] %v587_v3  ;;  %v589_v4 = vld [vmem:[%s3763_s0 + $0xc0] sm:$0xff]  ;;  %v591_v5 = vld [vmem:[%s3763_s0 + $0xd0] sm:$0xff] }
  0x52   : > { %v593_v6 = vld [vmem:[%s3763_s0 + $0xe0] sm:$0xff]  ;;  %590 = vst [vmem:[%s3768_s30 + $0x60] sm:$0xff] %v589_v4  ;;  %592 = vst [vmem:[%s3768_s30 + $0x68] sm:$0xff] %v591_v5  ;;  %v595_v7 = vld [vmem:[%s3763_s0 + $0xf0] sm:$0xff] }
  0x53   : > { %594 = vst [vmem:[%s3768_s30 + $0x70] sm:$0xff] %v593_v6  ;;  %v597_v8 = vld [vmem:[%s3763_s0 + $0x100] sm:$0xff]  ;;  %v599_v9 = vld [vmem:[%s3763_s0 + $0x110] sm:$0xff]  ;;  %596 = vst [vmem:[%s3768_s30 + $0x78] sm:$0xff] %v595_v7 }
  0x54   : > { %598 = vst [vmem:[%s3768_s30 + $0x80] sm:$0xff] %v597_v8  ;;  %600 = vst [vmem:[%s3768_s30 + $0x88] sm:$0xff] %v599_v9  ;;  %v601_v10 = vld [vmem:[%s3763_s0 + $0x120] sm:$0xff]  ;;  %v603_v11 = vld [vmem:[%s3763_s0 + $0x130] sm:$0xff] }
  0x55   : > { %v605_v12 = vld [vmem:[%s3763_s0 + $0x140] sm:$0xff]  ;;  %602 = vst [vmem:[%s3768_s30 + $0x90] sm:$0xff] %v601_v10  ;;  %604 = vst [vmem:[%s3768_s30 + $0x98] sm:$0xff] %v603_v11  ;;  %v607_v13 = vld [vmem:[%s3763_s0 + $0x150] sm:$0xff] }
  0x56   : > { %606 = vst [vmem:[%s3768_s30 + $0xa0] sm:$0xff] %v605_v12  ;;  %v609_v14 = vld [vmem:[%s3763_s0 + $0x160] sm:$0xff]  ;;  %v611_v15 = vld [vmem:[%s3763_s0 + $0x170] sm:$0xff]  ;;  %608 = vst [vmem:[%s3768_s30 + $0xa8] sm:$0xff] %v607_v13 }
  0x57   : > { %610 = vst [vmem:[%s3768_s30 + $0xb0] sm:$0xff] %v609_v14  ;;  %612 = vst [vmem:[%s3768_s30 + $0xb8] sm:$0xff] %v611_v15  ;;  %v613_v16 = vld [vmem:[%s3763_s0 + $0x180] sm:$0xff]  ;;  %v615_v17 = vld [vmem:[%s3763_s0 + $0x190] sm:$0xff] }
  0x58   : > { %v617_v18 = vld [vmem:[%s3763_s0 + $0x1a0] sm:$0xff]  ;;  %614 = vst [vmem:[%s3768_s30 + $0xc0] sm:$0xff] %v613_v16  ;;  %616 = vst [vmem:[%s3768_s30 + $0xc8] sm:$0xff] %v615_v17  ;;  %v619_v19 = vld [vmem:[%s3763_s0 + $0x1b0] sm:$0xff] }
  0x59   : > { %618 = vst [vmem:[%s3768_s30 + $0xd0] sm:$0xff] %v617_v18  ;;  %v621_v20 = vld [vmem:[%s3763_s0 + $0x1c0] sm:$0xff]  ;;  %v623_v21 = vld [vmem:[%s3763_s0 + $0x1d0] sm:$0xff]  ;;  %620 = vst [vmem:[%s3768_s30 + $0xd8] sm:$0xff] %v619_v19 }
  0x5a   : > { %622 = vst [vmem:[%s3768_s30 + $0xe0] sm:$0xff] %v621_v20  ;;  %624 = vst [vmem:[%s3768_s30 + $0xe8] sm:$0xff] %v623_v21  ;;  %v625_v22 = vld [vmem:[%s3763_s0 + $0x1e0] sm:$0xff]  ;;  %v627_v23 = vld [vmem:[%s3763_s0 + $0x1f0] sm:$0xff] }
  0x5b   : > { %v629_v24 = vld [vmem:[%s3763_s0 + $0x200] sm:$0xff]  ;;  %626 = vst [vmem:[%s3768_s30 + $0xf0] sm:$0xff] %v625_v22  ;;  %628 = vst [vmem:[%s3768_s30 + $0xf8] sm:$0xff] %v627_v23  ;;  %v631_v25 = vld [vmem:[%s3763_s0 + $0x210] sm:$0xff] }
  0x5c   : > { %630 = vst [vmem:[%s3768_s30 + $0x100] sm:$0xff] %v629_v24  ;;  %v633_v26 = vld [vmem:[%s3763_s0 + $0x220] sm:$0xff]  ;;  %v635_v27 = vld [vmem:[%s3763_s0 + $0x230] sm:$0xff]  ;;  %632 = vst [vmem:[%s3768_s30 + $0x108] sm:$0xff] %v631_v25 }
  0x5d   : > { %634 = vst [vmem:[%s3768_s30 + $0x110] sm:$0xff] %v633_v26  ;;  %636 = vst [vmem:[%s3768_s30 + $0x118] sm:$0xff] %v635_v27  ;;  %v637_v28 = vld [vmem:[%s3763_s0 + $0x240] sm:$0xff]  ;;  %v639_v29 = vld [vmem:[%s3763_s0 + $0x250] sm:$0xff] }
  0x5e   : > { %v641_v30 = vld [vmem:[%s3763_s0 + $0x260] sm:$0xff]  ;;  %638 = vst [vmem:[%s3768_s30 + $0x120] sm:$0xff] %v637_v28  ;;  %640 = vst [vmem:[%s3768_s30 + $0x128] sm:$0xff] %v639_v29  ;;  %v643_v31 = vld [vmem:[%s3763_s0 + $0x270] sm:$0xff] }
  0x5f   : > { %642 = vst [vmem:[%s3768_s30 + $0x130] sm:$0xff] %v641_v30  ;;  %v645_v32 = vld [vmem:[%s3763_s0 + $0x280] sm:$0xff]  ;;  %v647_v33 = vld [vmem:[%s3763_s0 + $0x290] sm:$0xff]  ;;  %644 = vst [vmem:[%s3768_s30 + $0x138] sm:$0xff] %v643_v31 }
  0x60   : > { %646 = vst [vmem:[%s3768_s30 + $0x140] sm:$0xff] %v645_v32  ;;  %648 = vst [vmem:[%s3768_s30 + $0x148] sm:$0xff] %v647_v33  ;;  %v649_v34 = vld [vmem:[%s3763_s0 + $0x2a0] sm:$0xff]  ;;  %v651_v35 = vld [vmem:[%s3763_s0 + $0x2b0] sm:$0xff] }
  0x61   : > { %v653_v36 = vld [vmem:[%s3763_s0 + $0x2c0] sm:$0xff]  ;;  %650 = vst [vmem:[%s3768_s30 + $0x150] sm:$0xff] %v649_v34  ;;  %652 = vst [vmem:[%s3768_s30 + $0x158] sm:$0xff] %v651_v35  ;;  %v655_v37 = vld [vmem:[%s3763_s0 + $0x2d0] sm:$0xff] }
  0x62   : > { %654 = vst [vmem:[%s3768_s30 + $0x160] sm:$0xff] %v653_v36  ;;  %v657_v38 = vld [vmem:[%s3763_s0 + $0x2e0] sm:$0xff]  ;;  %v659_v39 = vld [vmem:[%s3763_s0 + $0x2f0] sm:$0xff]  ;;  %656 = vst [vmem:[%s3768_s30 + $0x168] sm:$0xff] %v655_v37 }
  0x63   : > { %658 = vst [vmem:[%s3768_s30 + $0x170] sm:$0xff] %v657_v38  ;;  %660 = vst [vmem:[%s3768_s30 + $0x178] sm:$0xff] %v659_v39  ;;  %v661_v40 = vld [vmem:[%s3763_s0 + $0x300] sm:$0xff]  ;;  %v663_v41 = vld [vmem:[%s3763_s0 + $0x310] sm:$0xff] }
  0x64   : > { %v665_v42 = vld [vmem:[%s3763_s0 + $0x320] sm:$0xff]  ;;  %662 = vst [vmem:[%s3768_s30 + $0x180] sm:$0xff] %v661_v40  ;;  %664 = vst [vmem:[%s3768_s30 + $0x188] sm:$0xff] %v663_v41  ;;  %v667_v43 = vld [vmem:[%s3763_s0 + $0x330] sm:$0xff] }
  0x65   : > { %666 = vst [vmem:[%s3768_s30 + $0x190] sm:$0xff] %v665_v42  ;;  %v669_v44 = vld [vmem:[%s3763_s0 + $0x340] sm:$0xff]  ;;  %v671_v45 = vld [vmem:[%s3763_s0 + $0x350] sm:$0xff]  ;;  %668 = vst [vmem:[%s3768_s30 + $0x198] sm:$0xff] %v667_v43 }
  0x66   : > { %670 = vst [vmem:[%s3768_s30 + $0x1a0] sm:$0xff] %v669_v44  ;;  %672 = vst [vmem:[%s3768_s30 + $0x1a8] sm:$0xff] %v671_v45  ;;  %v673_v46 = vld [vmem:[%s3763_s0 + $0x360] sm:$0xff]  ;;  %v675_v47 = vld [vmem:[%s3763_s0 + $0x370] sm:$0xff] }
  0x67   : > { %v677_v48 = vld [vmem:[%s3763_s0 + $0x380] sm:$0xff]  ;;  %674 = vst [vmem:[%s3768_s30 + $0x1b0] sm:$0xff] %v673_v46  ;;  %676 = vst [vmem:[%s3768_s30 + $0x1b8] sm:$0xff] %v675_v47  ;;  %v679_v49 = vld [vmem:[%s3763_s0 + $0x390] sm:$0xff] }
  0x68   : > { %678 = vst [vmem:[%s3768_s30 + $0x1c0] sm:$0xff] %v677_v48  ;;  %v681_v50 = vld [vmem:[%s3763_s0 + $0x3a0] sm:$0xff]  ;;  %v683_v51 = vld [vmem:[%s3763_s0 + $0x3b0] sm:$0xff]  ;;  %680 = vst [vmem:[%s3768_s30 + $0x1c8] sm:$0xff] %v679_v49 }
  0x69   : > { %682 = vst [vmem:[%s3768_s30 + $0x1d0] sm:$0xff] %v681_v50  ;;  %684 = vst [vmem:[%s3768_s30 + $0x1d8] sm:$0xff] %v683_v51  ;;  %v685_v52 = vld [vmem:[%s3763_s0 + $0x3c0] sm:$0xff]  ;;  %v687_v53 = vld [vmem:[%s3763_s0 + $0x3d0] sm:$0xff] }
  0x6a   : > { %v689_v54 = vld [vmem:[%s3763_s0 + $0x3e0] sm:$0xff]  ;;  %686 = vst [vmem:[%s3768_s30 + $0x1e0] sm:$0xff] %v685_v52  ;;  %688 = vst [vmem:[%s3768_s30 + $0x1e8] sm:$0xff] %v687_v53  ;;  %v691_v55 = vld [vmem:[%s3763_s0 + $0x3f0] sm:$0xff] }
  0x6b   : > { %690 = vst [vmem:[%s3768_s30 + $0x1f0] sm:$0xff] %v689_v54  ;;  %v693_v56 = vld [vmem:[%s3763_s0 + $0x400] sm:$0xff]  ;;  %v695_v57 = vld [vmem:[%s3763_s0 + $0x410] sm:$0xff]  ;;  %692 = vst [vmem:[%s3768_s30 + $0x1f8] sm:$0xff] %v691_v55 }
  0x6c   : > { %694 = vst [vmem:[%s3768_s30 + $0x200] sm:$0xff] %v693_v56  ;;  %696 = vst [vmem:[%s3768_s30 + $0x208] sm:$0xff] %v695_v57  ;;  %v697_v58 = vld [vmem:[%s3763_s0 + $0x420] sm:$0xff]  ;;  %v699_v59 = vld [vmem:[%s3763_s0 + $0x430] sm:$0xff] }
  0x6d   : > { %v701_v60 = vld [vmem:[%s3763_s0 + $0x440] sm:$0xff]  ;;  %698 = vst [vmem:[%s3768_s30 + $0x210] sm:$0xff] %v697_v58  ;;  %700 = vst [vmem:[%s3768_s30 + $0x218] sm:$0xff] %v699_v59  ;;  %v703_v61 = vld [vmem:[%s3763_s0 + $0x450] sm:$0xff] }
  0x6e   : > { %702 = vst [vmem:[%s3768_s30 + $0x220] sm:$0xff] %v701_v60  ;;  %v705_v62 = vld [vmem:[%s3763_s0 + $0x460] sm:$0xff]  ;;  %v707_v63 = vld [vmem:[%s3763_s0 + $0x470] sm:$0xff]  ;;  %704 = vst [vmem:[%s3768_s30 + $0x228] sm:$0xff] %v703_v61 }
  0x6f   : > { %706 = vst [vmem:[%s3768_s30 + $0x230] sm:$0xff] %v705_v62  ;;  %708 = vst [vmem:[%s3768_s30 + $0x238] sm:$0xff] %v707_v63  ;;  %v709_v0 = vld [vmem:[%s3763_s0 + $0x480] sm:$0xff]  ;;  %v711_v1 = vld [vmem:[%s3763_s0 + $0x490] sm:$0xff] }
  0x70   : > { %v713_v2 = vld [vmem:[%s3763_s0 + $0x4a0] sm:$0xff]  ;;  %710 = vst [vmem:[%s3768_s30 + $0x240] sm:$0xff] %v709_v0  ;;  %712 = vst [vmem:[%s3768_s30 + $0x248] sm:$0xff] %v711_v1  ;;  %v715_v3 = vld [vmem:[%s3763_s0 + $0x4b0] sm:$0xff] }
  0x71   : > { %714 = vst [vmem:[%s3768_s30 + $0x250] sm:$0xff] %v713_v2  ;;  %v717_v4 = vld [vmem:[%s3763_s0 + $0x4c0] sm:$0xff]  ;;  %v719_v5 = vld [vmem:[%s3763_s0 + $0x4d0] sm:$0xff]  ;;  %716 = vst [vmem:[%s3768_s30 + $0x258] sm:$0xff] %v715_v3 }
  0x72   : > { %718 = vst [vmem:[%s3768_s30 + $0x260] sm:$0xff] %v717_v4  ;;  %720 = vst [vmem:[%s3768_s30 + $0x268] sm:$0xff] %v719_v5  ;;  %v721_v6 = vld [vmem:[%s3763_s0 + $0x4e0] sm:$0xff]  ;;  %v723_v7 = vld [vmem:[%s3763_s0 + $0x4f0] sm:$0xff] }
  0x73   : > { %v725_v8 = vld [vmem:[%s3763_s0 + $0x500] sm:$0xff]  ;;  %722 = vst [vmem:[%s3768_s30 + $0x270] sm:$0xff] %v721_v6  ;;  %724 = vst [vmem:[%s3768_s30 + $0x278] sm:$0xff] %v723_v7  ;;  %v727_v9 = vld [vmem:[%s3763_s0 + $0x510] sm:$0xff] }
  0x74   : > { %726 = vst [vmem:[%s3768_s30 + $0x280] sm:$0xff] %v725_v8  ;;  %v729_v10 = vld [vmem:[%s3763_s0 + $0x520] sm:$0xff]  ;;  %v731_v11 = vld [vmem:[%s3763_s0 + $0x530] sm:$0xff]  ;;  %728 = vst [vmem:[%s3768_s30 + $0x288] sm:$0xff] %v727_v9 }
  0x75   : > { %730 = vst [vmem:[%s3768_s30 + $0x290] sm:$0xff] %v729_v10  ;;  %732 = vst [vmem:[%s3768_s30 + $0x298] sm:$0xff] %v731_v11  ;;  %v733_v12 = vld [vmem:[%s3763_s0 + $0x540] sm:$0xff]  ;;  %v735_v13 = vld [vmem:[%s3763_s0 + $0x550] sm:$0xff] }
  0x76   : > { %v737_v14 = vld [vmem:[%s3763_s0 + $0x560] sm:$0xff]  ;;  %734 = vst [vmem:[%s3768_s30 + $0x2a0] sm:$0xff] %v733_v12  ;;  %736 = vst [vmem:[%s3768_s30 + $0x2a8] sm:$0xff] %v735_v13  ;;  %v739_v15 = vld [vmem:[%s3763_s0 + $0x570] sm:$0xff] }
  0x77   : > { %738 = vst [vmem:[%s3768_s30 + $0x2b0] sm:$0xff] %v737_v14  ;;  %v741_v16 = vld [vmem:[%s3763_s0 + $0x580] sm:$0xff]  ;;  %v743_v17 = vld [vmem:[%s3763_s0 + $0x590] sm:$0xff]  ;;  %740 = vst [vmem:[%s3768_s30 + $0x2b8] sm:$0xff] %v739_v15 }
  0x78   : > { %742 = vst [vmem:[%s3768_s30 + $0x2c0] sm:$0xff] %v741_v16  ;;  %744 = vst [vmem:[%s3768_s30 + $0x2c8] sm:$0xff] %v743_v17  ;;  %v745_v18 = vld [vmem:[%s3763_s0 + $0x5a0] sm:$0xff]  ;;  %v747_v19 = vld [vmem:[%s3763_s0 + $0x5b0] sm:$0xff] }
  0x79   : > { %v749_v20 = vld [vmem:[%s3763_s0 + $0x5c0] sm:$0xff]  ;;  %746 = vst [vmem:[%s3768_s30 + $0x2d0] sm:$0xff] %v745_v18  ;;  %748 = vst [vmem:[%s3768_s30 + $0x2d8] sm:$0xff] %v747_v19  ;;  %v751_v21 = vld [vmem:[%s3763_s0 + $0x5d0] sm:$0xff] }
  0x7a   : > { %750 = vst [vmem:[%s3768_s30 + $0x2e0] sm:$0xff] %v749_v20  ;;  %v753_v22 = vld [vmem:[%s3763_s0 + $0x5e0] sm:$0xff]  ;;  %v755_v23 = vld [vmem:[%s3763_s0 + $0x5f0] sm:$0xff]  ;;  %752 = vst [vmem:[%s3768_s30 + $0x2e8] sm:$0xff] %v751_v21 }
  0x7b   : > { %754 = vst [vmem:[%s3768_s30 + $0x2f0] sm:$0xff] %v753_v22  ;;  %756 = vst [vmem:[%s3768_s30 + $0x2f8] sm:$0xff] %v755_v23  ;;  %v757_v24 = vld [vmem:[%s3763_s0 + $0x600] sm:$0xff]  ;;  %v759_v25 = vld [vmem:[%s3763_s0 + $0x610] sm:$0xff] }
  0x7c   : > { %v761_v26 = vld [vmem:[%s3763_s0 + $0x620] sm:$0xff]  ;;  %758 = vst [vmem:[%s3768_s30 + $0x300] sm:$0xff] %v757_v24  ;;  %760 = vst [vmem:[%s3768_s30 + $0x308] sm:$0xff] %v759_v25  ;;  %v763_v27 = vld [vmem:[%s3763_s0 + $0x630] sm:$0xff] }
  0x7d   : > { %762 = vst [vmem:[%s3768_s30 + $0x310] sm:$0xff] %v761_v26  ;;  %v765_v28 = vld [vmem:[%s3763_s0 + $0x640] sm:$0xff]  ;;  %v767_v29 = vld [vmem:[%s3763_s0 + $0x650] sm:$0xff]  ;;  %764 = vst [vmem:[%s3768_s30 + $0x318] sm:$0xff] %v763_v27 }
  0x7e   : > { %766 = vst [vmem:[%s3768_s30 + $0x320] sm:$0xff] %v765_v28  ;;  %768 = vst [vmem:[%s3768_s30 + $0x328] sm:$0xff] %v767_v29  ;;  %v769_v30 = vld [vmem:[%s3763_s0 + $0x660] sm:$0xff]  ;;  %v771_v31 = vld [vmem:[%s3763_s0 + $0x670] sm:$0xff] }
  0x7f   : > { %v773_v32 = vld [vmem:[%s3763_s0 + $0x680] sm:$0xff]  ;;  %770 = vst [vmem:[%s3768_s30 + $0x330] sm:$0xff] %v769_v30  ;;  %772 = vst [vmem:[%s3768_s30 + $0x338] sm:$0xff] %v771_v31  ;;  %v775_v33 = vld [vmem:[%s3763_s0 + $0x690] sm:$0xff] }
  0x80   : > { %774 = vst [vmem:[%s3768_s30 + $0x340] sm:$0xff] %v773_v32  ;;  %v777_v34 = vld [vmem:[%s3763_s0 + $0x6a0] sm:$0xff]  ;;  %v779_v35 = vld [vmem:[%s3763_s0 + $0x6b0] sm:$0xff]  ;;  %776 = vst [vmem:[%s3768_s30 + $0x348] sm:$0xff] %v775_v33 }
  0x81   : > { %778 = vst [vmem:[%s3768_s30 + $0x350] sm:$0xff] %v777_v34  ;;  %780 = vst [vmem:[%s3768_s30 + $0x358] sm:$0xff] %v779_v35  ;;  %v781_v36 = vld [vmem:[%s3763_s0 + $0x6c0] sm:$0xff]  ;;  %v783_v37 = vld [vmem:[%s3763_s0 + $0x6d0] sm:$0xff] }
  0x82   : > { %v785_v38 = vld [vmem:[%s3763_s0 + $0x6e0] sm:$0xff]  ;;  %782 = vst [vmem:[%s3768_s30 + $0x360] sm:$0xff] %v781_v36  ;;  %784 = vst [vmem:[%s3768_s30 + $0x368] sm:$0xff] %v783_v37  ;;  %v787_v39 = vld [vmem:[%s3763_s0 + $0x6f0] sm:$0xff] }
  0x83   : > { %786 = vst [vmem:[%s3768_s30 + $0x370] sm:$0xff] %v785_v38  ;;  %v789_v40 = vld [vmem:[%s3763_s0 + $0x700] sm:$0xff]  ;;  %v791_v41 = vld [vmem:[%s3763_s0 + $0x710] sm:$0xff]  ;;  %788 = vst [vmem:[%s3768_s30 + $0x378] sm:$0xff] %v787_v39 }
  0x84   : > { %790 = vst [vmem:[%s3768_s30 + $0x380] sm:$0xff] %v789_v40  ;;  %792 = vst [vmem:[%s3768_s30 + $0x388] sm:$0xff] %v791_v41  ;;  %v793_v42 = vld [vmem:[%s3763_s0 + $0x720] sm:$0xff]  ;;  %v795_v43 = vld [vmem:[%s3763_s0 + $0x730] sm:$0xff] }
  0x85   : > { %v797_v44 = vld [vmem:[%s3763_s0 + $0x740] sm:$0xff]  ;;  %794 = vst [vmem:[%s3768_s30 + $0x390] sm:$0xff] %v793_v42  ;;  %796 = vst [vmem:[%s3768_s30 + $0x398] sm:$0xff] %v795_v43  ;;  %v799_v45 = vld [vmem:[%s3763_s0 + $0x750] sm:$0xff] }
  0x86   : > { %798 = vst [vmem:[%s3768_s30 + $0x3a0] sm:$0xff] %v797_v44  ;;  %v801_v46 = vld [vmem:[%s3763_s0 + $0x760] sm:$0xff]  ;;  %v803_v47 = vld [vmem:[%s3763_s0 + $0x770] sm:$0xff]  ;;  %800 = vst [vmem:[%s3768_s30 + $0x3a8] sm:$0xff] %v799_v45 }
  0x87   : > { %802 = vst [vmem:[%s3768_s30 + $0x3b0] sm:$0xff] %v801_v46  ;;  %804 = vst [vmem:[%s3768_s30 + $0x3b8] sm:$0xff] %v803_v47  ;;  %v805_v48 = vld [vmem:[%s3763_s0 + $0x780] sm:$0xff]  ;;  %v807_v49 = vld [vmem:[%s3763_s0 + $0x790] sm:$0xff] }
  0x88   : > { %v809_v50 = vld [vmem:[%s3763_s0 + $0x7a0] sm:$0xff]  ;;  %806 = vst [vmem:[%s3768_s30 + $0x3c0] sm:$0xff] %v805_v48  ;;  %808 = vst [vmem:[%s3768_s30 + $0x3c8] sm:$0xff] %v807_v49  ;;  %v811_v51 = vld [vmem:[%s3763_s0 + $0x7b0] sm:$0xff] }
  0x89   : > { %810 = vst [vmem:[%s3768_s30 + $0x3d0] sm:$0xff] %v809_v50  ;;  %v813_v52 = vld [vmem:[%s3763_s0 + $0x7c0] sm:$0xff]  ;;  %v815_v53 = vld [vmem:[%s3763_s0 + $0x7d0] sm:$0xff]  ;;  %812 = vst [vmem:[%s3768_s30 + $0x3d8] sm:$0xff] %v811_v51 }
  0x8a   : > { %814 = vst [vmem:[%s3768_s30 + $0x3e0] sm:$0xff] %v813_v52  ;;  %816 = vst [vmem:[%s3768_s30 + $0x3e8] sm:$0xff] %v815_v53  ;;  %v817_v54 = vld [vmem:[%s3763_s0 + $0x7e0] sm:$0xff]  ;;  %v819_v55 = vld [vmem:[%s3763_s0 + $0x7f0] sm:$0xff] }
  0x8b   : > { %818 = vst [vmem:[%s3768_s30 + $0x3f0] sm:$0xff] %v817_v54  ;;  %820 = vst [vmem:[%s3768_s30 + $0x3f8] sm:$0xff] %v819_v55 }
  0x8c PF: > { %p2922_p0 = scmp.ge.s32.totalorder %s3515_s19, 1  ;;  %p825_p1 = scmp.lt.s32.totalorder %s3515_s19, 9 }
  0x8e   : > { %p826_p2 = pnand %p2922_p0, %p825_p1 }
  0x90   : > { %829 = sbr.rel (%p826_p2) target bundleno = 597 (0x255), region = 81 }
  0x95   : > { %s832_s28 = sand.u32 1, %s3491_s13   ;;  %s839_s20 = sand.u32 1, %s3483_s11  }
  0x96   : > { %s3146_s25 = smul.u32 448, %s832_s28  ;;  %s2923_s29 = sshll.u32 %s839_s20, 10 }
  0x97   : > { %s860_s3 = sand.u32 1, %s3475_s9   ;;  %s4030_s8 = scalar_lea.vmem [#allocation4], %s2923_s29 }
  0x98   : > { %s3147_s7 = smul.u32 112, %s860_s3  ;;  %s4028_s0 = scalar_lea.vmem [#allocation3], %s3146_s25 }
  0x99   : > { %p2924_p3 = scmp.ne.s32.totalorder %s3499_s15, 0 }
  0x9a   : > { %s4032_s23 = scalar_lea.vmem [#allocation5], %s3147_s7 }
  0x9b   : > { %872 = sbr.rel (%p2924_p3) target bundleno = 175 (0xaf), region = 93 }
  0xa0   : > { %v3517_v56 = vmov 0.0  }
  0xa1   : > { %873 = vst [vmem:[#allocation2 + $0xb0] sm:$0xff] %v3517_v56  ;;  %874 = vst [vmem:[#allocation2] sm:$0xff] %v3517_v56 }
  0xa2   : > { %875 = vst [vmem:[#allocation2 + $0xd8] sm:$0xff] %v3517_v56  ;;  %876 = vst [vmem:[#allocation2 + $0x18] sm:$0xff] %v3517_v56 }
  0xa3   : > { %877 = vst [vmem:[#allocation2 + $0x50] sm:$0xff] %v3517_v56  ;;  %878 = vst [vmem:[#allocation2 + $0x68] sm:$0xff] %v3517_v56 }
  0xa4   : > { %879 = vst [vmem:[#allocation2 + $0x30] sm:$0xff] %v3517_v56  ;;  %880 = vst [vmem:[#allocation2 + $0x48] sm:$0xff] %v3517_v56 }
  0xa5   : > { %881 = vst [vmem:[#allocation2 + $0x80] sm:$0xff] %v3517_v56  ;;  %882 = vst [vmem:[#allocation2 + $0x88] sm:$0xff] %v3517_v56 }
  0xa6   : > { %883 = vst [vmem:[#allocation2 + $0x8] sm:$0xff] %v3517_v56  ;;  %884 = vst [vmem:[#allocation2 + $0x58] sm:$0xff] %v3517_v56 }
  0xa7   : > { %885 = vst [vmem:[#allocation2 + $0x38] sm:$0xff] %v3517_v56  ;;  %886 = vst [vmem:[#allocation2 + $0x90] sm:$0xff] %v3517_v56 }
  0xa8   : > { %887 = vst [vmem:[#allocation2 + $0x78] sm:$0xff] %v3517_v56  ;;  %888 = vst [vmem:[#allocation2 + $0xb8] sm:$0xff] %v3517_v56 }
  0xa9   : > { %889 = vst [vmem:[#allocation2 + $0x40] sm:$0xff] %v3517_v56  ;;  %890 = vst [vmem:[#allocation2 + $0x28] sm:$0xff] %v3517_v56 }
  0xaa   : > { %891 = vst [vmem:[#allocation2 + $0xc0] sm:$0xff] %v3517_v56  ;;  %892 = vst [vmem:[#allocation2 + $0x60] sm:$0xff] %v3517_v56 }
  0xab   : > { %893 = vst [vmem:[#allocation2 + $0xd0] sm:$0xff] %v3517_v56  ;;  %894 = vst [vmem:[#allocation2 + $0xa8] sm:$0xff] %v3517_v56 }
  0xac   : > { %895 = vst [vmem:[#allocation2 + $0x98] sm:$0xff] %v3517_v56  ;;  %896 = vst [vmem:[#allocation2 + $0xa0] sm:$0xff] %v3517_v56 }
  0xad   : > { %897 = vst [vmem:[#allocation2 + $0x20] sm:$0xff] %v3517_v56  ;;  %898 = vst [vmem:[#allocation2 + $0x10] sm:$0xff] %v3517_v56 }
  0xae   : > { %899 = vst [vmem:[#allocation2 + $0xc8] sm:$0xff] %v3517_v56  ;;  %900 = vst [vmem:[#allocation2 + $0x70] sm:$0xff] %v3517_v56 }
  0xaf PF: > { %v3237_v57 = vld [vmem:[%s4030_s8 + $0x74] ss:$8 sps:$4 sm:$0xff]   ;;  %v3241_v59 = vld [vmem:[%s4030_s8 + $0x70] ss:$8 sps:$4 sm:$0xff]   ;;  %v3243_v61 = vld [vmem:[%s4030_s8 + $0x64] ss:$8 sps:$4 sm:$0xff]  }
  0xb0   : > { %v3239_v58 = vld [vmem:[%s4030_s8 + $0x174] ss:$8 sps:$4 sm:$0xff]   ;;  %2033 = vmatprep.subr.bf16.mxu0 %v3237_v57  ;;  %v3242_v60 = vld [vmem:[%s4030_s8 + $0x170] ss:$8 sps:$4 sm:$0xff]   ;;  %v3245_v62 = vld [vmem:[%s4030_s8 + $0x164] ss:$8 sps:$4 sm:$0xff]  }
  0xb1   : > { %2136 = vmatprep.subr.bf16.mxu1 %v3239_v58  ;;  %2034 = vmatpush1.bf16.msra.mxu0 %v3241_v59  ;;  %v3247_v63 = vld [vmem:[%s4030_s8 + $0x60] ss:$8 sps:$4 sm:$0xff]   ;;  %v3249_v1 = vld [vmem:[%s4030_s8 + $0x54] ss:$8 sps:$4 sm:$0xff]   ;;  %v3253_v3 = vld [vmem:[%s4030_s8 + $0x50] ss:$8 sps:$4 sm:$0xff]  }
  0xb2   : > { %2137 = vmatpush1.bf16.msra.mxu1 %v3242_v60  ;;  %2035 = vmatprep.subr.bf16.mxu0 %v3243_v61  ;;  %v3248_v0 = vld [vmem:[%s4030_s8 + $0x160] ss:$8 sps:$4 sm:$0xff]   ;;  %v3251_v2 = vld [vmem:[%s4030_s8 + $0x154] ss:$8 sps:$4 sm:$0xff]   ;;  %v3254_v4 = vld [vmem:[%s4030_s8 + $0x150] ss:$8 sps:$4 sm:$0xff]  }
  0xb3   : > { %2138 = vmatprep.subr.bf16.mxu1 %v3245_v62  ;;  %v3255_v5 = vld [vmem:[%s4030_s8 + $0x44] ss:$8 sps:$4 sm:$0xff]   ;;  %v3259_v7 = vld [vmem:[%s4030_s8 + $0x40] ss:$8 sps:$4 sm:$0xff]   ;;  %v3261_v9 = vld [vmem:[%s4030_s8 + $0x34] ss:$8 sps:$4 sm:$0xff]  }
  0xb4   : > { %v3257_v6 = vld [vmem:[%s4030_s8 + $0x144] ss:$8 sps:$4 sm:$0xff]   ;;  %v3260_v8 = vld [vmem:[%s4030_s8 + $0x140] ss:$8 sps:$4 sm:$0xff]   ;;  %v3263_v10 = vld [vmem:[%s4030_s8 + $0x134] ss:$8 sps:$4 sm:$0xff]  }
  0xb5   : > { %2036 = vmatpush1.bf16.msra.mxu0 %v3247_v63  ;;  %v3265_v11 = vld [vmem:[%s4030_s8 + $0x30] ss:$8 sps:$4 sm:$0xff]   ;;  %v3267_v13 = vld [vmem:[%s4030_s8 + $0x24] ss:$8 sps:$4 sm:$0xff]   ;;  %v3271_v15 = vld [vmem:[%s4030_s8 + $0x20] ss:$8 sps:$4 sm:$0xff]  }
  0xb6   : > { %2139 = vmatpush1.bf16.msra.mxu1 %v3248_v0  ;;  %2037 = vmatprep.subr.bf16.mxu0 %v3249_v1  ;;  %v3266_v12 = vld [vmem:[%s4030_s8 + $0x130] ss:$8 sps:$4 sm:$0xff]   ;;  %v3269_v14 = vld [vmem:[%s4030_s8 + $0x124] ss:$8 sps:$4 sm:$0xff]   ;;  %v3272_v16 = vld [vmem:[%s4030_s8 + $0x120] ss:$8 sps:$4 sm:$0xff]  }
  0xb7   : > { %2140 = vmatprep.subr.bf16.mxu1 %v3251_v2  ;;  %v3273_v17 = vld [vmem:[%s4030_s8 + $0x14] ss:$8 sps:$4 sm:$0xff]   ;;  %v3277_v19 = vld [vmem:[%s4030_s8 + $0x10] ss:$8 sps:$4 sm:$0xff]   ;;  %v3279_v21 = vld [vmem:[%s4030_s8 + $0x4] ss:$8 sps:$4 sm:$0xff]  }
  0xb8   : > { %v3275_v18 = vld [vmem:[%s4030_s8 + $0x114] ss:$8 sps:$4 sm:$0xff]   ;;  %v3278_v20 = vld [vmem:[%s4030_s8 + $0x110] ss:$8 sps:$4 sm:$0xff]   ;;  %v3281_v22 = vld [vmem:[%s4030_s8 + $0x104] ss:$8 sps:$4 sm:$0xff]  }
  0xb9   : > { %2038 = vmatpush1.bf16.msra.mxu0 %v3253_v3  ;;  %v3283_v23 = vld [vmem:[%s4030_s8] ss:$8 sps:$4 sm:$0xff]   ;;  %v3285_v25 = vld [vmem:[%s4030_s8 + $0xf4] ss:$8 sps:$4 sm:$0xff]   ;;  %v3289_v27 = vld [vmem:[%s4030_s8 + $0xf0] ss:$8 sps:$4 sm:$0xff]  }
  0xba   : > { %2141 = vmatpush1.bf16.msra.mxu1 %v3254_v4  ;;  %2039 = vmatprep.subr.bf16.mxu0 %v3255_v5  ;;  %v3284_v24 = vld [vmem:[%s4030_s8 + $0x100] ss:$8 sps:$4 sm:$0xff]   ;;  %v3287_v26 = vld [vmem:[%s4030_s8 + $0x1f4] ss:$8 sps:$4 sm:$0xff]   ;;  %v3290_v28 = vld [vmem:[%s4030_s8 + $0x1f0] ss:$8 sps:$4 sm:$0xff]  }
  0xbb   : > { %2142 = vmatprep.subr.bf16.mxu1 %v3257_v6  ;;  %v3291_v29 = vld [vmem:[%s4030_s8 + $0xe4] ss:$8 sps:$4 sm:$0xff]   ;;  %v3295_v31 = vld [vmem:[%s4030_s8 + $0xe0] ss:$8 sps:$4 sm:$0xff]   ;;  %v3297_v33 = vld [vmem:[%s4030_s8 + $0xd4] ss:$8 sps:$4 sm:$0xff]  }
  0xbc   : > { %v3293_v30 = vld [vmem:[%s4030_s8 + $0x1e4] ss:$8 sps:$4 sm:$0xff]   ;;  %v3296_v32 = vld [vmem:[%s4030_s8 + $0x1e0] ss:$8 sps:$4 sm:$0xff]   ;;  %v3299_v34 = vld [vmem:[%s4030_s8 + $0x1d4] ss:$8 sps:$4 sm:$0xff]  }
  0xbd   : > { %2040 = vmatpush1.bf16.msra.mxu0 %v3259_v7  ;;  %v3301_v35 = vld [vmem:[%s4030_s8 + $0xd0] ss:$8 sps:$4 sm:$0xff]   ;;  %v3303_v37 = vld [vmem:[%s4030_s8 + $0xc4] ss:$8 sps:$4 sm:$0xff]   ;;  %v3307_v39 = vld [vmem:[%s4030_s8 + $0xc0] ss:$8 sps:$4 sm:$0xff]  }
  0xbe   : > { %2143 = vmatpush1.bf16.msra.mxu1 %v3260_v8  ;;  %2041 = vmatprep.subr.bf16.mxu0 %v3261_v9  ;;  %v3302_v36 = vld [vmem:[%s4030_s8 + $0x1d0] ss:$8 sps:$4 sm:$0xff]   ;;  %v3305_v38 = vld [vmem:[%s4030_s8 + $0x1c4] ss:$8 sps:$4 sm:$0xff]   ;;  %v3308_v40 = vld [vmem:[%s4030_s8 + $0x1c0] ss:$8 sps:$4 sm:$0xff]  }
  0xbf   : > { %2144 = vmatprep.subr.bf16.mxu1 %v3263_v10  ;;  %v929_v41 = vld [vmem:[%s4028_s0] sm:$0xff]  ;;  %v930_v43 = vld [vmem:[%s4028_s0 + $0x8] sm:$0xff]  ;;  %v3309_v45 = vld [vmem:[%s4030_s8 + $0xb4] ss:$8 sps:$4 sm:$0xff]   ;;  %p3109_p4 = scmp.ne.s32.totalorder %s3499_s15, 3 }
  0xc0   : > { %v933_v42 = vld [vmem:[%s4028_s0 + $0x20] sm:$0xff]  ;;  %v934_v44 = vld [vmem:[%s4028_s0 + $0x28] sm:$0xff]  ;;  %v3311_v47 = vld [vmem:[%s4030_s8 + $0x1b4] ss:$8 sps:$4 sm:$0xff]  }
  0xc1   : > { %2042 = vmatpush1.bf16.msra.mxu0 %v3265_v11  ;;  %v2926_v46 = vcombine.high %v929_v41, %v933_v42  ;;  %v2928_v48 = vcombine.high %v930_v43, %v934_v44  ;;  %v3313_v49 = vld [vmem:[%s4030_s8 + $0xb0] ss:$8 sps:$4 sm:$0xff]   ;;  %v3315_v51 = vld [vmem:[%s4030_s8 + $0xa4] ss:$8 sps:$4 sm:$0xff]   ;;  %v3319_v53 = vld [vmem:[%s4030_s8 + $0xa0] ss:$8 sps:$4 sm:$0xff]   ;;  %v2925_v4 = vcombine.low %v929_v41, %v933_v42  ;;  %v2927_v5 = vcombine.low %v930_v43, %v934_v44 }
  0xc2   : > { %2145 = vmatpush1.bf16.msra.mxu1 %v3266_v12  ;;  %2043 = vmatprep.subr.bf16.mxu0 %v3267_v13  ;;  %v3314_v50 = vld [vmem:[%s4030_s8 + $0x1b0] ss:$8 sps:$4 sm:$0xff]   ;;  %v3317_v52 = vld [vmem:[%s4030_s8 + $0x1a4] ss:$8 sps:$4 sm:$0xff]   ;;  %v3320_v54 = vld [vmem:[%s4030_s8 + $0x1a0] ss:$8 sps:$4 sm:$0xff]  }
  0xc3   : > { %2146 = vmatprep.subr.bf16.mxu1 %v3269_v14  ;;  %2065 = vmatprep.mubr.bf16.mxu0 %v2926_v46  ;;  %v3321_v55 = vld [vmem:[%s4030_s8 + $0x94] ss:$8 sps:$4 sm:$0xff]   ;;  %v3325_v57 = vld [vmem:[%s4030_s8 + $0x90] ss:$8 sps:$4 sm:$0xff]   ;;  %v3327_v59 = vld [vmem:[%s4030_s8 + $0x84] ss:$8 sps:$4 sm:$0xff]  }
  0xc4   : > { %2168 = vmatprep.mubr.bf16.mxu1 %v2928_v48  ;;  %v3323_v56 = vld [vmem:[%s4030_s8 + $0x194] ss:$8 sps:$4 sm:$0xff]   ;;  %v3326_v58 = vld [vmem:[%s4030_s8 + $0x190] ss:$8 sps:$4 sm:$0xff]   ;;  %v3329_v60 = vld [vmem:[%s4030_s8 + $0x184] ss:$8 sps:$4 sm:$0xff]  }
  0xc5   : > { %2044 = vmatpush1.bf16.msra.mxu0 %v3271_v15  ;;  %v3331_v61 = vld [vmem:[%s4030_s8 + $0x80] ss:$8 sps:$4 sm:$0xff]   ;;  %v3335_v63 = vld [vmem:[%s4030_s8 + $0x274] ss:$8 sps:$4 sm:$0xff]   ;;  %v3333_v1 = vld [vmem:[%s4030_s8 + $0x270] ss:$8 sps:$4 sm:$0xff]  }
  0xc6   : > { %2147 = vmatpush1.bf16.msra.mxu1 %v3272_v16  ;;  %2045 = vmatprep.subr.bf16.mxu0 %v3273_v17  ;;  %v3332_v62 = vld [vmem:[%s4030_s8 + $0x180] ss:$8 sps:$4 sm:$0xff]   ;;  %v3338_v0 = vld [vmem:[%s4030_s8 + $0x374] ss:$8 sps:$4 sm:$0xff]   ;;  %v3336_v8 = vld [vmem:[%s4030_s8 + $0x370] ss:$8 sps:$4 sm:$0xff]  }
  0xc7   : > { %2148 = vmatprep.subr.bf16.mxu1 %v3275_v18  ;;  %v937_v2 = vld [vmem:[%s4028_s0 + $0x40] sm:$0xff]  ;;  %v938_v6 = vld [vmem:[%s4028_s0 + $0x48] sm:$0xff]  ;;  %v3347_v15 = vld [vmem:[%s4030_s8 + $0x254] ss:$8 sps:$4 sm:$0xff]  }
  0xc8   : > { %v941_v3 = vld [vmem:[%s4028_s0 + $0x60] sm:$0xff]  ;;  %v942_v7 = vld [vmem:[%s4028_s0 + $0x68] sm:$0xff]  ;;  %v3350_v16 = vld [vmem:[%s4030_s8 + $0x354] ss:$8 sps:$4 sm:$0xff]  }
  0xc9   : > { %2046 = vmatpush1.bf16.msra.mxu0 %v3277_v19  ;;  %v3341_v9 = vld [vmem:[%s4030_s8 + $0x264] ss:$8 sps:$4 sm:$0xff]   ;;  %v2934_v11 = vcombine.high %v937_v2, %v941_v3  ;;  %v2936_v12 = vcombine.high %v938_v6, %v942_v7  ;;  %v3339_v13 = vld [vmem:[%s4030_s8 + $0x260] ss:$8 sps:$4 sm:$0xff]   ;;  %v2933_v19 = vcombine.low %v937_v2, %v941_v3  ;;  %v3374_v48 = vld [vmem:[%s4030_s8 + $0x314] ss:$8 sps:$4 sm:$0xff]  }
  0xca   : > { %2149 = vmatpush1.bf16.msra.mxu1 %v3278_v20  ;;  %2047 = vmatprep.subr.bf16.mxu0 %v3279_v21  ;;  %v3344_v10 = vld [vmem:[%s4030_s8 + $0x364] ss:$8 sps:$4 sm:$0xff]   ;;  %v3342_v14 = vld [vmem:[%s4030_s8 + $0x360] ss:$8 sps:$4 sm:$0xff]   ;;  %v2935_v20 = vcombine.low %v938_v6, %v942_v7  ;;  %v3381_v7 = vld [vmem:[%s4030_s8 + $0x2f0] ss:$8 sps:$4 sm:$0xff]  }
  0xcb   : > { %2150 = vmatprep.subr.bf16.mxu1 %v3281_v22  ;;  %v945_v17 = vld [vmem:[%s4028_s0 + $0x80] sm:$0xff]  ;;  %v946_v21 = vld [vmem:[%s4028_s0 + $0x88] sm:$0xff] }
  0xcc   : > { %v949_v18 = vld [vmem:[%s4028_s0 + $0xa0] sm:$0xff]  ;;  %v950_v22 = vld [vmem:[%s4028_s0 + $0xa8] sm:$0xff] }
  0xcd   : > { %2048 = vmatpush1.bf16.msra.mxu0 %v3283_v23  ;;  %v3345_v23 = vld [vmem:[%s4030_s8 + $0x250] ss:$8 sps:$4 sm:$0xff]   ;;  %v3365_v41 = vld [vmem:[%s4030_s8 + $0x224] ss:$8 sps:$4 sm:$0xff]   ;;  %v3366_v46 = vld [vmem:[%s4030_s8 + $0x320] ss:$8 sps:$4 sm:$0xff]  }
  0xce   : > { %2151 = vmatpush1.bf16.msra.mxu1 %v3284_v24  ;;  %2049 = vmatprep.subr.bf16.mxu0 %v3285_v25  ;;  %v3348_v24 = vld [vmem:[%s4030_s8 + $0x350] ss:$8 sps:$4 sm:$0xff]   ;;  %v3353_v25 = vld [vmem:[%s4030_s8 + $0x244] ss:$8 sps:$4 sm:$0xff]  }
  0xcf   : > { %2152 = vmatprep.subr.bf16.mxu1 %v3287_v26  ;;  %v3356_v26 = vld [vmem:[%s4030_s8 + $0x344] ss:$8 sps:$4 sm:$0xff]  }
  0xd0   : > { %v3368_v42 = vld [vmem:[%s4030_s8 + $0x324] ss:$8 sps:$4 sm:$0xff]  }
  0xd1   : > { %2050 = vmatpush2.bf16.msra.mxu0 %v3289_v27  ;;  %v2942_v27 = vcombine.high %v945_v17, %v949_v18  ;;  %v974_v6 = vld [vmem:[%s4028_s0 + $0x168] sm:$0xff] }
  0xd2   : > { %2153 = vmatpush2.bf16.msra.mxu1 %v3290_v28  ;;  %2051 = vmatprep.subr.bf16.mxu0 %v3291_v29  ;;  %v2944_v28 = vcombine.high %v946_v21, %v950_v22  ;;  %v3351_v29 = vld [vmem:[%s4030_s8 + $0x240] ss:$8 sps:$4 sm:$0xff]  }
  0xd3   : > { %2154 = vmatprep.subr.bf16.mxu1 %v3293_v30  ;;  %v3354_v30 = vld [vmem:[%s4030_s8 + $0x340] ss:$8 sps:$4 sm:$0xff]  }
  0xd5   : > { %2052 = vmatpush2.bf16.msra.mxu0 %v3295_v31  ;;  %v3359_v31 = vld [vmem:[%s4030_s8 + $0x234] ss:$8 sps:$4 sm:$0xff]  }
  0xd6   : > { %2155 = vmatpush2.bf16.msra.mxu1 %v3296_v32  ;;  %2053 = vmatprep.subr.bf16.mxu0 %v3297_v33  ;;  %v3362_v32 = vld [vmem:[%s4030_s8 + $0x334] ss:$8 sps:$4 sm:$0xff]   ;;  %v3357_v33 = vld [vmem:[%s4030_s8 + $0x230] ss:$8 sps:$4 sm:$0xff]  }
  0xd7   : > { %2156 = vmatprep.subr.bf16.mxu1 %v3299_v34  ;;  %v3360_v34 = vld [vmem:[%s4030_s8 + $0x330] ss:$8 sps:$4 sm:$0xff]  }
  0xd9   : > { %2054 = vmatpush2.bf16.msra.mxu0 %v3301_v35  ;;  %v953_v35 = vld [vmem:[%s4028_s0 + $0xc0] sm:$0xff] }
  0xda   : > { %2157 = vmatpush2.bf16.msra.mxu1 %v3302_v36  ;;  %2055 = vmatprep.subr.bf16.mxu0 %v3303_v37  ;;  %v2941_v36 = vcombine.low %v945_v17, %v949_v18  ;;  %v2943_v37 = vcombine.low %v946_v21, %v950_v22  ;;  %v977_v17 = vld [vmem:[%s4028_s0 + $0x180] sm:$0xff]  ;;  %v978_v21 = vld [vmem:[%s4028_s0 + $0x188] sm:$0xff] }
  0xdb   : > { %2158 = vmatprep.subr.bf16.mxu1 %v3305_v38  ;;  %v957_v38 = vld [vmem:[%s4028_s0 + $0xe0] sm:$0xff]  ;;  %v982_v22 = vld [vmem:[%s4028_s0 + $0x1a8] sm:$0xff] }
  0xdc   : > { %v2950_v43 = vcombine.high %v953_v35, %v957_v38 }
  0xdd   : > { %2056 = vmatpush2.bf16.msra.mxu0 %v3307_v39  ;;  %v954_v39 = vld [vmem:[%s4028_s0 + $0xc8] sm:$0xff] }
  0xde   : > { %2159 = vmatpush2.bf16.msra.mxu1 %v3308_v40  ;;  %2057 = vmatprep.subr.bf16.mxu0 %v3309_v45  ;;  %v958_v40 = vld [vmem:[%s4028_s0 + $0xe8] sm:$0xff] }
  0xdf   : > { %2160 = vmatprep.subr.bf16.mxu1 %v3311_v47  ;;  %v2952_v44 = vcombine.high %v954_v39, %v958_v40  ;;  %v3363_v45 = vld [vmem:[%s4030_s8 + $0x220] ss:$8 sps:$4 sm:$0xff]   ;;  %v3371_v47 = vld [vmem:[%s4030_s8 + $0x214] ss:$8 sps:$4 sm:$0xff]  }
  0xe1   : > { %2058 = vmatpush2.bf16.msra.mxu0 %v3313_v49  ;;  %v3369_v49 = vld [vmem:[%s4030_s8 + $0x210] ss:$8 sps:$4 sm:$0xff]  }
  0xe2   : > { %2161 = vmatpush2.bf16.msra.mxu1 %v3314_v50  ;;  %2059 = vmatprep.subr.bf16.mxu0 %v3315_v51  ;;  %v3372_v50 = vld [vmem:[%s4030_s8 + $0x310] ss:$8 sps:$4 sm:$0xff]   ;;  %v961_v51 = vld [vmem:[%s4028_s0 + $0x100] sm:$0xff] }
  0xe3   : > { %2162 = vmatprep.subr.bf16.mxu1 %v3317_v52  ;;  %v965_v52 = vld [vmem:[%s4028_s0 + $0x120] sm:$0xff] }
  0xe4   : > { %v2957_v2 = vcombine.low %v961_v51, %v965_v52 }
  0xe5   : > { %2060 = vmatpush2.bf16.msra.mxu0 %v3319_v53  ;;  %v2949_v53 = vcombine.low %v953_v35, %v957_v38  ;;  %v2975_v35 = vcombine.low %v978_v21, %v982_v22  ;;  %v936_v38 = vld [vmem:[%s4028_s0 + $0x38] sm:$0xff] }
  0xe6   : > { %2163 = vmatpush2.bf16.msra.mxu1 %v3320_v54  ;;  %2061 = vmatprep.subr.bf16.mxu0 %v3321_v55  ;;  %v2951_v54 = vcombine.low %v954_v39, %v958_v40  ;;  %v962_v55 = vld [vmem:[%s4028_s0 + $0x108] sm:$0xff]  ;;  %v3405_v39 = vld [vmem:[%s4030_s8 + $0x2b0] ss:$8 sps:$4 sm:$0xff]  }
  0xe7   : > { %2164 = vmatprep.subr.bf16.mxu1 %v3323_v56  ;;  %v966_v56 = vld [vmem:[%s4028_s0 + $0x128] sm:$0xff]  ;;  %v3408_v40 = vld [vmem:[%s4030_s8 + $0x3b0] ss:$8 sps:$4 sm:$0xff]  }
  0xe8   : > { %v2959_v3 = vcombine.low %v962_v55, %v966_v56 }
  0xe9   : > { %2062 = vmatpush2.bf16.msra.mxu0 %v3325_v57  ;;  %v3377_v57 = vld [vmem:[%s4030_s8 + $0x204] ss:$8 sps:$4 sm:$0xff]  }
  0xea   : > { %2165 = vmatpush2.bf16.msra.mxu1 %v3326_v58  ;;  %2063 = vmatprep.subr.bf16.mxu0 %v3327_v59  ;;  %v3380_v58 = vld [vmem:[%s4030_s8 + $0x304] ss:$8 sps:$4 sm:$0xff]   ;;  %v2958_v59 = vcombine.high %v961_v51, %v965_v52 }
  0xeb   : > { %2166 = vmatprep.subr.bf16.mxu1 %v3329_v60  ;;  %v2960_v60 = vcombine.high %v962_v55, %v966_v56  ;;  %v3425_v51 = vld [vmem:[%s4030_s8 + $0x284] ss:$8 sps:$4 sm:$0xff]   ;;  %v939_v55 = vld [vmem:[%s4028_s0 + $0x50] sm:$0xff] }
  0xec   : > { %v3428_v52 = vld [vmem:[%s4030_s8 + $0x384] ss:$8 sps:$4 sm:$0xff]   ;;  %v943_v56 = vld [vmem:[%s4028_s0 + $0x70] sm:$0xff] }
  0xed   : > { %2064 = vmatpush2.bf16.msra.mxu0 %v3331_v61  ;;  %v3375_v61 = vld [vmem:[%s4030_s8 + $0x200] ss:$8 sps:$4 sm:$0xff]  }
  0xee   : > { %2167 = vmatpush2.bf16.msra.mxu1 %v3332_v62  ;;  %2239 = vmatprep.subr.bf16.mxu0 %v3335_v63  ;;  %v3378_v62 = vld [vmem:[%s4030_s8 + $0x300] ss:$8 sps:$4 sm:$0xff]   ;;  %v3383_v63 = vld [vmem:[%s4030_s8 + $0x2f4] ss:$8 sps:$4 sm:$0xff]  }
  0xef   : > { %2342 = vmatprep.subr.bf16.mxu1 %v3338_v0  ;;  %v3386_v0 = vld [vmem:[%s4030_s8 + $0x3f4] ss:$8 sps:$4 sm:$0xff]  }
  0xf0   : > { %2066 = vmatmul.mubr.bf16.vlgmr.msra.gmra.mxu0 %v2925_v4  ;;  %v973_v4 = vld [vmem:[%s4028_s0 + $0x160] sm:$0xff] }
  0xf1   : > { %2169 = vmatmul.mubr.bf16.vlgmr.msra.gmra.mxu1 %v2927_v5  ;;  %2240 = vmatpush1.bf16.msra.mxu0 %v3333_v1  ;;  %v969_v1 = vld [vmem:[%s4028_s0 + $0x140] sm:$0xff]  ;;  %v970_v5 = vld [vmem:[%s4028_s0 + $0x148] sm:$0xff] }
  0xf2   : > { %2343 = vmatpush1.bf16.msra.mxu1 %v3336_v8  ;;  %2241 = vmatprep.subr.bf16.mxu0 %v3341_v9  ;;  %v3384_v8 = vld [vmem:[%s4030_s8 + $0x3f0] ss:$8 sps:$4 sm:$0xff]   ;;  %v3389_v9 = vld [vmem:[%s4030_s8 + $0x2e4] ss:$8 sps:$4 sm:$0xff]   ;;  %v2965_v18 = vcombine.low %v969_v1, %v973_v4 }
  0xf3   : > { %2344 = vmatprep.subr.bf16.mxu1 %v3344_v10  ;;  %2075 = vmatprep.mubr.bf16.mxu0 %v2934_v11  ;;  %v3392_v10 = vld [vmem:[%s4030_s8 + $0x3e4] ss:$8 sps:$4 sm:$0xff]   ;;  %v2966_v11 = vcombine.high %v969_v1, %v973_v4  ;;  %v948_v1 = vld [vmem:[%s4028_s0 + $0x98] sm:$0xff] }
  0xf4   : > { %2178 = vmatprep.mubr.bf16.mxu1 %v2936_v12  ;;  %v2968_v12 = vcombine.high %v970_v5, %v974_v6 }
  0xf5   : > { %2242 = vmatpush1.bf16.msra.mxu0 %v3339_v13  ;;  %v3387_v13 = vld [vmem:[%s4030_s8 + $0x2e0] ss:$8 sps:$4 sm:$0xff]  }
  0xf6   : > { %2345 = vmatpush1.bf16.msra.mxu1 %v3342_v14  ;;  %2243 = vmatprep.subr.bf16.mxu0 %v3347_v15  ;;  %v3390_v14 = vld [vmem:[%s4030_s8 + $0x3e0] ss:$8 sps:$4 sm:$0xff]   ;;  %v3395_v15 = vld [vmem:[%s4030_s8 + $0x2d4] ss:$8 sps:$4 sm:$0xff]  }
  0xf7   : > { %2346 = vmatprep.subr.bf16.mxu1 %v3350_v16  ;;  %v3398_v16 = vld [vmem:[%s4030_s8 + $0x3d4] ss:$8 sps:$4 sm:$0xff]  }
  0xf8   : > { %2076 = vmatmul.mubr.bf16.gmra.mxu0 %v2933_v19  ;;  %v2967_v19 = vcombine.low %v970_v5, %v974_v6 }
  0xf9   : > { %2179 = vmatmul.mubr.bf16.gmra.mxu1 %v2935_v20  ;;  %2244 = vmatpush1.bf16.msra.mxu0 %v3345_v23  ;;  %v981_v20 = vld [vmem:[%s4028_s0 + $0x1a0] sm:$0xff]  ;;  %v3393_v23 = vld [vmem:[%s4030_s8 + $0x2d0] ss:$8 sps:$4 sm:$0xff]  }
  0xfa   : > { %2347 = vmatpush1.bf16.msra.mxu1 %v3348_v24  ;;  %2245 = vmatprep.subr.bf16.mxu0 %v3353_v25  ;;  %v3396_v24 = vld [vmem:[%s4030_s8 + $0x3d0] ss:$8 sps:$4 sm:$0xff]   ;;  %v3401_v25 = vld [vmem:[%s4030_s8 + $0x2c4] ss:$8 sps:$4 sm:$0xff]  }
  0xfb   : > { %2348 = vmatprep.subr.bf16.mxu1 %v3356_v26  ;;  %2085 = vmatprep.mubr.bf16.mxu0 %v2942_v27  ;;  %v3404_v26 = vld [vmem:[%s4030_s8 + $0x3c4] ss:$8 sps:$4 sm:$0xff]   ;;  %v2974_v27 = vcombine.high %v977_v17, %v981_v20 }
  0xfc   : > { %2188 = vmatprep.mubr.bf16.mxu1 %v2944_v28  ;;  %v2976_v28 = vcombine.high %v978_v21, %v982_v22 }
  0xfd   : > { %2246 = vmatpush1.bf16.msra.mxu0 %v3351_v29  ;;  %v3399_v29 = vld [vmem:[%s4030_s8 + $0x2c0] ss:$8 sps:$4 sm:$0xff]  }
  0xfe   : > { %2349 = vmatpush1.bf16.msra.mxu1 %v3354_v30  ;;  %2247 = vmatprep.subr.bf16.mxu0 %v3359_v31  ;;  %v3402_v30 = vld [vmem:[%s4030_s8 + $0x3c0] ss:$8 sps:$4 sm:$0xff]   ;;  %v3407_v31 = vld [vmem:[%s4030_s8 + $0x2b4] ss:$8 sps:$4 sm:$0xff]  }
  0xff   : > { %2350 = vmatprep.subr.bf16.mxu1 %v3362_v32  ;;  %v3410_v32 = vld [vmem:[%s4030_s8 + $0x3b4] ss:$8 sps:$4 sm:$0xff]  }
 0x100   : > { %2086 = vmatmul.mubr.bf16.gmra.mxu0 %v2941_v36  ;;  %v935_v36 = vld [vmem:[%s4028_s0 + $0x30] sm:$0xff] }
 0x101   : > { %2189 = vmatmul.mubr.bf16.gmra.mxu1 %v2943_v37  ;;  %2248 = vmatpush1.bf16.msra.mxu0 %v3357_v33  ;;  %v931_v33 = vld [vmem:[%s4028_s0 + $0x10] sm:$0xff]  ;;  %v932_v37 = vld [vmem:[%s4028_s0 + $0x18] sm:$0xff] }
 0x102   : > { %2351 = vmatpush1.bf16.msra.mxu1 %v3360_v34  ;;  %2249 = vmatprep.subr.bf16.mxu0 %v3365_v41  ;;  %v2973_v34 = vcombine.low %v977_v17, %v981_v20  ;;  %v3413_v41 = vld [vmem:[%s4030_s8 + $0x2a4] ss:$8 sps:$4 sm:$0xff]   ;;  %v964_v17 = vld [vmem:[%s4028_s0 + $0x118] sm:$0xff] }
 0x103   : > { %2352 = vmatprep.subr.bf16.mxu1 %v3368_v42  ;;  %2095 = vmatprep.mubr.bf16.mxu0 %v2950_v43  ;;  %v3416_v42 = vld [vmem:[%s4030_s8 + $0x3a4] ss:$8 sps:$4 sm:$0xff]   ;;  %v2930_v43 = vcombine.high %v931_v33, %v935_v36 }
 0x104   : > { %2198 = vmatprep.mubr.bf16.mxu1 %v2952_v44  ;;  %v2932_v44 = vcombine.high %v932_v37, %v936_v38 }
 0x105   : > { %2250 = vmatpush1.bf16.msra.mxu0 %v3363_v45  ;;  %v3411_v45 = vld [vmem:[%s4030_s8 + $0x2a0] ss:$8 sps:$4 sm:$0xff]  }
 0x106   : > { %2353 = vmatpush1.bf16.msra.mxu1 %v3366_v46  ;;  %2251 = vmatprep.subr.bf16.mxu0 %v3371_v47  ;;  %v3414_v46 = vld [vmem:[%s4030_s8 + $0x3a0] ss:$8 sps:$4 sm:$0xff]   ;;  %v3419_v47 = vld [vmem:[%s4030_s8 + $0x294] ss:$8 sps:$4 sm:$0xff]  }
 0x107   : > { %2354 = vmatprep.subr.bf16.mxu1 %v3374_v48  ;;  %v3422_v48 = vld [vmem:[%s4030_s8 + $0x394] ss:$8 sps:$4 sm:$0xff]  }
 0x108   : > { %2096 = vmatmul.mubr.bf16.gmra.mxu0 %v2949_v53  ;;  %v3423_v53 = vld [vmem:[%s4030_s8 + $0x280] ss:$8 sps:$4 sm:$0xff]  }
 0x109   : > { %2199 = vmatmul.mubr.bf16.gmra.mxu1 %v2951_v54  ;;  %2252 = vmatpush1.bf16.msra.mxu0 %v3369_v49  ;;  %v3417_v49 = vld [vmem:[%s4030_s8 + $0x290] ss:$8 sps:$4 sm:$0xff]   ;;  %v3426_v54 = vld [vmem:[%s4030_s8 + $0x380] ss:$8 sps:$4 sm:$0xff]  }
 0x10a   : > { %2355 = vmatpush1.bf16.msra.mxu1 %v3372_v50  ;;  %2253 = vmatprep.subr.bf16.mxu0 %v3377_v57  ;;  %v3420_v50 = vld [vmem:[%s4030_s8 + $0x390] ss:$8 sps:$4 sm:$0xff]  }
 0x10b   : > { %2356 = vmatprep.subr.bf16.mxu1 %v3380_v58  ;;  %2105 = vmatprep.mubr.bf16.mxu0 %v2958_v59  ;;  %v940_v57 = vld [vmem:[%s4028_s0 + $0x58] sm:$0xff]  ;;  %v2929_v59 = vcombine.low %v931_v33, %v935_v36 }
 0x10c   : > { %2208 = vmatprep.mubr.bf16.mxu1 %v2960_v60  ;;  %v944_v58 = vld [vmem:[%s4028_s0 + $0x78] sm:$0xff]  ;;  %v2931_v60 = vcombine.low %v932_v37, %v936_v38 }
 0x10d   : > { %2254 = vmatpush1.bf16.msra.mxu0 %v3375_v61  ;;  %v2938_v61 = vcombine.high %v939_v55, %v943_v56  ;;  %v2939_v4 = vcombine.low %v940_v57, %v944_v58  ;;  %v980_v33 = vld [vmem:[%s4028_s0 + $0x198] sm:$0xff] }
 0x10e   : > { %2357 = vmatpush1.bf16.msra.mxu1 %v3378_v62  ;;  %2255 = vmatprep.subr.bf16.mxu0 %v3383_v63  ;;  %v2940_v62 = vcombine.high %v940_v57, %v944_v58  ;;  %v947_v63 = vld [vmem:[%s4028_s0 + $0x90] sm:$0xff] }
 0x10f   : > { %2358 = vmatprep.subr.bf16.mxu1 %v3386_v0  ;;  %v951_v0 = vld [vmem:[%s4028_s0 + $0xb0] sm:$0xff] }
 0x110   : > { %2106 = vmatmul.mubr.bf16.gmra.mxu0 %v2957_v2  ;;  %v952_v2 = vld [vmem:[%s4028_s0 + $0xb8] sm:$0xff]  ;;  %v2946_v5 = vcombine.high %v947_v63, %v951_v0 }
 0x111   : > { %2209 = vmatmul.mubr.bf16.gmra.mxu1 %v2959_v3  ;;  %2256 = vmatpush2.bf16.msra.mxu0 %v3381_v7  ;;  %v2937_v3 = vcombine.low %v939_v55, %v943_v56  ;;  %v2948_v6 = vcombine.high %v948_v1, %v952_v2  ;;  %v955_v7 = vld [vmem:[%s4028_s0 + $0xd0] sm:$0xff] }
 0x112   : > { %2359 = vmatpush2.bf16.msra.mxu1 %v3384_v8  ;;  %2257 = vmatprep.subr.bf16.mxu0 %v3389_v9  ;;  %v959_v8 = vld [vmem:[%s4028_s0 + $0xf0] sm:$0xff]  ;;  %v956_v9 = vld [vmem:[%s4028_s0 + $0xd8] sm:$0xff] }
 0x113   : > { %2360 = vmatprep.subr.bf16.mxu1 %v3392_v10  ;;  %2115 = vmatprep.mubr.bf16.mxu0 %v2966_v11  ;;  %v960_v10 = vld [vmem:[%s4028_s0 + $0xf8] sm:$0xff]  ;;  %v2945_v11 = vcombine.low %v947_v63, %v951_v0 }
 0x114   : > { %2218 = vmatprep.mubr.bf16.mxu1 %v2968_v12  ;;  %v2947_v12 = vcombine.low %v948_v1, %v952_v2  ;;  %v2955_v20 = vcombine.low %v956_v9, %v960_v10 }
 0x115   : > { %2258 = vmatpush2.bf16.msra.mxu0 %v3387_v13  ;;  %v2954_v13 = vcombine.high %v955_v7, %v959_v8 }
 0x116   : > { %2361 = vmatpush2.bf16.msra.mxu1 %v3390_v14  ;;  %2259 = vmatprep.subr.bf16.mxu0 %v3395_v15  ;;  %v2956_v14 = vcombine.high %v956_v9, %v960_v10  ;;  %v963_v15 = vld [vmem:[%s4028_s0 + $0x110] sm:$0xff] }
 0x117   : > { %2362 = vmatprep.subr.bf16.mxu1 %v3398_v16  ;;  %v967_v16 = vld [vmem:[%s4028_s0 + $0x130] sm:$0xff] }
 0x118   : > { %2116 = vmatmul.mubr.bf16.gmra.mxu0 %v2965_v18  ;;  %v968_v18 = vld [vmem:[%s4028_s0 + $0x138] sm:$0xff]  ;;  %v2962_v21 = vcombine.high %v963_v15, %v967_v16 }
 0x119   : > { %2219 = vmatmul.mubr.bf16.gmra.mxu1 %v2967_v19  ;;  %2260 = vmatpush2.bf16.msra.mxu0 %v3393_v23  ;;  %v2953_v19 = vcombine.low %v955_v7, %v959_v8  ;;  %v2964_v22 = vcombine.high %v964_v17, %v968_v18  ;;  %v971_v23 = vld [vmem:[%s4028_s0 + $0x150] sm:$0xff] }
 0x11a   : > { %2363 = vmatpush2.bf16.msra.mxu1 %v3396_v24  ;;  %2261 = vmatprep.subr.bf16.mxu0 %v3401_v25  ;;  %v975_v24 = vld [vmem:[%s4028_s0 + $0x170] sm:$0xff]  ;;  %v972_v25 = vld [vmem:[%s4028_s0 + $0x158] sm:$0xff] }
 0x11b   : > { %2364 = vmatprep.subr.bf16.mxu1 %v3404_v26  ;;  %2125 = vmatprep.mubr.bf16.mxu0 %v2974_v27  ;;  %v976_v26 = vld [vmem:[%s4028_s0 + $0x178] sm:$0xff]  ;;  %v2961_v27 = vcombine.low %v963_v15, %v967_v16 }
 0x11c   : > { %2228 = vmatprep.mubr.bf16.mxu1 %v2976_v28  ;;  %v2963_v28 = vcombine.low %v964_v17, %v968_v18  ;;  %v2971_v36 = vcombine.low %v972_v25, %v976_v26 }
 0x11d   : > { %2262 = vmatpush2.bf16.msra.mxu0 %v3399_v29  ;;  %v2970_v29 = vcombine.high %v971_v23, %v975_v24 }
 0x11e   : > { %2365 = vmatpush2.bf16.msra.mxu1 %v3402_v30  ;;  %2263 = vmatprep.subr.bf16.mxu0 %v3407_v31  ;;  %v2972_v30 = vcombine.high %v972_v25, %v976_v26  ;;  %v979_v31 = vld [vmem:[%s4028_s0 + $0x190] sm:$0xff] }
 0x11f   : > { %2366 = vmatprep.subr.bf16.mxu1 %v3410_v32  ;;  %v983_v32 = vld [vmem:[%s4028_s0 + $0x1b0] sm:$0xff] }
 0x120   : > { %2126 = vmatmul.mubr.bf16.gmra.mxu0 %v2973_v34  ;;  %v984_v34 = vld [vmem:[%s4028_s0 + $0x1b8] sm:$0xff]  ;;  %v2978_v37 = vcombine.high %v979_v31, %v983_v32 }
 0x121   : > { %2229 = vmatmul.mubr.bf16.gmra.mxu1 %v2975_v35  ;;  %2264 = vmatpush2.bf16.msra.mxu0 %v3405_v39  ;;  %v2969_v35 = vcombine.low %v971_v23, %v975_v24  ;;  %v2980_v38 = vcombine.high %v980_v33, %v984_v34  ;;  %v2977_v39 = vcombine.low %v979_v31, %v983_v32 }
 0x122   : > { %2367 = vmatpush2.bf16.msra.mxu1 %v3408_v40  ;;  %2265 = vmatprep.subr.bf16.mxu0 %v3413_v41  ;;  %v2979_v40 = vcombine.low %v980_v33, %v984_v34 }
 0x123   : > { %2368 = vmatprep.subr.bf16.mxu1 %v3416_v42  ;;  %2271 = vmatprep.mubr.bf16.mxu0 %v2930_v43 }
 0x124   : > { %2374 = vmatprep.mubr.bf16.mxu1 %v2932_v44 }
 0x125   : > { %2266 = vmatpush2.bf16.msra.mxu0 %v3411_v45 }
 0x126   : > { %2369 = vmatpush2.bf16.msra.mxu1 %v3414_v46  ;;  %2267 = vmatprep.subr.bf16.mxu0 %v3419_v47 }
 0x127   : > { %2370 = vmatprep.subr.bf16.mxu1 %v3422_v48 }
 0x129   : > { %2268 = vmatpush2.bf16.msra.mxu0 %v3417_v49 }
 0x12a   : > { %2371 = vmatpush2.bf16.msra.mxu1 %v3420_v50  ;;  %2269 = vmatprep.subr.bf16.mxu0 %v3425_v51 }
 0x12b   : > { %2372 = vmatprep.subr.bf16.mxu1 %v3428_v52 }
 0x12d   : > { %2270 = vmatpush2.bf16.msra.mxu0 %v3423_v53 }
 0x12e   : > { %2373 = vmatpush2.bf16.msra.mxu1 %v3426_v54 }
 0x130   : > { %2272 = vmatmul.mubr.bf16.vlgmr.msra.gmra.mxu0 %v2929_v59 }
 0x131   : > { %2375 = vmatmul.mubr.bf16.vlgmr.msra.gmra.mxu1 %v2931_v60  ;;  %2281 = vmatprep.mubr.bf16.mxu0 %v2938_v61 }
 0x132   : > { %2384 = vmatprep.mubr.bf16.mxu1 %v2940_v62 }
 0x138   : > { %2282 = vmatmul.mubr.bf16.gmra.mxu0 %v2937_v3 }
 0x139   : > { %2385 = vmatmul.mubr.bf16.gmra.mxu1 %v2939_v4  ;;  %2291 = vmatprep.mubr.bf16.mxu0 %v2946_v5 }
 0x13a   : > { %2394 = vmatprep.mubr.bf16.mxu1 %v2948_v6 }
 0x140   : > { %2292 = vmatmul.mubr.bf16.gmra.mxu0 %v2945_v11 }
 0x141   : > { %2395 = vmatmul.mubr.bf16.gmra.mxu1 %v2947_v12  ;;  %2301 = vmatprep.mubr.bf16.mxu0 %v2954_v13 }
 0x142   : > { %2404 = vmatprep.mubr.bf16.mxu1 %v2956_v14 }
 0x148   : > { %2302 = vmatmul.mubr.bf16.gmra.mxu0 %v2953_v19 }
 0x149   : > { %2405 = vmatmul.mubr.bf16.gmra.mxu1 %v2955_v20  ;;  %2311 = vmatprep.mubr.bf16.mxu0 %v2962_v21 }
 0x14a   : > { %2414 = vmatprep.mubr.bf16.mxu1 %v2964_v22 }
 0x150   : > { %2312 = vmatmul.mubr.bf16.gmra.mxu0 %v2961_v27 }
 0x151   : > { %2415 = vmatmul.mubr.bf16.gmra.mxu1 %v2963_v28  ;;  %2321 = vmatprep.mubr.bf16.mxu0 %v2970_v29 }
 0x152   : > { %2424 = vmatprep.mubr.bf16.mxu1 %v2972_v30 }
 0x158   : > { %2322 = vmatmul.mubr.bf16.gmra.mxu0 %v2969_v35 }
 0x159   : > { %2425 = vmatmul.mubr.bf16.gmra.mxu1 %v2971_v36  ;;  %2331 = vmatprep.mubr.bf16.mxu0 %v2978_v37 }
 0x15a   : > { %2434 = vmatprep.mubr.bf16.mxu1 %v2980_v38  ;;  %v901_v38 = vld [vmem:[#allocation2 + $0xb0] sm:$0xff] }
 0x160   : > { %2332 = vmatmul.mubr.bf16.gmra.mxu0 %v2977_v39 }
 0x161   : > { %2435 = vmatmul.mubr.bf16.gmra.mxu1 %v2979_v40 }
 0x1b0   : > { %v2067_v41 = vpop.f32.mrf.mxu0 }
 0x1b1   : > { %v2170_v42 = vpop.f32.mrf.mxu1 }
 0x1b2   : > { %v2069_v43 = vpop.f32.mrf.mxu0  ;;  %v2171_v33 = vadd.f32 %v2170_v42, %v2067_v41  ;;  %v903_v41 = vld [vmem:[#allocation2 + $0xd8] sm:$0xff] }
 0x1b3   : > { %v2172_v44 = vpop.f32.mrf.mxu1 }
 0x1b4   : > { %v2071_v45 = vpop.f32.mrf.mxu0  ;;  %v2173_v36 = vadd.f32 %v2172_v44, %v2069_v43 }
 0x1b5   : > { %v2174_v46 = vpop.f32.mrf.mxu1 }
 0x1b6   : > { %v4219_v47 = vpop.f32.mrf.mxu0 }
 0x1b7   : > { %v4221_v48 = vpop.f32.mrf.mxu1 }
 0x1b8   : > { %v4223_v49 = vpop.f32.mrf.mxu0 }
 0x1b9   : > { %v4225_v50 = vpop.f32.mrf.mxu1 }
 0x1ba   : > { %v4227_v51 = vpop.f32.mrf.mxu0  ;;  %v2181_v43 = vadd.f32 %v4225_v50, %v4223_v49 }
 0x1bb   : > { %v4229_v52 = vpop.f32.mrf.mxu1 }
 0x1bc   : > { %v4231_v53 = vpop.f32.mrf.mxu0 }
 0x1bd   : > { %v4233_v54 = vpop.f32.mrf.mxu1 }
 0x1be   : > { %v4235_v55 = vpop.f32.mrf.mxu0  ;;  %v2185_v49 = vadd.f32 %v4233_v54, %v4231_v53 }
 0x1bf   : > { %v4237_v56 = vpop.f32.mrf.mxu1 }
 0x1c0   : > { %v4239_v57 = vpop.f32.mrf.mxu0 }
 0x1c1   : > { %v4241_v58 = vpop.f32.mrf.mxu1 }
 0x1c2   : > { %v4243_v59 = vpop.f32.mrf.mxu0  ;;  %v2191_v53 = vadd.f32 %v4241_v58, %v4239_v57 }
 0x1c3   : > { %v4245_v60 = vpop.f32.mrf.mxu1 }
 0x1c4   : > { %v4247_v61 = vpop.f32.mrf.mxu0 }
 0x1c5   : > { %v4249_v62 = vpop.f32.mrf.mxu1 }
 0x1c6   : > { %v4251_v63 = vpop.f32.mrf.mxu0  ;;  %v2195_v57 = vadd.f32 %v4249_v62, %v4247_v61 }
 0x1c7   : > { %v4253_v0 = vpop.f32.mrf.mxu1 }
 0x1c8   : > { %v4255_v1 = vpop.f32.mrf.mxu0 }
 0x1c9   : > { %v4257_v2 = vpop.f32.mrf.mxu1 }
 0x1ca   : > { %v4259_v3 = vpop.f32.mrf.mxu0  ;;  %v2201_v61 = vadd.f32 %v4257_v2, %v4255_v1 }
 0x1cb   : > { %v4261_v4 = vpop.f32.mrf.mxu1 }
 0x1cc   : > { %v4263_v5 = vpop.f32.mrf.mxu0 }
 0x1cd   : > { %v4265_v6 = vpop.f32.mrf.mxu1 }
 0x1ce   : > { %v4267_v7 = vpop.f32.mrf.mxu0  ;;  %v2205_v1 = vadd.f32 %v4265_v6, %v4263_v5 }
 0x1cf   : > { %v4269_v8 = vpop.f32.mrf.mxu1 }
 0x1d0   : > { %v4271_v9 = vpop.f32.mrf.mxu0 }
 0x1d1   : > { %v4273_v10 = vpop.f32.mrf.mxu1 }
 0x1d2   : > { %v4275_v11 = vpop.f32.mrf.mxu0  ;;  %v2211_v5 = vadd.f32 %v4273_v10, %v4271_v9 }
 0x1d3   : > { %v4277_v12 = vpop.f32.mrf.mxu1 }
 0x1d4   : > { %v4279_v13 = vpop.f32.mrf.mxu0 }
 0x1d5   : > { %v4281_v14 = vpop.f32.mrf.mxu1 }
 0x1d6   : > { %v4283_v15 = vpop.f32.mrf.mxu0  ;;  %v2215_v9 = vadd.f32 %v4281_v14, %v4279_v13 }
 0x1d7   : > { %v4285_v16 = vpop.f32.mrf.mxu1 }
 0x1d8   : > { %v4287_v17 = vpop.f32.mrf.mxu0 }
 0x1d9   : > { %v4289_v18 = vpop.f32.mrf.mxu1 }
 0x1da   : > { %v4291_v19 = vpop.f32.mrf.mxu0  ;;  %v2221_v13 = vadd.f32 %v4289_v18, %v4287_v17 }
 0x1db   : > { %v4293_v20 = vpop.f32.mrf.mxu1 }
 0x1dc   : > { %v4295_v21 = vpop.f32.mrf.mxu0 }
 0x1dd   : > { %v4297_v22 = vpop.f32.mrf.mxu1 }
 0x1de   : > { %4452 = vst [vmem:[#allocation6_spill] sm:$0xff] %v4297_v22  ;;  %v4299_v23 = vpop.f32.mrf.mxu0 }
 0x1df   : > { %4453 = vst [vmem:[#allocation7_spill] sm:$0xff] %v4299_v23  ;;  %v4301_v24 = vpop.f32.mrf.mxu1 }
 0x1e0   : > { %4454 = vst [vmem:[#allocation8_spill] sm:$0xff] %v4301_v24  ;;  %v4303_v25 = vpop.f32.mrf.mxu0 }
 0x1e1   : > { %4455 = vst [vmem:[#allocation9_spill] sm:$0xff] %v4303_v25  ;;  %v4305_v26 = vpop.f32.mrf.mxu1 }
 0x1e2   : > { %4456 = vst [vmem:[#allocation10_spill] sm:$0xff] %v4305_v26  ;;  %v4307_v27 = vpop.f32.mrf.mxu0  ;;  %v2175_v26 = vadd.f32 %v2174_v46, %v2071_v45 }
 0x1e3   : > { %4457 = vst [vmem:[#allocation11_spill] sm:$0xff] %v4307_v27  ;;  %v4309_v28 = vpop.f32.mrf.mxu1 }
 0x1e4   : > { %4458 = vst [vmem:[#allocation12_spill] sm:$0xff] %v4309_v28  ;;  %v4311_v29 = vpop.f32.mrf.mxu0  ;;  %v902_v28 = vld [vmem:[#allocation2] sm:$0xff] }
 0x1e5   : > { %4459 = vst [vmem:[#allocation13_spill] sm:$0xff] %v4311_v29  ;;  %v4313_v30 = vpop.f32.mrf.mxu1 }
 0x1e6   : > { %4460 = vst [vmem:[#allocation14_spill] sm:$0xff] %v4313_v30  ;;  %v4315_v31 = vpop.f32.mrf.mxu0  ;;  %v2177_v30 = vadd.f32 %v4221_v48, %v4219_v47 }
 0x1e7   : > { %4461 = vst [vmem:[#allocation15_spill] sm:$0xff] %v4315_v31  ;;  %v4317_v32 = vpop.f32.mrf.mxu1 }
 0x1e8   : > { %4462 = vst [vmem:[#allocation16_spill] sm:$0xff] %v4317_v32 }
 0x1f0   : > { %v2273_v34 = vpop.f32.mrf.mxu0 }
 0x1f1   : > { %v2376_v35 = vpop.f32.mrf.mxu1  ;;  %v2274_v37 = vadd.f32 %v2273_v34, %v2171_v33  ;;  %v904_v33 = vld [vmem:[#allocation2 + $0x18] sm:$0xff] }
 0x1f2   : > { %v2275_v39 = vpop.f32.mrf.mxu0 }
 0x1f3   : > { %v2378_v40 = vpop.f32.mrf.mxu1  ;;  %v2377_v27 = vadd.f32 %v2376_v35, %v2274_v37  ;;  %v2276_v25 = vadd.f32 %v2275_v39, %v2173_v36  ;;  %v2183_v36 = vadd.f32 %v4229_v52, %v4227_v51  ;;  %v2187_v51 = vadd.f32 %v4237_v56, %v4235_v55  ;;  %v907_v37 = vld [vmem:[#allocation2 + $0x30] sm:$0xff] }
 0x1f4   : > { %v2277_v24 = vpop.f32.mrf.mxu0  ;;  %v2193_v55 = vadd.f32 %v4245_v60, %v4243_v59  ;;  %v2197_v59 = vadd.f32 %v4253_v0, %v4251_v63  ;;  %v2203_v63 = vadd.f32 %v4261_v4, %v4259_v3  ;;  %v2207_v3 = vadd.f32 %v4269_v8, %v4267_v7 }
 0x1f5   : > { %v2380_v29 = vpop.f32.mrf.mxu1  ;;  %v2445_v31 = vadd.f32 %v2377_v27, %v901_v38  ;;  %v2379_v23 = vadd.f32 %v2378_v40, %v2276_v25  ;;  %v2278_v32 = vadd.f32 %v2277_v24, %v2175_v26  ;;  %v905_v25 = vld [vmem:[#allocation2 + $0x50] sm:$0xff]  ;;  %v2213_v7 = vadd.f32 %v4277_v12, %v4275_v11 }
 0x1f6   : > { %v2279_v42 = vpop.f32.mrf.mxu0  ;;  %v2217_v11 = vadd.f32 %v4285_v16, %v4283_v15  ;;  %v2223_v15 = vadd.f32 %v4293_v20, %v4291_v19 }
 0x1f7   : > { %v2382_v22 = vpop.f32.mrf.mxu1  ;;  %2473 = vst [vmem:[#allocation2 + $0xb0] sm:$0xff] %v2445_v31  ;;  %v2446_v44 = vadd.f32 %v2379_v23, %v902_v28  ;;  %v2381_v45 = vadd.f32 %v2380_v29, %v2278_v32  ;;  %v2280_v46 = vadd.f32 %v2279_v42, %v2177_v30  ;;  %v906_v29 = vld [vmem:[#allocation2 + $0x68] sm:$0xff] }
 0x1f8   : > { %v2283_v34 = vpop.f32.mrf.mxu0  ;;  %v908_v42 = vld [vmem:[#allocation2 + $0x48] sm:$0xff] }
 0x1f9   : > { %v2386_v35 = vpop.f32.mrf.mxu1  ;;  %2474 = vst [vmem:[#allocation2] sm:$0xff] %v2446_v44  ;;  %v2447_v47 = vadd.f32 %v2381_v45, %v903_v41  ;;  %v2383_v48 = vadd.f32 %v2382_v22, %v2280_v46  ;;  %v2284_v24 = vadd.f32 %v2283_v34, %v2181_v43 }
 0x1fa   : > { %v2285_v26 = vpop.f32.mrf.mxu0 }
 0x1fb   : > { %v2388_v27 = vpop.f32.mrf.mxu1  ;;  %2475 = vst [vmem:[#allocation2 + $0xd8] sm:$0xff] %v2447_v47  ;;  %v2448_v50 = vadd.f32 %v2383_v48, %v904_v33  ;;  %v2387_v23 = vadd.f32 %v2386_v35, %v2284_v24  ;;  %v2286_v28 = vadd.f32 %v2285_v26, %v2183_v36  ;;  %v909_v33 = vld [vmem:[#allocation2 + $0x80] sm:$0xff]  ;;  %v910_v48 = vld [vmem:[#allocation2 + $0x88] sm:$0xff] }
 0x1fc   : > { %v2287_v30 = vpop.f32.mrf.mxu0 }
 0x1fd   : > { %v2390_v31 = vpop.f32.mrf.mxu1  ;;  %2476 = vst [vmem:[#allocation2 + $0x18] sm:$0xff] %v2448_v50  ;;  %v2449_v52 = vadd.f32 %v2387_v23, %v905_v25  ;;  %v2389_v22 = vadd.f32 %v2388_v27, %v2286_v28  ;;  %v2288_v32 = vadd.f32 %v2287_v30, %v2185_v49  ;;  %v911_v49 = vld [vmem:[#allocation2 + $0x8] sm:$0xff]  ;;  %v912_v30 = vld [vmem:[#allocation2 + $0x58] sm:$0xff] }
 0x1fe   : > { %v2289_v38 = vpop.f32.mrf.mxu0 }
 0x1ff   : > { %v2392_v39 = vpop.f32.mrf.mxu1  ;;  %2477 = vst [vmem:[#allocation2 + $0x50] sm:$0xff] %v2449_v52  ;;  %v2450_v54 = vadd.f32 %v2389_v22, %v906_v29  ;;  %v2391_v40 = vadd.f32 %v2390_v31, %v2288_v32  ;;  %v2290_v41 = vadd.f32 %v2289_v38, %v2187_v51  ;;  %v913_v32 = vld [vmem:[#allocation2 + $0x38] sm:$0xff] }
 0x200   : > { %v2293_v43 = vpop.f32.mrf.mxu0 }
 0x201   : > { %v2396_v44 = vpop.f32.mrf.mxu1  ;;  %2478 = vst [vmem:[#allocation2 + $0x68] sm:$0xff] %v2450_v54  ;;  %v2451_v56 = vadd.f32 %v2391_v40, %v907_v37  ;;  %v2393_v45 = vadd.f32 %v2392_v39, %v2290_v41  ;;  %v2294_v46 = vadd.f32 %v2293_v43, %v2191_v53  ;;  %v914_v54 = vld [vmem:[#allocation2 + $0x90] sm:$0xff] }
 0x202   : > { %v2295_v34 = vpop.f32.mrf.mxu0 }
 0x203   : > { %v2398_v35 = vpop.f32.mrf.mxu1  ;;  %2479 = vst [vmem:[#allocation2 + $0x30] sm:$0xff] %v2451_v56  ;;  %v2452_v58 = vadd.f32 %v2393_v45, %v908_v42  ;;  %v2397_v36 = vadd.f32 %v2396_v44, %v2294_v46  ;;  %v2296_v47 = vadd.f32 %v2295_v34, %v2193_v55  ;;  %v915_v44 = vld [vmem:[#allocation2 + $0x78] sm:$0xff] }
 0x204   : > { %v2297_v24 = vpop.f32.mrf.mxu0 }
 0x205   : > { %v2400_v25 = vpop.f32.mrf.mxu1  ;;  %2480 = vst [vmem:[#allocation2 + $0x48] sm:$0xff] %v2452_v58  ;;  %v2453_v60 = vadd.f32 %v2397_v36, %v909_v33  ;;  %v2399_v26 = vadd.f32 %v2398_v35, %v2296_v47  ;;  %v2298_v27 = vadd.f32 %v2297_v24, %v2195_v57  ;;  %v916_v33 = vld [vmem:[#allocation2 + $0xb8] sm:$0xff]  ;;  %v917_v36 = vld [vmem:[#allocation2 + $0x40] sm:$0xff] }
 0x206   : > { %v2299_v50 = vpop.f32.mrf.mxu0 }
 0x207   : > { %v2402_v23 = vpop.f32.mrf.mxu1  ;;  %2481 = vst [vmem:[#allocation2 + $0x80] sm:$0xff] %v2453_v60  ;;  %v2454_v62 = vadd.f32 %v2399_v26, %v910_v48  ;;  %v2401_v28 = vadd.f32 %v2400_v25, %v2298_v27  ;;  %v2300_v29 = vadd.f32 %v2299_v50, %v2197_v59  ;;  %v918_v59 = vld [vmem:[#allocation2 + $0x28] sm:$0xff]  ;;  %v919_v50 = vld [vmem:[#allocation2 + $0xc0] sm:$0xff] }
 0x208   : > { %v2303_v31 = vpop.f32.mrf.mxu0 }
 0x209   : > { %v2406_v51 = vpop.f32.mrf.mxu1  ;;  %2482 = vst [vmem:[#allocation2 + $0x88] sm:$0xff] %v2454_v62  ;;  %v2455_v0 = vadd.f32 %v2401_v28, %v911_v49  ;;  %v2403_v52 = vadd.f32 %v2402_v23, %v2300_v29  ;;  %v2304_v22 = vadd.f32 %v2303_v31, %v2201_v61  ;;  %v920_v29 = vld [vmem:[#allocation2 + $0x60] sm:$0xff] }
 0x20a   : > { %v2305_v37 = vpop.f32.mrf.mxu0 }
 0x20b   : > { %v2408_v38 = vpop.f32.mrf.mxu1  ;;  %2483 = vst [vmem:[#allocation2 + $0x8] sm:$0xff] %v2455_v0  ;;  %v2456_v2 = vadd.f32 %v2403_v52, %v912_v30  ;;  %v2407_v39 = vadd.f32 %v2406_v51, %v2304_v22  ;;  %v2306_v53 = vadd.f32 %v2305_v37, %v2203_v63  ;;  %v921_v0 = vld [vmem:[#allocation2 + $0xd0] sm:$0xff] }
 0x20c   : > { %v2307_v40 = vpop.f32.mrf.mxu0 }
 0x20d   : > { %v2410_v41 = vpop.f32.mrf.mxu1  ;;  %2484 = vst [vmem:[#allocation2 + $0x58] sm:$0xff] %v2456_v2  ;;  %v2457_v4 = vadd.f32 %v2407_v39, %v913_v32  ;;  %v2409_v42 = vadd.f32 %v2408_v38, %v2306_v53  ;;  %v2308_v43 = vadd.f32 %v2307_v40, %v2205_v1  ;;  %v4463_v32 = vld [vmem:[#allocation6_spill] sm:$0xff]  ;;  %v922_v1 = vld [vmem:[#allocation2 + $0xa8] sm:$0xff] }
 0x20e   : > { %v2309_v55 = vpop.f32.mrf.mxu0  ;;  %v2225_v17 = vadd.f32 %v4463_v32, %v4295_v21  ;;  %v4464_v53 = vld [vmem:[#allocation7_spill] sm:$0xff] }
 0x20f   : > { %v2412_v56 = vpop.f32.mrf.mxu1  ;;  %2485 = vst [vmem:[#allocation2 + $0x38] sm:$0xff] %v2457_v4  ;;  %v2458_v6 = vadd.f32 %v2409_v42, %v914_v54  ;;  %v2411_v45 = vadd.f32 %v2410_v41, %v2308_v43  ;;  %v2310_v46 = vadd.f32 %v2309_v55, %v2207_v3  ;;  %v4465_v54 = vld [vmem:[#allocation8_spill] sm:$0xff]  ;;  %v923_v3 = vld [vmem:[#allocation2 + $0x98] sm:$0xff] }
 0x210   : > { %v2313_v34 = vpop.f32.mrf.mxu0  ;;  %v2227_v19 = vadd.f32 %v4465_v54, %v4464_v53  ;;  %v4466_v43 = vld [vmem:[#allocation9_spill] sm:$0xff] }
 0x211   : > { %v2416_v35 = vpop.f32.mrf.mxu1  ;;  %2486 = vst [vmem:[#allocation2 + $0x90] sm:$0xff] %v2458_v6  ;;  %v2459_v8 = vadd.f32 %v2411_v45, %v915_v44  ;;  %v2413_v57 = vadd.f32 %v2412_v56, %v2310_v46  ;;  %v2314_v58 = vadd.f32 %v2313_v34, %v2211_v5  ;;  %v4467_v44 = vld [vmem:[#allocation10_spill] sm:$0xff]  ;;  %v4469_v34 = vld [vmem:[#allocation12_spill] sm:$0xff] }
 0x212   : > { %v2315_v47 = vpop.f32.mrf.mxu0  ;;  %v2231_v21 = vadd.f32 %v4467_v44, %v4466_v43  ;;  %v924_v6 = vld [vmem:[#allocation2 + $0xa0] sm:$0xff] }
 0x213   : > { %v2418_v48 = vpop.f32.mrf.mxu1  ;;  %2487 = vst [vmem:[#allocation2 + $0x78] sm:$0xff] %v2459_v8  ;;  %v2460_v10 = vadd.f32 %v2413_v57, %v916_v33  ;;  %v2417_v24 = vadd.f32 %v2416_v35, %v2314_v58  ;;  %v2316_v25 = vadd.f32 %v2315_v47, %v2213_v7  ;;  %v4468_v33 = vld [vmem:[#allocation11_spill] sm:$0xff]  ;;  %v925_v58 = vld [vmem:[#allocation2 + $0x20] sm:$0xff] }
 0x214   : > { %v2317_v60 = vpop.f32.mrf.mxu0  ;;  %v2233_v35 = vadd.f32 %v4469_v34, %v4468_v33 }
 0x215   : > { %v2420_v26 = vpop.f32.mrf.mxu1  ;;  %2488 = vst [vmem:[#allocation2 + $0xb8] sm:$0xff] %v2460_v10  ;;  %v2461_v12 = vadd.f32 %v2417_v24, %v917_v36  ;;  %v2419_v27 = vadd.f32 %v2418_v48, %v2316_v25  ;;  %v2318_v49 = vadd.f32 %v2317_v60, %v2215_v9  ;;  %v4470_v48 = vld [vmem:[#allocation13_spill] sm:$0xff]  ;;  %v4471_v9 = vld [vmem:[#allocation14_spill] sm:$0xff]  ;;  %v926_v60 = vld [vmem:[#allocation2 + $0x10] sm:$0xff] }
 0x216   : > { %v2319_v23 = vpop.f32.mrf.mxu0  ;;  %v2235_v10 = vadd.f32 %v4471_v9, %v4470_v48 }
 0x217   : > { %v2422_v61 = vpop.f32.mrf.mxu1  ;;  %2489 = vst [vmem:[#allocation2 + $0x40] sm:$0xff] %v2461_v12  ;;  %v2462_v14 = vadd.f32 %v2419_v27, %v918_v59  ;;  %v2421_v62 = vadd.f32 %v2420_v26, %v2318_v49  ;;  %v2320_v28 = vadd.f32 %v2319_v23, %v2217_v11  ;;  %v4472_v12 = vld [vmem:[#allocation15_spill] sm:$0xff]  ;;  %v4473_v27 = vld [vmem:[#allocation16_spill] sm:$0xff] }
 0x218   : > { %v2323_v30 = vpop.f32.mrf.mxu0  ;;  %v2237_v49 = vadd.f32 %v4473_v27, %v4472_v12 }
 0x219   : > { %v2426_v31 = vpop.f32.mrf.mxu1  ;;  %2490 = vst [vmem:[#allocation2 + $0x28] sm:$0xff] %v2462_v14  ;;  %v2463_v16 = vadd.f32 %v2421_v62, %v919_v50  ;;  %v2423_v51 = vadd.f32 %v2422_v61, %v2320_v28  ;;  %v2324_v63 = vadd.f32 %v2323_v30, %v2221_v13  ;;  %v927_v13 = vld [vmem:[#allocation2 + $0xc8] sm:$0xff]  ;;  %v928_v30 = vld [vmem:[#allocation2 + $0x70] sm:$0xff] }
 0x21a   : > { %v2325_v52 = vpop.f32.mrf.mxu0 }
 0x21b   : > { %v2428_v22 = vpop.f32.mrf.mxu1  ;;  %2491 = vst [vmem:[#allocation2 + $0xc0] sm:$0xff] %v2463_v16  ;;  %v2464_v18 = vadd.f32 %v2423_v51, %v920_v29  ;;  %v2427_v37 = vadd.f32 %v2426_v31, %v2324_v63  ;;  %v2326_v38 = vadd.f32 %v2325_v52, %v2223_v15 }
 0x21c   : > { %v2327_v2 = vpop.f32.mrf.mxu0 }
 0x21d   : > { %v2430_v39 = vpop.f32.mrf.mxu1  ;;  %2492 = vst [vmem:[#allocation2 + $0x60] sm:$0xff] %v2464_v18  ;;  %v2465_v20 = vadd.f32 %v2427_v37, %v921_v0  ;;  %v2429_v40 = vadd.f32 %v2428_v22, %v2326_v38  ;;  %v2328_v41 = vadd.f32 %v2327_v2, %v2225_v17 }
 0x21e   : > { %v2329_v4 = vpop.f32.mrf.mxu0 }
 0x21f   : > { %v2432_v42 = vpop.f32.mrf.mxu1  ;;  %2493 = vst [vmem:[#allocation2 + $0xd0] sm:$0xff] %v2465_v20  ;;  %v2466_v55 = vadd.f32 %v2429_v40, %v922_v1  ;;  %v2431_v56 = vadd.f32 %v2430_v39, %v2328_v41  ;;  %v2330_v5 = vadd.f32 %v2329_v4, %v2227_v19 }
 0x220   : > { %v2333_v45 = vpop.f32.mrf.mxu0 }
 0x221   : > { %v2436_v46 = vpop.f32.mrf.mxu1  ;;  %2494 = vst [vmem:[#allocation2 + $0xa8] sm:$0xff] %v2466_v55  ;;  %v2467_v7 = vadd.f32 %v2431_v56, %v923_v3  ;;  %v2433_v8 = vadd.f32 %v2432_v42, %v2330_v5  ;;  %v2334_v57 = vadd.f32 %v2333_v45, %v2231_v21 }
 0x222   : > { %v2335_v36 = vpop.f32.mrf.mxu0 }
 0x223   : > { %v2438_v47 = vpop.f32.mrf.mxu1  ;;  %2495 = vst [vmem:[#allocation2 + $0x98] sm:$0xff] %v2467_v7  ;;  %v2468_v24 = vadd.f32 %v2433_v8, %v924_v6  ;;  %v2437_v25 = vadd.f32 %v2436_v46, %v2334_v57  ;;  %v2336_v59 = vadd.f32 %v2335_v36, %v2233_v35 }
 0x224   : > { %v2337_v26 = vpop.f32.mrf.mxu0 }
 0x225   : > { %v2440_v11 = vpop.f32.mrf.mxu1  ;;  %2496 = vst [vmem:[#allocation2 + $0xa0] sm:$0xff] %v2468_v24  ;;  %v2469_v50 = vadd.f32 %v2437_v25, %v925_v58  ;;  %v2439_v23 = vadd.f32 %v2438_v47, %v2336_v59  ;;  %v2338_v61 = vadd.f32 %v2337_v26, %v2235_v10 }
 0x226   : > { %v2339_v14 = vpop.f32.mrf.mxu0 }
 0x227   : > { %2497 = vst [vmem:[#allocation2 + $0x20] sm:$0xff] %v2469_v50  ;;  %v2470_v62 = vadd.f32 %v2439_v23, %v926_v60  ;;  %v2441_v28 = vadd.f32 %v2440_v11, %v2338_v61  ;;  %v2340_v29 = vadd.f32 %v2339_v14, %v2237_v49  ;;  %v2442_v31 = vpop.f32.mrf.mxu1 }
 0x229   : > { %2498 = vst [vmem:[#allocation2 + $0x10] sm:$0xff] %v2470_v62  ;;  %v2471_v15 = vadd.f32 %v2441_v28, %v927_v13  ;;  %v2443_v16 = vadd.f32 %v2442_v31, %v2340_v29  ;;  %2504 = sbr.rel (%p3109_p4) target bundleno = 588 (0x24c), region = 97 }
 0x22b   : > { %2499 = vst [vmem:[#allocation2 + $0xc8] sm:$0xff] %v2471_v15  ;;  %v2472_v51 = vadd.f32 %v2443_v16, %v928_v30 }
 0x22d   : > { %2500 = vst [vmem:[#allocation2 + $0x70] sm:$0xff] %v2472_v51 }
 0x22e   : > { %v2505_v63 = vld [vmem:[#allocation2 + $0xb0] sm:$0xff]  ;;  %v2506_v0 = vld [vmem:[#allocation2] sm:$0xff]  ;;  %v2507_v52 = vld [vmem:[#allocation2 + $0xd8] sm:$0xff] }
 0x22f   : > { %vm2533_vm0 = vcmp.ge.f32.partialorder %v2505_v63, 0.0  ;;  %vm2534_vm1 = vcmp.ge.f32.partialorder %v2506_v0, 0.0  ;;  %v2561_v22 = vmul.f32 0.2, %v2505_v63  ;;  %v2562_v32 = vmul.f32 0.2, %v2506_v0 }
 0x230   : > { %v2508_v17 = vld [vmem:[#allocation2 + $0x18] sm:$0xff]  ;;  %vm2535_vm2 = vcmp.ge.f32.partialorder %v2507_v52, 0.0  ;;  %v2563_v18 = vmul.f32 0.2, %v2507_v52  ;;  %v2509_v37 = vld [vmem:[#allocation2 + $0x50] sm:$0xff]  ;;  %v2510_v38 = vld [vmem:[#allocation2 + $0x68] sm:$0xff] }
 0x231   : > { %v2589_v1 = vsel %vm2533_vm0, %v2505_v63, %v2561_v22  ;;  %v2590_v2 = vsel %vm2534_vm1, %v2506_v0, %v2562_v32  ;;  %vm2536_vm3 = vcmp.ge.f32.partialorder %v2508_v17, 0.0  ;;  %v2564_v39 = vmul.f32 0.2, %v2508_v17  ;;  %v2511_v53 = vld [vmem:[#allocation2 + $0x30] sm:$0xff]  ;;  %v2512_v54 = vld [vmem:[#allocation2 + $0x48] sm:$0xff]  ;;  %v2513_v40 = vld [vmem:[#allocation2 + $0x80] sm:$0xff] }
 0x232   : > { %v3130_v19 = vpack.c.bf16 %v2590_v2, %v2589_v1  ;;  %v2591_v20 = vsel %vm2535_vm2, %v2507_v52, %v2563_v18  ;;  %vm2537_vm4 = vcmp.ge.f32.partialorder %v2509_v37, 0.0  ;;  %vm2538_vm5 = vcmp.ge.f32.partialorder %v2510_v38, 0.0  ;;  %v2514_v41 = vld [vmem:[#allocation2 + $0x88] sm:$0xff]  ;;  %v2516_v56 = vld [vmem:[#allocation2 + $0x58] sm:$0xff]  ;;  %v2518_v7 = vld [vmem:[#allocation2 + $0x90] sm:$0xff] }
 0x233   : > { %v2592_v3 = vsel %vm2536_vm3, %v2508_v17, %v2564_v39  ;;  %v2565_v4 = vmul.f32 0.2, %v2509_v37  ;;  %v2566_v42 = vmul.f32 0.2, %v2510_v38  ;;  %vm2539_vm6 = vcmp.ge.f32.partialorder %v2511_v53, 0.0  ;;  %v2515_v43 = vld [vmem:[#allocation2 + $0x8] sm:$0xff] }
 0x234   : > { %2701 = vst [vmem:[%s4032_s23] sm:$0xff] %v3130_v19  ;;  %v3131_v44 = vpack.c.bf16 %v2592_v3, %v2591_v20  ;;  %vm2540_vm7 = vcmp.ge.f32.partialorder %v2512_v54, 0.0  ;;  %v2567_v21 = vmul.f32 0.2, %v2511_v53  ;;  %v2568_v55 = vmul.f32 0.2, %v2512_v54  ;;  %v2517_v45 = vld [vmem:[#allocation2 + $0x38] sm:$0xff] }
 0x235   : > { %v2593_v5 = vsel %vm2537_vm4, %v2509_v37, %v2565_v4  ;;  %v2594_v6 = vsel %vm2538_vm5, %v2510_v38, %v2566_v42  ;;  %vm2541_vm8 = vcmp.ge.f32.partialorder %v2513_v40, 0.0  ;;  %vm2542_vm9 = vcmp.ge.f32.partialorder %v2514_v41, 0.0  ;;  %v2519_v58 = vld [vmem:[#allocation2 + $0x78] sm:$0xff]  ;;  %v2521_v59 = vld [vmem:[#allocation2 + $0x40] sm:$0xff]  ;;  %v2522_v12 = vld [vmem:[#allocation2 + $0x28] sm:$0xff] }
 0x236   : > { %2702 = vst [vmem:[%s4032_s23 + $0x8] sm:$0xff] %v3131_v44  ;;  %v3132_v46 = vpack.c.bf16 %v2594_v6, %v2593_v5  ;;  %v2595_v33 = vsel %vm2539_vm6, %v2511_v53, %v2567_v21  ;;  %v2596_v34 = vsel %vm2540_vm7, %v2512_v54, %v2568_v55  ;;  %v2569_v35 = vmul.f32 0.2, %v2513_v40  ;;  %v2520_v9 = vld [vmem:[#allocation2 + $0xb8] sm:$0xff]  ;;  %v2523_v27 = vld [vmem:[#allocation2 + $0xc0] sm:$0xff]  ;;  %v2525_v13 = vld [vmem:[#allocation2 + $0xd0] sm:$0xff] }
 0x237   : > { %v3133_v8 = vpack.c.bf16 %v2596_v34, %v2595_v33  ;;  %v2570_v57 = vmul.f32 0.2, %v2514_v41  ;;  %vm2543_vm10 = vcmp.ge.f32.partialorder %v2515_v43, 0.0  ;;  %vm2544_vm11 = vcmp.ge.f32.partialorder %v2516_v56, 0.0  ;;  %v2524_v61 = vld [vmem:[#allocation2 + $0x60] sm:$0xff]  ;;  %v2526_v29 = vld [vmem:[#allocation2 + $0xa8] sm:$0xff] }
 0x238   : > { %2703 = vst [vmem:[%s4032_s23 + $0x10] sm:$0xff] %v3132_v46  ;;  %v2597_v36 = vsel %vm2541_vm8, %v2513_v40, %v2569_v35  ;;  %v2571_v47 = vmul.f32 0.2, %v2515_v43  ;;  %v2572_v48 = vmul.f32 0.2, %v2516_v56  ;;  %vm2545_vm12 = vcmp.ge.f32.partialorder %v2517_v45, 0.0 }
 0x239   : > { %2704 = vst [vmem:[%s4032_s23 + $0x18] sm:$0xff] %v3133_v8  ;;  %v2598_v10 = vsel %vm2542_vm9, %v2514_v41, %v2570_v57  ;;  %vm2546_vm13 = vcmp.ge.f32.partialorder %v2518_v7, 0.0  ;;  %v2573_v24 = vmul.f32 0.2, %v2517_v45  ;;  %v2574_v25 = vmul.f32 0.2, %v2518_v7 }
 0x23a   : > { %v3134_v60 = vpack.c.bf16 %v2598_v10, %v2597_v36  ;;  %v2599_v26 = vsel %vm2543_vm10, %v2515_v43, %v2571_v47  ;;  %v2600_v11 = vsel %vm2544_vm11, %v2516_v56, %v2572_v48  ;;  %vm2547_vm14 = vcmp.ge.f32.partialorder %v2519_v58, 0.0  ;;  %v2527_v63 = vld [vmem:[#allocation2 + $0x98] sm:$0xff]  ;;  %v2528_v17 = vld [vmem:[#allocation2 + $0xa0] sm:$0xff]  ;;  %v2530_v1 = vld [vmem:[#allocation2 + $0x10] sm:$0xff] }
 0x23b   : > { %v3135_v49 = vpack.c.bf16 %v2600_v11, %v2599_v26  ;;  %v2601_v50 = vsel %vm2545_vm12, %v2517_v45, %v2573_v24  ;;  %v2602_v23 = vsel %vm2546_vm13, %v2518_v7, %v2574_v25  ;;  %vm2548_vm15 = vcmp.ge.f32.partialorder %v2520_v9, 0.0  ;;  %v2529_v38 = vld [vmem:[#allocation2 + $0x20] sm:$0xff]  ;;  %v2531_v54 = vld [vmem:[#allocation2 + $0xc8] sm:$0xff]  ;;  %v2532_v41 = vld [vmem:[#allocation2 + $0x70] sm:$0xff] }
 0x23c   : > { %2705 = vst [vmem:[%s4032_s23 + $0x20] sm:$0xff] %v3134_v60  ;;  %v3136_v14 = vpack.c.bf16 %v2602_v23, %v2601_v50  ;;  %v2575_v62 = vmul.f32 0.2, %v2519_v58  ;;  %v2576_v28 = vmul.f32 0.2, %v2520_v9  ;;  %vm2549_vm0 = vcmp.ge.f32.partialorder %v2521_v59, 0.0 }
 0x23d   : > { %2706 = vst [vmem:[%s4032_s23 + $0x28] sm:$0xff] %v3135_v49  ;;  %vm2550_vm1 = vcmp.ge.f32.partialorder %v2522_v12, 0.0  ;;  %v2577_v30 = vmul.f32 0.2, %v2521_v59  ;;  %v2578_v31 = vmul.f32 0.2, %v2522_v12 }
 0x23e   : > { %vm2551_vm2 = vcmp.ge.f32.partialorder %v2523_v27, 0.0  ;;  %2707 = vst [vmem:[%s4032_s23 + $0x30] sm:$0xff] %v3136_v14  ;;  %v2603_v15 = vsel %vm2547_vm14, %v2519_v58, %v2575_v62  ;;  %v2604_v16 = vsel %vm2548_vm15, %v2520_v9, %v2576_v28  ;;  %vm2552_vm3 = vcmp.ge.f32.partialorder %v2524_v61, 0.0 }
 0x23f   : > { %v2579_v51 = vmul.f32 0.2, %v2523_v27  ;;  %v3137_v0 = vpack.c.bf16 %v2604_v16, %v2603_v15  ;;  %v2605_v52 = vsel %vm2549_vm0, %v2521_v59, %v2577_v30  ;;  %v2606_v22 = vsel %vm2550_vm1, %v2522_v12, %v2578_v31 }
 0x240   : > { %v2580_v32 = vmul.f32 0.2, %v2524_v61  ;;  %v3138_v18 = vpack.c.bf16 %v2606_v22, %v2605_v52  ;;  %vm2553_vm4 = vcmp.ge.f32.partialorder %v2525_v13, 0.0  ;;  %vm2554_vm5 = vcmp.ge.f32.partialorder %v2526_v29, 0.0 }
 0x241   : > { %v2607_v37 = vsel %vm2551_vm2, %v2523_v27, %v2579_v51  ;;  %2708 = vst [vmem:[%s4032_s23 + $0x38] sm:$0xff] %v3137_v0  ;;  %v2581_v39 = vmul.f32 0.2, %v2525_v13  ;;  %v2582_v53 = vmul.f32 0.2, %v2526_v29  ;;  %vm2555_vm6 = vcmp.ge.f32.partialorder %v2527_v63, 0.0 }
 0x242   : > { %v2608_v2 = vsel %vm2552_vm3, %v2524_v61, %v2580_v32  ;;  %2709 = vst [vmem:[%s4032_s23 + $0x40] sm:$0xff] %v3138_v18  ;;  %vm2556_vm7 = vcmp.ge.f32.partialorder %v2528_v17, 0.0  ;;  %v2583_v20 = vmul.f32 0.2, %v2527_v63  ;;  %v2584_v40 = vmul.f32 0.2, %v2528_v17 }
 0x243   : > { %v3139_v19 = vpack.c.bf16 %v2608_v2, %v2607_v37  ;;  %v2609_v3 = vsel %vm2553_vm4, %v2525_v13, %v2581_v39  ;;  %v2610_v4 = vsel %vm2554_vm5, %v2526_v29, %v2582_v53  ;;  %vm2557_vm8 = vcmp.ge.f32.partialorder %v2529_v38, 0.0 }
 0x244   : > { %vm2558_vm9 = vcmp.ge.f32.partialorder %v2530_v1, 0.0  ;;  %v3140_v42 = vpack.c.bf16 %v2610_v4, %v2609_v3  ;;  %v2611_v43 = vsel %vm2555_vm6, %v2527_v63, %v2583_v20  ;;  %v2612_v44 = vsel %vm2556_vm7, %v2528_v17, %v2584_v40 }
 0x245   : > { %2710 = vst [vmem:[%s4032_s23 + $0x48] sm:$0xff] %v3139_v19  ;;  %v2585_v21 = vmul.f32 0.2, %v2529_v38  ;;  %v3141_v55 = vpack.c.bf16 %v2612_v44, %v2611_v43  ;;  %v2586_v56 = vmul.f32 0.2, %v2530_v1  ;;  %vm2559_vm10 = vcmp.ge.f32.partialorder %v2531_v54, 0.0 }
 0x246   : > { %vm2560_vm11 = vcmp.ge.f32.partialorder %v2532_v41, 0.0  ;;  %2711 = vst [vmem:[%s4032_s23 + $0x50] sm:$0xff] %v3140_v42  ;;  %v2587_v6 = vmul.f32 0.2, %v2531_v54  ;;  %v2588_v45 = vmul.f32 0.2, %v2532_v41 }
 0x247   : > { %v2613_v5 = vsel %vm2557_vm8, %v2529_v38, %v2585_v21  ;;  %2712 = vst [vmem:[%s4032_s23 + $0x58] sm:$0xff] %v3141_v55  ;;  %v2614_v46 = vsel %vm2558_vm9, %v2530_v1, %v2586_v56 }
 0x248   : > { %v3142_v33 = vpack.c.bf16 %v2614_v46, %v2613_v5  ;;  %v2615_v34 = vsel %vm2559_vm10, %v2531_v54, %v2587_v6  ;;  %v2616_v35 = vsel %vm2560_vm11, %v2532_v41, %v2588_v45 }
 0x249   : > { %v3143_v7 = vpack.c.bf16 %v2616_v35, %v2615_v34 }
 0x24a   : > { %2713 = vst [vmem:[%s4032_s23 + $0x60] sm:$0xff] %v3142_v33 }
 0x24b   : > { %2714 = vst [vmem:[%s4032_s23 + $0x68] sm:$0xff] %v3143_v7 }
 0x24c PF: > { %2721 = sbr.rel (!%p3627_p12) target bundleno = 597 (0x255), region = 101  ;;  %s3144_s9 = sshll.u32 (%p3627_p12), %s3503_s16, 3  ;;  %v2782_v8 = vld [vmem:[%s4032_s23] sm:$0xff] (%p3627_p12)  ;;  %v2784_v57 = vld [vmem:[%s4032_s23 + $0x8] sm:$0xff] (%p3627_p12)  ;;  %v2786_v58 = vld [vmem:[%s4032_s23 + $0x10] sm:$0xff] (%p3627_p12) }
 0x24d   : > { %s2727_s15 = scalar_lea.vmem (%p3627_p12), %s4446_s2, %s3144_s9  ;;  %v2788_v36 = vld [vmem:[%s4032_s23 + $0x18] sm:$0xff] (%p3627_p12)  ;;  %v2790_v47 = vld [vmem:[%s4032_s23 + $0x20] sm:$0xff] (%p3627_p12)  ;;  %v2792_v48 = vld [vmem:[%s4032_s23 + $0x28] sm:$0xff] (%p3627_p12) }
 0x24e   : > { %2783 = vst [vmem:[%s2727_s15] sm:$0xff] (%p3627_p12), %v2782_v8  ;;  %2785 = vst [vmem:[%s2727_s15 + $0x10] sm:$0xff] (%p3627_p12), %v2784_v57  ;;  %v2794_v9 = vld [vmem:[%s4032_s23 + $0x30] sm:$0xff] (%p3627_p12)  ;;  %v2796_v10 = vld [vmem:[%s4032_s23 + $0x38] sm:$0xff] (%p3627_p12) }
 0x24f   : > { %2787 = vst [vmem:[%s2727_s15 + $0x20] sm:$0xff] (%p3627_p12), %v2786_v58  ;;  %2789 = vst [vmem:[%s2727_s15 + $0x30] sm:$0xff] (%p3627_p12), %v2788_v36  ;;  %v2798_v24 = vld [vmem:[%s4032_s23 + $0x40] sm:$0xff] (%p3627_p12)  ;;  %v2800_v25 = vld [vmem:[%s4032_s23 + $0x48] sm:$0xff] (%p3627_p12) }
 0x250   : > { %2791 = vst [vmem:[%s2727_s15 + $0x40] sm:$0xff] (%p3627_p12), %v2790_v47  ;;  %2793 = vst [vmem:[%s2727_s15 + $0x50] sm:$0xff] (%p3627_p12), %v2792_v48  ;;  %v2802_v59 = vld [vmem:[%s4032_s23 + $0x50] sm:$0xff] (%p3627_p12)  ;;  %v2804_v60 = vld [vmem:[%s4032_s23 + $0x58] sm:$0xff] (%p3627_p12) }
 0x251   : > { %2795 = vst [vmem:[%s2727_s15 + $0x60] sm:$0xff] %v2794_v9  ;;  %2797 = vst [vmem:[%s2727_s15 + $0x70] sm:$0xff] %v2796_v10  ;;  %v2806_v26 = vld [vmem:[%s4032_s23 + $0x60] sm:$0xff] }
 0x252   : > { %2799 = vst [vmem:[%s2727_s15 + $0x80] sm:$0xff] %v2798_v24  ;;  %2801 = vst [vmem:[%s2727_s15 + $0x90] sm:$0xff] %v2800_v25  ;;  %v2808_v11 = vld [vmem:[%s4032_s23 + $0x68] sm:$0xff] }
 0x253   : > { %2803 = vst [vmem:[%s2727_s15 + $0xa0] sm:$0xff] %v2802_v59  ;;  %2805 = vst [vmem:[%s2727_s15 + $0xb0] sm:$0xff] %v2804_v60 }
 0x254   : > { %2807 = vst [vmem:[%s2727_s15 + $0xc0] sm:$0xff] %v2806_v26  ;;  %2809 = vst [vmem:[%s2727_s15 + $0xd0] sm:$0xff] %v2808_v11 }
 0x255 PF: > { %s12_s19 = sadd.s32 1, %s3515_s19   ;;  %s4474_s9 = smov %s3479_s10 }
 0x256   : > { %p9_p5 = scmp.ge.s32.totalorder %s12_s19, 10   ;;  %s4475_s10 = smov %s3625_s5 }
 0x257   : > { %s4476_s11 = smov %s3487_s12  ;;  %s4477_s12 = smov %s3622_s4 }
 0x258   : > { %s4478_s13 = smov %s3495_s14  ;;  %s4479_s14 = smov %s3608_s27 }
 0x259   : > { %s4480_s15 = smov %s3507_s17  ;;  %s4481_s16 = smov %s3511_s18 }
 0x25a   : > { %s4482_s17 = smov %s4485_s21  ;;  %s4483_s18 = smov %s4489_s22 }
 0x25b   :  { %11 = sbr.rel (!%p9_p5) target bundleno = 8 (0x8), region = 178 }

// kernel: _lambda_.9
= control target key start
LH: loop header
LB: loop body
LE: loop exit
PB: predicated region body
PF: predicated region fallthrough
CT: control target
= control target key end

     0   :  { %s1988_s9 = smov 0   ;;  %s1990_s10 = smov 0   ;;  %s2349_s0 = inlined_call_operand.vmem [shape: bf16[80,8192], index: 0, kind: input, shape index: {}]   ;;  %s2350_s1 = inlined_call_operand.vmem [shape: bf16[8192,128], index: 1, kind: input, shape index: {}]   ;;  %s2351_s2 = inlined_call_operand.vmem [shape: f32[80,128], index: 2, kind: output, shape index: {}]  }
   0x1   :  { %s1992_s11 = smov 0   ;;  %s1994_s12 = smov 0  }
   0x2   :  { %s1996_s13 = smov 0  }
   0x3 LB: > { %s24_s14 = sadd.s32 1, %s1966_s12  ;;  %p47_p1 = scmp.ne.s32.totalorder %s1958_s10, %s1954_s9  ;;  %s1970_s13 = sphi %s1996_s13, %s12_s13   ;;  %s1966_s12 = sphi %s1994_s12, %s2355_s12   ;;  %s1962_s11 = sphi %s1992_s11, %s2354_s11   ;;  %s1958_s10 = sphi %s1990_s10, %s2353_s10   ;;  %s1954_s9 = sphi %s1988_s9, %s2352_s9  }
   0x4   : > { %p25_p0 = scmp.ge.s32.totalorder %s24_s14, 8  ;;  %p48_p2 = scmp.eq.s32.totalorder %s1970_s13, 0 }
   0x5   : > { %s40_s16 = sadd.s32 1, %s1958_s10  ;;  %p1524_p5 = scmp.ge.s32.totalorder %s1970_s13, 8 }
   0x6   : > { %s2357_s14 = smov (%p25_p0, %s24_s14), 0  ;;  %p49_p3 = por %p48_p2, %p47_p1 }
   0x7   : > { %s36_s15 = ssub.s32 %s1966_s12, %s2357_s14  ;;  %129 = sbr.rel (%p1524_p5) target bundleno = 37 (0x25), region = 16 }
   0x8   : > { %p38_p4 = scmp.eq.s32.totalorder %s36_s15, 0 }
   0xa   : > { %s2023_s17 = scalar_select %p38_p4, %s1958_s10, %s40_s16  }
   0xc   : > { %132 = sbr.rel (!%p49_p3) target bundleno = 37 (0x25), region = 20  ;;  %s134_s18 = sand.u32 (%p49_p3), 1, %s1958_s10  }
   0xd   : > { %s1640_s19 = sshll.u32 (%p49_p3), %s1966_s12, 5  ;;  %s1825_s20 = smul.u32 (%p49_p3), 320, %s134_s18 }
   0xe   : > { %s2031_s23 = scalar_lea.vmem (%p49_p3), %s2349_s0, %s1640_s19 }
   0xf   : > { %v155_v0 = vld [vmem:[%s2031_s23] sm:$0xff] (%p49_p3)  ;;  %v157_v1 = vld [vmem:[%s2031_s23 + $0x8] sm:$0xff] (%p49_p3)  ;;  %v159_v2 = vld [vmem:[%s2031_s23 + $0x10] sm:$0xff] (%p49_p3)  ;;  %s2039_s24 = scalar_lea.vmem (%p49_p3), [#allocation3], %s1825_s20 }
  0x10   : > { %v161_v3 = vld [vmem:[%s2031_s23 + $0x18] sm:$0xff] (%p49_p3)  ;;  %v163_v4 = vld [vmem:[%s2031_s23 + $0x100] sm:$0xff] (%p49_p3)  ;;  %v165_v5 = vld [vmem:[%s2031_s23 + $0x108] sm:$0xff] (%p49_p3)  ;;  %156 = vst [vmem:[%s2039_s24] sm:$0xff] (%p49_p3), %v155_v0 }
  0x11   : > { %158 = vst [vmem:[%s2039_s24 + $0x8] sm:$0xff] %v157_v1  ;;  %160 = vst [vmem:[%s2039_s24 + $0x10] sm:$0xff] %v159_v2  ;;  %v167_v6 = vld [vmem:[%s2031_s23 + $0x110] sm:$0xff]  ;;  %v169_v7 = vld [vmem:[%s2031_s23 + $0x118] sm:$0xff] }
  0x12   : > { %162 = vst [vmem:[%s2039_s24 + $0x18] sm:$0xff] %v161_v3  ;;  %164 = vst [vmem:[%s2039_s24 + $0x20] sm:$0xff] %v163_v4  ;;  %v171_v8 = vld [vmem:[%s2031_s23 + $0x200] sm:$0xff]  ;;  %v173_v9 = vld [vmem:[%s2031_s23 + $0x208] sm:$0xff] }
  0x13   : > { %166 = vst [vmem:[%s2039_s24 + $0x28] sm:$0xff] %v165_v5  ;;  %168 = vst [vmem:[%s2039_s24 + $0x30] sm:$0xff] %v167_v6  ;;  %v175_v10 = vld [vmem:[%s2031_s23 + $0x210] sm:$0xff]  ;;  %v177_v11 = vld [vmem:[%s2031_s23 + $0x218] sm:$0xff] }
  0x14   : > { %170 = vst [vmem:[%s2039_s24 + $0x38] sm:$0xff] %v169_v7  ;;  %172 = vst [vmem:[%s2039_s24 + $0x40] sm:$0xff] %v171_v8  ;;  %v179_v12 = vld [vmem:[%s2031_s23 + $0x300] sm:$0xff]  ;;  %v181_v13 = vld [vmem:[%s2031_s23 + $0x308] sm:$0xff] }
  0x15   : > { %174 = vst [vmem:[%s2039_s24 + $0x48] sm:$0xff] %v173_v9  ;;  %176 = vst [vmem:[%s2039_s24 + $0x50] sm:$0xff] %v175_v10  ;;  %v183_v14 = vld [vmem:[%s2031_s23 + $0x310] sm:$0xff]  ;;  %v185_v15 = vld [vmem:[%s2031_s23 + $0x318] sm:$0xff] }
  0x16   : > { %178 = vst [vmem:[%s2039_s24 + $0x58] sm:$0xff] %v177_v11  ;;  %180 = vst [vmem:[%s2039_s24 + $0x60] sm:$0xff] %v179_v12  ;;  %v187_v16 = vld [vmem:[%s2031_s23 + $0x400] sm:$0xff]  ;;  %v189_v17 = vld [vmem:[%s2031_s23 + $0x408] sm:$0xff] }
  0x17   : > { %182 = vst [vmem:[%s2039_s24 + $0x68] sm:$0xff] %v181_v13  ;;  %184 = vst [vmem:[%s2039_s24 + $0x70] sm:$0xff] %v183_v14  ;;  %v191_v18 = vld [vmem:[%s2031_s23 + $0x410] sm:$0xff]  ;;  %v193_v19 = vld [vmem:[%s2031_s23 + $0x418] sm:$0xff] }
  0x18   : > { %186 = vst [vmem:[%s2039_s24 + $0x78] sm:$0xff] %v185_v15  ;;  %188 = vst [vmem:[%s2039_s24 + $0x80] sm:$0xff] %v187_v16  ;;  %v195_v20 = vld [vmem:[%s2031_s23 + $0x500] sm:$0xff]  ;;  %v197_v21 = vld [vmem:[%s2031_s23 + $0x508] sm:$0xff] }
  0x19   : > { %190 = vst [vmem:[%s2039_s24 + $0x88] sm:$0xff] %v189_v17  ;;  %192 = vst [vmem:[%s2039_s24 + $0x90] sm:$0xff] %v191_v18  ;;  %v199_v22 = vld [vmem:[%s2031_s23 + $0x510] sm:$0xff]  ;;  %v201_v23 = vld [vmem:[%s2031_s23 + $0x518] sm:$0xff] }
  0x1a   : > { %194 = vst [vmem:[%s2039_s24 + $0x98] sm:$0xff] %v193_v19  ;;  %196 = vst [vmem:[%s2039_s24 + $0xa0] sm:$0xff] %v195_v20  ;;  %v203_v24 = vld [vmem:[%s2031_s23 + $0x600] sm:$0xff]  ;;  %v205_v25 = vld [vmem:[%s2031_s23 + $0x608] sm:$0xff] }
  0x1b   : > { %198 = vst [vmem:[%s2039_s24 + $0xa8] sm:$0xff] %v197_v21  ;;  %200 = vst [vmem:[%s2039_s24 + $0xb0] sm:$0xff] %v199_v22  ;;  %v207_v26 = vld [vmem:[%s2031_s23 + $0x610] sm:$0xff]  ;;  %v209_v27 = vld [vmem:[%s2031_s23 + $0x618] sm:$0xff] }
  0x1c   : > { %202 = vst [vmem:[%s2039_s24 + $0xb8] sm:$0xff] %v201_v23  ;;  %204 = vst [vmem:[%s2039_s24 + $0xc0] sm:$0xff] %v203_v24  ;;  %v211_v28 = vld [vmem:[%s2031_s23 + $0x700] sm:$0xff]  ;;  %v213_v29 = vld [vmem:[%s2031_s23 + $0x708] sm:$0xff] }
  0x1d   : > { %206 = vst [vmem:[%s2039_s24 + $0xc8] sm:$0xff] %v205_v25  ;;  %208 = vst [vmem:[%s2039_s24 + $0xd0] sm:$0xff] %v207_v26  ;;  %v215_v30 = vld [vmem:[%s2031_s23 + $0x710] sm:$0xff]  ;;  %v217_v31 = vld [vmem:[%s2031_s23 + $0x718] sm:$0xff] }
  0x1e   : > { %210 = vst [vmem:[%s2039_s24 + $0xd8] sm:$0xff] %v209_v27  ;;  %212 = vst [vmem:[%s2039_s24 + $0xe0] sm:$0xff] %v211_v28  ;;  %v219_v32 = vld [vmem:[%s2031_s23 + $0x800] sm:$0xff]  ;;  %v221_v33 = vld [vmem:[%s2031_s23 + $0x808] sm:$0xff] }
  0x1f   : > { %214 = vst [vmem:[%s2039_s24 + $0xe8] sm:$0xff] %v213_v29  ;;  %216 = vst [vmem:[%s2039_s24 + $0xf0] sm:$0xff] %v215_v30  ;;  %v223_v34 = vld [vmem:[%s2031_s23 + $0x810] sm:$0xff]  ;;  %v225_v35 = vld [vmem:[%s2031_s23 + $0x818] sm:$0xff] }
  0x20   : > { %218 = vst [vmem:[%s2039_s24 + $0xf8] sm:$0xff] %v217_v31  ;;  %220 = vst [vmem:[%s2039_s24 + $0x100] sm:$0xff] %v219_v32  ;;  %v227_v36 = vld [vmem:[%s2031_s23 + $0x900] sm:$0xff]  ;;  %v229_v37 = vld [vmem:[%s2031_s23 + $0x908] sm:$0xff] }
  0x21   : > { %222 = vst [vmem:[%s2039_s24 + $0x108] sm:$0xff] %v221_v33  ;;  %224 = vst [vmem:[%s2039_s24 + $0x110] sm:$0xff] %v223_v34  ;;  %v231_v38 = vld [vmem:[%s2031_s23 + $0x910] sm:$0xff]  ;;  %v233_v39 = vld [vmem:[%s2031_s23 + $0x918] sm:$0xff] }
  0x22   : > { %226 = vst [vmem:[%s2039_s24 + $0x118] sm:$0xff] %v225_v35  ;;  %228 = vst [vmem:[%s2039_s24 + $0x120] sm:$0xff] %v227_v36 }
  0x23   : > { %230 = vst [vmem:[%s2039_s24 + $0x128] sm:$0xff] %v229_v37  ;;  %232 = vst [vmem:[%s2039_s24 + $0x130] sm:$0xff] %v231_v38 }
  0x24   : > { %234 = vst [vmem:[%s2039_s24 + $0x138] sm:$0xff] %v233_v39 }
  0x25 PF: > { %p1527_p6 = scmp.ge.s32.totalorder %s1970_s13, 1  ;;  %p251_p7 = scmp.lt.s32.totalorder %s1970_s13, 9 }
  0x27   : > { %p252_p8 = pnand %p1527_p6, %p251_p7 }
  0x28   : > { %s258_s25 = sand.u32 (!%p252_p8), 1, %s1954_s9   ;;  %s1528_s26 = sshll.u32 (!%p252_p8), %s1962_s11, 7 }
  0x29   : > { %255 = sbr.rel (%p252_p8) target bundleno = 379 (0x17b), region = 47  ;;  %p293_p9 = scmp.lt.s32.totalorder (!%p252_p8), %s1528_s26, 1023 }
  0x2a   : > { %s1826_s27 = smul.u32 (!%p252_p8), 320, %s258_s25  ;;  %p1530_p10 = scmp.ne.s32.totalorder (!%p252_p8), %s1962_s11, 0 }
  0x2c   : > { %s2124_s4 = scalar_lea.vmem (!%p252_p8), [#allocation3], %s1826_s27 }
  0x2e   : > { %s2359_s26 = smov (!%p293_p9, %s1528_s26), 1023  ;;  %314 = sbr.rel (%p1530_p10) target bundleno = 57 (0x39), region = 55 }
  0x2f   : > { %s1529_s28 = sshll.u32 %s2359_s26, 2 }
  0x30   : > { %s2122_s3 = scalar_lea.vmem %s2350_s1, %s1529_s28 }
  0x33   : > { %v1972_v40 = vmov 0.0  }
  0x34   : > { %315 = vst [vmem:[#allocation2 + $0x30] sm:$0xff] %v1972_v40  ;;  %316 = vst [vmem:[#allocation2] sm:$0xff] %v1972_v40 }
  0x35   : > { %317 = vst [vmem:[#allocation2 + $0x18] sm:$0xff] %v1972_v40  ;;  %318 = vst [vmem:[#allocation2 + $0x10] sm:$0xff] %v1972_v40 }
  0x36   : > { %319 = vst [vmem:[#allocation2 + $0x48] sm:$0xff] %v1972_v40  ;;  %320 = vst [vmem:[#allocation2 + $0x28] sm:$0xff] %v1972_v40 }
  0x37   : > { %321 = vst [vmem:[#allocation2 + $0x8] sm:$0xff] %v1972_v40  ;;  %322 = vst [vmem:[#allocation2 + $0x20] sm:$0xff] %v1972_v40 }
  0x38   : > { %323 = vst [vmem:[#allocation2 + $0x40] sm:$0xff] %v1972_v40  ;;  %324 = vst [vmem:[#allocation2 + $0x38] sm:$0xff] %v1972_v40 }
  0x39 PF: > { %v1868_v41 = vld [vmem:[%s2122_s3 + $0x78] sm:$0xff]   ;;  %v1872_v45 = vld [vmem:[%s2122_s3 + $0x70] sm:$0xff]   ;;  %v1876_v49 = vld [vmem:[%s2122_s3 + $0x68] sm:$0xff]   ;;  %p1635_p11 = scmp.ne.s32.totalorder %s1962_s11, 7 }
  0x3a   : > { %v1869_v42 = vld [vmem:[%s2122_s3 + $0xf8] sm:$0xff]   ;;  %1641 = vmatprep.subr.bf16.mxu0 %v1868_v41  ;;  %v1873_v46 = vld [vmem:[%s2122_s3 + $0xf0] sm:$0xff]   ;;  %v1877_v50 = vld [vmem:[%s2122_s3 + $0xe8] sm:$0xff]  }
  0x3b   : > { %v1870_v43 = vld [vmem:[%s2122_s3 + $0x38] sm:$0xff]   ;;  %1687 = vmatprep.subr.bf16.mxu1 %v1869_v42  ;;  %v1874_v47 = vld [vmem:[%s2122_s3 + $0x30] sm:$0xff]   ;;  %v1878_v51 = vld [vmem:[%s2122_s3 + $0x28] sm:$0xff]  }
  0x3c   : > { %v1871_v44 = vld [vmem:[%s2122_s3 + $0xb8] sm:$0xff]   ;;  %1642 = vmatpush3.bf16.msra.mxu0 %v1870_v43  ;;  %v1875_v48 = vld [vmem:[%s2122_s3 + $0xb0] sm:$0xff]   ;;  %v1879_v52 = vld [vmem:[%s2122_s3 + $0xa8] sm:$0xff]  }
  0x3d   : > { %1688 = vmatpush3.bf16.msra.mxu1 %v1871_v44  ;;  %1643 = vmatprep.subr.bf16.mxu0 %v1872_v45  ;;  %v1880_v53 = vld [vmem:[%s2122_s3 + $0x60] sm:$0xff]   ;;  %v1884_v57 = vld [vmem:[%s2122_s3 + $0x58] sm:$0xff]   ;;  %v1888_v61 = vld [vmem:[%s2122_s3 + $0x50] sm:$0xff]  }
  0x3e   : > { %1689 = vmatprep.subr.bf16.mxu1 %v1873_v46  ;;  %v1881_v54 = vld [vmem:[%s2122_s3 + $0xe0] sm:$0xff]   ;;  %v1885_v58 = vld [vmem:[%s2122_s3 + $0xd8] sm:$0xff]   ;;  %v1889_v62 = vld [vmem:[%s2122_s3 + $0xd0] sm:$0xff]  }
  0x3f   : > { %v1882_v55 = vld [vmem:[%s2122_s3 + $0x20] sm:$0xff]   ;;  %v1886_v59 = vld [vmem:[%s2122_s3 + $0x18] sm:$0xff]   ;;  %v1890_v63 = vld [vmem:[%s2122_s3 + $0x10] sm:$0xff]  }
  0x40   : > { %1644 = vmatpush3.bf16.msra.mxu0 %v1874_v47  ;;  %v1883_v56 = vld [vmem:[%s2122_s3 + $0xa0] sm:$0xff]   ;;  %v1887_v60 = vld [vmem:[%s2122_s3 + $0x98] sm:$0xff]   ;;  %v1891_v0 = vld [vmem:[%s2122_s3 + $0x90] sm:$0xff]  }
  0x41   : > { %1690 = vmatpush3.bf16.msra.mxu1 %v1875_v48  ;;  %1645 = vmatprep.subr.bf16.mxu0 %v1876_v49  ;;  %v1892_v1 = vld [vmem:[%s2122_s3 + $0x48] sm:$0xff]   ;;  %v1896_v5 = vld [vmem:[%s2122_s3 + $0x40] sm:$0xff]   ;;  %v335_v9 = vld [vmem:[%s2124_s4] sm:$0xff] }
  0x42   : > { %1691 = vmatprep.subr.bf16.mxu1 %v1877_v50  ;;  %v1893_v2 = vld [vmem:[%s2122_s3 + $0xc8] sm:$0xff]   ;;  %v1897_v6 = vld [vmem:[%s2122_s3 + $0xc0] sm:$0xff]   ;;  %v339_v10 = vld [vmem:[%s2124_s4 + $0x20] sm:$0xff] }
  0x43   : > { %v1894_v3 = vld [vmem:[%s2122_s3 + $0x8] sm:$0xff]   ;;  %v1898_v7 = vld [vmem:[%s2122_s3] sm:$0xff]   ;;  %v336_v11 = vld [vmem:[%s2124_s4 + $0x8] sm:$0xff]  ;;  %v1531_v12 = vcombine.low %v335_v9, %v339_v10  ;;  %v1532_v13 = vcombine.high %v335_v9, %v339_v10 }
  0x44   : > { %1646 = vmatpush3.bf16.msra.mxu0 %v1878_v51  ;;  %v1895_v4 = vld [vmem:[%s2122_s3 + $0x88] sm:$0xff]   ;;  %v1899_v8 = vld [vmem:[%s2122_s3 + $0x80] sm:$0xff]   ;;  %v340_v14 = vld [vmem:[%s2124_s4 + $0x28] sm:$0xff] }
  0x45   : > { %1692 = vmatpush3.bf16.msra.mxu1 %v1879_v52  ;;  %1647 = vmatprep.subr.bf16.mxu0 %v1880_v53  ;;  %v1533_v15 = vcombine.low %v336_v11, %v340_v14  ;;  %v1534_v16 = vcombine.high %v336_v11, %v340_v14  ;;  %v1900_v17 = vld [vmem:[%s2122_s3 + $0x178] sm:$0xff]   ;;  %v1904_v21 = vld [vmem:[%s2122_s3 + $0x170] sm:$0xff]   ;;  %v1908_v33 = vld [vmem:[%s2122_s3 + $0x168] sm:$0xff]  }
  0x46   : > { %1693 = vmatprep.subr.bf16.mxu1 %v1881_v54  ;;  %1119 = vmatprep.mubr.bf16.mxu0 %v1532_v13  ;;  %v1901_v18 = vld [vmem:[%s2122_s3 + $0x138] sm:$0xff]   ;;  %v1905_v22 = vld [vmem:[%s2122_s3 + $0x130] sm:$0xff]   ;;  %v1909_v34 = vld [vmem:[%s2122_s3 + $0x128] sm:$0xff]  }
  0x47   : > { %1192 = vmatprep.mubr.bf16.mxu1 %v1534_v16  ;;  %v1902_v19 = vld [vmem:[%s2122_s3 + $0x1f8] sm:$0xff]   ;;  %v343_v23 = vld [vmem:[%s2124_s4 + $0x40] sm:$0xff]  ;;  %v1910_v35 = vld [vmem:[%s2122_s3 + $0x1e8] sm:$0xff]  }
  0x48   : > { %1648 = vmatpush3.bf16.msra.mxu0 %v1882_v55  ;;  %v1903_v20 = vld [vmem:[%s2122_s3 + $0x1b8] sm:$0xff]   ;;  %v347_v24 = vld [vmem:[%s2124_s4 + $0x60] sm:$0xff]  ;;  %v1911_v36 = vld [vmem:[%s2122_s3 + $0x1a8] sm:$0xff]  }
  0x49   : > { %1694 = vmatpush3.bf16.msra.mxu1 %v1883_v56  ;;  %1649 = vmatprep.subr.bf16.mxu0 %v1884_v57  ;;  %v1540_v25 = vcombine.high %v343_v23, %v347_v24  ;;  %v344_v26 = vld [vmem:[%s2124_s4 + $0x48] sm:$0xff]  ;;  %v1539_v28 = vcombine.low %v343_v23, %v347_v24  ;;  %v1906_v30 = vld [vmem:[%s2122_s3 + $0x1f0] sm:$0xff]   ;;  %v1912_v43 = vld [vmem:[%s2122_s3 + $0x160] sm:$0xff]  }
  0x4a   : > { %1695 = vmatprep.subr.bf16.mxu1 %v1885_v58  ;;  %v348_v27 = vld [vmem:[%s2124_s4 + $0x68] sm:$0xff]  ;;  %v1907_v32 = vld [vmem:[%s2122_s3 + $0x1b0] sm:$0xff]   ;;  %v1913_v46 = vld [vmem:[%s2122_s3 + $0x120] sm:$0xff]  }
  0x4b   : > { %v1542_v29 = vcombine.high %v344_v26, %v348_v27  ;;  %v1541_v31 = vcombine.low %v344_v26, %v348_v27  ;;  %v351_v37 = vld [vmem:[%s2124_s4 + $0x80] sm:$0xff]  ;;  %v352_v39 = vld [vmem:[%s2124_s4 + $0x88] sm:$0xff]  ;;  %v1914_v47 = vld [vmem:[%s2122_s3 + $0x1e0] sm:$0xff]  }
  0x4c   : > { %1650 = vmatpush3.bf16.msra.mxu0 %v1886_v59  ;;  %v355_v38 = vld [vmem:[%s2124_s4 + $0xa0] sm:$0xff]  ;;  %v356_v40 = vld [vmem:[%s2124_s4 + $0xa8] sm:$0xff]  ;;  %v1915_v48 = vld [vmem:[%s2122_s3 + $0x1a0] sm:$0xff]  }
  0x4d   : > { %1696 = vmatpush3.bf16.msra.mxu1 %v1887_v60  ;;  %1651 = vmatprep.subr.bf16.mxu0 %v1888_v61  ;;  %v1548_v41 = vcombine.high %v351_v37, %v355_v38  ;;  %v1550_v42 = vcombine.high %v352_v39, %v356_v40  ;;  %v1547_v44 = vcombine.low %v351_v37, %v355_v38  ;;  %v1916_v49 = vld [vmem:[%s2122_s3 + $0x158] sm:$0xff]   ;;  %v359_v52 = vld [vmem:[%s2124_s4 + $0xc0] sm:$0xff]  ;;  %v1926_v11 = vld [vmem:[%s2122_s3 + $0x1c8] sm:$0xff]  }
  0x4e   : > { %1697 = vmatprep.subr.bf16.mxu1 %v1889_v62  ;;  %v1549_v45 = vcombine.low %v352_v39, %v356_v40  ;;  %v1917_v50 = vld [vmem:[%s2122_s3 + $0x118] sm:$0xff]   ;;  %v363_v53 = vld [vmem:[%s2124_s4 + $0xe0] sm:$0xff]  ;;  %v1928_v13 = vld [vmem:[%s2122_s3 + $0x140] sm:$0xff]  }
  0x4f   : > { %v1918_v51 = vld [vmem:[%s2122_s3 + $0x1d8] sm:$0xff]   ;;  %v1556_v55 = vcombine.high %v359_v52, %v363_v53  ;;  %v1555_v57 = vcombine.low %v359_v52, %v363_v53  ;;  %v1920_v61 = vld [vmem:[%s2122_s3 + $0x150] sm:$0xff]   ;;  %v1929_v14 = vld [vmem:[%s2122_s3 + $0x100] sm:$0xff]  }
  0x50   : > { %1652 = vmatpush3.bf16.msra.mxu0 %v1890_v63  ;;  %v360_v54 = vld [vmem:[%s2124_s4 + $0xc8] sm:$0xff]  ;;  %v1921_v62 = vld [vmem:[%s2122_s3 + $0x110] sm:$0xff]   ;;  %v1931_v16 = vld [vmem:[%s2122_s3 + $0x180] sm:$0xff]  }
  0x51   : > { %1698 = vmatpush3.bf16.msra.mxu1 %v1891_v0  ;;  %1653 = vmatprep.subr.bf16.mxu0 %v1892_v1  ;;  %v364_v56 = vld [vmem:[%s2124_s4 + $0xe8] sm:$0xff]  ;;  %v1922_v63 = vld [vmem:[%s2122_s3 + $0x1d0] sm:$0xff]   ;;  %v1924_v1 = vld [vmem:[%s2122_s3 + $0x148] sm:$0xff]  }
  0x52   : > { %1699 = vmatprep.subr.bf16.mxu1 %v1893_v2  ;;  %v1558_v58 = vcombine.high %v360_v54, %v364_v56  ;;  %v1919_v59 = vld [vmem:[%s2122_s3 + $0x198] sm:$0xff]   ;;  %v1557_v60 = vcombine.low %v360_v54, %v364_v56  ;;  %v1923_v0 = vld [vmem:[%s2122_s3 + $0x190] sm:$0xff]   ;;  %v345_v24 = vld [vmem:[%s2124_s4 + $0x50] sm:$0xff] }
  0x53   : > { %v367_v2 = vld [vmem:[%s2124_s4 + $0x100] sm:$0xff]  ;;  %v346_v26 = vld [vmem:[%s2124_s4 + $0x58] sm:$0xff]  ;;  %v361_v39 = vld [vmem:[%s2124_s4 + $0xd0] sm:$0xff] }
  0x54   : > { %1654 = vmatpush3.bf16.msra.mxu0 %v1894_v3  ;;  %v371_v3 = vld [vmem:[%s2124_s4 + $0x120] sm:$0xff]  ;;  %v365_v40 = vld [vmem:[%s2124_s4 + $0xf0] sm:$0xff] }
  0x55   : > { %1700 = vmatpush3.bf16.msra.mxu1 %v1895_v4  ;;  %1655 = vmatprep.subr.bf16.mxu0 %v1896_v5  ;;  %v1564_v4 = vcombine.high %v367_v2, %v371_v3  ;;  %v368_v5 = vld [vmem:[%s2124_s4 + $0x108] sm:$0xff]  ;;  %v1563_v9 = vcombine.low %v367_v2, %v371_v3 }
  0x56   : > { %1701 = vmatprep.subr.bf16.mxu1 %v1897_v6  ;;  %v372_v6 = vld [vmem:[%s2124_s4 + $0x128] sm:$0xff] }
  0x57   : > { %v1565_v10 = vcombine.low %v368_v5, %v372_v6 }
  0x58   : > { %1656 = vmatpush3.bf16.msra.mxu0 %v1898_v7  ;;  %v1566_v7 = vcombine.high %v368_v5, %v372_v6 }
  0x59   : > { %1702 = vmatpush3.bf16.msra.mxu1 %v1899_v8  ;;  %1733 = vmatprep.subr.bf16.mxu0 %v1900_v17  ;;  %v1925_v8 = vld [vmem:[%s2122_s3 + $0x108] sm:$0xff]   ;;  %v337_v17 = vld [vmem:[%s2124_s4 + $0x10] sm:$0xff] }
  0x5a   : > { %1779 = vmatprep.subr.bf16.mxu1 %v1902_v19  ;;  %v338_v19 = vld [vmem:[%s2124_s4 + $0x18] sm:$0xff] }
  0x5b   : > { %1120 = vmatmul.mubr.bf16.vlgmr.msra.gmra.mxu0 %v1531_v12  ;;  %v1927_v12 = vld [vmem:[%s2122_s3 + $0x188] sm:$0xff]  }
  0x5c   : > { %1193 = vmatmul.mubr.bf16.vlgmr.msra.gmra.mxu1 %v1533_v15  ;;  %1734 = vmatpush3.bf16.msra.mxu0 %v1901_v18  ;;  %v1930_v15 = vld [vmem:[%s2122_s3 + $0x1c0] sm:$0xff]  }
  0x5d   : > { %1780 = vmatpush3.bf16.msra.mxu1 %v1903_v20  ;;  %1735 = vmatprep.subr.bf16.mxu0 %v1904_v21  ;;  %v341_v18 = vld [vmem:[%s2124_s4 + $0x30] sm:$0xff]  ;;  %v342_v20 = vld [vmem:[%s2124_s4 + $0x38] sm:$0xff] }
  0x5e   : > { %1127 = vmatprep.mubr.bf16.mxu0 %v1540_v25  ;;  %1200 = vmatprep.mubr.bf16.mxu1 %v1542_v29  ;;  %v1535_v21 = vcombine.low %v337_v17, %v341_v18  ;;  %v1538_v23 = vcombine.high %v338_v19, %v342_v20  ;;  %v349_v25 = vld [vmem:[%s2124_s4 + $0x70] sm:$0xff]  ;;  %v1537_v27 = vcombine.low %v338_v19, %v342_v20  ;;  %v350_v29 = vld [vmem:[%s2124_s4 + $0x78] sm:$0xff] }
  0x5f   : > { %1781 = vmatprep.subr.bf16.mxu1 %v1906_v30  ;;  %v1546_v30 = vcombine.high %v346_v26, %v350_v29 }
  0x60   : > { %1736 = vmatpush3.bf16.msra.mxu0 %v1905_v22  ;;  %v1536_v22 = vcombine.high %v337_v17, %v341_v18 }
  0x61   : > { %1782 = vmatpush3.bf16.msra.mxu1 %v1907_v32  ;;  %1737 = vmatprep.subr.bf16.mxu0 %v1908_v33  ;;  %v357_v32 = vld [vmem:[%s2124_s4 + $0xb0] sm:$0xff]  ;;  %v354_v33 = vld [vmem:[%s2124_s4 + $0x98] sm:$0xff] }
  0x62   : > { %1783 = vmatprep.subr.bf16.mxu1 %v1910_v35  ;;  %v1543_v35 = vcombine.low %v345_v24, %v349_v25 }
  0x63   : > { %1128 = vmatmul.mubr.bf16.gmra.mxu0 %v1539_v28  ;;  %v1544_v28 = vcombine.high %v345_v24, %v349_v25 }
  0x64   : > { %1201 = vmatmul.mubr.bf16.gmra.mxu1 %v1541_v31  ;;  %1738 = vmatpush3.bf16.msra.mxu0 %v1909_v34  ;;  %v353_v31 = vld [vmem:[%s2124_s4 + $0x90] sm:$0xff]  ;;  %v358_v34 = vld [vmem:[%s2124_s4 + $0xb8] sm:$0xff] }
  0x65   : > { %1784 = vmatpush3.bf16.msra.mxu1 %v1911_v36  ;;  %1135 = vmatprep.mubr.bf16.mxu0 %v1548_v41  ;;  %v1545_v36 = vcombine.low %v346_v26, %v350_v29  ;;  %v1552_v37 = vcombine.high %v353_v31, %v357_v32  ;;  %v1554_v38 = vcombine.high %v354_v33, %v358_v34  ;;  %v362_v41 = vld [vmem:[%s2124_s4 + $0xd8] sm:$0xff] }
  0x66   : > { %1208 = vmatprep.mubr.bf16.mxu1 %v1550_v42  ;;  %1739 = vmatprep.subr.bf16.mxu0 %v1912_v43  ;;  %v366_v42 = vld [vmem:[%s2124_s4 + $0xf8] sm:$0xff]  ;;  %v1551_v43 = vcombine.low %v353_v31, %v357_v32 }
  0x67   : > { %1785 = vmatprep.subr.bf16.mxu1 %v1914_v47  ;;  %v369_v47 = vld [vmem:[%s2124_s4 + $0x110] sm:$0xff]  ;;  %v1561_v52 = vcombine.low %v362_v41, %v366_v42 }
  0x68   : > { %1740 = vmatpush3.bf16.msra.mxu0 %v1913_v46  ;;  %v1562_v46 = vcombine.high %v362_v41, %v366_v42 }
  0x69   : > { %1786 = vmatpush3.bf16.msra.mxu1 %v1915_v48  ;;  %1741 = vmatprep.subr.bf16.mxu0 %v1916_v49  ;;  %v373_v48 = vld [vmem:[%s2124_s4 + $0x130] sm:$0xff]  ;;  %v370_v49 = vld [vmem:[%s2124_s4 + $0x118] sm:$0xff] }
  0x6a   : > { %1787 = vmatprep.subr.bf16.mxu1 %v1918_v51  ;;  %v1559_v51 = vcombine.low %v361_v39, %v365_v40  ;;  %v1568_v53 = vcombine.high %v369_v47, %v373_v48 }
  0x6b   : > { %1136 = vmatmul.mubr.bf16.gmra.mxu0 %v1547_v44  ;;  %v1553_v44 = vcombine.low %v354_v33, %v358_v34 }
  0x6c   : > { %1209 = vmatmul.mubr.bf16.gmra.mxu1 %v1549_v45  ;;  %1742 = vmatpush3.bf16.msra.mxu0 %v1917_v50  ;;  %v1560_v45 = vcombine.high %v361_v39, %v365_v40  ;;  %v374_v50 = vld [vmem:[%s2124_s4 + $0x138] sm:$0xff] }
  0x6d   : > { %1143 = vmatprep.mubr.bf16.mxu0 %v1556_v55  ;;  %1216 = vmatprep.mubr.bf16.mxu1 %v1558_v58  ;;  %v1570_v54 = vcombine.high %v370_v49, %v374_v50  ;;  %v1567_v55 = vcombine.low %v369_v47, %v373_v48  ;;  %v1569_v56 = vcombine.low %v370_v49, %v374_v50  ;;  %v325_v49 = vld [vmem:[#allocation2 + $0x30] sm:$0xff] }
  0x6e   : > { %1788 = vmatpush3.bf16.msra.mxu1 %v1919_v59  ;;  %1743 = vmatprep.subr.bf16.mxu0 %v1920_v61 }
  0x6f   : > { %1789 = vmatprep.subr.bf16.mxu1 %v1922_v63 }
  0x70   : > { %1744 = vmatpush3.bf16.msra.mxu0 %v1921_v62 }
  0x71   : > { %1745 = vmatprep.subr.bf16.mxu0 %v1924_v1 }
  0x72   : > { %1790 = vmatpush3.bf16.msra.mxu1 %v1923_v0 }
  0x73   : > { %1144 = vmatmul.mubr.bf16.gmra.mxu0 %v1555_v57  ;;  %1791 = vmatprep.subr.bf16.mxu1 %v1926_v11 }
  0x74   : > { %1217 = vmatmul.mubr.bf16.gmra.mxu1 %v1557_v60  ;;  %1151 = vmatprep.mubr.bf16.mxu0 %v1564_v4 }
  0x75   : > { %1224 = vmatprep.mubr.bf16.mxu1 %v1566_v7  ;;  %1746 = vmatpush3.bf16.msra.mxu0 %v1925_v8 }
  0x76   : > { %1792 = vmatpush3.bf16.msra.mxu1 %v1927_v12  ;;  %1747 = vmatprep.subr.bf16.mxu0 %v1928_v13 }
  0x77   : > { %1793 = vmatprep.subr.bf16.mxu1 %v1930_v15 }
  0x79   : > { %1748 = vmatpush3.bf16.msra.mxu0 %v1929_v14 }
  0x7a   : > { %1794 = vmatpush3.bf16.msra.mxu1 %v1931_v16 }
  0x7b   : > { %1152 = vmatmul.mubr.bf16.gmra.mxu0 %v1563_v9 }
  0x7c   : > { %1225 = vmatmul.mubr.bf16.gmra.mxu1 %v1565_v10  ;;  %1265 = vmatprep.mubr.bf16.mxu0 %v1536_v22 }
  0x7d   : > { %1338 = vmatprep.mubr.bf16.mxu1 %v1538_v23 }
  0x83   : > { %1266 = vmatmul.mubr.bf16.vlgmr.msra.gmra.mxu0 %v1535_v21 }
  0x84   : > { %1339 = vmatmul.mubr.bf16.vlgmr.msra.gmra.mxu1 %v1537_v27  ;;  %1273 = vmatprep.mubr.bf16.mxu0 %v1544_v28 }
  0x85   : > { %1346 = vmatprep.mubr.bf16.mxu1 %v1546_v30 }
  0x8b   : > { %1274 = vmatmul.mubr.bf16.gmra.mxu0 %v1543_v35 }
  0x8c   : > { %1347 = vmatmul.mubr.bf16.gmra.mxu1 %v1545_v36  ;;  %1281 = vmatprep.mubr.bf16.mxu0 %v1552_v37 }
  0x8d   : > { %1354 = vmatprep.mubr.bf16.mxu1 %v1554_v38 }
  0x93   : > { %1282 = vmatmul.mubr.bf16.gmra.mxu0 %v1551_v43 }
  0x94   : > { %1355 = vmatmul.mubr.bf16.gmra.mxu1 %v1553_v44  ;;  %1289 = vmatprep.mubr.bf16.mxu0 %v1560_v45 }
  0x95   : > { %1362 = vmatprep.mubr.bf16.mxu1 %v1562_v46 }
  0x9b   : > { %1290 = vmatmul.mubr.bf16.gmra.mxu0 %v1559_v51 }
  0x9c   : > { %1363 = vmatmul.mubr.bf16.gmra.mxu1 %v1561_v52  ;;  %1297 = vmatprep.mubr.bf16.mxu0 %v1568_v53 }
  0x9d   : > { %1370 = vmatprep.mubr.bf16.mxu1 %v1570_v54 }
  0xa3   : > { %1298 = vmatmul.mubr.bf16.gmra.mxu0 %v1567_v55 }
  0xa4   : > { %1371 = vmatmul.mubr.bf16.gmra.mxu1 %v1569_v56 }
 0x11b   : > { %v1657_v57 = vpop.f32.mrf.mxu0 }
 0x11c   : > { %v1703_v58 = vpop.f32.mrf.mxu1 }
 0x11d   : > { %v1658_v59 = vpop.f32.mrf.mxu0 }
 0x11e   : > { %v1704_v60 = vpop.f32.mrf.mxu1  ;;  %v1659_v32 = vadd.f32 %v1658_v59, %v1657_v57 }
 0x11f   : > { %v1660_v61 = vpop.f32.mrf.mxu0  ;;  %v1705_v33 = vadd.f32 %v1704_v60, %v1703_v58 }
 0x120   : > { %v1706_v62 = vpop.f32.mrf.mxu1 }
 0x121   : > { %v1661_v63 = vpop.f32.mrf.mxu0  ;;  %v1195_v38 = vadd.f32 %v1705_v33, %v1659_v32 }
 0x122   : > { %v1707_v0 = vpop.f32.mrf.mxu1  ;;  %v1662_v39 = vadd.f32 %v1661_v63, %v1660_v61  ;;  %v326_v61 = vld [vmem:[#allocation2] sm:$0xff] }
 0x123   : > { %v1663_v1 = vpop.f32.mrf.mxu0  ;;  %v1708_v40 = vadd.f32 %v1707_v0, %v1706_v62 }
 0x124   : > { %v1709_v2 = vpop.f32.mrf.mxu1 }
 0x125   : > { %v1664_v3 = vpop.f32.mrf.mxu0  ;;  %v1198_v51 = vadd.f32 %v1708_v40, %v1662_v39  ;;  %v327_v39 = vld [vmem:[#allocation2 + $0x18] sm:$0xff] }
 0x126   : > { %v1710_v4 = vpop.f32.mrf.mxu1  ;;  %v1665_v47 = vadd.f32 %v1664_v3, %v1663_v1 }
 0x127   : > { %v1666_v5 = vpop.f32.mrf.mxu0  ;;  %v1711_v48 = vadd.f32 %v1710_v4, %v1709_v2 }
 0x128   : > { %v1712_v6 = vpop.f32.mrf.mxu1 }
 0x129   : > { %v1667_v7 = vpop.f32.mrf.mxu0  ;;  %v1203_v60 = vadd.f32 %v1711_v48, %v1665_v47  ;;  %v328_v47 = vld [vmem:[#allocation2 + $0x10] sm:$0xff] }
 0x12a   : > { %v1713_v8 = vpop.f32.mrf.mxu1  ;;  %v1668_v63 = vadd.f32 %v1667_v7, %v1666_v5 }
 0x12b   : > { %v2231_v9 = vpop.f32.mrf.mxu0  ;;  %v1714_v0 = vadd.f32 %v1713_v8, %v1712_v6 }
 0x12c   : > { %v2233_v10 = vpop.f32.mrf.mxu1 }
 0x12d   : > { %v2235_v11 = vpop.f32.mrf.mxu0 }
 0x12e   : > { %v2237_v12 = vpop.f32.mrf.mxu1 }
 0x12f   : > { %v2239_v13 = vpop.f32.mrf.mxu0 }
 0x130   : > { %v2241_v14 = vpop.f32.mrf.mxu1 }
 0x131   : > { %v2243_v15 = vpop.f32.mrf.mxu0 }
 0x132   : > { %v2245_v16 = vpop.f32.mrf.mxu1 }
 0x133   : > { %v2247_v17 = vpop.f32.mrf.mxu0 }
 0x134   : > { %v2249_v18 = vpop.f32.mrf.mxu1 }
 0x135   : > { %v2251_v19 = vpop.f32.mrf.mxu0 }
 0x136   : > { %v2253_v20 = vpop.f32.mrf.mxu1 }
 0x137   : > { %v2255_v21 = vpop.f32.mrf.mxu0 }
 0x138   : > { %v2257_v22 = vpop.f32.mrf.mxu1 }
 0x139   : > { %v2259_v23 = vpop.f32.mrf.mxu0 }
 0x13a   : > { %v2261_v24 = vpop.f32.mrf.mxu1 }
 0x13b   : > { %v2263_v25 = vpop.f32.mrf.mxu0 }
 0x13c   : > { %v2265_v26 = vpop.f32.mrf.mxu1 }
 0x13d   : > { %v2267_v27 = vpop.f32.mrf.mxu0 }
 0x13e   : > { %v2269_v28 = vpop.f32.mrf.mxu1 }
 0x13f   : > { %v2271_v29 = vpop.f32.mrf.mxu0 }
 0x140   : > { %v2273_v30 = vpop.f32.mrf.mxu1 }
 0x141   : > { %v2275_v31 = vpop.f32.mrf.mxu0 }
 0x142   : > { %v2277_v34 = vpop.f32.mrf.mxu1 }
 0x143   : > { %v1749_v35 = vpop.f32.mrf.mxu0 }
 0x144   : > { %v1795_v36 = vpop.f32.mrf.mxu1 }
 0x145   : > { %v1750_v37 = vpop.f32.mrf.mxu0 }
 0x146   : > { %v1751_v41 = vadd.f32 %v1750_v37, %v1749_v35  ;;  %v1796_v42 = vpop.f32.mrf.mxu1  ;;  %v1671_v37 = vadd.f32 %v2235_v11, %v2231_v9  ;;  %v1674_v9 = vadd.f32 %v2243_v15, %v2239_v13 }
 0x147   : > { %v1752_v43 = vpop.f32.mrf.mxu0  ;;  %v1797_v45 = vadd.f32 %v1796_v42, %v1795_v36 }
 0x148   : > { %v1268_v44 = vadd.f32 %v1751_v41, %v1195_v38  ;;  %v1798_v46 = vpop.f32.mrf.mxu1  ;;  %v1717_v38 = vadd.f32 %v2237_v12, %v2233_v10  ;;  %v1206_v41 = vadd.f32 %v1714_v0, %v1668_v63  ;;  %v1720_v10 = vadd.f32 %v2245_v16, %v2241_v14 }
 0x149   : > { %v1753_v50 = vpop.f32.mrf.mxu0 }
 0x14a   : > { %v1341_v52 = vadd.f32 %v1797_v45, %v1268_v44  ;;  %v1754_v53 = vadd.f32 %v1753_v50, %v1752_v43  ;;  %v1799_v54 = vpop.f32.mrf.mxu1  ;;  %v1214_v15 = vadd.f32 %v1720_v10, %v1674_v9 }
 0x14b   : > { %v1755_v55 = vpop.f32.mrf.mxu0  ;;  %v1800_v58 = vadd.f32 %v1799_v54, %v1798_v46  ;;  %v1211_v46 = vadd.f32 %v1717_v38, %v1671_v37  ;;  %v1683_v37 = vadd.f32 %v2267_v27, %v2263_v25  ;;  %v1729_v38 = vadd.f32 %v2269_v28, %v2265_v26 }
 0x14c   : > { %v1379_v56 = vadd.f32 %v1341_v52, %v325_v49  ;;  %v1271_v57 = vadd.f32 %v1754_v53, %v1198_v51  ;;  %v1801_v59 = vpop.f32.mrf.mxu1  ;;  %v1686_v25 = vadd.f32 %v2275_v31, %v2271_v29  ;;  %v1732_v26 = vadd.f32 %v2277_v34, %v2273_v30  ;;  %v334_v30 = vld [vmem:[#allocation2 + $0x38] sm:$0xff] }
 0x14d   : > { %v1756_v62 = vpop.f32.mrf.mxu0 }
 0x14e   : > { %1389 = vst [vmem:[#allocation2 + $0x30] sm:$0xff] %v1379_v56  ;;  %v1344_v32 = vadd.f32 %v1800_v58, %v1271_v57  ;;  %v1757_v1 = vadd.f32 %v1756_v62, %v1755_v55  ;;  %v1802_v2 = vpop.f32.mrf.mxu1  ;;  %v1677_v55 = vadd.f32 %v2251_v19, %v2247_v17  ;;  %v1723_v56 = vadd.f32 %v2253_v20, %v2249_v18  ;;  %v329_v57 = vld [vmem:[#allocation2 + $0x48] sm:$0xff] }
 0x14f   : > { %v1758_v3 = vpop.f32.mrf.mxu0  ;;  %v1803_v35 = vadd.f32 %v1802_v2, %v1801_v59  ;;  %v1680_v17 = vadd.f32 %v2259_v23, %v2255_v21  ;;  %v1726_v18 = vadd.f32 %v2261_v24, %v2257_v22 }
 0x150   : > { %v1380_v4 = vadd.f32 %v1344_v32, %v326_v61  ;;  %v1276_v33 = vadd.f32 %v1757_v1, %v1203_v60  ;;  %v1804_v36 = vpop.f32.mrf.mxu1  ;;  %v1219_v0 = vadd.f32 %v1723_v56, %v1677_v55  ;;  %v330_v32 = vld [vmem:[#allocation2 + $0x28] sm:$0xff] }
 0x151   : > { %v1759_v40 = vpop.f32.mrf.mxu0  ;;  %v1222_v23 = vadd.f32 %v1726_v18, %v1680_v17 }
 0x152   : > { %1390 = vst [vmem:[#allocation2] sm:$0xff] %v1380_v4  ;;  %v1349_v5 = vadd.f32 %v1803_v35, %v1276_v33  ;;  %v1760_v6 = vadd.f32 %v1759_v40, %v1758_v3  ;;  %v1805_v7 = vpop.f32.mrf.mxu1 }
 0x153   : > { %v1761_v8 = vpop.f32.mrf.mxu0  ;;  %v1806_v44 = vadd.f32 %v1805_v7, %v1804_v36 }
 0x154   : > { %v1381_v42 = vadd.f32 %v1349_v5, %v327_v39  ;;  %v1279_v43 = vadd.f32 %v1760_v6, %v1206_v41  ;;  %v1807_v45 = vpop.f32.mrf.mxu1  ;;  %v331_v39 = vld [vmem:[#allocation2 + $0x8] sm:$0xff] }
 0x155   : > { %v1762_v48 = vpop.f32.mrf.mxu0 }
 0x156   : > { %1391 = vst [vmem:[#allocation2 + $0x18] sm:$0xff] %v1381_v42  ;;  %v1352_v11 = vadd.f32 %v1806_v44, %v1279_v43  ;;  %v1763_v12 = vadd.f32 %v1762_v48, %v1761_v8  ;;  %v1808_v49 = vpop.f32.mrf.mxu1  ;;  %v1227_v42 = vadd.f32 %v1729_v38, %v1683_v37  ;;  %v332_v43 = vld [vmem:[#allocation2 + $0x20] sm:$0xff] }
 0x157   : > { %v1764_v50 = vpop.f32.mrf.mxu0  ;;  %v1809_v53 = vadd.f32 %v1808_v49, %v1807_v45  ;;  %v1230_v49 = vadd.f32 %v1732_v26, %v1686_v25 }
 0x158   : > { %v1382_v51 = vadd.f32 %v1352_v11, %v328_v47  ;;  %v1284_v52 = vadd.f32 %v1763_v12, %v1211_v46  ;;  %v1810_v54 = vpop.f32.mrf.mxu1  ;;  %v333_v11 = vld [vmem:[#allocation2 + $0x40] sm:$0xff] }
 0x159   : > { %v1765_v13 = vpop.f32.mrf.mxu0 }
 0x15a   : > { %1392 = vst [vmem:[#allocation2 + $0x10] sm:$0xff] %v1382_v51  ;;  %v1357_v14 = vadd.f32 %v1809_v53, %v1284_v52  ;;  %v1766_v16 = vadd.f32 %v1765_v13, %v1764_v50  ;;  %v1811_v58 = vpop.f32.mrf.mxu1 }
 0x15b   : > { %v1767_v59 = vpop.f32.mrf.mxu0  ;;  %v1812_v62 = vadd.f32 %v1811_v58, %v1810_v54 }
 0x15c   : > { %v1383_v60 = vadd.f32 %v1357_v14, %v329_v57  ;;  %v1287_v61 = vadd.f32 %v1766_v16, %v1214_v15  ;;  %v1813_v63 = vpop.f32.mrf.mxu1 }
 0x15d   : > { %v1768_v1 = vpop.f32.mrf.mxu0 }
 0x15e   : > { %1393 = vst [vmem:[#allocation2 + $0x48] sm:$0xff] %v1383_v60  ;;  %v1360_v19 = vadd.f32 %v1812_v62, %v1287_v61  ;;  %v1769_v20 = vadd.f32 %v1768_v1, %v1767_v59  ;;  %v1814_v2 = vpop.f32.mrf.mxu1 }
 0x15f   : > { %v1770_v3 = vpop.f32.mrf.mxu0  ;;  %v1815_v35 = vadd.f32 %v1814_v2, %v1813_v63 }
 0x160   : > { %v1384_v4 = vadd.f32 %v1360_v19, %v330_v32  ;;  %v1292_v33 = vadd.f32 %v1769_v20, %v1219_v0  ;;  %v1816_v36 = vpop.f32.mrf.mxu1 }
 0x161   : > { %v1771_v21 = vpop.f32.mrf.mxu0 }
 0x162   : > { %1394 = vst [vmem:[#allocation2 + $0x28] sm:$0xff] %v1384_v4  ;;  %v1365_v22 = vadd.f32 %v1815_v35, %v1292_v33  ;;  %v1772_v24 = vadd.f32 %v1771_v21, %v1770_v3  ;;  %v1817_v40 = vpop.f32.mrf.mxu1 }
 0x163   : > { %v1773_v41 = vpop.f32.mrf.mxu0  ;;  %v1818_v7 = vadd.f32 %v1817_v40, %v1816_v36 }
 0x164   : > { %v1385_v5 = vadd.f32 %v1365_v22, %v331_v39  ;;  %v1295_v6 = vadd.f32 %v1772_v24, %v1222_v23  ;;  %v1819_v8 = vpop.f32.mrf.mxu1 }
 0x165   : > { %v1774_v44 = vpop.f32.mrf.mxu0 }
 0x166   : > { %1395 = vst [vmem:[#allocation2 + $0x8] sm:$0xff] %v1385_v5  ;;  %v1368_v27 = vadd.f32 %v1818_v7, %v1295_v6  ;;  %v1775_v28 = vadd.f32 %v1774_v44, %v1773_v41  ;;  %v1820_v45 = vpop.f32.mrf.mxu1 }
 0x167   : > { %v1776_v46 = vpop.f32.mrf.mxu0  ;;  %v1821_v9 = vadd.f32 %v1820_v45, %v1819_v8 }
 0x168   : > { %v1386_v47 = vadd.f32 %v1368_v27, %v332_v43  ;;  %v1300_v48 = vadd.f32 %v1775_v28, %v1227_v42  ;;  %v1822_v10 = vpop.f32.mrf.mxu1 }
 0x169   : > { %v1777_v12 = vpop.f32.mrf.mxu0 }
 0x16a   : > { %1396 = vst [vmem:[#allocation2 + $0x20] sm:$0xff] %v1386_v47  ;;  %v1373_v50 = vadd.f32 %v1821_v9, %v1300_v48  ;;  %v1778_v51 = vadd.f32 %v1777_v12, %v1776_v46  ;;  %v1823_v52 = vpop.f32.mrf.mxu1 }
 0x16b   : > { %v1824_v53 = vadd.f32 %v1823_v52, %v1822_v10 }
 0x16c   : > { %v1387_v29 = vadd.f32 %v1373_v50, %v333_v11  ;;  %v1303_v31 = vadd.f32 %v1778_v51, %v1230_v49 }
 0x16e   : > { %1397 = vst [vmem:[#allocation2 + $0x40] sm:$0xff] %v1387_v29  ;;  %v1376_v34 = vadd.f32 %v1824_v53, %v1303_v31  ;;  %1402 = sbr.rel (%p1635_p11) target bundleno = 379 (0x17b), region = 59 }
 0x170   : > { %v1388_v54 = vadd.f32 %v1376_v34, %v334_v30 }
 0x172   : > { %1398 = vst [vmem:[#allocation2 + $0x38] sm:$0xff] %v1388_v54 }
 0x173   : > { %v1403_v55 = vld [vmem:[#allocation2 + $0x30] sm:$0xff]  ;;  %v1404_v56 = vld [vmem:[#allocation2] sm:$0xff]  ;;  %v1405_v57 = vld [vmem:[#allocation2 + $0x18] sm:$0xff] }
 0x174   : > { %1413 = vst [vmem:[%s2351_s2] sm:$0xff] %v1403_v55  ;;  %1414 = vst [vmem:[%s2351_s2 + $0x8] sm:$0xff] %v1404_v56  ;;  %v1406_v13 = vld [vmem:[#allocation2 + $0x10] sm:$0xff]  ;;  %v1407_v15 = vld [vmem:[#allocation2 + $0x48] sm:$0xff] }
 0x175   : > { %1415 = vst [vmem:[%s2351_s2 + $0x10] sm:$0xff] %v1405_v57  ;;  %v1408_v14 = vld [vmem:[#allocation2 + $0x28] sm:$0xff]  ;;  %1416 = vst [vmem:[%s2351_s2 + $0x18] sm:$0xff] %v1406_v13  ;;  %v1410_v58 = vld [vmem:[#allocation2 + $0x20] sm:$0xff] }
 0x176   : > { %1417 = vst [vmem:[%s2351_s2 + $0x20] sm:$0xff] %v1407_v15  ;;  %1418 = vst [vmem:[%s2351_s2 + $0x28] sm:$0xff] %v1408_v14  ;;  %v1409_v16 = vld [vmem:[#allocation2 + $0x8] sm:$0xff]  ;;  %v1411_v59 = vld [vmem:[#allocation2 + $0x40] sm:$0xff] }
 0x177   : > { %1419 = vst [vmem:[%s2351_s2 + $0x30] sm:$0xff] %v1409_v16  ;;  %1420 = vst [vmem:[%s2351_s2 + $0x38] sm:$0xff] %v1410_v58 }
 0x178   : > { %1421 = vst [vmem:[%s2351_s2 + $0x40] sm:$0xff] %v1411_v59 }
 0x179   : > { %v1412_v60 = vld [vmem:[#allocation2 + $0x38] sm:$0xff] }
 0x17a   : > { %1422 = vst [vmem:[%s2351_s2 + $0x48] sm:$0xff] %v1412_v60 }
 0x17b PF: > { %s12_s13 = sadd.s32 1, %s1970_s13   ;;  %s2352_s9 = smov %s1958_s10 }
 0x17c   : > { %p9_p12 = scmp.ge.s32.totalorder %s12_s13, 10   ;;  %s2353_s10 = smov %s2023_s17 }
 0x17d   : > { %s2354_s11 = smov %s1966_s12  ;;  %s2355_s12 = smov %s2357_s14 }
 0x17e   :  { %11 = sbr.rel (!%p9_p12) target bundleno = 3 (0x3), region = 97 }

</bundles_post_ra>
